<compile_context>
chip_gen: v6e
topology: v6e:2x2x1
jax: 0.10.0
libtpu: 0.0.40
codegen_flags: <defaults>
</compile_context>

<pallas_src>
import functools

import jax
import jax.numpy as jnp
from jax import lax
from jax.experimental import pallas as pl
from jax.experimental.pallas import tpu as pltpu


# ---------------------------------------------------------------------------
# Pallas kernel: one full transformer block for a tile of `block_b` batch rows.
# Weight refs arrive pre-transposed (activation @ weight layout); Q columns of
# the fused QKV weight / bias already carry the 1/sqrt(head_dim) scale.
# ---------------------------------------------------------------------------
def _transformer_block_kernel(
    x_ref,        # (Bt, S, E)  f32
    wqkv_ref,     # (E, 3E)     in_proj_weight^T (Q cols pre-scaled)   compute dtype
    bqkv_ref,     # (1, 3E)     in_proj_bias (Q slice pre-scaled)      f32
    wo_ref,       # (E, E)      out_proj.weight^T                      compute dtype
    bo_ref,       # (1, E)
    g1_ref,       # (1, E)      norm1.weight
    be1_ref,      # (1, E)      norm1.bias
    w1_ref,       # (E, 4E)     feed_forward[0].weight^T               compute dtype
    bf1_ref,      # (1, 4E)
    w2_ref,       # (4E, E)     feed_forward[3].weight^T               compute dtype
    bf2_ref,      # (1, E)
    g2_ref,       # (1, E)      norm2.weight
    be2_ref,      # (1, E)      norm2.bias
    o_ref,        # (Bt, S, E)  f32
    attn_ref,     # VMEM scratch (Bt*S, E) f32 — per-head outputs packed here
    *,
    num_heads: int,
):
    xb = x_ref[...]                             # (Bt, S, E) f32
    Bt, S, E = xb.shape
    D = E // num_heads
    N = Bt * S
    compute_dtype = wqkv_ref.dtype

    x2d = xb.reshape(N, E)                      # flatten the batch tile for big matmuls
    xc = x2d.astype(compute_dtype)

    # --- fused QKV projection: (N, E) @ (E, 3E) ----------------------------
    qkv = jnp.dot(xc, wqkv_ref[...], preferred_element_type=jnp.float32) + bqkv_ref[...]

    # --- per-head attention, batched over the batch tile --------------------
    # Each head's output goes directly into the attn scratch slab at lane
    # offset h*D (no Python list, no concatenate, no long live ranges).
    for h in range(num_heads):
        qh = qkv[:, h * D:(h + 1) * D].reshape(Bt, S, D)          # scale already folded in
        kh = qkv[:, E + h * D:E + (h + 1) * D].reshape(Bt, S, D)
        vh = qkv[:, 2 * E + h * D:2 * E + (h + 1) * D].reshape(Bt, S, D)

        s = lax.dot_general(                                       # (Bt, S, S) f32
            qh.astype(compute_dtype), kh.astype(compute_dtype),
            dimension_numbers=(((2,), (2,)), ((0,), (0,))),
            preferred_element_type=jnp.float32)
        s = s - jnp.max(s, axis=-1, keepdims=True)
        p = jnp.exp(s)
        p = p * pl.reciprocal(jnp.sum(p, axis=-1, keepdims=True), approx=True)

        oh = lax.dot_general(                                      # (Bt, S, D) f32
            p.astype(compute_dtype), vh.astype(compute_dtype),
            dimension_numbers=(((2,), (1,)), ((0,), (0,))),
            preferred_element_type=jnp.float32)
        attn_ref[:, h * D:(h + 1) * D] = oh.reshape(N, D)

    # --- single fused output projection: (N, E) @ (E, E) --------------------
    attended = jnp.dot(attn_ref[...].astype(compute_dtype), wo_ref[...],
                       preferred_element_type=jnp.float32) + bo_ref[...]

    def layer_norm(y, gamma, beta):
        mu = jnp.mean(y, axis=-1, keepdims=True)
        var = jnp.mean((y - mu) ** 2, axis=-1, keepdims=True)
        return (y - mu) * lax.rsqrt(var + 1e-5) * gamma + beta

    # --- residual + norm1 ----------------------------------------------------
    x1 = layer_norm(x2d + attended, g1_ref[...], be1_ref[...])     # (N, E) f32

    # --- feed-forward (Linear -> ReLU -> Linear), dropout = identity --------
    h1 = jnp.dot(x1.astype(compute_dtype), w1_ref[...],
                 preferred_element_type=jnp.float32) + bf1_ref[...]
    h1 = jnp.maximum(h1, 0.0)
    ff = jnp.dot(h1.astype(compute_dtype), w2_ref[...],
                 preferred_element_type=jnp.float32) + bf2_ref[...]

    # --- residual + norm2 ----------------------------------------------------
    y = layer_norm(x1 + ff, g2_ref[...], be2_ref[...])
    o_ref[...] = y.reshape(Bt, S, E).astype(o_ref.dtype)


# ---------------------------------------------------------------------------
# One-time parameter preparation (hoist outside any jitted step / call it once).
# ---------------------------------------------------------------------------
def prepare_params(params, *, num_heads, compute_dtype=jnp.bfloat16):
    """Transpose weights to `activation @ weight` layout, cast to compute dtype,
    and fold the 1/sqrt(head_dim) attention scale into the Q rows of in_proj.
    Call ONCE and reuse the result across forward calls."""
    (wqkv, bqkv, wo, bo, g1, be1, w1, bf1, w2, bf2, g2, be2) = params
    E = wo.shape[0]
    D = E // num_heads
    scale = 1.0 / (D ** 0.5)

    wqkv = jnp.asarray(wqkv, jnp.float32)
    bqkv = jnp.asarray(bqkv, jnp.float32)
    wqkv = jnp.concatenate([wqkv[:E] * scale, wqkv[E:]], axis=0)       # scale Q rows
    bqkv = jnp.concatenate([bqkv[:, :E] * scale, bqkv[:, E:]], axis=1)  # scale Q bias

    return (
        wqkv.T.astype(compute_dtype),                               # (E, 3E)
        bqkv.astype(jnp.float32),                                   # (1, 3E)
        jnp.asarray(wo, jnp.float32).T.astype(compute_dtype),       # (E, E)
        jnp.asarray(bo, jnp.float32),
        jnp.asarray(g1, jnp.float32), jnp.asarray(be1, jnp.float32),
        jnp.asarray(w1, jnp.float32).T.astype(compute_dtype),       # (E, 4E)
        jnp.asarray(bf1, jnp.float32),
        jnp.asarray(w2, jnp.float32).T.astype(compute_dtype),       # (4E, E)
        jnp.asarray(bf2, jnp.float32),
        jnp.asarray(g2, jnp.float32), jnp.asarray(be2, jnp.float32),
    )


# ---------------------------------------------------------------------------
# Generation-aware VMEM budget / batch-tile selection
# ---------------------------------------------------------------------------
def _vmem_budget_and_cores():
    """(scoped VMEM limit in bytes, # TensorCores sharing the grid)."""
    try:
        kind = jax.devices()[0].device_kind.lower()
    except Exception:
        kind = ""
    if "v7" in kind:
        physical, cores = 64 * 1024 * 1024, 2      # v7x: 64 MiB / TC, 2 TCs/chip
    else:
        physical, cores = 128 * 1024 * 1024, 1     # v5e / v6e: 128 MiB, single TC
    return (physical * 3) // 4, cores              # 25% headroom -> 48 MiB / 96 MiB


def _pick_block_b(B, S, E, *, w_itemsize, vmem_limit, num_cores):
    """Largest batch tile whose working set fits the VMEM budget.  Single-TC chips
    take the largest fitting divisor of B (fewer grid steps, bigger matmul M);
    v7x additionally prefers a grid that splits evenly across its 2 TensorCores."""
    weight_bytes = 12 * E * E * w_itemsize * 2 + 16 * E * 4   # worst case: double-buffered

    def act_bytes(bb):
        n = bb * S
        return (
            2 * 2 * n * E * 4        # double-buffered x and out tiles (f32)
            + n * 3 * E * 4          # fused QKV result
            + n * E * 4              # attention scratch slab
            + n * 4 * E * 4          # FFN hidden activations
            + 2 * n * E * 4          # residual / LN temporaries
            + 2 * bb * S * S * 4     # per-head scores + probs in flight
        )

    budget = int(vmem_limit * 0.9) - weight_bytes
    divisors = [d for d in range(1, B + 1) if B % d == 0]
    fitting = [d for d in divisors if act_bytes(d) <= budget] or [1]
    if num_cores > 1:
        even = [d for d in fitting if (B // d) % num_cores == 0]
        if even:
            return max(even)
    return max(fitting)


# ---------------------------------------------------------------------------
# Wrapper
# ---------------------------------------------------------------------------
def transformer_block(x_sbe, prepared, *, num_heads, block_b=None):
    """x_sbe: (S, B, E) exactly like the PyTorch module; `prepared` from prepare_params().
    Returns (S, B, E) float32."""
    x = jnp.transpose(x_sbe, (1, 0, 2)).astype(jnp.float32)     # (B, S, E)
    B, S, E = x.shape
    (wqkv_t, bqkv, wo_t, bo, g1, be1, w1_t, bf1, w2_t, bf2, g2, be2) = prepared

    vmem_limit, num_cores = _vmem_budget_and_cores()
    if block_b is None:
        block_b = _pick_block_b(B, S, E,
                                w_itemsize=jnp.dtype(wqkv_t.dtype).itemsize,
                                vmem_limit=vmem_limit, num_cores=num_cores)
    assert B % block_b == 0

    kernel = functools.partial(_transformer_block_kernel, num_heads=num_heads)
    args = (x, wqkv_t, bqkv, wo_t, bo, g1, be1, w1_t, bf1, w2_t, bf2, g2, be2)

    def build(single_buffer_weights):
        def rep(arr):  # grid-invariant weights/biases: same block every step
            nd = arr.ndim
            if single_buffer_weights:
                return pl.BlockSpec(arr.shape, lambda b, _n=nd: (0,) * _n,
                                    pipeline_mode=pl.Buffered(1))
            return pl.BlockSpec(arr.shape, lambda b, _n=nd: (0,) * _n)

        return pl.pallas_call(
            kernel,
            out_shape=jax.ShapeDtypeStruct((B, S, E), jnp.float32),
            grid=(B // block_b,),
            in_specs=[
                pl.BlockSpec((block_b, S, E), lambda b: (b, 0, 0)),  # x
                rep(wqkv_t), rep(bqkv),
                rep(wo_t), rep(bo),
                rep(g1), rep(be1),
                rep(w1_t), rep(bf1),
                rep(w2_t), rep(bf2),
                rep(g2), rep(be2),
            ],
            out_specs=pl.BlockSpec((block_b, S, E), lambda b: (b, 0, 0)),
            scratch_shapes=[pltpu.VMEM((block_b * S, E), jnp.float32)],
            compiler_params=pltpu.CompilerParams(
                dimension_semantics=("parallel",),
                vmem_limit_bytes=vmem_limit,
            ),
        )

    try:
        out = jax.block_until_ready(build(True)(*args))
    except Exception:
        # Installed Pallas rejects pipeline_mode=pl.Buffered(1): fall back to the
        # default (double-buffered) grid-invariant weight specs.
        out = jax.block_until_ready(build(False)(*args))

    return jnp.transpose(out, (1, 0, 2))                         # back to (S, B, E)


# ---------------------------------------------------------------------------
# Pure-JAX reference (same math, original PyTorch weight layout).
# ---------------------------------------------------------------------------
def reference(x_sbe, params, *, num_heads):
    (wqkv, bqkv, wo, bo, g1, be1, w1, bf1, w2, bf2, g2, be2) = params
    x = jnp.transpose(x_sbe, (1, 0, 2))                          # (B, S, E)
    B, S, E = x.shape
    D = E // num_heads
    qkv = jnp.einsum("bse,fe->bsf", x, wqkv) + bqkv[0]
    q, k, v = jnp.split(qkv, 3, axis=-1)
    q = q.reshape(B, S, num_heads, D).transpose(0, 2, 1, 3) / (D ** 0.5)
    k = k.reshape(B, S, num_heads, D).transpose(0, 2, 1, 3)
    v = v.reshape(B, S, num_heads, D).transpose(0, 2, 1, 3)
    s = jnp.einsum("bhqd,bhkd->bhqk", q, k)
    p = jax.nn.softmax(s, axis=-1)
    o = jnp.einsum("bhqk,bhkd->bhqd", p, v).transpose(0, 2, 1, 3).reshape(B, S, E)
    attended = jnp.einsum("bse,fe->bsf", o, wo) + bo[0]

    def ln(y, g, b):
        mu = jnp.mean(y, -1, keepdims=True)
        var = jnp.mean((y - mu) ** 2, -1, keepdims=True)
        return (y - mu) * lax.rsqrt(var + 1e-5) * g[0] + b[0]

    x1 = ln(x + attended, g1, be1)
    h1 = jnp.maximum(jnp.einsum("bse,fe->bsf", x1, w1) + bf1[0], 0.0)
    ff = jnp.einsum("bsf,ef->bse", h1, w2) + bf2[0]
    x2 = ln(x1 + ff, g2, be2)
    return jnp.transpose(x2, (1, 0, 2))


# ---------------------------------------------------------------------------
# Main
# ---------------------------------------------------------------------------
if __name__ == "__main__":
    # Small but lane-friendly shapes: E multiple of 128, S multiple of 8.
    S, B, E, H = 16, 4, 128, 8          # seq, batch, embed_dim, num_heads (head_dim=16)

    key = jax.random.PRNGKey(0)
    ks = jax.random.split(key, 8)

    # Deterministic synthetic parameters (shapes follow the PyTorch module).
    wqkv = 0.02 * jax.random.normal(ks[0], (3 * E, E), jnp.float32)   # in_proj_weight
    bqkv = jnp.zeros((1, 3 * E), jnp.float32)                         # in_proj_bias
    wo = 0.02 * jax.random.normal(ks[1], (E, E), jnp.float32)         # out_proj.weight
    bo = jnp.zeros((1, E), jnp.float32)                               # out_proj.bias
    g1 = jnp.ones((1, E), jnp.float32)                                # norm1.weight
    be1 = jnp.zeros((1, E), jnp.float32)                              # norm1.bias
    w1 = 0.02 * jax.random.normal(ks[2], (4 * E, E), jnp.float32)     # ff Linear1.weight
    bf1 = 0.01 * jax.random.normal(ks[3], (1, 4 * E), jnp.float32)    # ff Linear1.bias
    w2 = 0.02 * jax.random.normal(ks[4], (E, 4 * E), jnp.float32)     # ff Linear2.weight
    bf2 = 0.01 * jax.random.normal(ks[5], (1, E), jnp.float32)        # ff Linear2.bias
    g2 = jnp.ones((1, E), jnp.float32)                                # norm2.weight
    be2 = jnp.zeros((1, E), jnp.float32)                              # norm2.bias
    params = (wqkv, bqkv, wo, bo, g1, be1, w1, bf1, w2, bf2, g2, be2)

    x = jax.random.normal(ks[6], (S, B, E), jnp.float32)              # (seq, batch, embed)

    ref = jax.block_until_ready(reference(x, params, num_heads=H))

    # f32 compute path (tight tolerance; approx reciprocal in softmax denom)
    prep_f32 = prepare_params(params, num_heads=H, compute_dtype=jnp.float32)
    out_f32 = jax.block_until_ready(transformer_block(x, prep_f32, num_heads=H))
    assert out_f32.shape == (S, B, E)
    err32 = float(jnp.max(jnp.abs(out_f32 - ref)))
    assert err32 < 5e-3, f"f32 Pallas output mismatch vs reference: {err32}"

    # bf16 matmul-input path (default; f32 accumulation) -> looser tolerance
    prep_bf16 = prepare_params(params, num_heads=H)                   # bfloat16 default
    out_bf16 = jax.block_until_ready(transformer_block(x, prep_bf16, num_heads=H))
    errbf = float(jnp.max(jnp.abs(out_bf16 - ref)))
    assert errbf < 2e-1, f"bf16 Pallas output mismatch vs reference: {errbf}"

    print("KERNEL_OK")
</pallas_src>

<mosaic_0001>
module attributes {stable_mosaic.version = 11 : i64} {
  func.func @_transformer_block_kernel(%arg0: i32, %arg1: memref<4x16x128xf32, #tpu.memory_space<vmem>>, %arg2: memref<128x384xf32, #tpu.memory_space<vmem>>, %arg3: memref<1x384xf32, #tpu.memory_space<vmem>>, %arg4: memref<128x128xf32, #tpu.memory_space<vmem>>, %arg5: memref<1x128xf32, #tpu.memory_space<vmem>>, %arg6: memref<1x128xf32, #tpu.memory_space<vmem>>, %arg7: memref<1x128xf32, #tpu.memory_space<vmem>>, %arg8: memref<128x512xf32, #tpu.memory_space<vmem>>, %arg9: memref<1x512xf32, #tpu.memory_space<vmem>>, %arg10: memref<512x128xf32, #tpu.memory_space<vmem>>, %arg11: memref<1x128xf32, #tpu.memory_space<vmem>>, %arg12: memref<1x128xf32, #tpu.memory_space<vmem>>, %arg13: memref<1x128xf32, #tpu.memory_space<vmem>>, %arg14: memref<4x16x128xf32, #tpu.memory_space<vmem>>, %arg15: memref<64x128xf32, #tpu.memory_space<vmem>>) attributes {dimension_semantics = [#tpu.dimension_semantics<parallel>], iteration_bounds = array<i64: 1>, scalar_prefetch = 0 : i64, scratch_operands = 1 : i64, tpu.core_type = #tpu.core_type<tc>, window_params = [{transform_indices = @transform_0, window_bounds = array<i64: 4, 16, 128>}, {pipeline_mode = #tpu.pipeline_mode<synchronous>, transform_indices = @transform_1, window_bounds = array<i64: 128, 384>}, {pipeline_mode = #tpu.pipeline_mode<synchronous>, transform_indices = @transform_2, window_bounds = array<i64: 1, 384>}, {pipeline_mode = #tpu.pipeline_mode<synchronous>, transform_indices = @transform_3, window_bounds = array<i64: 128, 128>}, {pipeline_mode = #tpu.pipeline_mode<synchronous>, transform_indices = @transform_4, window_bounds = array<i64: 1, 128>}, {pipeline_mode = #tpu.pipeline_mode<synchronous>, transform_indices = @transform_5, window_bounds = array<i64: 1, 128>}, {pipeline_mode = #tpu.pipeline_mode<synchronous>, transform_indices = @transform_6, window_bounds = array<i64: 1, 128>}, {pipeline_mode = #tpu.pipeline_mode<synchronous>, transform_indices = @transform_7, window_bounds = array<i64: 128, 512>}, {pipeline_mode = #tpu.pipeline_mode<synchronous>, transform_indices = @transform_8, window_bounds = array<i64: 1, 512>}, {pipeline_mode = #tpu.pipeline_mode<synchronous>, transform_indices = @transform_9, window_bounds = array<i64: 512, 128>}, {pipeline_mode = #tpu.pipeline_mode<synchronous>, transform_indices = @transform_10, window_bounds = array<i64: 1, 128>}, {pipeline_mode = #tpu.pipeline_mode<synchronous>, transform_indices = @transform_11, window_bounds = array<i64: 1, 128>}, {pipeline_mode = #tpu.pipeline_mode<synchronous>, transform_indices = @transform_12, window_bounds = array<i64: 1, 128>}, {transform_indices = @transform_13, window_bounds = array<i64: 4, 16, 128>}]} {
    %c0 = arith.constant 0 : index
    %c0_0 = arith.constant 0 : index
    %c0_1 = arith.constant 0 : index
    %0 = vector.load %arg1[%c0, %c0_0, %c0_1] : memref<4x16x128xf32, #tpu.memory_space<vmem>>, vector<4x16x128xf32>
    %1 = vector.shape_cast %0 : vector<4x16x128xf32> to vector<64x128xf32>
    %c0_2 = arith.constant 0 : index
    %c0_3 = arith.constant 0 : index
    %2 = vector.load %arg2[%c0_2, %c0_3] : memref<128x384xf32, #tpu.memory_space<vmem>>, vector<128x384xf32>
    %cst = arith.constant dense<0.000000e+00> : vector<64x384xf32>
    %3 = tpu.matmul %1, %2, %cst {dimension_numbers = #tpu.dot_dimension_numbers<[1], [0], [0], [1], [0, 0, 1, 1], [], []>} : vector<64x128xf32>, vector<128x384xf32>, vector<64x384xf32> -> vector<64x384xf32>
    %c0_4 = arith.constant 0 : index
    %c0_5 = arith.constant 0 : index
    %4 = vector.load %arg3[%c0_4, %c0_5] : memref<1x384xf32, #tpu.memory_space<vmem>>, vector<1x384xf32>
    %5 = vector.broadcast %4 : vector<1x384xf32> to vector<64x384xf32>
    %6 = arith.addf %3, %5 : vector<64x384xf32>
    %7 = vector.extract_strided_slice %6 {offsets = [0, 0], sizes = [64, 16], strides = [1, 1]} : vector<64x384xf32> to vector<64x16xf32>
    %8 = vector.shape_cast %7 : vector<64x16xf32> to vector<4x16x16xf32>
    %9 = vector.extract_strided_slice %6 {offsets = [0, 128], sizes = [64, 16], strides = [1, 1]} : vector<64x384xf32> to vector<64x16xf32>
    %10 = vector.shape_cast %9 : vector<64x16xf32> to vector<4x16x16xf32>
    %11 = vector.extract_strided_slice %6 {offsets = [0, 256], sizes = [64, 16], strides = [1, 1]} : vector<64x384xf32> to vector<64x16xf32>
    %12 = vector.shape_cast %11 : vector<64x16xf32> to vector<4x16x16xf32>
    %cst_6 = arith.constant dense<0.000000e+00> : vector<4x16x16xf32>
    %13 = tpu.matmul %8, %10, %cst_6 {dimension_numbers = #tpu.dot_dimension_numbers<[2], [2], [1], [1], [0, 0, 0, 1, 1, 1], [0], [0]>} : vector<4x16x16xf32>, vector<4x16x16xf32>, vector<4x16x16xf32> -> vector<4x16x16xf32>
    %cst_7 = arith.constant dense<0xFF800000> : vector<4x16xf32>
    %14 = vector.multi_reduction <maximumf>, %13, %cst_7 [2] : vector<4x16x16xf32> to vector<4x16xf32>
    %15 = vector.shape_cast %14 : vector<4x16xf32> to vector<4x16x1xf32>
    %16 = vector.broadcast %15 : vector<4x16x1xf32> to vector<4x16x16xf32>
    %17 = arith.subf %13, %16 : vector<4x16x16xf32>
    %18 = math.exp %17 : vector<4x16x16xf32>
    %cst_8 = arith.constant dense<0.000000e+00> : vector<4x16xf32>
    %19 = vector.multi_reduction <add>, %18, %cst_8 [2] : vector<4x16x16xf32> to vector<4x16xf32>
    %20 = vector.shape_cast %19 : vector<4x16xf32> to vector<4x16x1xf32>
    %21 = tpu.reciprocal %20 {approx = true} : vector<4x16x1xf32> -> vector<4x16x1xf32>
    %22 = vector.broadcast %21 : vector<4x16x1xf32> to vector<4x16x16xf32>
    %23 = arith.mulf %18, %22 : vector<4x16x16xf32>
    %cst_9 = arith.constant dense<0.000000e+00> : vector<4x16x16xf32>
    %24 = tpu.matmul %23, %12, %cst_9 {dimension_numbers = #tpu.dot_dimension_numbers<[2], [1], [1], [2], [0, 0, 0, 1, 1, 2], [0], [0]>} : vector<4x16x16xf32>, vector<4x16x16xf32>, vector<4x16x16xf32> -> vector<4x16x16xf32>
    %25 = vector.shape_cast %24 : vector<4x16x16xf32> to vector<64x16xf32>
    %c0_10 = arith.constant 0 : index
    %c0_11 = arith.constant 0 : index
    %26 = vector.load %arg15[%c0_10, %c0_11] : memref<64x128xf32, #tpu.memory_space<vmem>>, vector<64x16xf32>
    tpu.vector_store %arg15[%c0_10, %c0_11], %25 {strides = array<i32>} : memref<64x128xf32, #tpu.memory_space<vmem>>, vector<64x16xf32>,
    %27 = vector.extract_strided_slice %6 {offsets = [0, 16], sizes = [64, 16], strides = [1, 1]} : vector<64x384xf32> to vector<64x16xf32>
    %28 = vector.shape_cast %27 : vector<64x16xf32> to vector<4x16x16xf32>
    %29 = vector.extract_strided_slice %6 {offsets = [0, 144], sizes = [64, 16], strides = [1, 1]} : vector<64x384xf32> to vector<64x16xf32>
    %30 = vector.shape_cast %29 : vector<64x16xf32> to vector<4x16x16xf32>
    %31 = vector.extract_strided_slice %6 {offsets = [0, 272], sizes = [64, 16], strides = [1, 1]} : vector<64x384xf32> to vector<64x16xf32>
    %32 = vector.shape_cast %31 : vector<64x16xf32> to vector<4x16x16xf32>
    %cst_12 = arith.constant dense<0.000000e+00> : vector<4x16x16xf32>
    %33 = tpu.matmul %28, %30, %cst_12 {dimension_numbers = #tpu.dot_dimension_numbers<[2], [2], [1], [1], [0, 0, 0, 1, 1, 1], [0], [0]>} : vector<4x16x16xf32>, vector<4x16x16xf32>, vector<4x16x16xf32> -> vector<4x16x16xf32>
    %cst_13 = arith.constant dense<0xFF800000> : vector<4x16xf32>
    %34 = vector.multi_reduction <maximumf>, %33, %cst_13 [2] : vector<4x16x16xf32> to vector<4x16xf32>
    %35 = vector.shape_cast %34 : vector<4x16xf32> to vector<4x16x1xf32>
    %36 = vector.broadcast %35 : vector<4x16x1xf32> to vector<4x16x16xf32>
    %37 = arith.subf %33, %36 : vector<4x16x16xf32>
    %38 = math.exp %37 : vector<4x16x16xf32>
    %cst_14 = arith.constant dense<0.000000e+00> : vector<4x16xf32>
    %39 = vector.multi_reduction <add>, %38, %cst_14 [2] : vector<4x16x16xf32> to vector<4x16xf32>
    %40 = vector.shape_cast %39 : vector<4x16xf32> to vector<4x16x1xf32>
    %41 = tpu.reciprocal %40 {approx = true} : vector<4x16x1xf32> -> vector<4x16x1xf32>
    %42 = vector.broadcast %41 : vector<4x16x1xf32> to vector<4x16x16xf32>
    %43 = arith.mulf %38, %42 : vector<4x16x16xf32>
    %cst_15 = arith.constant dense<0.000000e+00> : vector<4x16x16xf32>
    %44 = tpu.matmul %43, %32, %cst_15 {dimension_numbers = #tpu.dot_dimension_numbers<[2], [1], [1], [2], [0, 0, 0, 1, 1, 2], [0], [0]>} : vector<4x16x16xf32>, vector<4x16x16xf32>, vector<4x16x16xf32> -> vector<4x16x16xf32>
    %45 = vector.shape_cast %44 : vector<4x16x16xf32> to vector<64x16xf32>
    %c0_16 = arith.constant 0 : index
    %c16 = arith.constant 16 : index
    %46 = vector.load %arg15[%c0_16, %c16] : memref<64x128xf32, #tpu.memory_space<vmem>>, vector<64x16xf32>
    tpu.vector_store %arg15[%c0_16, %c16], %45 {strides = array<i32>} : memref<64x128xf32, #tpu.memory_space<vmem>>, vector<64x16xf32>,
    %47 = vector.extract_strided_slice %6 {offsets = [0, 32], sizes = [64, 16], strides = [1, 1]} : vector<64x384xf32> to vector<64x16xf32>
    %48 = vector.shape_cast %47 : vector<64x16xf32> to vector<4x16x16xf32>
    %49 = vector.extract_strided_slice %6 {offsets = [0, 160], sizes = [64, 16], strides = [1, 1]} : vector<64x384xf32> to vector<64x16xf32>
    %50 = vector.shape_cast %49 : vector<64x16xf32> to vector<4x16x16xf32>
    %51 = vector.extract_strided_slice %6 {offsets = [0, 288], sizes = [64, 16], strides = [1, 1]} : vector<64x384xf32> to vector<64x16xf32>
    %52 = vector.shape_cast %51 : vector<64x16xf32> to vector<4x16x16xf32>
    %cst_17 = arith.constant dense<0.000000e+00> : vector<4x16x16xf32>
    %53 = tpu.matmul %48, %50, %cst_17 {dimension_numbers = #tpu.dot_dimension_numbers<[2], [2], [1], [1], [0, 0, 0, 1, 1, 1], [0], [0]>} : vector<4x16x16xf32>, vector<4x16x16xf32>, vector<4x16x16xf32> -> vector<4x16x16xf32>
    %cst_18 = arith.constant dense<0xFF800000> : vector<4x16xf32>
    %54 = vector.multi_reduction <maximumf>, %53, %cst_18 [2] : vector<4x16x16xf32> to vector<4x16xf32>
    %55 = vector.shape_cast %54 : vector<4x16xf32> to vector<4x16x1xf32>
    %56 = vector.broadcast %55 : vector<4x16x1xf32> to vector<4x16x16xf32>
    %57 = arith.subf %53, %56 : vector<4x16x16xf32>
    %58 = math.exp %57 : vector<4x16x16xf32>
    %cst_19 = arith.constant dense<0.000000e+00> : vector<4x16xf32>
    %59 = vector.multi_reduction <add>, %58, %cst_19 [2] : vector<4x16x16xf32> to vector<4x16xf32>
    %60 = vector.shape_cast %59 : vector<4x16xf32> to vector<4x16x1xf32>
    %61 = tpu.reciprocal %60 {approx = true} : vector<4x16x1xf32> -> vector<4x16x1xf32>
    %62 = vector.broadcast %61 : vector<4x16x1xf32> to vector<4x16x16xf32>
    %63 = arith.mulf %58, %62 : vector<4x16x16xf32>
    %cst_20 = arith.constant dense<0.000000e+00> : vector<4x16x16xf32>
    %64 = tpu.matmul %63, %52, %cst_20 {dimension_numbers = #tpu.dot_dimension_numbers<[2], [1], [1], [2], [0, 0, 0, 1, 1, 2], [0], [0]>} : vector<4x16x16xf32>, vector<4x16x16xf32>, vector<4x16x16xf32> -> vector<4x16x16xf32>
    %65 = vector.shape_cast %64 : vector<4x16x16xf32> to vector<64x16xf32>
    %c0_21 = arith.constant 0 : index
    %c32 = arith.constant 32 : index
    %66 = vector.load %arg15[%c0_21, %c32] : memref<64x128xf32, #tpu.memory_space<vmem>>, vector<64x16xf32>
    tpu.vector_store %arg15[%c0_21, %c32], %65 {strides = array<i32>} : memref<64x128xf32, #tpu.memory_space<vmem>>, vector<64x16xf32>,
    %67 = vector.extract_strided_slice %6 {offsets = [0, 48], sizes = [64, 16], strides = [1, 1]} : vector<64x384xf32> to vector<64x16xf32>
    %68 = vector.shape_cast %67 : vector<64x16xf32> to vector<4x16x16xf32>
    %69 = vector.extract_strided_slice %6 {offsets = [0, 176], sizes = [64, 16], strides = [1, 1]} : vector<64x384xf32> to vector<64x16xf32>
    %70 = vector.shape_cast %69 : vector<64x16xf32> to vector<4x16x16xf32>
    %71 = vector.extract_strided_slice %6 {offsets = [0, 304], sizes = [64, 16], strides = [1, 1]} : vector<64x384xf32> to vector<64x16xf32>
    %72 = vector.shape_cast %71 : vector<64x16xf32> to vector<4x16x16xf32>
    %cst_22 = arith.constant dense<0.000000e+00> : vector<4x16x16xf32>
    %73 = tpu.matmul %68, %70, %cst_22 {dimension_numbers = #tpu.dot_dimension_numbers<[2], [2], [1], [1], [0, 0, 0, 1, 1, 1], [0], [0]>} : vector<4x16x16xf32>, vector<4x16x16xf32>, vector<4x16x16xf32> -> vector<4x16x16xf32>
    %cst_23 = arith.constant dense<0xFF800000> : vector<4x16xf32>
    %74 = vector.multi_reduction <maximumf>, %73, %cst_23 [2] : vector<4x16x16xf32> to vector<4x16xf32>
    %75 = vector.shape_cast %74 : vector<4x16xf32> to vector<4x16x1xf32>
    %76 = vector.broadcast %75 : vector<4x16x1xf32> to vector<4x16x16xf32>
    %77 = arith.subf %73, %76 : vector<4x16x16xf32>
    %78 = math.exp %77 : vector<4x16x16xf32>
    %cst_24 = arith.constant dense<0.000000e+00> : vector<4x16xf32>
    %79 = vector.multi_reduction <add>, %78, %cst_24 [2] : vector<4x16x16xf32> to vector<4x16xf32>
    %80 = vector.shape_cast %79 : vector<4x16xf32> to vector<4x16x1xf32>
    %81 = tpu.reciprocal %80 {approx = true} : vector<4x16x1xf32> -> vector<4x16x1xf32>
    %82 = vector.broadcast %81 : vector<4x16x1xf32> to vector<4x16x16xf32>
    %83 = arith.mulf %78, %82 : vector<4x16x16xf32>
    %cst_25 = arith.constant dense<0.000000e+00> : vector<4x16x16xf32>
    %84 = tpu.matmul %83, %72, %cst_25 {dimension_numbers = #tpu.dot_dimension_numbers<[2], [1], [1], [2], [0, 0, 0, 1, 1, 2], [0], [0]>} : vector<4x16x16xf32>, vector<4x16x16xf32>, vector<4x16x16xf32> -> vector<4x16x16xf32>
    %85 = vector.shape_cast %84 : vector<4x16x16xf32> to vector<64x16xf32>
    %c0_26 = arith.constant 0 : index
    %c48 = arith.constant 48 : index
    %86 = vector.load %arg15[%c0_26, %c48] : memref<64x128xf32, #tpu.memory_space<vmem>>, vector<64x16xf32>
    tpu.vector_store %arg15[%c0_26, %c48], %85 {strides = array<i32>} : memref<64x128xf32, #tpu.memory_space<vmem>>, vector<64x16xf32>,
    %87 = vector.extract_strided_slice %6 {offsets = [0, 64], sizes = [64, 16], strides = [1, 1]} : vector<64x384xf32> to vector<64x16xf32>
    %88 = vector.shape_cast %87 : vector<64x16xf32> to vector<4x16x16xf32>
    %89 = vector.extract_strided_slice %6 {offsets = [0, 192], sizes = [64, 16], strides = [1, 1]} : vector<64x384xf32> to vector<64x16xf32>
    %90 = vector.shape_cast %89 : vector<64x16xf32> to vector<4x16x16xf32>
    %91 = vector.extract_strided_slice %6 {offsets = [0, 320], sizes = [64, 16], strides = [1, 1]} : vector<64x384xf32> to vector<64x16xf32>
    %92 = vector.shape_cast %91 : vector<64x16xf32> to vector<4x16x16xf32>
    %cst_27 = arith.constant dense<0.000000e+00> : vector<4x16x16xf32>
    %93 = tpu.matmul %88, %90, %cst_27 {dimension_numbers = #tpu.dot_dimension_numbers<[2], [2], [1], [1], [0, 0, 0, 1, 1, 1], [0], [0]>} : vector<4x16x16xf32>, vector<4x16x16xf32>, vector<4x16x16xf32> -> vector<4x16x16xf32>
    %cst_28 = arith.constant dense<0xFF800000> : vector<4x16xf32>
    %94 = vector.multi_reduction <maximumf>, %93, %cst_28 [2] : vector<4x16x16xf32> to vector<4x16xf32>
    %95 = vector.shape_cast %94 : vector<4x16xf32> to vector<4x16x1xf32>
    %96 = vector.broadcast %95 : vector<4x16x1xf32> to vector<4x16x16xf32>
    %97 = arith.subf %93, %96 : vector<4x16x16xf32>
    %98 = math.exp %97 : vector<4x16x16xf32>
    %cst_29 = arith.constant dense<0.000000e+00> : vector<4x16xf32>
    %99 = vector.multi_reduction <add>, %98, %cst_29 [2] : vector<4x16x16xf32> to vector<4x16xf32>
    %100 = vector.shape_cast %99 : vector<4x16xf32> to vector<4x16x1xf32>
    %101 = tpu.reciprocal %100 {approx = true} : vector<4x16x1xf32> -> vector<4x16x1xf32>
    %102 = vector.broadcast %101 : vector<4x16x1xf32> to vector<4x16x16xf32>
    %103 = arith.mulf %98, %102 : vector<4x16x16xf32>
    %cst_30 = arith.constant dense<0.000000e+00> : vector<4x16x16xf32>
    %104 = tpu.matmul %103, %92, %cst_30 {dimension_numbers = #tpu.dot_dimension_numbers<[2], [1], [1], [2], [0, 0, 0, 1, 1, 2], [0], [0]>} : vector<4x16x16xf32>, vector<4x16x16xf32>, vector<4x16x16xf32> -> vector<4x16x16xf32>
    %105 = vector.shape_cast %104 : vector<4x16x16xf32> to vector<64x16xf32>
    %c0_31 = arith.constant 0 : index
    %c64 = arith.constant 64 : index
    %106 = vector.load %arg15[%c0_31, %c64] : memref<64x128xf32, #tpu.memory_space<vmem>>, vector<64x16xf32>
    tpu.vector_store %arg15[%c0_31, %c64], %105 {strides = array<i32>} : memref<64x128xf32, #tpu.memory_space<vmem>>, vector<64x16xf32>,
    %107 = vector.extract_strided_slice %6 {offsets = [0, 80], sizes = [64, 16], strides = [1, 1]} : vector<64x384xf32> to vector<64x16xf32>
    %108 = vector.shape_cast %107 : vector<64x16xf32> to vector<4x16x16xf32>
    %109 = vector.extract_strided_slice %6 {offsets = [0, 208], sizes = [64, 16], strides = [1, 1]} : vector<64x384xf32> to vector<64x16xf32>
    %110 = vector.shape_cast %109 : vector<64x16xf32> to vector<4x16x16xf32>
    %111 = vector.extract_strided_slice %6 {offsets = [0, 336], sizes = [64, 16], strides = [1, 1]} : vector<64x384xf32> to vector<64x16xf32>
    %112 = vector.shape_cast %111 : vector<64x16xf32> to vector<4x16x16xf32>
    %cst_32 = arith.constant dense<0.000000e+00> : vector<4x16x16xf32>
    %113 = tpu.matmul %108, %110, %cst_32 {dimension_numbers = #tpu.dot_dimension_numbers<[2], [2], [1], [1], [0, 0, 0, 1, 1, 1], [0], [0]>} : vector<4x16x16xf32>, vector<4x16x16xf32>, vector<4x16x16xf32> -> vector<4x16x16xf32>
    %cst_33 = arith.constant dense<0xFF800000> : vector<4x16xf32>
    %114 = vector.multi_reduction <maximumf>, %113, %cst_33 [2] : vector<4x16x16xf32> to vector<4x16xf32>
    %115 = vector.shape_cast %114 : vector<4x16xf32> to vector<4x16x1xf32>
    %116 = vector.broadcast %115 : vector<4x16x1xf32> to vector<4x16x16xf32>
    %117 = arith.subf %113, %116 : vector<4x16x16xf32>
    %118 = math.exp %117 : vector<4x16x16xf32>
    %cst_34 = arith.constant dense<0.000000e+00> : vector<4x16xf32>
    %119 = vector.multi_reduction <add>, %118, %cst_34 [2] : vector<4x16x16xf32> to vector<4x16xf32>
    %120 = vector.shape_cast %119 : vector<4x16xf32> to vector<4x16x1xf32>
    %121 = tpu.reciprocal %120 {approx = true} : vector<4x16x1xf32> -> vector<4x16x1xf32>
    %122 = vector.broadcast %121 : vector<4x16x1xf32> to vector<4x16x16xf32>
    %123 = arith.mulf %118, %122 : vector<4x16x16xf32>
    %cst_35 = arith.constant dense<0.000000e+00> : vector<4x16x16xf32>
    %124 = tpu.matmul %123, %112, %cst_35 {dimension_numbers = #tpu.dot_dimension_numbers<[2], [1], [1], [2], [0, 0, 0, 1, 1, 2], [0], [0]>} : vector<4x16x16xf32>, vector<4x16x16xf32>, vector<4x16x16xf32> -> vector<4x16x16xf32>
    %125 = vector.shape_cast %124 : vector<4x16x16xf32> to vector<64x16xf32>
    %c0_36 = arith.constant 0 : index
    %c80 = arith.constant 80 : index
    %126 = vector.load %arg15[%c0_36, %c80] : memref<64x128xf32, #tpu.memory_space<vmem>>, vector<64x16xf32>
    tpu.vector_store %arg15[%c0_36, %c80], %125 {strides = array<i32>} : memref<64x128xf32, #tpu.memory_space<vmem>>, vector<64x16xf32>,
    %127 = vector.extract_strided_slice %6 {offsets = [0, 96], sizes = [64, 16], strides = [1, 1]} : vector<64x384xf32> to vector<64x16xf32>
    %128 = vector.shape_cast %127 : vector<64x16xf32> to vector<4x16x16xf32>
    %129 = vector.extract_strided_slice %6 {offsets = [0, 224], sizes = [64, 16], strides = [1, 1]} : vector<64x384xf32> to vector<64x16xf32>
    %130 = vector.shape_cast %129 : vector<64x16xf32> to vector<4x16x16xf32>
    %131 = vector.extract_strided_slice %6 {offsets = [0, 352], sizes = [64, 16], strides = [1, 1]} : vector<64x384xf32> to vector<64x16xf32>
    %132 = vector.shape_cast %131 : vector<64x16xf32> to vector<4x16x16xf32>
    %cst_37 = arith.constant dense<0.000000e+00> : vector<4x16x16xf32>
    %133 = tpu.matmul %128, %130, %cst_37 {dimension_numbers = #tpu.dot_dimension_numbers<[2], [2], [1], [1], [0, 0, 0, 1, 1, 1], [0], [0]>} : vector<4x16x16xf32>, vector<4x16x16xf32>, vector<4x16x16xf32> -> vector<4x16x16xf32>
    %cst_38 = arith.constant dense<0xFF800000> : vector<4x16xf32>
    %134 = vector.multi_reduction <maximumf>, %133, %cst_38 [2] : vector<4x16x16xf32> to vector<4x16xf32>
    %135 = vector.shape_cast %134 : vector<4x16xf32> to vector<4x16x1xf32>
    %136 = vector.broadcast %135 : vector<4x16x1xf32> to vector<4x16x16xf32>
    %137 = arith.subf %133, %136 : vector<4x16x16xf32>
    %138 = math.exp %137 : vector<4x16x16xf32>
    %cst_39 = arith.constant dense<0.000000e+00> : vector<4x16xf32>
    %139 = vector.multi_reduction <add>, %138, %cst_39 [2] : vector<4x16x16xf32> to vector<4x16xf32>
    %140 = vector.shape_cast %139 : vector<4x16xf32> to vector<4x16x1xf32>
    %141 = tpu.reciprocal %140 {approx = true} : vector<4x16x1xf32> -> vector<4x16x1xf32>
    %142 = vector.broadcast %141 : vector<4x16x1xf32> to vector<4x16x16xf32>
    %143 = arith.mulf %138, %142 : vector<4x16x16xf32>
    %cst_40 = arith.constant dense<0.000000e+00> : vector<4x16x16xf32>
    %144 = tpu.matmul %143, %132, %cst_40 {dimension_numbers = #tpu.dot_dimension_numbers<[2], [1], [1], [2], [0, 0, 0, 1, 1, 2], [0], [0]>} : vector<4x16x16xf32>, vector<4x16x16xf32>, vector<4x16x16xf32> -> vector<4x16x16xf32>
    %145 = vector.shape_cast %144 : vector<4x16x16xf32> to vector<64x16xf32>
    %c0_41 = arith.constant 0 : index
    %c96 = arith.constant 96 : index
    %146 = vector.load %arg15[%c0_41, %c96] : memref<64x128xf32, #tpu.memory_space<vmem>>, vector<64x16xf32>
    tpu.vector_store %arg15[%c0_41, %c96], %145 {strides = array<i32>} : memref<64x128xf32, #tpu.memory_space<vmem>>, vector<64x16xf32>,
    %147 = vector.extract_strided_slice %6 {offsets = [0, 112], sizes = [64, 16], strides = [1, 1]} : vector<64x384xf32> to vector<64x16xf32>
    %148 = vector.shape_cast %147 : vector<64x16xf32> to vector<4x16x16xf32>
    %149 = vector.extract_strided_slice %6 {offsets = [0, 240], sizes = [64, 16], strides = [1, 1]} : vector<64x384xf32> to vector<64x16xf32>
    %150 = vector.shape_cast %149 : vector<64x16xf32> to vector<4x16x16xf32>
    %151 = vector.extract_strided_slice %6 {offsets = [0, 368], sizes = [64, 16], strides = [1, 1]} : vector<64x384xf32> to vector<64x16xf32>
    %152 = vector.shape_cast %151 : vector<64x16xf32> to vector<4x16x16xf32>
    %cst_42 = arith.constant dense<0.000000e+00> : vector<4x16x16xf32>
    %153 = tpu.matmul %148, %150, %cst_42 {dimension_numbers = #tpu.dot_dimension_numbers<[2], [2], [1], [1], [0, 0, 0, 1, 1, 1], [0], [0]>} : vector<4x16x16xf32>, vector<4x16x16xf32>, vector<4x16x16xf32> -> vector<4x16x16xf32>
    %cst_43 = arith.constant dense<0xFF800000> : vector<4x16xf32>
    %154 = vector.multi_reduction <maximumf>, %153, %cst_43 [2] : vector<4x16x16xf32> to vector<4x16xf32>
    %155 = vector.shape_cast %154 : vector<4x16xf32> to vector<4x16x1xf32>
    %156 = vector.broadcast %155 : vector<4x16x1xf32> to vector<4x16x16xf32>
    %157 = arith.subf %153, %156 : vector<4x16x16xf32>
    %158 = math.exp %157 : vector<4x16x16xf32>
    %cst_44 = arith.constant dense<0.000000e+00> : vector<4x16xf32>
    %159 = vector.multi_reduction <add>, %158, %cst_44 [2] : vector<4x16x16xf32> to vector<4x16xf32>
    %160 = vector.shape_cast %159 : vector<4x16xf32> to vector<4x16x1xf32>
    %161 = tpu.reciprocal %160 {approx = true} : vector<4x16x1xf32> -> vector<4x16x1xf32>
    %162 = vector.broadcast %161 : vector<4x16x1xf32> to vector<4x16x16xf32>
    %163 = arith.mulf %158, %162 : vector<4x16x16xf32>
    %cst_45 = arith.constant dense<0.000000e+00> : vector<4x16x16xf32>
    %164 = tpu.matmul %163, %152, %cst_45 {dimension_numbers = #tpu.dot_dimension_numbers<[2], [1], [1], [2], [0, 0, 0, 1, 1, 2], [0], [0]>} : vector<4x16x16xf32>, vector<4x16x16xf32>, vector<4x16x16xf32> -> vector<4x16x16xf32>
    %165 = vector.shape_cast %164 : vector<4x16x16xf32> to vector<64x16xf32>
    %c0_46 = arith.constant 0 : index
    %c112 = arith.constant 112 : index
    %166 = vector.load %arg15[%c0_46, %c112] : memref<64x128xf32, #tpu.memory_space<vmem>>, vector<64x16xf32>
    tpu.vector_store %arg15[%c0_46, %c112], %165 {strides = array<i32>} : memref<64x128xf32, #tpu.memory_space<vmem>>, vector<64x16xf32>,
    %c0_47 = arith.constant 0 : index
    %c0_48 = arith.constant 0 : index
    %167 = vector.load %arg15[%c0_47, %c0_48] : memref<64x128xf32, #tpu.memory_space<vmem>>, vector<64x128xf32>
    %c0_49 = arith.constant 0 : index
    %c0_50 = arith.constant 0 : index
    %168 = vector.load %arg4[%c0_49, %c0_50] : memref<128x128xf32, #tpu.memory_space<vmem>>, vector<128x128xf32>
    %cst_51 = arith.constant dense<0.000000e+00> : vector<64x128xf32>
    %169 = tpu.matmul %167, %168, %cst_51 {dimension_numbers = #tpu.dot_dimension_numbers<[1], [0], [0], [1], [0, 0, 1, 1], [], []>} : vector<64x128xf32>, vector<128x128xf32>, vector<64x128xf32> -> vector<64x128xf32>
    %c0_52 = arith.constant 0 : index
    %c0_53 = arith.constant 0 : index
    %170 = vector.load %arg5[%c0_52, %c0_53] : memref<1x128xf32, #tpu.memory_space<vmem>>, vector<1x128xf32>
    %171 = vector.broadcast %170 : vector<1x128xf32> to vector<64x128xf32>
    %172 = arith.addf %169, %171 : vector<64x128xf32>
    %173 = arith.addf %1, %172 : vector<64x128xf32>
    %c0_54 = arith.constant 0 : index
    %c0_55 = arith.constant 0 : index
    %174 = vector.load %arg6[%c0_54, %c0_55] : memref<1x128xf32, #tpu.memory_space<vmem>>, vector<1x128xf32>
    %c0_56 = arith.constant 0 : index
    %c0_57 = arith.constant 0 : index
    %175 = vector.load %arg7[%c0_56, %c0_57] : memref<1x128xf32, #tpu.memory_space<vmem>>, vector<1x128xf32>
    %cst_58 = arith.constant dense<0.000000e+00> : vector<64xf32>
    %176 = vector.multi_reduction <add>, %173, %cst_58 [1] : vector<64x128xf32> to vector<64xf32>
    %177 = vector.shape_cast %176 : vector<64xf32> to vector<64x1xf32>
    %cst_59 = arith.constant 1.280000e+02 : f32
    %178 = vector.broadcast %cst_59 : f32 to vector<64x1xf32>
    %179 = arith.divf %177, %178 : vector<64x1xf32>
    %180 = vector.broadcast %179 : vector<64x1xf32> to vector<64x128xf32>
    %181 = arith.subf %173, %180 : vector<64x128xf32>
    %182 = arith.mulf %181, %181 : vector<64x128xf32>
    %cst_60 = arith.constant dense<0.000000e+00> : vector<64xf32>
    %183 = vector.multi_reduction <add>, %182, %cst_60 [1] : vector<64x128xf32> to vector<64xf32>
    %184 = vector.shape_cast %183 : vector<64xf32> to vector<64x1xf32>
    %cst_61 = arith.constant 1.280000e+02 : f32
    %185 = vector.broadcast %cst_61 : f32 to vector<64x1xf32>
    %186 = arith.divf %184, %185 : vector<64x1xf32>
    %187 = vector.broadcast %179 : vector<64x1xf32> to vector<64x128xf32>
    %188 = arith.subf %173, %187 : vector<64x128xf32>
    %cst_62 = arith.constant 9.99999974E-6 : f32
    %189 = vector.broadcast %cst_62 : f32 to vector<64x1xf32>
    %190 = arith.addf %186, %189 : vector<64x1xf32>
    %191 = math.rsqrt %190 : vector<64x1xf32>
    %192 = vector.broadcast %191 : vector<64x1xf32> to vector<64x128xf32>
    %193 = arith.mulf %188, %192 : vector<64x128xf32>
    %194 = vector.broadcast %174 : vector<1x128xf32> to vector<64x128xf32>
    %195 = arith.mulf %193, %194 : vector<64x128xf32>
    %196 = vector.broadcast %175 : vector<1x128xf32> to vector<64x128xf32>
    %197 = arith.addf %195, %196 : vector<64x128xf32>
    %c0_63 = arith.constant 0 : index
    %c0_64 = arith.constant 0 : index
    %198 = vector.load %arg8[%c0_63, %c0_64] : memref<128x512xf32, #tpu.memory_space<vmem>>, vector<128x512xf32>
    %cst_65 = arith.constant dense<0.000000e+00> : vector<64x512xf32>
    %199 = tpu.matmul %197, %198, %cst_65 {dimension_numbers = #tpu.dot_dimension_numbers<[1], [0], [0], [1], [0, 0, 1, 1], [], []>} : vector<64x128xf32>, vector<128x512xf32>, vector<64x512xf32> -> vector<64x512xf32>
    %c0_66 = arith.constant 0 : index
    %c0_67 = arith.constant 0 : index
    %200 = vector.load %arg9[%c0_66, %c0_67] : memref<1x512xf32, #tpu.memory_space<vmem>>, vector<1x512xf32>
    %201 = vector.broadcast %200 : vector<1x512xf32> to vector<64x512xf32>
    %202 = arith.addf %199, %201 : vector<64x512xf32>
    %cst_68 = arith.constant 0.000000e+00 : f32
    %203 = vector.broadcast %cst_68 : f32 to vector<64x512xf32>
    %204 = arith.maximumf %202, %203 : vector<64x512xf32>
    %c0_69 = arith.constant 0 : index
    %c0_70 = arith.constant 0 : index
    %205 = vector.load %arg10[%c0_69, %c0_70] : memref<512x128xf32, #tpu.memory_space<vmem>>, vector<512x128xf32>
    %cst_71 = arith.constant dense<0.000000e+00> : vector<64x128xf32>
    %206 = tpu.matmul %204, %205, %cst_71 {dimension_numbers = #tpu.dot_dimension_numbers<[1], [0], [0], [1], [0, 0, 1, 1], [], []>} : vector<64x512xf32>, vector<512x128xf32>, vector<64x128xf32> -> vector<64x128xf32>
    %c0_72 = arith.constant 0 : index
    %c0_73 = arith.constant 0 : index
    %207 = vector.load %arg11[%c0_72, %c0_73] : memref<1x128xf32, #tpu.memory_space<vmem>>, vector<1x128xf32>
    %208 = vector.broadcast %207 : vector<1x128xf32> to vector<64x128xf32>
    %209 = arith.addf %206, %208 : vector<64x128xf32>
    %210 = arith.addf %197, %209 : vector<64x128xf32>
    %c0_74 = arith.constant 0 : index
    %c0_75 = arith.constant 0 : index
    %211 = vector.load %arg12[%c0_74, %c0_75] : memref<1x128xf32, #tpu.memory_space<vmem>>, vector<1x128xf32>
    %c0_76 = arith.constant 0 : index
    %c0_77 = arith.constant 0 : index
    %212 = vector.load %arg13[%c0_76, %c0_77] : memref<1x128xf32, #tpu.memory_space<vmem>>, vector<1x128xf32>
    %cst_78 = arith.constant dense<0.000000e+00> : vector<64xf32>
    %213 = vector.multi_reduction <add>, %210, %cst_78 [1] : vector<64x128xf32> to vector<64xf32>
    %214 = vector.shape_cast %213 : vector<64xf32> to vector<64x1xf32>
    %cst_79 = arith.constant 1.280000e+02 : f32
    %215 = vector.broadcast %cst_79 : f32 to vector<64x1xf32>
    %216 = arith.divf %214, %215 : vector<64x1xf32>
    %217 = vector.broadcast %216 : vector<64x1xf32> to vector<64x128xf32>
    %218 = arith.subf %210, %217 : vector<64x128xf32>
    %219 = arith.mulf %218, %218 : vector<64x128xf32>
    %cst_80 = arith.constant dense<0.000000e+00> : vector<64xf32>
    %220 = vector.multi_reduction <add>, %219, %cst_80 [1] : vector<64x128xf32> to vector<64xf32>
    %221 = vector.shape_cast %220 : vector<64xf32> to vector<64x1xf32>
    %cst_81 = arith.constant 1.280000e+02 : f32
    %222 = vector.broadcast %cst_81 : f32 to vector<64x1xf32>
    %223 = arith.divf %221, %222 : vector<64x1xf32>
    %224 = vector.broadcast %216 : vector<64x1xf32> to vector<64x128xf32>
    %225 = arith.subf %210, %224 : vector<64x128xf32>
    %cst_82 = arith.constant 9.99999974E-6 : f32
    %226 = vector.broadcast %cst_82 : f32 to vector<64x1xf32>
    %227 = arith.addf %223, %226 : vector<64x1xf32>
    %228 = math.rsqrt %227 : vector<64x1xf32>
    %229 = vector.broadcast %228 : vector<64x1xf32> to vector<64x128xf32>
    %230 = arith.mulf %225, %229 : vector<64x128xf32>
    %231 = vector.broadcast %211 : vector<1x128xf32> to vector<64x128xf32>
    %232 = arith.mulf %230, %231 : vector<64x128xf32>
    %233 = vector.broadcast %212 : vector<1x128xf32> to vector<64x128xf32>
    %234 = arith.addf %232, %233 : vector<64x128xf32>
    %235 = vector.shape_cast %234 : vector<64x128xf32> to vector<4x16x128xf32>
    %c0_83 = arith.constant 0 : index
    %c0_84 = arith.constant 0 : index
    %c0_85 = arith.constant 0 : index
    %236 = vector.load %arg14[%c0_83, %c0_84, %c0_85] : memref<4x16x128xf32, #tpu.memory_space<vmem>>, vector<4x16x128xf32>
    tpu.vector_store %arg14[%c0_83, %c0_84, %c0_85], %235 {strides = array<i32>} : memref<4x16x128xf32, #tpu.memory_space<vmem>>, vector<4x16x128xf32>,
    return
  }
  func.func @transform_0(%arg0: i32) -> (i32, i32, i32) {
    %c0_i32 = arith.constant 0 : i32
    %c0_i32_0 = arith.constant 0 : i32
    %c0_i32_1 = arith.constant 0 : i32
    return %arg0, %c0_i32, %c0_i32_0 : i32, i32, i32
  }
  func.func @transform_1(%arg0: i32) -> (i32, i32) {
    %c0_i32 = arith.constant 0 : i32
    %c0_i32_0 = arith.constant 0 : i32
    %c0_i32_1 = arith.constant 0 : i32
    return %c0_i32, %c0_i32_0 : i32, i32
  }
  func.func @transform_2(%arg0: i32) -> (i32, i32) {
    %c0_i32 = arith.constant 0 : i32
    %c0_i32_0 = arith.constant 0 : i32
    %c0_i32_1 = arith.constant 0 : i32
    return %c0_i32, %c0_i32_0 : i32, i32
  }
  func.func @transform_3(%arg0: i32) -> (i32, i32) {
    %c0_i32 = arith.constant 0 : i32
    %c0_i32_0 = arith.constant 0 : i32
    %c0_i32_1 = arith.constant 0 : i32
    return %c0_i32, %c0_i32_0 : i32, i32
  }
  func.func @transform_4(%arg0: i32) -> (i32, i32) {
    %c0_i32 = arith.constant 0 : i32
    %c0_i32_0 = arith.constant 0 : i32
    %c0_i32_1 = arith.constant 0 : i32
    return %c0_i32, %c0_i32_0 : i32, i32
  }
  func.func @transform_5(%arg0: i32) -> (i32, i32) {
    %c0_i32 = arith.constant 0 : i32
    %c0_i32_0 = arith.constant 0 : i32
    %c0_i32_1 = arith.constant 0 : i32
    return %c0_i32, %c0_i32_0 : i32, i32
  }
  func.func @transform_6(%arg0: i32) -> (i32, i32) {
    %c0_i32 = arith.constant 0 : i32
    %c0_i32_0 = arith.constant 0 : i32
    %c0_i32_1 = arith.constant 0 : i32
    return %c0_i32, %c0_i32_0 : i32, i32
  }
  func.func @transform_7(%arg0: i32) -> (i32, i32) {
    %c0_i32 = arith.constant 0 : i32
    %c0_i32_0 = arith.constant 0 : i32
    %c0_i32_1 = arith.constant 0 : i32
    return %c0_i32, %c0_i32_0 : i32, i32
  }
  func.func @transform_8(%arg0: i32) -> (i32, i32) {
    %c0_i32 = arith.constant 0 : i32
    %c0_i32_0 = arith.constant 0 : i32
    %c0_i32_1 = arith.constant 0 : i32
    return %c0_i32, %c0_i32_0 : i32, i32
  }
  func.func @transform_9(%arg0: i32) -> (i32, i32) {
    %c0_i32 = arith.constant 0 : i32
    %c0_i32_0 = arith.constant 0 : i32
    %c0_i32_1 = arith.constant 0 : i32
    return %c0_i32, %c0_i32_0 : i32, i32
  }
  func.func @transform_10(%arg0: i32) -> (i32, i32) {
    %c0_i32 = arith.constant 0 : i32
    %c0_i32_0 = arith.constant 0 : i32
    %c0_i32_1 = arith.constant 0 : i32
    return %c0_i32, %c0_i32_0 : i32, i32
  }
  func.func @transform_11(%arg0: i32) -> (i32, i32) {
    %c0_i32 = arith.constant 0 : i32
    %c0_i32_0 = arith.constant 0 : i32
    %c0_i32_1 = arith.constant 0 : i32
    return %c0_i32, %c0_i32_0 : i32, i32
  }
  func.func @transform_12(%arg0: i32) -> (i32, i32) {
    %c0_i32 = arith.constant 0 : i32
    %c0_i32_0 = arith.constant 0 : i32
    %c0_i32_1 = arith.constant 0 : i32
    return %c0_i32, %c0_i32_0 : i32, i32
  }
  func.func @transform_13(%arg0: i32) -> (i32, i32, i32) {
    %c0_i32 = arith.constant 0 : i32
    %c0_i32_0 = arith.constant 0 : i32
    %c0_i32_1 = arith.constant 0 : i32
    return %arg0, %c0_i32, %c0_i32_0 : i32, i32, i32
  }
}

module attributes {stable_mosaic.version = 11 : i64} {
  func.func @_transformer_block_kernel(%arg0: i32, %arg1: memref<4x16x128xf32, #tpu.memory_space<vmem>>, %arg2: memref<128x384xf32, #tpu.memory_space<vmem>>, %arg3: memref<1x384xf32, #tpu.memory_space<vmem>>, %arg4: memref<128x128xf32, #tpu.memory_space<vmem>>, %arg5: memref<1x128xf32, #tpu.memory_space<vmem>>, %arg6: memref<1x128xf32, #tpu.memory_space<vmem>>, %arg7: memref<1x128xf32, #tpu.memory_space<vmem>>, %arg8: memref<128x512xf32, #tpu.memory_space<vmem>>, %arg9: memref<1x512xf32, #tpu.memory_space<vmem>>, %arg10: memref<512x128xf32, #tpu.memory_space<vmem>>, %arg11: memref<1x128xf32, #tpu.memory_space<vmem>>, %arg12: memref<1x128xf32, #tpu.memory_space<vmem>>, %arg13: memref<1x128xf32, #tpu.memory_space<vmem>>, %arg14: memref<4x16x128xf32, #tpu.memory_space<vmem>>, %arg15: memref<64x128xf32, #tpu.memory_space<vmem>>) attributes {dimension_semantics = [#tpu.dimension_semantics<parallel>], iteration_bounds = array<i64: 1>, scalar_prefetch = 0 : i64, scratch_operands = 1 : i64, tpu.core_type = #tpu.core_type<tc>, window_params = [{transform_indices = @transform_0, window_bounds = array<i64: 4, 16, 128>}, {pipeline_mode = #tpu.pipeline_mode<synchronous>, transform_indices = @transform_1, window_bounds = array<i64: 128, 384>}, {pipeline_mode = #tpu.pipeline_mode<synchronous>, transform_indices = @transform_2, window_bounds = array<i64: 1, 384>}, {pipeline_mode = #tpu.pipeline_mode<synchronous>, transform_indices = @transform_3, window_bounds = array<i64: 128, 128>}, {pipeline_mode = #tpu.pipeline_mode<synchronous>, transform_indices = @transform_4, window_bounds = array<i64: 1, 128>}, {pipeline_mode = #tpu.pipeline_mode<synchronous>, transform_indices = @transform_5, window_bounds = array<i64: 1, 128>}, {pipeline_mode = #tpu.pipeline_mode<synchronous>, transform_indices = @transform_6, window_bounds = array<i64: 1, 128>}, {pipeline_mode = #tpu.pipeline_mode<synchronous>, transform_indices = @transform_7, window_bounds = array<i64: 128, 512>}, {pipeline_mode = #tpu.pipeline_mode<synchronous>, transform_indices = @transform_8, window_bounds = array<i64: 1, 512>}, {pipeline_mode = #tpu.pipeline_mode<synchronous>, transform_indices = @transform_9, window_bounds = array<i64: 512, 128>}, {pipeline_mode = #tpu.pipeline_mode<synchronous>, transform_indices = @transform_10, window_bounds = array<i64: 1, 128>}, {pipeline_mode = #tpu.pipeline_mode<synchronous>, transform_indices = @transform_11, window_bounds = array<i64: 1, 128>}, {pipeline_mode = #tpu.pipeline_mode<synchronous>, transform_indices = @transform_12, window_bounds = array<i64: 1, 128>}, {transform_indices = @transform_13, window_bounds = array<i64: 4, 16, 128>}]} {
    %c0 = arith.constant 0 : index
    %c0_0 = arith.constant 0 : index
    %c0_1 = arith.constant 0 : index
    %0 = vector.load %arg1[%c0, %c0_0, %c0_1] : memref<4x16x128xf32, #tpu.memory_space<vmem>>, vector<4x16x128xf32>
    %1 = vector.shape_cast %0 : vector<4x16x128xf32> to vector<64x128xf32>
    %c0_2 = arith.constant 0 : index
    %c0_3 = arith.constant 0 : index
    %2 = vector.load %arg2[%c0_2, %c0_3] : memref<128x384xf32, #tpu.memory_space<vmem>>, vector<128x384xf32>
    %cst = arith.constant dense<0.000000e+00> : vector<64x384xf32>
    %3 = tpu.matmul %1, %2, %cst {dimension_numbers = #tpu.dot_dimension_numbers<[1], [0], [0], [1], [0, 0, 1, 1], [], []>} : vector<64x128xf32>, vector<128x384xf32>, vector<64x384xf32> -> vector<64x384xf32>
    %c0_4 = arith.constant 0 : index
    %c0_5 = arith.constant 0 : index
    %4 = vector.load %arg3[%c0_4, %c0_5] : memref<1x384xf32, #tpu.memory_space<vmem>>, vector<1x384xf32>
    %5 = vector.broadcast %4 : vector<1x384xf32> to vector<64x384xf32>
    %6 = arith.addf %3, %5 : vector<64x384xf32>
    %7 = vector.extract_strided_slice %6 {offsets = [0, 0], sizes = [64, 16], strides = [1, 1]} : vector<64x384xf32> to vector<64x16xf32>
    %8 = vector.shape_cast %7 : vector<64x16xf32> to vector<4x16x16xf32>
    %9 = vector.extract_strided_slice %6 {offsets = [0, 128], sizes = [64, 16], strides = [1, 1]} : vector<64x384xf32> to vector<64x16xf32>
    %10 = vector.shape_cast %9 : vector<64x16xf32> to vector<4x16x16xf32>
    %11 = vector.extract_strided_slice %6 {offsets = [0, 256], sizes = [64, 16], strides = [1, 1]} : vector<64x384xf32> to vector<64x16xf32>
    %12 = vector.shape_cast %11 : vector<64x16xf32> to vector<4x16x16xf32>
    %cst_6 = arith.constant dense<0.000000e+00> : vector<4x16x16xf32>
    %13 = tpu.matmul %8, %10, %cst_6 {dimension_numbers = #tpu.dot_dimension_numbers<[2], [2], [1], [1], [0, 0, 0, 1, 1, 1], [0], [0]>} : vector<4x16x16xf32>, vector<4x16x16xf32>, vector<4x16x16xf32> -> vector<4x16x16xf32>
    %cst_7 = arith.constant dense<0xFF800000> : vector<4x16xf32>
    %14 = vector.multi_reduction <maximumf>, %13, %cst_7 [2] : vector<4x16x16xf32> to vector<4x16xf32>
    %15 = vector.shape_cast %14 : vector<4x16xf32> to vector<4x16x1xf32>
    %16 = vector.broadcast %15 : vector<4x16x1xf32> to vector<4x16x16xf32>
    %17 = arith.subf %13, %16 : vector<4x16x16xf32>
    %18 = math.exp %17 : vector<4x16x16xf32>
    %cst_8 = arith.constant dense<0.000000e+00> : vector<4x16xf32>
    %19 = vector.multi_reduction <add>, %18, %cst_8 [2] : vector<4x16x16xf32> to vector<4x16xf32>
    %20 = vector.shape_cast %19 : vector<4x16xf32> to vector<4x16x1xf32>
    %21 = tpu.reciprocal %20 {approx = true} : vector<4x16x1xf32> -> vector<4x16x1xf32>
    %22 = vector.broadcast %21 : vector<4x16x1xf32> to vector<4x16x16xf32>
    %23 = arith.mulf %18, %22 : vector<4x16x16xf32>
    %cst_9 = arith.constant dense<0.000000e+00> : vector<4x16x16xf32>
    %24 = tpu.matmul %23, %12, %cst_9 {dimension_numbers = #tpu.dot_dimension_numbers<[2], [1], [1], [2], [0, 0, 0, 1, 1, 2], [0], [0]>} : vector<4x16x16xf32>, vector<4x16x16xf32>, vector<4x16x16xf32> -> vector<4x16x16xf32>
    %25 = vector.shape_cast %24 : vector<4x16x16xf32> to vector<64x16xf32>
    %c0_10 = arith.constant 0 : index
    %c0_11 = arith.constant 0 : index
    %26 = vector.load %arg15[%c0_10, %c0_11] : memref<64x128xf32, #tpu.memory_space<vmem>>, vector<64x16xf32>
    tpu.vector_store %arg15[%c0_10, %c0_11], %25 {strides = array<i32>} : memref<64x128xf32, #tpu.memory_space<vmem>>, vector<64x16xf32>,
    %27 = vector.extract_strided_slice %6 {offsets = [0, 16], sizes = [64, 16], strides = [1, 1]} : vector<64x384xf32> to vector<64x16xf32>
    %28 = vector.shape_cast %27 : vector<64x16xf32> to vector<4x16x16xf32>
    %29 = vector.extract_strided_slice %6 {offsets = [0, 144], sizes = [64, 16], strides = [1, 1]} : vector<64x384xf32> to vector<64x16xf32>
    %30 = vector.shape_cast %29 : vector<64x16xf32> to vector<4x16x16xf32>
    %31 = vector.extract_strided_slice %6 {offsets = [0, 272], sizes = [64, 16], strides = [1, 1]} : vector<64x384xf32> to vector<64x16xf32>
    %32 = vector.shape_cast %31 : vector<64x16xf32> to vector<4x16x16xf32>
    %cst_12 = arith.constant dense<0.000000e+00> : vector<4x16x16xf32>
    %33 = tpu.matmul %28, %30, %cst_12 {dimension_numbers = #tpu.dot_dimension_numbers<[2], [2], [1], [1], [0, 0, 0, 1, 1, 1], [0], [0]>} : vector<4x16x16xf32>, vector<4x16x16xf32>, vector<4x16x16xf32> -> vector<4x16x16xf32>
    %cst_13 = arith.constant dense<0xFF800000> : vector<4x16xf32>
    %34 = vector.multi_reduction <maximumf>, %33, %cst_13 [2] : vector<4x16x16xf32> to vector<4x16xf32>
    %35 = vector.shape_cast %34 : vector<4x16xf32> to vector<4x16x1xf32>
    %36 = vector.broadcast %35 : vector<4x16x1xf32> to vector<4x16x16xf32>
    %37 = arith.subf %33, %36 : vector<4x16x16xf32>
    %38 = math.exp %37 : vector<4x16x16xf32>
    %cst_14 = arith.constant dense<0.000000e+00> : vector<4x16xf32>
    %39 = vector.multi_reduction <add>, %38, %cst_14 [2] : vector<4x16x16xf32> to vector<4x16xf32>
    %40 = vector.shape_cast %39 : vector<4x16xf32> to vector<4x16x1xf32>
    %41 = tpu.reciprocal %40 {approx = true} : vector<4x16x1xf32> -> vector<4x16x1xf32>
    %42 = vector.broadcast %41 : vector<4x16x1xf32> to vector<4x16x16xf32>
    %43 = arith.mulf %38, %42 : vector<4x16x16xf32>
    %cst_15 = arith.constant dense<0.000000e+00> : vector<4x16x16xf32>
    %44 = tpu.matmul %43, %32, %cst_15 {dimension_numbers = #tpu.dot_dimension_numbers<[2], [1], [1], [2], [0, 0, 0, 1, 1, 2], [0], [0]>} : vector<4x16x16xf32>, vector<4x16x16xf32>, vector<4x16x16xf32> -> vector<4x16x16xf32>
    %45 = vector.shape_cast %44 : vector<4x16x16xf32> to vector<64x16xf32>
    %c0_16 = arith.constant 0 : index
    %c16 = arith.constant 16 : index
    %46 = vector.load %arg15[%c0_16, %c16] : memref<64x128xf32, #tpu.memory_space<vmem>>, vector<64x16xf32>
    tpu.vector_store %arg15[%c0_16, %c16], %45 {strides = array<i32>} : memref<64x128xf32, #tpu.memory_space<vmem>>, vector<64x16xf32>,
    %47 = vector.extract_strided_slice %6 {offsets = [0, 32], sizes = [64, 16], strides = [1, 1]} : vector<64x384xf32> to vector<64x16xf32>
    %48 = vector.shape_cast %47 : vector<64x16xf32> to vector<4x16x16xf32>
    %49 = vector.extract_strided_slice %6 {offsets = [0, 160], sizes = [64, 16], strides = [1, 1]} : vector<64x384xf32> to vector<64x16xf32>
    %50 = vector.shape_cast %49 : vector<64x16xf32> to vector<4x16x16xf32>
    %51 = vector.extract_strided_slice %6 {offsets = [0, 288], sizes = [64, 16], strides = [1, 1]} : vector<64x384xf32> to vector<64x16xf32>
    %52 = vector.shape_cast %51 : vector<64x16xf32> to vector<4x16x16xf32>
    %cst_17 = arith.constant dense<0.000000e+00> : vector<4x16x16xf32>
    %53 = tpu.matmul %48, %50, %cst_17 {dimension_numbers = #tpu.dot_dimension_numbers<[2], [2], [1], [1], [0, 0, 0, 1, 1, 1], [0], [0]>} : vector<4x16x16xf32>, vector<4x16x16xf32>, vector<4x16x16xf32> -> vector<4x16x16xf32>
    %cst_18 = arith.constant dense<0xFF800000> : vector<4x16xf32>
    %54 = vector.multi_reduction <maximumf>, %53, %cst_18 [2] : vector<4x16x16xf32> to vector<4x16xf32>
    %55 = vector.shape_cast %54 : vector<4x16xf32> to vector<4x16x1xf32>
    %56 = vector.broadcast %55 : vector<4x16x1xf32> to vector<4x16x16xf32>
    %57 = arith.subf %53, %56 : vector<4x16x16xf32>
    %58 = math.exp %57 : vector<4x16x16xf32>
    %cst_19 = arith.constant dense<0.000000e+00> : vector<4x16xf32>
    %59 = vector.multi_reduction <add>, %58, %cst_19 [2] : vector<4x16x16xf32> to vector<4x16xf32>
    %60 = vector.shape_cast %59 : vector<4x16xf32> to vector<4x16x1xf32>
    %61 = tpu.reciprocal %60 {approx = true} : vector<4x16x1xf32> -> vector<4x16x1xf32>
    %62 = vector.broadcast %61 : vector<4x16x1xf32> to vector<4x16x16xf32>
    %63 = arith.mulf %58, %62 : vector<4x16x16xf32>
    %cst_20 = arith.constant dense<0.000000e+00> : vector<4x16x16xf32>
    %64 = tpu.matmul %63, %52, %cst_20 {dimension_numbers = #tpu.dot_dimension_numbers<[2], [1], [1], [2], [0, 0, 0, 1, 1, 2], [0], [0]>} : vector<4x16x16xf32>, vector<4x16x16xf32>, vector<4x16x16xf32> -> vector<4x16x16xf32>
    %65 = vector.shape_cast %64 : vector<4x16x16xf32> to vector<64x16xf32>
    %c0_21 = arith.constant 0 : index
    %c32 = arith.constant 32 : index
    %66 = vector.load %arg15[%c0_21, %c32] : memref<64x128xf32, #tpu.memory_space<vmem>>, vector<64x16xf32>
    tpu.vector_store %arg15[%c0_21, %c32], %65 {strides = array<i32>} : memref<64x128xf32, #tpu.memory_space<vmem>>, vector<64x16xf32>,
    %67 = vector.extract_strided_slice %6 {offsets = [0, 48], sizes = [64, 16], strides = [1, 1]} : vector<64x384xf32> to vector<64x16xf32>
    %68 = vector.shape_cast %67 : vector<64x16xf32> to vector<4x16x16xf32>
    %69 = vector.extract_strided_slice %6 {offsets = [0, 176], sizes = [64, 16], strides = [1, 1]} : vector<64x384xf32> to vector<64x16xf32>
    %70 = vector.shape_cast %69 : vector<64x16xf32> to vector<4x16x16xf32>
    %71 = vector.extract_strided_slice %6 {offsets = [0, 304], sizes = [64, 16], strides = [1, 1]} : vector<64x384xf32> to vector<64x16xf32>
    %72 = vector.shape_cast %71 : vector<64x16xf32> to vector<4x16x16xf32>
    %cst_22 = arith.constant dense<0.000000e+00> : vector<4x16x16xf32>
    %73 = tpu.matmul %68, %70, %cst_22 {dimension_numbers = #tpu.dot_dimension_numbers<[2], [2], [1], [1], [0, 0, 0, 1, 1, 1], [0], [0]>} : vector<4x16x16xf32>, vector<4x16x16xf32>, vector<4x16x16xf32> -> vector<4x16x16xf32>
    %cst_23 = arith.constant dense<0xFF800000> : vector<4x16xf32>
    %74 = vector.multi_reduction <maximumf>, %73, %cst_23 [2] : vector<4x16x16xf32> to vector<4x16xf32>
    %75 = vector.shape_cast %74 : vector<4x16xf32> to vector<4x16x1xf32>
    %76 = vector.broadcast %75 : vector<4x16x1xf32> to vector<4x16x16xf32>
    %77 = arith.subf %73, %76 : vector<4x16x16xf32>
    %78 = math.exp %77 : vector<4x16x16xf32>
    %cst_24 = arith.constant dense<0.000000e+00> : vector<4x16xf32>
    %79 = vector.multi_reduction <add>, %78, %cst_24 [2] : vector<4x16x16xf32> to vector<4x16xf32>
    %80 = vector.shape_cast %79 : vector<4x16xf32> to vector<4x16x1xf32>
    %81 = tpu.reciprocal %80 {approx = true} : vector<4x16x1xf32> -> vector<4x16x1xf32>
    %82 = vector.broadcast %81 : vector<4x16x1xf32> to vector<4x16x16xf32>
    %83 = arith.mulf %78, %82 : vector<4x16x16xf32>
    %cst_25 = arith.constant dense<0.000000e+00> : vector<4x16x16xf32>
    %84 = tpu.matmul %83, %72, %cst_25 {dimension_numbers = #tpu.dot_dimension_numbers<[2], [1], [1], [2], [0, 0, 0, 1, 1, 2], [0], [0]>} : vector<4x16x16xf32>, vector<4x16x16xf32>, vector<4x16x16xf32> -> vector<4x16x16xf32>
    %85 = vector.shape_cast %84 : vector<4x16x16xf32> to vector<64x16xf32>
    %c0_26 = arith.constant 0 : index
    %c48 = arith.constant 48 : index
    %86 = vector.load %arg15[%c0_26, %c48] : memref<64x128xf32, #tpu.memory_space<vmem>>, vector<64x16xf32>
    tpu.vector_store %arg15[%c0_26, %c48], %85 {strides = array<i32>} : memref<64x128xf32, #tpu.memory_space<vmem>>, vector<64x16xf32>,
    %87 = vector.extract_strided_slice %6 {offsets = [0, 64], sizes = [64, 16], strides = [1, 1]} : vector<64x384xf32> to vector<64x16xf32>
    %88 = vector.shape_cast %87 : vector<64x16xf32> to vector<4x16x16xf32>
    %89 = vector.extract_strided_slice %6 {offsets = [0, 192], sizes = [64, 16], strides = [1, 1]} : vector<64x384xf32> to vector<64x16xf32>
    %90 = vector.shape_cast %89 : vector<64x16xf32> to vector<4x16x16xf32>
    %91 = vector.extract_strided_slice %6 {offsets = [0, 320], sizes = [64, 16], strides = [1, 1]} : vector<64x384xf32> to vector<64x16xf32>
    %92 = vector.shape_cast %91 : vector<64x16xf32> to vector<4x16x16xf32>
    %cst_27 = arith.constant dense<0.000000e+00> : vector<4x16x16xf32>
    %93 = tpu.matmul %88, %90, %cst_27 {dimension_numbers = #tpu.dot_dimension_numbers<[2], [2], [1], [1], [0, 0, 0, 1, 1, 1], [0], [0]>} : vector<4x16x16xf32>, vector<4x16x16xf32>, vector<4x16x16xf32> -> vector<4x16x16xf32>
    %cst_28 = arith.constant dense<0xFF800000> : vector<4x16xf32>
    %94 = vector.multi_reduction <maximumf>, %93, %cst_28 [2] : vector<4x16x16xf32> to vector<4x16xf32>
    %95 = vector.shape_cast %94 : vector<4x16xf32> to vector<4x16x1xf32>
    %96 = vector.broadcast %95 : vector<4x16x1xf32> to vector<4x16x16xf32>
    %97 = arith.subf %93, %96 : vector<4x16x16xf32>
    %98 = math.exp %97 : vector<4x16x16xf32>
    %cst_29 = arith.constant dense<0.000000e+00> : vector<4x16xf32>
    %99 = vector.multi_reduction <add>, %98, %cst_29 [2] : vector<4x16x16xf32> to vector<4x16xf32>
    %100 = vector.shape_cast %99 : vector<4x16xf32> to vector<4x16x1xf32>
    %101 = tpu.reciprocal %100 {approx = true} : vector<4x16x1xf32> -> vector<4x16x1xf32>
    %102 = vector.broadcast %101 : vector<4x16x1xf32> to vector<4x16x16xf32>
    %103 = arith.mulf %98, %102 : vector<4x16x16xf32>
    %cst_30 = arith.constant dense<0.000000e+00> : vector<4x16x16xf32>
    %104 = tpu.matmul %103, %92, %cst_30 {dimension_numbers = #tpu.dot_dimension_numbers<[2], [1], [1], [2], [0, 0, 0, 1, 1, 2], [0], [0]>} : vector<4x16x16xf32>, vector<4x16x16xf32>, vector<4x16x16xf32> -> vector<4x16x16xf32>
    %105 = vector.shape_cast %104 : vector<4x16x16xf32> to vector<64x16xf32>
    %c0_31 = arith.constant 0 : index
    %c64 = arith.constant 64 : index
    %106 = vector.load %arg15[%c0_31, %c64] : memref<64x128xf32, #tpu.memory_space<vmem>>, vector<64x16xf32>
    tpu.vector_store %arg15[%c0_31, %c64], %105 {strides = array<i32>} : memref<64x128xf32, #tpu.memory_space<vmem>>, vector<64x16xf32>,
    %107 = vector.extract_strided_slice %6 {offsets = [0, 80], sizes = [64, 16], strides = [1, 1]} : vector<64x384xf32> to vector<64x16xf32>
    %108 = vector.shape_cast %107 : vector<64x16xf32> to vector<4x16x16xf32>
    %109 = vector.extract_strided_slice %6 {offsets = [0, 208], sizes = [64, 16], strides = [1, 1]} : vector<64x384xf32> to vector<64x16xf32>
    %110 = vector.shape_cast %109 : vector<64x16xf32> to vector<4x16x16xf32>
    %111 = vector.extract_strided_slice %6 {offsets = [0, 336], sizes = [64, 16], strides = [1, 1]} : vector<64x384xf32> to vector<64x16xf32>
    %112 = vector.shape_cast %111 : vector<64x16xf32> to vector<4x16x16xf32>
    %cst_32 = arith.constant dense<0.000000e+00> : vector<4x16x16xf32>
    %113 = tpu.matmul %108, %110, %cst_32 {dimension_numbers = #tpu.dot_dimension_numbers<[2], [2], [1], [1], [0, 0, 0, 1, 1, 1], [0], [0]>} : vector<4x16x16xf32>, vector<4x16x16xf32>, vector<4x16x16xf32> -> vector<4x16x16xf32>
    %cst_33 = arith.constant dense<0xFF800000> : vector<4x16xf32>
    %114 = vector.multi_reduction <maximumf>, %113, %cst_33 [2] : vector<4x16x16xf32> to vector<4x16xf32>
    %115 = vector.shape_cast %114 : vector<4x16xf32> to vector<4x16x1xf32>
    %116 = vector.broadcast %115 : vector<4x16x1xf32> to vector<4x16x16xf32>
    %117 = arith.subf %113, %116 : vector<4x16x16xf32>
    %118 = math.exp %117 : vector<4x16x16xf32>
    %cst_34 = arith.constant dense<0.000000e+00> : vector<4x16xf32>
    %119 = vector.multi_reduction <add>, %118, %cst_34 [2] : vector<4x16x16xf32> to vector<4x16xf32>
    %120 = vector.shape_cast %119 : vector<4x16xf32> to vector<4x16x1xf32>
    %121 = tpu.reciprocal %120 {approx = true} : vector<4x16x1xf32> -> vector<4x16x1xf32>
    %122 = vector.broadcast %121 : vector<4x16x1xf32> to vector<4x16x16xf32>
    %123 = arith.mulf %118, %122 : vector<4x16x16xf32>
    %cst_35 = arith.constant dense<0.000000e+00> : vector<4x16x16xf32>
    %124 = tpu.matmul %123, %112, %cst_35 {dimension_numbers = #tpu.dot_dimension_numbers<[2], [1], [1], [2], [0, 0, 0, 1, 1, 2], [0], [0]>} : vector<4x16x16xf32>, vector<4x16x16xf32>, vector<4x16x16xf32> -> vector<4x16x16xf32>
    %125 = vector.shape_cast %124 : vector<4x16x16xf32> to vector<64x16xf32>
    %c0_36 = arith.constant 0 : index
    %c80 = arith.constant 80 : index
    %126 = vector.load %arg15[%c0_36, %c80] : memref<64x128xf32, #tpu.memory_space<vmem>>, vector<64x16xf32>
    tpu.vector_store %arg15[%c0_36, %c80], %125 {strides = array<i32>} : memref<64x128xf32, #tpu.memory_space<vmem>>, vector<64x16xf32>,
    %127 = vector.extract_strided_slice %6 {offsets = [0, 96], sizes = [64, 16], strides = [1, 1]} : vector<64x384xf32> to vector<64x16xf32>
    %128 = vector.shape_cast %127 : vector<64x16xf32> to vector<4x16x16xf32>
    %129 = vector.extract_strided_slice %6 {offsets = [0, 224], sizes = [64, 16], strides = [1, 1]} : vector<64x384xf32> to vector<64x16xf32>
    %130 = vector.shape_cast %129 : vector<64x16xf32> to vector<4x16x16xf32>
    %131 = vector.extract_strided_slice %6 {offsets = [0, 352], sizes = [64, 16], strides = [1, 1]} : vector<64x384xf32> to vector<64x16xf32>
    %132 = vector.shape_cast %131 : vector<64x16xf32> to vector<4x16x16xf32>
    %cst_37 = arith.constant dense<0.000000e+00> : vector<4x16x16xf32>
    %133 = tpu.matmul %128, %130, %cst_37 {dimension_numbers = #tpu.dot_dimension_numbers<[2], [2], [1], [1], [0, 0, 0, 1, 1, 1], [0], [0]>} : vector<4x16x16xf32>, vector<4x16x16xf32>, vector<4x16x16xf32> -> vector<4x16x16xf32>
    %cst_38 = arith.constant dense<0xFF800000> : vector<4x16xf32>
    %134 = vector.multi_reduction <maximumf>, %133, %cst_38 [2] : vector<4x16x16xf32> to vector<4x16xf32>
    %135 = vector.shape_cast %134 : vector<4x16xf32> to vector<4x16x1xf32>
    %136 = vector.broadcast %135 : vector<4x16x1xf32> to vector<4x16x16xf32>
    %137 = arith.subf %133, %136 : vector<4x16x16xf32>
    %138 = math.exp %137 : vector<4x16x16xf32>
    %cst_39 = arith.constant dense<0.000000e+00> : vector<4x16xf32>
    %139 = vector.multi_reduction <add>, %138, %cst_39 [2] : vector<4x16x16xf32> to vector<4x16xf32>
    %140 = vector.shape_cast %139 : vector<4x16xf32> to vector<4x16x1xf32>
    %141 = tpu.reciprocal %140 {approx = true} : vector<4x16x1xf32> -> vector<4x16x1xf32>
    %142 = vector.broadcast %141 : vector<4x16x1xf32> to vector<4x16x16xf32>
    %143 = arith.mulf %138, %142 : vector<4x16x16xf32>
    %cst_40 = arith.constant dense<0.000000e+00> : vector<4x16x16xf32>
    %144 = tpu.matmul %143, %132, %cst_40 {dimension_numbers = #tpu.dot_dimension_numbers<[2], [1], [1], [2], [0, 0, 0, 1, 1, 2], [0], [0]>} : vector<4x16x16xf32>, vector<4x16x16xf32>, vector<4x16x16xf32> -> vector<4x16x16xf32>
    %145 = vector.shape_cast %144 : vector<4x16x16xf32> to vector<64x16xf32>
    %c0_41 = arith.constant 0 : index
    %c96 = arith.constant 96 : index
    %146 = vector.load %arg15[%c0_41, %c96] : memref<64x128xf32, #tpu.memory_space<vmem>>, vector<64x16xf32>
    tpu.vector_store %arg15[%c0_41, %c96], %145 {strides = array<i32>} : memref<64x128xf32, #tpu.memory_space<vmem>>, vector<64x16xf32>,
    %147 = vector.extract_strided_slice %6 {offsets = [0, 112], sizes = [64, 16], strides = [1, 1]} : vector<64x384xf32> to vector<64x16xf32>
    %148 = vector.shape_cast %147 : vector<64x16xf32> to vector<4x16x16xf32>
    %149 = vector.extract_strided_slice %6 {offsets = [0, 240], sizes = [64, 16], strides = [1, 1]} : vector<64x384xf32> to vector<64x16xf32>
    %150 = vector.shape_cast %149 : vector<64x16xf32> to vector<4x16x16xf32>
    %151 = vector.extract_strided_slice %6 {offsets = [0, 368], sizes = [64, 16], strides = [1, 1]} : vector<64x384xf32> to vector<64x16xf32>
    %152 = vector.shape_cast %151 : vector<64x16xf32> to vector<4x16x16xf32>
    %cst_42 = arith.constant dense<0.000000e+00> : vector<4x16x16xf32>
    %153 = tpu.matmul %148, %150, %cst_42 {dimension_numbers = #tpu.dot_dimension_numbers<[2], [2], [1], [1], [0, 0, 0, 1, 1, 1], [0], [0]>} : vector<4x16x16xf32>, vector<4x16x16xf32>, vector<4x16x16xf32> -> vector<4x16x16xf32>
    %cst_43 = arith.constant dense<0xFF800000> : vector<4x16xf32>
    %154 = vector.multi_reduction <maximumf>, %153, %cst_43 [2] : vector<4x16x16xf32> to vector<4x16xf32>
    %155 = vector.shape_cast %154 : vector<4x16xf32> to vector<4x16x1xf32>
    %156 = vector.broadcast %155 : vector<4x16x1xf32> to vector<4x16x16xf32>
    %157 = arith.subf %153, %156 : vector<4x16x16xf32>
    %158 = math.exp %157 : vector<4x16x16xf32>
    %cst_44 = arith.constant dense<0.000000e+00> : vector<4x16xf32>
    %159 = vector.multi_reduction <add>, %158, %cst_44 [2] : vector<4x16x16xf32> to vector<4x16xf32>
    %160 = vector.shape_cast %159 : vector<4x16xf32> to vector<4x16x1xf32>
    %161 = tpu.reciprocal %160 {approx = true} : vector<4x16x1xf32> -> vector<4x16x1xf32>
    %162 = vector.broadcast %161 : vector<4x16x1xf32> to vector<4x16x16xf32>
    %163 = arith.mulf %158, %162 : vector<4x16x16xf32>
    %cst_45 = arith.constant dense<0.000000e+00> : vector<4x16x16xf32>
    %164 = tpu.matmul %163, %152, %cst_45 {dimension_numbers = #tpu.dot_dimension_numbers<[2], [1], [1], [2], [0, 0, 0, 1, 1, 2], [0], [0]>} : vector<4x16x16xf32>, vector<4x16x16xf32>, vector<4x16x16xf32> -> vector<4x16x16xf32>
    %165 = vector.shape_cast %164 : vector<4x16x16xf32> to vector<64x16xf32>
    %c0_46 = arith.constant 0 : index
    %c112 = arith.constant 112 : index
    %166 = vector.load %arg15[%c0_46, %c112] : memref<64x128xf32, #tpu.memory_space<vmem>>, vector<64x16xf32>
    tpu.vector_store %arg15[%c0_46, %c112], %165 {strides = array<i32>} : memref<64x128xf32, #tpu.memory_space<vmem>>, vector<64x16xf32>,
    %c0_47 = arith.constant 0 : index
    %c0_48 = arith.constant 0 : index
    %167 = vector.load %arg15[%c0_47, %c0_48] : memref<64x128xf32, #tpu.memory_space<vmem>>, vector<64x128xf32>
    %c0_49 = arith.constant 0 : index
    %c0_50 = arith.constant 0 : index
    %168 = vector.load %arg4[%c0_49, %c0_50] : memref<128x128xf32, #tpu.memory_space<vmem>>, vector<128x128xf32>
    %cst_51 = arith.constant dense<0.000000e+00> : vector<64x128xf32>
    %169 = tpu.matmul %167, %168, %cst_51 {dimension_numbers = #tpu.dot_dimension_numbers<[1], [0], [0], [1], [0, 0, 1, 1], [], []>} : vector<64x128xf32>, vector<128x128xf32>, vector<64x128xf32> -> vector<64x128xf32>
    %c0_52 = arith.constant 0 : index
    %c0_53 = arith.constant 0 : index
    %170 = vector.load %arg5[%c0_52, %c0_53] : memref<1x128xf32, #tpu.memory_space<vmem>>, vector<1x128xf32>
    %171 = vector.broadcast %170 : vector<1x128xf32> to vector<64x128xf32>
    %172 = arith.addf %169, %171 : vector<64x128xf32>
    %173 = arith.addf %1, %172 : vector<64x128xf32>
    %c0_54 = arith.constant 0 : index
    %c0_55 = arith.constant 0 : index
    %174 = vector.load %arg6[%c0_54, %c0_55] : memref<1x128xf32, #tpu.memory_space<vmem>>, vector<1x128xf32>
    %c0_56 = arith.constant 0 : index
    %c0_57 = arith.constant 0 : index
    %175 = vector.load %arg7[%c0_56, %c0_57] : memref<1x128xf32, #tpu.memory_space<vmem>>, vector<1x128xf32>
    %cst_58 = arith.constant dense<0.000000e+00> : vector<64xf32>
    %176 = vector.multi_reduction <add>, %173, %cst_58 [1] : vector<64x128xf32> to vector<64xf32>
    %177 = vector.shape_cast %176 : vector<64xf32> to vector<64x1xf32>
    %cst_59 = arith.constant 1.280000e+02 : f32
    %178 = vector.broadcast %cst_59 : f32 to vector<64x1xf32>
    %179 = arith.divf %177, %178 : vector<64x1xf32>
    %180 = vector.broadcast %179 : vector<64x1xf32> to vector<64x128xf32>
    %181 = arith.subf %173, %180 : vector<64x128xf32>
    %182 = arith.mulf %181, %181 : vector<64x128xf32>
    %cst_60 = arith.constant dense<0.000000e+00> : vector<64xf32>
    %183 = vector.multi_reduction <add>, %182, %cst_60 [1] : vector<64x128xf32> to vector<64xf32>
    %184 = vector.shape_cast %183 : vector<64xf32> to vector<64x1xf32>
    %cst_61 = arith.constant 1.280000e+02 : f32
    %185 = vector.broadcast %cst_61 : f32 to vector<64x1xf32>
    %186 = arith.divf %184, %185 : vector<64x1xf32>
    %187 = vector.broadcast %179 : vector<64x1xf32> to vector<64x128xf32>
    %188 = arith.subf %173, %187 : vector<64x128xf32>
    %cst_62 = arith.constant 9.99999974E-6 : f32
    %189 = vector.broadcast %cst_62 : f32 to vector<64x1xf32>
    %190 = arith.addf %186, %189 : vector<64x1xf32>
    %191 = math.rsqrt %190 : vector<64x1xf32>
    %192 = vector.broadcast %191 : vector<64x1xf32> to vector<64x128xf32>
    %193 = arith.mulf %188, %192 : vector<64x128xf32>
    %194 = vector.broadcast %174 : vector<1x128xf32> to vector<64x128xf32>
    %195 = arith.mulf %193, %194 : vector<64x128xf32>
    %196 = vector.broadcast %175 : vector<1x128xf32> to vector<64x128xf32>
    %197 = arith.addf %195, %196 : vector<64x128xf32>
    %c0_63 = arith.constant 0 : index
    %c0_64 = arith.constant 0 : index
    %198 = vector.load %arg8[%c0_63, %c0_64] : memref<128x512xf32, #tpu.memory_space<vmem>>, vector<128x512xf32>
    %cst_65 = arith.constant dense<0.000000e+00> : vector<64x512xf32>
    %199 = tpu.matmul %197, %198, %cst_65 {dimension_numbers = #tpu.dot_dimension_numbers<[1], [0], [0], [1], [0, 0, 1, 1], [], []>} : vector<64x128xf32>, vector<128x512xf32>, vector<64x512xf32> -> vector<64x512xf32>
    %c0_66 = arith.constant 0 : index
    %c0_67 = arith.constant 0 : index
    %200 = vector.load %arg9[%c0_66, %c0_67] : memref<1x512xf32, #tpu.memory_space<vmem>>, vector<1x512xf32>
    %201 = vector.broadcast %200 : vector<1x512xf32> to vector<64x512xf32>
    %202 = arith.addf %199, %201 : vector<64x512xf32>
    %cst_68 = arith.constant 0.000000e+00 : f32
    %203 = vector.broadcast %cst_68 : f32 to vector<64x512xf32>
    %204 = arith.maximumf %202, %203 : vector<64x512xf32>
    %c0_69 = arith.constant 0 : index
    %c0_70 = arith.constant 0 : index
    %205 = vector.load %arg10[%c0_69, %c0_70] : memref<512x128xf32, #tpu.memory_space<vmem>>, vector<512x128xf32>
    %cst_71 = arith.constant dense<0.000000e+00> : vector<64x128xf32>
    %206 = tpu.matmul %204, %205, %cst_71 {dimension_numbers = #tpu.dot_dimension_numbers<[1], [0], [0], [1], [0, 0, 1, 1], [], []>} : vector<64x512xf32>, vector<512x128xf32>, vector<64x128xf32> -> vector<64x128xf32>
    %c0_72 = arith.constant 0 : index
    %c0_73 = arith.constant 0 : index
    %207 = vector.load %arg11[%c0_72, %c0_73] : memref<1x128xf32, #tpu.memory_space<vmem>>, vector<1x128xf32>
    %208 = vector.broadcast %207 : vector<1x128xf32> to vector<64x128xf32>
    %209 = arith.addf %206, %208 : vector<64x128xf32>
    %210 = arith.addf %197, %209 : vector<64x128xf32>
    %c0_74 = arith.constant 0 : index
    %c0_75 = arith.constant 0 : index
    %211 = vector.load %arg12[%c0_74, %c0_75] : memref<1x128xf32, #tpu.memory_space<vmem>>, vector<1x128xf32>
    %c0_76 = arith.constant 0 : index
    %c0_77 = arith.constant 0 : index
    %212 = vector.load %arg13[%c0_76, %c0_77] : memref<1x128xf32, #tpu.memory_space<vmem>>, vector<1x128xf32>
    %cst_78 = arith.constant dense<0.000000e+00> : vector<64xf32>
    %213 = vector.multi_reduction <add>, %210, %cst_78 [1] : vector<64x128xf32> to vector<64xf32>
    %214 = vector.shape_cast %213 : vector<64xf32> to vector<64x1xf32>
    %cst_79 = arith.constant 1.280000e+02 : f32
    %215 = vector.broadcast %cst_79 : f32 to vector<64x1xf32>
    %216 = arith.divf %214, %215 : vector<64x1xf32>
    %217 = vector.broadcast %216 : vector<64x1xf32> to vector<64x128xf32>
    %218 = arith.subf %210, %217 : vector<64x128xf32>
    %219 = arith.mulf %218, %218 : vector<64x128xf32>
    %cst_80 = arith.constant dense<0.000000e+00> : vector<64xf32>
    %220 = vector.multi_reduction <add>, %219, %cst_80 [1] : vector<64x128xf32> to vector<64xf32>
    %221 = vector.shape_cast %220 : vector<64xf32> to vector<64x1xf32>
    %cst_81 = arith.constant 1.280000e+02 : f32
    %222 = vector.broadcast %cst_81 : f32 to vector<64x1xf32>
    %223 = arith.divf %221, %222 : vector<64x1xf32>
    %224 = vector.broadcast %216 : vector<64x1xf32> to vector<64x128xf32>
    %225 = arith.subf %210, %224 : vector<64x128xf32>
    %cst_82 = arith.constant 9.99999974E-6 : f32
    %226 = vector.broadcast %cst_82 : f32 to vector<64x1xf32>
    %227 = arith.addf %223, %226 : vector<64x1xf32>
    %228 = math.rsqrt %227 : vector<64x1xf32>
    %229 = vector.broadcast %228 : vector<64x1xf32> to vector<64x128xf32>
    %230 = arith.mulf %225, %229 : vector<64x128xf32>
    %231 = vector.broadcast %211 : vector<1x128xf32> to vector<64x128xf32>
    %232 = arith.mulf %230, %231 : vector<64x128xf32>
    %233 = vector.broadcast %212 : vector<1x128xf32> to vector<64x128xf32>
    %234 = arith.addf %232, %233 : vector<64x128xf32>
    %235 = vector.shape_cast %234 : vector<64x128xf32> to vector<4x16x128xf32>
    %c0_83 = arith.constant 0 : index
    %c0_84 = arith.constant 0 : index
    %c0_85 = arith.constant 0 : index
    %236 = vector.load %arg14[%c0_83, %c0_84, %c0_85] : memref<4x16x128xf32, #tpu.memory_space<vmem>>, vector<4x16x128xf32>
    tpu.vector_store %arg14[%c0_83, %c0_84, %c0_85], %235 {strides = array<i32>} : memref<4x16x128xf32, #tpu.memory_space<vmem>>, vector<4x16x128xf32>,
    return
  }
  func.func @transform_0(%arg0: i32) -> (i32, i32, i32) {
    %c0_i32 = arith.constant 0 : i32
    %c0_i32_0 = arith.constant 0 : i32
    %c0_i32_1 = arith.constant 0 : i32
    return %arg0, %c0_i32, %c0_i32_0 : i32, i32, i32
  }
  func.func @transform_1(%arg0: i32) -> (i32, i32) {
    %c0_i32 = arith.constant 0 : i32
    %c0_i32_0 = arith.constant 0 : i32
    %c0_i32_1 = arith.constant 0 : i32
    return %c0_i32, %c0_i32_0 : i32, i32
  }
  func.func @transform_2(%arg0: i32) -> (i32, i32) {
    %c0_i32 = arith.constant 0 : i32
    %c0_i32_0 = arith.constant 0 : i32
    %c0_i32_1 = arith.constant 0 : i32
    return %c0_i32, %c0_i32_0 : i32, i32
  }
  func.func @transform_3(%arg0: i32) -> (i32, i32) {
    %c0_i32 = arith.constant 0 : i32
    %c0_i32_0 = arith.constant 0 : i32
    %c0_i32_1 = arith.constant 0 : i32
    return %c0_i32, %c0_i32_0 : i32, i32
  }
  func.func @transform_4(%arg0: i32) -> (i32, i32) {
    %c0_i32 = arith.constant 0 : i32
    %c0_i32_0 = arith.constant 0 : i32
    %c0_i32_1 = arith.constant 0 : i32
    return %c0_i32, %c0_i32_0 : i32, i32
  }
  func.func @transform_5(%arg0: i32) -> (i32, i32) {
    %c0_i32 = arith.constant 0 : i32
    %c0_i32_0 = arith.constant 0 : i32
    %c0_i32_1 = arith.constant 0 : i32
    return %c0_i32, %c0_i32_0 : i32, i32
  }
  func.func @transform_6(%arg0: i32) -> (i32, i32) {
    %c0_i32 = arith.constant 0 : i32
    %c0_i32_0 = arith.constant 0 : i32
    %c0_i32_1 = arith.constant 0 : i32
    return %c0_i32, %c0_i32_0 : i32, i32
  }
  func.func @transform_7(%arg0: i32) -> (i32, i32) {
    %c0_i32 = arith.constant 0 : i32
    %c0_i32_0 = arith.constant 0 : i32
    %c0_i32_1 = arith.constant 0 : i32
    return %c0_i32, %c0_i32_0 : i32, i32
  }
  func.func @transform_8(%arg0: i32) -> (i32, i32) {
    %c0_i32 = arith.constant 0 : i32
    %c0_i32_0 = arith.constant 0 : i32
    %c0_i32_1 = arith.constant 0 : i32
    return %c0_i32, %c0_i32_0 : i32, i32
  }
  func.func @transform_9(%arg0: i32) -> (i32, i32) {
    %c0_i32 = arith.constant 0 : i32
    %c0_i32_0 = arith.constant 0 : i32
    %c0_i32_1 = arith.constant 0 : i32
    return %c0_i32, %c0_i32_0 : i32, i32
  }
  func.func @transform_10(%arg0: i32) -> (i32, i32) {
    %c0_i32 = arith.constant 0 : i32
    %c0_i32_0 = arith.constant 0 : i32
    %c0_i32_1 = arith.constant 0 : i32
    return %c0_i32, %c0_i32_0 : i32, i32
  }
  func.func @transform_11(%arg0: i32) -> (i32, i32) {
    %c0_i32 = arith.constant 0 : i32
    %c0_i32_0 = arith.constant 0 : i32
    %c0_i32_1 = arith.constant 0 : i32
    return %c0_i32, %c0_i32_0 : i32, i32
  }
  func.func @transform_12(%arg0: i32) -> (i32, i32) {
    %c0_i32 = arith.constant 0 : i32
    %c0_i32_0 = arith.constant 0 : i32
    %c0_i32_1 = arith.constant 0 : i32
    return %c0_i32, %c0_i32_0 : i32, i32
  }
  func.func @transform_13(%arg0: i32) -> (i32, i32, i32) {
    %c0_i32 = arith.constant 0 : i32
    %c0_i32_0 = arith.constant 0 : i32
    %c0_i32_1 = arith.constant 0 : i32
    return %arg0, %c0_i32, %c0_i32_0 : i32, i32, i32
  }
}

</mosaic_0001>

<bundles_post_ra>
// kernel: tpu_custom_call.1
= control target key start
LH: loop header
LB: loop body
LE: loop exit
PB: predicated region body
PF: predicated region fallthrough
CT: control target
= control target key end

     0   :  { %18 = vsyncpa [#allocation4], 0  ;;  %s11745_s0 = inlined_call_operand.hbm [shape: f32[4,16,128], index: 0, kind: input, shape index: {}]   ;;  %s11746_s1 = inlined_call_operand.hbm [shape: f32[128,384], index: 1, kind: input, shape index: {}]   ;;  %s11747_s2 = inlined_call_operand.vmem [shape: f32[1,384], index: 2, kind: input, shape index: {}]   ;;  %s11748_s3 = inlined_call_operand.hbm [shape: f32[128,128], index: 3, kind: input, shape index: {}]   ;;  %s11749_s4 = inlined_call_operand.hbm [shape: f32[1,128], index: 4, kind: input, shape index: {}]   ;;  %s11750_s5 = inlined_call_operand.vmem [shape: f32[1,128], index: 5, kind: input, shape index: {}]   ;;  %s11751_s6 = inlined_call_operand.vmem [shape: f32[1,128], index: 6, kind: input, shape index: {}]   ;;  %s11752_s7 = inlined_call_operand.hbm [shape: f32[128,512], index: 7, kind: input, shape index: {}]   ;;  %s11753_s8 = inlined_call_operand.vmem [shape: f32[1,512], index: 8, kind: input, shape index: {}]   ;;  %s11754_s9 = inlined_call_operand.hbm [shape: f32[512,128], index: 9, kind: input, shape index: {}]   ;;  %s11755_s10 = inlined_call_operand.vmem [shape: f32[1,128], index: 10, kind: input, shape index: {}]   ;;  %s11756_s11 = inlined_call_operand.vmem [shape: f32[1,128], index: 11, kind: input, shape index: {}]   ;;  %s11757_s12 = inlined_call_operand.vmem [shape: f32[1,128], index: 12, kind: input, shape index: {}]   ;;  %s11758_s13 = inlined_call_operand.hbm [shape: f32[4,16,128], index: 13, kind: output, shape index: {}]  }
   0x1   :  { %19 = vsyncpa [#allocation7], 0 }
   0x2   :  { %20 = vsyncpa [#allocation10], 0 }
   0x3   :  { %21 = vsyncpa [#allocation13], 0 }
   0x4   :  { %22 = vsyncpa [#allocation5], 0  ;;  %s9770_s25 = smov [#allocation6]  }
   0x5   :  { %s40_s26 = sshll.u32 %s9770_s25, 4  ;;  %s41_s26 = int_to_ptr.vmem [resolvable:$true] %s40_s26 }
   0x6   :  { %s9628_s27 = scalar_lea.vmem %s41_s26, 6144  ;;  %p9633_p1 = scmp.lt.s32.totalorder %s41_s26, %s41_s26 }
   0x7   :  { %p9629_p0 = scmp.ne.s32.totalorder %s41_s26, %s9628_s27  ;;  %p9634_p2 = scmp.lt.s32.totalorder %s9628_s27, %s9628_s27 }
   0x9   :  { %p9635_p3 = por %p9634_p2, %p9633_p1 }
   0xb   :  { %p9636_p4 = pnand %p9635_p3, %p9629_p0 }
   0xd   :  { %9639 = shalt.err (!%p9636_p4)
}
   0xe   :  { %s9771_s28 = smov 384   ;;  %s9772_s29 = smov 24  }
   0xf   :  { %46 = dma.hbm_to_vmem [thread:$0]  %s11746_s1, 6144, %s41_s26, [#allocation7], %s9771_s28, %s9771_s28, %s9772_s29  }
  0x10   :  { %s9773_s15 = smov [#allocation9]   ;;  %s9774_s17 = smov [#allocation3]  }
  0x11   :  { %s67_s16 = sshll.u32 %s9773_s15, 4  ;;  %s28_s18 = sshll.u32 %s9774_s17, 4  ;;  %s68_s16 = int_to_ptr.vmem [resolvable:$true] %s67_s16  ;;  %s29_s18 = int_to_ptr.vmem [resolvable:$true] %s28_s18 }
  0x12   :  { %s9648_s19 = scalar_lea.vmem %s68_s16, 16  ;;  %s9652_s20 = scalar_lea.vmem %s68_s16, 32 }
  0x13   :  { %p9649_p5 = scmp.ne.s32.totalorder %s68_s16, %s9648_s19  ;;  %p9653_p6 = scmp.lt.s32.totalorder %s68_s16, %s68_s16 }
  0x14   :  { %p9654_p7 = scmp.lt.s32.totalorder %s9652_s20, %s9648_s19 }
  0x16   :  { %p9655_p8 = por %p9654_p7, %p9653_p6 }
  0x18   :  { %p9656_p9 = pnand %p9655_p8, %p9649_p5 }
  0x1a   :  { %9659 = shalt.err (!%p9656_p9)
}
  0x1b   :  { %70 = dma.hbm_to_vmem [thread:$0]  %s11749_s4, 16, %s68_s16, [#allocation10]  }
  0x1c   :  { %s9668_s23 = scalar_lea.vmem %s29_s18, 1024  ;;  %p9673_p11 = scmp.lt.s32.totalorder %s29_s18, %s29_s18 }
  0x1d   :  { %p9669_p10 = scmp.ne.s32.totalorder %s29_s18, %s9668_s23  ;;  %p9674_p12 = scmp.lt.s32.totalorder %s9668_s23, %s9668_s23 }
  0x1f   :  { %p9675_p13 = por %p9674_p12, %p9673_p11 }
  0x21   :  { %p9676_p0 = pnand %p9675_p13, %p9669_p10 }
  0x23   :  { %9679 = shalt.err (!%p9676_p0)
}
  0x24   :  { %s9775_s1 = smov 128   ;;  %s9776_s24 = smov 8  }
  0x25   :  { %34 = dma.hbm_to_vmem [thread:$0]  %s11745_s0, 1024, %s29_s18, [#allocation4], %s9775_s1, %s9775_s1, %s9776_s24  }
  0x26   :  { %s9777_s27 = smov [#allocation8]   ;;  %s9778_s4 = smov [#allocation11]  }
  0x27   :  { %s54_s28 = sshll.u32 %s9777_s27, 4  ;;  %s80_s29 = sshll.u32 %s9778_s4, 4  ;;  %s55_s28 = int_to_ptr.vmem [resolvable:$true] %s54_s28  ;;  %s81_s29 = int_to_ptr.vmem [resolvable:$true] %s80_s29 }
  0x28   :  { %s9688_s30 = scalar_lea.vmem %s55_s28, 2048  ;;  %p9693_p2 = scmp.lt.s32.totalorder %s55_s28, %s55_s28 }
  0x29   :  { %p9689_p1 = scmp.ne.s32.totalorder %s55_s28, %s9688_s30  ;;  %p9694_p3 = scmp.lt.s32.totalorder %s9688_s30, %s9688_s30 }
  0x2b   :  { %p9695_p4 = por %p9694_p3, %p9693_p2 }
  0x2d   :  { %p9696_p5 = pnand %p9695_p4, %p9689_p1 }
  0x2f   :  { %9699 = shalt.err (!%p9696_p5)
}
  0x30   :  { %60 = dma.hbm_to_vmem [thread:$0]  %s11748_s3, 2048, %s55_s28, [#allocation7], %s9775_s1, %s9775_s1, %s9776_s24  }
  0x31   :  { %s9708_s0 = scalar_lea.vmem %s81_s29, 8192  ;;  %p9713_p7 = scmp.lt.s32.totalorder %s81_s29, %s81_s29 }
  0x32   :  { %p9709_p6 = scmp.ne.s32.totalorder %s81_s29, %s9708_s0  ;;  %p9714_p8 = scmp.lt.s32.totalorder %s9708_s0, %s9708_s0 }
  0x34   :  { %p9715_p9 = por %p9714_p8, %p9713_p7 }
  0x36   :  { %p9716_p10 = pnand %p9715_p9, %p9709_p6 }
  0x38   :  { %9719 = shalt.err (!%p9716_p10)
}
  0x39   :  { %s9779_s16 = smov 512   ;;  %s9780_s17 = smov 32  }
  0x3a   :  { %86 = dma.hbm_to_vmem [thread:$0]  %s11752_s7, 8192, %s81_s29, [#allocation10], %s9779_s16, %s9779_s16, %s9780_s17  }
  0x3b   :  { %s9781_s20 = smov [#allocation12]  }
  0x3c   :  { %s94_s21 = sshll.u32 %s9781_s20, 4  ;;  %s95_s21 = int_to_ptr.vmem [resolvable:$true] %s94_s21 }
  0x3d   :  { %s9728_s22 = scalar_lea.vmem %s95_s21, 8192  ;;  %p9733_p12 = scmp.lt.s32.totalorder %s95_s21, %s95_s21 }
  0x3e   :  { %p9729_p11 = scmp.ne.s32.totalorder %s95_s21, %s9728_s22  ;;  %p9734_p13 = scmp.lt.s32.totalorder %s9728_s22, %s9728_s22 }
  0x40   :  { %p9735_p0 = por %p9734_p13, %p9733_p12 }
  0x42   :  { %p9736_p1 = pnand %p9735_p0, %p9729_p11 }
  0x44   :  { %9739 = shalt.err (!%p9736_p1)
}
  0x45   :  { %100 = dma.hbm_to_vmem [thread:$0]  %s11754_s9, 8192, %s95_s21, [#allocation13], %s9775_s1, %s9775_s1, %s9776_s24  }
  0x46   :  { %9760 = dma.done.wait [#allocation4], 1024  }
  0x47   :  { %9761 = vsyncadd [#allocation4], 4294966272 }
  0x48   :  { %9762 = dma.done.wait [#allocation7], 8192  }
  0x49   :  { %9763 = vsyncadd [#allocation7], 4294959104 }
  0x4a   :  { %9764 = dma.done.wait [#allocation10], 8208  }
  0x4b   :  { %9765 = vsyncadd [#allocation10], 4294959088 }
  0x4c   :  { %9766 = dma.done.wait [#allocation13], 8192  }
  0x4d   :  { %9767 = vsyncadd [#allocation13], 4294959104  ;;  %v11762_v0 = vmov 0.0   ;;  %v179_v1 = vld [vmem:[#allocation6 + $0x170] sm:$0xff]  ;;  %v178_v2 = vld [vmem:[#allocation6 + $0x168] sm:$0xff]  ;;  %v183_v57 = vlaneseq  ;;  %vm416_vm0 = vcmask 130048  }
  0x4e   :  { %262 = vmatprep.mubr.f32.mxu0 %v11762_v0  ;;  %v176_v3 = vld [vmem:[#allocation6 + $0x158] sm:$0xff]  ;;  %198 = vmatprep.subr.mxu0 %v179_v1  ;;  %v175_v4 = vld [vmem:[#allocation6 + $0x150] sm:$0xff]  ;;  %v173_v5 = vld [vmem:[#allocation6 + $0x140] sm:$0xff]  ;;  %s9783_s25 = smov 112   ;;  %s9785_s26 = smov 80   ;;  %vm2025_vm1 = vcmask 261248  }
  0x4f   :  { %199 = vmatpush1.msra.mxu0 %v178_v2  ;;  %v172_v6 = vld [vmem:[#allocation6 + $0x138] sm:$0xff]  ;;  %v170_v7 = vld [vmem:[#allocation6 + $0x128] sm:$0xff]  ;;  %v169_v8 = vld [vmem:[#allocation6 + $0x120] sm:$0xff]  ;;  %v9900_v58 = vshrl.u32 %v183_v57, 7  ;;  %s9786_s27 = smov 64   ;;  %s9787_s28 = smov 48  }
  0x50   :  { %200 = vmatprep.subr.mxu0 %v176_v3  ;;  %v167_v9 = vld [vmem:[#allocation6 + $0x110] sm:$0xff]  ;;  %v166_v10 = vld [vmem:[#allocation6 + $0x108] sm:$0xff]  ;;  %v164_v11 = vld [vmem:[#allocation6 + $0xf8] sm:$0xff]  ;;  %s9788_s4 = smov 16   ;;  %vm2866_vm2 = vcmask 392448   ;;  %vm3707_vm3 = vcmask 523648  }
  0x51   :  { %201 = vmatpush1.msra.mxu0 %v175_v4  ;;  %v163_v12 = vld [vmem:[#allocation6 + $0xf0] sm:$0xff]  ;;  %v161_v13 = vld [vmem:[#allocation6 + $0xe0] sm:$0xff]  ;;  %v160_v15 = vld [vmem:[#allocation6 + $0xd8] sm:$0xff]  ;;  %11766 = vst [vmem:[#allocation20_spill] sm:$0xff] %v9900_v58  ;;  %v11761_v59 = vsub.s32 0, %v9900_v58  ;;  %v11759_v62 = vsub.s32 1, %v9900_v58 }
  0x52   :  { %202 = vmatprep.subr.mxu0 %v173_v5  ;;  %v9889_v14 = vld [vmem:[#allocation3] sm:$0xff]  ;;  %v158_v16 = vld [vmem:[#allocation6 + $0xc8] sm:$0xff]  ;;  %v180_v18 = vld [vmem:[#allocation6 + $0x178] sm:$0xff]  ;;  %vm4548_vm4 = vcmask 654848   ;;  %vm5389_vm5 = vcmask 786048   ;;  %vm6230_vm6 = vcmask 917248  }
  0x53   :  { %203 = vmatpush1.msra.mxu0 %v172_v6  ;;  %8768 = vmatprep.mubr.f32.mxu1 %v9889_v14  ;;  %v157_v17 = vld [vmem:[#allocation6 + $0xc0] sm:$0xff]  ;;  %v155_v20 = vld [vmem:[#allocation6 + $0xb0] sm:$0xff]  ;;  %v154_v21 = vld [vmem:[#allocation6 + $0xa8] sm:$0xff]  ;;  %vm7071_vm7 = vcmask 1048448  }
  0x54   :  { %204 = vmatprep.subr.mxu0 %v170_v7  ;;  %v177_v19 = vld [vmem:[#allocation6 + $0x160] sm:$0xff]  ;;  %8736 = vmatprep.subr.mxu1 %v180_v18  ;;  %v174_v22 = vld [vmem:[#allocation6 + $0x148] sm:$0xff]  ;;  %v152_v23 = vld [vmem:[#allocation6 + $0x98] sm:$0xff] }
  0x55   :  { %205 = vmatpush1.msra.mxu0 %v169_v8  ;;  %8737 = vmatpush3.msra.mxu1 %v180_v18  ;;  %v151_v24 = vld [vmem:[#allocation6 + $0x90] sm:$0xff]  ;;  %v149_v26 = vld [vmem:[#allocation6 + $0x80] sm:$0xff]  ;;  %v148_v27 = vld [vmem:[#allocation6 + $0x78] sm:$0xff] }
  0x56   :  { %206 = vmatprep.subr.mxu0 %v167_v9  ;;  %8738 = vmatprep.subr.mxu1 %v177_v19  ;;  %v171_v25 = vld [vmem:[#allocation6 + $0x130] sm:$0xff]  ;;  %v168_v28 = vld [vmem:[#allocation6 + $0x118] sm:$0xff]  ;;  %v146_v29 = vld [vmem:[#allocation6 + $0x68] sm:$0xff] }
  0x57   :  { %207 = vmatpush1.msra.mxu0 %v166_v10  ;;  %8739 = vmatpush3.msra.mxu1 %v177_v19  ;;  %v145_v30 = vld [vmem:[#allocation6 + $0x60] sm:$0xff]  ;;  %v143_v32 = vld [vmem:[#allocation6 + $0x50] sm:$0xff]  ;;  %v142_v33 = vld [vmem:[#allocation6 + $0x48] sm:$0xff] }
  0x58   :  { %208 = vmatprep.subr.mxu0 %v164_v11  ;;  %8740 = vmatprep.subr.mxu1 %v174_v22  ;;  %v165_v31 = vld [vmem:[#allocation6 + $0x100] sm:$0xff]  ;;  %v162_v34 = vld [vmem:[#allocation6 + $0xe8] sm:$0xff]  ;;  %v140_v35 = vld [vmem:[#allocation6 + $0x38] sm:$0xff] }
  0x59   :  { %209 = vmatpush1.msra.mxu0 %v163_v12  ;;  %8741 = vmatpush3.msra.mxu1 %v174_v22  ;;  %v139_v36 = vld [vmem:[#allocation6 + $0x30] sm:$0xff]  ;;  %v137_v38 = vld [vmem:[#allocation6 + $0x20] sm:$0xff]  ;;  %v136_v39 = vld [vmem:[#allocation6 + $0x18] sm:$0xff]  ;;  %v11760_v22 = vsub.s32 2, %v9900_v58 }
  0x5a   :  { %210 = vmatprep.subr.mxu0 %v161_v13  ;;  %8742 = vmatprep.subr.mxu1 %v171_v25  ;;  %v159_v37 = vld [vmem:[#allocation6 + $0xd0] sm:$0xff]  ;;  %v156_v40 = vld [vmem:[#allocation6 + $0xb8] sm:$0xff]  ;;  %v134_v41 = vld [vmem:[#allocation6 + $0x8] sm:$0xff] }
  0x5b   :  { %211 = vmatpush1.msra.mxu0 %v160_v15  ;;  %8743 = vmatpush3.msra.mxu1 %v171_v25  ;;  %v133_v42 = vld [vmem:[#allocation6] sm:$0xff]  ;;  %v150_v44 = vld [vmem:[#allocation6 + $0x88] sm:$0xff]  ;;  %v147_v45 = vld [vmem:[#allocation6 + $0x70] sm:$0xff] }
  0x5c   :  { %212 = vmatprep.subr.mxu0 %v158_v16  ;;  %8744 = vmatprep.subr.mxu1 %v168_v28  ;;  %v153_v43 = vld [vmem:[#allocation6 + $0xa0] sm:$0xff]  ;;  %v126_v46 = vld [vmem:[#allocation3 + $0x8] sm:$0xff]  ;;  %v144_v47 = vld [vmem:[#allocation6 + $0x58] sm:$0xff] }
  0x5d   :  { %213 = vmatpush1.msra.mxu0 %v157_v17  ;;  %8745 = vmatpush3.msra.mxu1 %v168_v28  ;;  %v141_v48 = vld [vmem:[#allocation6 + $0x40] sm:$0xff]  ;;  %v127_v49 = vld [vmem:[#allocation3 + $0x10] sm:$0xff]  ;;  %v138_v50 = vld [vmem:[#allocation6 + $0x28] sm:$0xff] }
  0x5e   :  { %214 = vmatprep.subr.mxu0 %v155_v20  ;;  %8746 = vmatprep.subr.mxu1 %v165_v31  ;;  %v135_v51 = vld [vmem:[#allocation6 + $0x10] sm:$0xff]  ;;  %v128_v52 = vld [vmem:[#allocation3 + $0x18] sm:$0xff]  ;;  %v129_v53 = vld [vmem:[#allocation3 + $0x20] sm:$0xff] }
  0x5f   :  { %215 = vmatpush1.msra.mxu0 %v154_v21  ;;  %8747 = vmatpush3.msra.mxu1 %v165_v31  ;;  %v130_v54 = vld [vmem:[#allocation3 + $0x28] sm:$0xff]  ;;  %v131_v55 = vld [vmem:[#allocation3 + $0x30] sm:$0xff]  ;;  %v132_v56 = vld [vmem:[#allocation3 + $0x38] sm:$0xff] }
  0x60   :  { %216 = vmatprep.subr.mxu0 %v152_v23  ;;  %8748 = vmatprep.subr.mxu1 %v162_v34  ;;  %v181_v60 = vld [vmem:[%s11747_s2] sm:$0x7]  ;;  %s9784_s2 = smov 96  }
  0x61   :  { %217 = vmatpush1.msra.mxu0 %v151_v24  ;;  %8749 = vmatpush3.msra.mxu1 %v162_v34  ;;  %v9908_v61 = vrot.slane %v181_v60, %v11761_v59  ;;  %v190_v2 = vrot.slane %v181_v60, %v11759_v62 }
  0x62   :  { %218 = vmatprep.subr.mxu0 %v149_v26  ;;  %8750 = vmatprep.subr.mxu1 %v159_v37 }
  0x63   :  { %219 = vmatpush1.msra.mxu0 %v148_v27  ;;  %8751 = vmatpush3.msra.mxu1 %v159_v37  ;;  %v9966_v27 = vrot.slane %v181_v60, %v11760_v22 }
  0x64   :  { %220 = vmatprep.subr.mxu0 %v146_v29  ;;  %8752 = vmatprep.subr.mxu1 %v156_v40 }
  0x65   :  { %221 = vmatpush1.msra.mxu0 %v145_v30  ;;  %8753 = vmatpush3.msra.mxu1 %v156_v40 }
  0x66   :  { %222 = vmatprep.subr.mxu0 %v143_v32  ;;  %8754 = vmatprep.subr.mxu1 %v153_v43 }
  0x67   :  { %223 = vmatpush1.msra.mxu0 %v142_v33  ;;  %8755 = vmatpush3.msra.mxu1 %v153_v43 }
  0x68   :  { %224 = vmatprep.subr.mxu0 %v140_v35  ;;  %8756 = vmatprep.subr.mxu1 %v150_v44 }
  0x69   :  { %225 = vmatpush1.msra.mxu0 %v139_v36  ;;  %8757 = vmatpush3.msra.mxu1 %v150_v44 }
  0x6a   :  { %226 = vmatprep.subr.mxu0 %v137_v38  ;;  %8758 = vmatprep.subr.mxu1 %v147_v45 }
  0x6b   :  { %227 = vmatpush1.msra.mxu0 %v136_v39  ;;  %8759 = vmatpush3.msra.mxu1 %v147_v45 }
  0x6c   :  { %228 = vmatprep.subr.mxu0 %v134_v41  ;;  %8760 = vmatprep.subr.mxu1 %v144_v47 }
  0x6d   :  { %229 = vmatpush1.msra.mxu0 %v133_v42  ;;  %8761 = vmatpush3.msra.mxu1 %v144_v47 }
  0x6e   :  { %263 = vmatmul.mubr.f32.vlgmr.msra.gmra.mxu0 %v9889_v14  ;;  %8762 = vmatprep.subr.mxu1 %v141_v48 }
  0x6f   :  { %268 = vmatprep.mubr.f32.mxu0 %v11762_v0  ;;  %8763 = vmatpush3.msra.mxu1 %v141_v48 }
  0x70   :  { %8764 = vmatprep.subr.mxu1 %v138_v50 }
  0x71   :  { %8765 = vmatpush3.msra.mxu1 %v138_v50 }
  0x72   :  { %269 = vmatmul.mubr.f32.gmra.mxu0 %v126_v46  ;;  %8766 = vmatprep.subr.mxu1 %v135_v51 }
  0x73   :  { %274 = vmatprep.mubr.f32.mxu0 %v11762_v0  ;;  %8767 = vmatpush3.msra.mxu1 %v135_v51 }
  0x74   :  { %8769 = vmatmul.mubr.f32.vlgmr.msra.gmra.mxu1 %v126_v46 }
  0x75   :  { %8771 = vmatprep.mubr.f32.mxu1 %v127_v49 }
  0x76   :  { %275 = vmatmul.mubr.f32.gmra.mxu0 %v127_v49 }
  0x77   :  { %280 = vmatprep.mubr.f32.mxu0 %v11762_v0 }
  0x78   :  { %8772 = vmatmul.mubr.f32.gmra.mxu1 %v128_v52 }
  0x79   :  { %8774 = vmatprep.mubr.f32.mxu1 %v129_v53 }
  0x7a   :  { %281 = vmatmul.mubr.f32.gmra.mxu0 %v128_v52 }
  0x7b   :  { %286 = vmatprep.mubr.f32.mxu0 %v11762_v0 }
  0x7c   :  { %8775 = vmatmul.mubr.f32.gmra.mxu1 %v130_v54 }
  0x7d   :  { %8777 = vmatprep.mubr.f32.mxu1 %v131_v55 }
  0x7e   :  { %287 = vmatmul.mubr.f32.gmra.mxu0 %v129_v53 }
  0x7f   :  { %292 = vmatprep.mubr.f32.mxu0 %v11762_v0 }
  0x80   :  { %8778 = vmatmul.mubr.f32.gmra.mxu1 %v132_v56 }
  0x82   :  { %293 = vmatmul.mubr.f32.gmra.mxu0 %v130_v54 }
  0x83   :  { %298 = vmatprep.mubr.f32.mxu0 %v11762_v0 }
  0x86   :  { %299 = vmatmul.mubr.f32.gmra.mxu0 %v131_v55 }
  0x87   :  { %304 = vmatprep.mubr.f32.mxu0 %v11762_v0 }
  0x8a   :  { %305 = vmatmul.mubr.f32.gmra.mxu0 %v132_v56 }
 0x12e   :  { %v264_v63 = vpop.f32.mrf.mxu0 }
 0x12f   :  { %v9912_v1 = vadd.f32 %v264_v63, %v9908_v61 }
 0x130   :  { %v266_v3 = vpop.f32.mrf.mxu0 }
 0x131   :  { %1185 = vrot.lane.b32.xlu1 %v9912_v1, %s9783_s25  ;;  %8784 = vmatprep.mubr.msk.f32.mxu1 %vm416_vm0, %v9912_v1  ;;  %v9920_v5 = vadd.f32 %v266_v3, %v190_v2 }
 0x132   :  { %v270_v4 = vpop.f32.mrf.mxu0 }
 0x133   :  { %v9939_v15 = vadd.f32 %v270_v4, %v9908_v61 }
 0x134   :  { %v272_v6 = vpop.f32.mrf.mxu0  ;;  %v8770_v11 = vpop.f32.mrf.mxu1 }
 0x135   :  { %v9922_v7 = vadd.f32 %v272_v6, %v190_v2  ;;  %1189 = vrot.lane.b32.xlu1 %v9920_v5, %s9783_s25  ;;  %v9994_v36 = vadd.f32 %v8770_v11, %v9966_v27 }
 0x136   :  { %v276_v8 = vpop.f32.mrf.mxu0  ;;  %v377_v14 = vpop.f32.mrf.mxu1 }
 0x137   :  { %1191 = vrot.lane.b32.xlu0 %v9922_v7, %s9783_s25  ;;  %8780 = vmatprep.subr.msk.mxu1 %vm416_vm0, %v9922_v7  ;;  %v9942_v17 = vadd.f32 %v276_v8, %v9908_v61  ;;  %v10006_v42 = vadd.f32 %v377_v14, %v9966_v27 }
 0x138   :  { %v278_v9 = vpop.f32.mrf.mxu0  ;;  %8781 = vmatpush3.xpose.msk.msra.mxu1 %vm416_vm0, %v9922_v7  ;;  %v8773_v19 = vpop.f32.mrf.mxu1 }
 0x139   :  { %8782 = vmatprep.subr.msk.mxu1 %vm416_vm0, %v9920_v5  ;;  %v9951_v20 = vadd.f32 %v278_v9, %v190_v2  ;;  %v10022_v44 = vadd.f32 %v8773_v19, %v9966_v27 }
 0x13a   :  { %v282_v10 = vpop.f32.mrf.mxu0  ;;  %v387_v23 = vpop.f32.mrf.mxu1 }
 0x13b   :  { %v9973_v30 = vadd.f32 %v282_v10, %v9908_v61  ;;  %v10033_v46 = vadd.f32 %v387_v23, %v9966_v27 }
 0x13c   :  { %v284_v12 = vpop.f32.mrf.mxu0  ;;  %8783 = vmatpush3.xpose.msk.msra.mxu1 %vm416_vm0, %v9920_v5  ;;  %v8776_v25 = vpop.f32.mrf.mxu1 }
 0x13d   :  { %v9936_v13 = vadd.f32 %v284_v12, %v190_v2  ;;  %v10014_v43 = vadd.f32 %v8776_v25, %v9966_v27 }
 0x13e   :  { %v288_v16 = vpop.f32.mrf.mxu0  ;;  %v397_v29 = vpop.f32.mrf.mxu1 }
 0x13f   :  { %v9945_v18 = vadd.f32 %v288_v16, %v9908_v61  ;;  %8787 = vmatprep.subr.msk.mxu1 %vm416_vm0, %v9936_v13  ;;  %1282 = vrot.lane.b32.xlu1 %v9936_v13, %s9783_s25  ;;  %v9976_v32 = vadd.f32 %v397_v29, %v9966_v27 }
 0x140   :  { %8785 = vmatmul.mubr.msk.f32.vlgmr.msra.gmra.mxu1 %vm416_vm0, %v9939_v15  ;;  %v290_v21 = vpop.f32.mrf.mxu0  ;;  %v8779_v47 = vpop.f32.mrf.mxu1 }
 0x141   :  { %8788 = vmatpush3.xpose.msk.msra.mxu1 %vm416_vm0, %v9936_v13  ;;  %8791 = vmatprep.mubr.msk.f32.mxu1 %vm416_vm0, %v9942_v17  ;;  %v9978_v33 = vadd.f32 %v290_v21, %v190_v2  ;;  %v10039_v48 = vadd.f32 %v8779_v47, %v9966_v27 }
 0x142   :  { %8789 = vmatprep.subr.msk.mxu1 %vm416_vm0, %v9951_v20  ;;  %8798 = vmatprep.mubr.msk.f32.mxu0 %vm416_vm0, %v9945_v18  ;;  %v294_v24 = vpop.f32.mrf.mxu0  ;;  %v10045_v49 = vpop.f32.mrf.mxu1 }
 0x143   :  { %v9999_v39 = vadd.f32 %v294_v24, %v9908_v61 }
 0x144   :  { %v296_v26 = vpop.f32.mrf.mxu0 }
 0x145   :  { %v9968_v28 = vadd.f32 %v296_v26, %v190_v2  ;;  %8790 = vmatpush3.xpose.msk.msra.mxu1 %vm416_vm0, %v9951_v20 }
 0x146   :  { %v300_v31 = vpop.f32.mrf.mxu0 }
 0x147   :  { %v9981_v34 = vadd.f32 %v300_v31, %v9908_v61  ;;  %8794 = vmatprep.subr.msk.mxu0 %vm416_vm0, %v9968_v28 }
 0x148   :  { %8792 = vmatmul.mubr.msk.f32.vlgmr.msra.gmra.mxu1 %vm416_vm0, %v9973_v30  ;;  %v302_v35 = vpop.f32.mrf.mxu0  ;;  %8795 = vmatpush3.xpose.msk.msra.mxu0 %vm416_vm0, %v9968_v28 }
 0x149   :  { %8796 = vmatprep.subr.msk.mxu0 %vm416_vm0, %v9978_v33  ;;  %8805 = vmatprep.mubr.msk.f32.mxu1 %vm416_vm0, %v9981_v34  ;;  %v10001_v40 = vadd.f32 %v302_v35, %v190_v2 }
 0x14a   :  { %v306_v37 = vpop.f32.mrf.mxu0 }
 0x14b   :  { %v10027_v45 = vadd.f32 %v306_v37, %v9908_v61 }
 0x14c   :  { %v308_v38 = vpop.f32.mrf.mxu0  ;;  %8797 = vmatpush3.xpose.msk.msra.mxu0 %vm416_vm0, %v9978_v33 }
 0x14d   :  { %v10003_v41 = vadd.f32 %v308_v38, %v190_v2  ;;  %8808 = vmatprep.subr.mxu0 %v9994_v36 }
 0x14f   :  { %8799 = vmatmul.mubr.msk.f32.vlgmr.msra.gmra.mxu0 %vm416_vm0, %v9999_v39  ;;  %8801 = vmatprep.subr.msk.mxu1 %vm416_vm0, %v10003_v41 }
 0x150   :  { %8802 = vmatpush3.xpose.msk.msra.mxu1 %vm416_vm0, %v10003_v41  ;;  %8809 = vmatpush3.msra.mxu0 %v9994_v36 }
 0x151   :  { %8803 = vmatprep.subr.msk.mxu1 %vm416_vm0, %v10001_v40  ;;  %8810 = vmatprep.subr.mxu0 %v10006_v42 }
 0x152   :  { %8811 = vmatpush3.msra.mxu0 %v10006_v42 }
 0x153   :  { %8822 = vmatprep.subr.mxu0 %v10014_v43 }
 0x154   :  { %8804 = vmatpush3.xpose.msk.msra.mxu1 %vm416_vm0, %v10001_v40 }
 0x155   :  { %8815 = vmatprep.subr.mxu1 %v10022_v44 }
 0x157   :  { %8806 = vmatmul.mubr.msk.f32.vlgmr.msra.gmra.mxu1 %vm416_vm0, %v10027_v45 }
 0x158   :  { %8816 = vmatpush3.msra.mxu1 %v10022_v44 }
 0x159   :  { %8817 = vmatprep.subr.mxu1 %v10033_v46 }
 0x15a   :  { %8818 = vmatpush3.msra.mxu1 %v10033_v46 }
 0x15b   :  { %8829 = vmatprep.subr.mxu1 %v10039_v48 }
 0x1a3   :  { %v10059_v9 = vpop.permute.xlu1 %1185 }
 0x1a7   :  { %v10063_v11 = vpop.permute.xlu1 %1189 }
 0x1a9   :  { %v10061_v10 = vpop.permute.xlu0 %1191 }
 0x1b1   :  { %v10065_v19 = vpop.permute.xlu1 %1282 }
 0x200   :  { %v8786_v50 = vpop.f32.mrf.mxu1 }
 0x201   :  { %v768_v51 = vsel %vm416_vm0, %v8786_v50, -inf }
 0x202   :  { %769 = vmax.xlane.f32.xlu0 %v768_v51  ;;  %v495_v52 = vpop.f32.mrf.mxu1 }
 0x203   :  { %v765_v53 = vsel %vm416_vm0, %v495_v52, -inf }
 0x206   :  { %766 = vmax.xlane.f32.xlu0 %v765_v53 }
 0x208   :  { %v8793_v54 = vpop.f32.mrf.mxu1 }
 0x209   :  { %v774_v55 = vsel %vm416_vm0, %v8793_v54, -inf }
 0x20a   :  { %775 = vmax.xlane.f32.xlu1 %v774_v55  ;;  %v582_v56 = vpop.f32.mrf.mxu1 }
 0x20b   :  { %v771_v57 = vsel %vm416_vm0, %v582_v56, -inf }
 0x20c   :  { %772 = vmax.xlane.f32.xlu0 %v771_v57 }
 0x20f   :  { %v8800_v60 = vpop.f32.mrf.mxu0 }
 0x210   :  { %v780_v61 = vsel %vm416_vm0, %v8800_v60, -inf }
 0x211   :  { %v669_v63 = vpop.f32.mrf.mxu0  ;;  %781 = vmax.xlane.f32.xlu1 %v780_v61 }
 0x212   :  { %v777_v2 = vsel %vm416_vm0, %v669_v63, -inf }
 0x215   :  { %778 = vmax.xlane.f32.xlu1 %v777_v2 }
 0x217   :  { %v8807_v3 = vpop.f32.mrf.mxu1 }
 0x218   :  { %v786_v4 = vsel %vm416_vm0, %v8807_v3, -inf }
 0x219   :  { %787 = vmax.xlane.f32.xlu1 %v786_v4  ;;  %v756_v6 = vpop.f32.mrf.mxu1 }
 0x21a   :  { %v783_v8 = vsel %vm416_vm0, %v756_v6, -inf }
 0x21b   :  { %784 = vmax.xlane.f32.xlu0 %v783_v8 }
 0x22a   :  { %1187 = vrot.lane.b32.xlu1 %v9939_v15, %s9783_s25 }
 0x231   :  { %1373 = vrot.lane.b32.xlu0 %v9968_v28, %s9783_s25 }
 0x28b   :  { %v770_v12 = vpop.xlane.xlu0 %769 }
 0x28c   :  { %v790_v14 = vsub.f32 %v8786_v50, %v770_v12 }
 0x28e   :  { %v799_v16 = vmul.f32 1.442695, %v790_v14 }
 0x28f   :  { %v767_v21 = vpop.xlane.xlu0 %766 }
 0x290   :  { %9324 = vpow2.f32 %v799_v16  ;;  %v789_v23 = vsub.f32 %v495_v52, %v767_v21 }
 0x292   :  { %v797_v24 = vmul.f32 1.442695, %v789_v23 }
 0x293   :  { %v776_v25 = vpop.xlane.xlu1 %775 }
 0x294   :  { %9326 = vpow2.f32 %v797_v24  ;;  %v792_v26 = vsub.f32 %v8793_v54, %v776_v25 }
 0x295   :  { %v773_v29 = vpop.xlane.xlu0 %772 }
 0x296   :  { %v803_v31 = vmul.f32 1.442695, %v792_v26  ;;  %v791_v35 = vsub.f32 %v582_v56, %v773_v29 }
 0x298   :  { %9328 = vpow2.f32 %v803_v31  ;;  %v801_v37 = vmul.f32 1.442695, %v791_v35 }
 0x29a   :  { %9330 = vpow2.f32 %v801_v37  ;;  %v782_v38 = vpop.xlane.xlu1 %781 }
 0x29b   :  { %v794_v47 = vsub.f32 %v8800_v60, %v782_v38 }
 0x29d   :  { %v10067_v51 = vpop.eup %9324  ;;  %v807_v50 = vmul.f32 1.442695, %v794_v47 }
 0x29e   :  { %v779_v53 = vpop.xlane.xlu1 %778  ;;  %v816_v55 = vsel %vm416_vm0, %v10067_v51, 0.0 }
 0x29f   :  { %9332 = vpow2.f32 %v807_v50  ;;  %v793_v52 = vsub.f32 %v669_v63, %v779_v53  ;;  %817 = vadd.xlane.f32.xlu1 %v816_v55 }
 0x2a1   :  { %v9327_v57 = vpop.eup %9326  ;;  %v805_v54 = vmul.f32 1.442695, %v793_v52 }
 0x2a2   :  { %v813_v61 = vsel %vm416_vm0, %v9327_v57, 0.0  ;;  %v788_v16 = vpop.xlane.xlu1 %787 }
 0x2a3   :  { %9334 = vpow2.f32 %v805_v54  ;;  %814 = vadd.xlane.f32.xlu0 %v813_v61  ;;  %v796_v21 = vsub.f32 %v8807_v3, %v788_v16 }
 0x2a4   :  { %v785_v23 = vpop.xlane.xlu0 %784 }
 0x2a5   :  { %v10072_v56 = vpop.eup %9328  ;;  %v811_v24 = vmul.f32 1.442695, %v796_v21  ;;  %v795_v25 = vsub.f32 %v756_v6, %v785_v23 }
 0x2a6   :  { %v822_v60 = vsel %vm416_vm0, %v10072_v56, 0.0  ;;  %v1188_v3 = vpop.permute.xlu1 %1187 }
 0x2a7   :  { %v9331_v2 = vpop.eup %9330  ;;  %823 = vadd.xlane.f32.xlu1 %v822_v60  ;;  %9336 = vpow2.f32 %v811_v24  ;;  %v809_v26 = vmul.f32 1.442695, %v795_v25 }
 0x2a8   :  { %v819_v4 = vsel %vm416_vm0, %v9331_v2, 0.0  ;;  %v1374_v6 = vpop.permute.xlu0 %1373 }
 0x2a9   :  { %820 = vadd.xlane.f32.xlu0 %v819_v4  ;;  %9338 = vpow2.f32 %v809_v26 }
 0x2ac   :  { %v10077_v8 = vpop.eup %9332 }
 0x2ad   :  { %v828_v63 = vsel %vm416_vm0, %v10077_v8, 0.0 }
 0x2ae   :  { %829 = vadd.xlane.f32.xlu1 %v828_v63 }
 0x2b0   :  { %v10081_v12 = vpop.eup %9334 }
 0x2b1   :  { %v825_v14 = vsel %vm416_vm0, %v10081_v12, 0.0 }
 0x2b2   :  { %826 = vadd.xlane.f32.xlu0 %v825_v14 }
 0x2b4   :  { %v10089_v29 = vpop.eup %9336 }
 0x2b5   :  { %v834_v31 = vsel %vm416_vm0, %v10089_v29, 0.0 }
 0x2b6   :  { %v10093_v35 = vpop.eup %9338 }
 0x2b7   :  { %v831_v37 = vsel %vm416_vm0, %v10093_v35, 0.0 }
 0x2bf   :  { %1371 = vrot.lane.b32.xlu1 %v9978_v33, %s9783_s25 }
 0x2c8   :  { %1280 = vrot.lane.b32.xlu0 %v9951_v20, %s9783_s25 }
 0x2e3   :  { %835 = vadd.xlane.f32.xlu1 %v834_v31 }
 0x2e7   :  { %832 = vadd.xlane.f32.xlu0 %v831_v37 }
 0x2f4   :  { %1276 = vrot.lane.b32.xlu1 %v9942_v17, %s9783_s25 }
 0x2f8   :  { %1464 = vrot.lane.b32.xlu1 %v10003_v41, %s9783_s25 }
 0x2fc   :  { %1462 = vrot.lane.b32.xlu1 %v10001_v40, %s9783_s25 }
 0x2fd   :  { %1367 = vrot.lane.b32.xlu0 %v9945_v18, %s9783_s25 }
 0x300   :  { %1460 = vrot.lane.b32.xlu1 %v10027_v45, %s9783_s25 }
 0x301   :  { %1369 = vrot.lane.b32.xlu0 %v9999_v39, %s9783_s25 }
 0x305   :  { %1278 = vrot.lane.b32.xlu0 %v9973_v30, %s9783_s25 }
 0x309   :  { %1458 = vrot.lane.b32.xlu0 %v9981_v34, %s9783_s25 }
 0x328   :  { %v818_v38 = vpop.xlane.xlu1 %817 }
 0x329   :  { %9340 = vrcp.f32 %v818_v38 }
 0x32c   :  { %v815_v47 = vpop.xlane.xlu0 %814 }
 0x32d   :  { %9342 = vrcp.f32 %v815_v47 }
 0x330   :  { %v824_v50 = vpop.xlane.xlu1 %823 }
 0x331   :  { %9344 = vrcp.f32 %v824_v50 }
 0x332   :  { %v821_v53 = vpop.xlane.xlu0 %820 }
 0x333   :  { %9346 = vrcp.f32 %v821_v53 }
 0x336   :  { %v9341_v52 = vpop.eup %9340 }
 0x337   :  { %v830_v55 = vpop.xlane.xlu1 %829  ;;  %v846_v4 = vmul.f32 %v9341_v52, %v10067_v51  ;;  %v10125_v51 = vadd.f32 %v10045_v49, %v9966_v27 }
 0x338   :  { %9348 = vrcp.f32 %v830_v55 }
 0x33a   :  { %v9343_v54 = vpop.eup %9342 }
 0x33b   :  { %v827_v61 = vpop.xlane.xlu0 %826  ;;  %v845_v60 = vmul.f32 %v9343_v54, %v9327_v57  ;;  %v1372_v27 = vpop.permute.xlu1 %1371 }
 0x33c   :  { %9350 = vrcp.f32 %v827_v61 }
 0x33d   :  { %8812 = vmatprep.mubr.msk.f32.mxu0 %vm416_vm0, %v845_v60 }
 0x33e   :  { %8813 = vmatmul.mubr.msk.f32.vlgmr.msra.gmra.mxu0 %vm416_vm0, %v846_v4  ;;  %v9345_v63 = vpop.eup %9344 }
 0x33f   :  { %8823 = vmatpush3.msra.mxu0 %v10014_v43  ;;  %v848_v57 = vmul.f32 %v9345_v63, %v10072_v56  ;;  %v1281_v49 = vpop.permute.xlu0 %1280 }
 0x340   :  { %v9347_v14 = vpop.eup %9346  ;;  %8824 = vmatprep.subr.mxu0 %v9976_v32 }
 0x341   :  { %8825 = vmatpush3.msra.mxu0 %v9976_v32  ;;  %v847_v16 = vmul.f32 %v9347_v14, %v9331_v2 }
 0x342   :  { %8836 = vmatprep.subr.msk.mxu0 %vm416_vm0, %v10061_v10 }
 0x343   :  { %8819 = vmatprep.mubr.msk.f32.mxu1 %vm416_vm0, %v847_v16 }
 0x344   :  { %8820 = vmatmul.mubr.msk.f32.vlgmr.msra.gmra.mxu1 %vm416_vm0, %v848_v57 }
 0x345   :  { %8830 = vmatpush3.msra.mxu1 %v10039_v48  ;;  %v9349_v2 = vpop.eup %9348 }
 0x346   :  { %8831 = vmatprep.subr.mxu1 %v10125_v51  ;;  %v850_v23 = vmul.f32 %v9349_v2, %v10077_v8 }
 0x347   :  { %8832 = vmatpush3.msra.mxu1 %v10125_v51 }
 0x348   :  { %8843 = vmatprep.subr.msk.mxu1 %vm416_vm0, %v10065_v19 }
 0x349   :  { %v9351_v21 = vpop.eup %9350 }
 0x34a   :  { %v849_v56 = vmul.f32 %v9351_v21, %v10081_v12 }
 0x34c   :  { %8826 = vmatprep.mubr.msk.f32.mxu0 %vm416_vm0, %v849_v56 }
 0x34d   :  { %8827 = vmatmul.mubr.msk.f32.vlgmr.msra.gmra.mxu0 %vm416_vm0, %v850_v23 }
 0x34e   :  { %8837 = vmatpush3.xpose.msk.msra.mxu0 %vm416_vm0, %v10061_v10  ;;  %8840 = vmatprep.mubr.msk.f32.mxu0 %vm416_vm0, %v10059_v9 }
 0x34f   :  { %8838 = vmatprep.subr.msk.mxu0 %vm416_vm0, %v10063_v11 }
 0x352   :  { %8839 = vmatpush3.xpose.msk.msra.mxu0 %vm416_vm0, %v10063_v11 }
 0x353   :  { %8850 = vmatprep.subr.msk.mxu0 %vm416_vm0, %v1374_v6 }
 0x355   :  { %8841 = vmatmul.mubr.msk.f32.vlgmr.msra.gmra.mxu0 %vm416_vm0, %v1188_v3 }
 0x356   :  { %8851 = vmatpush3.xpose.msk.msra.mxu0 %vm416_vm0, %v1374_v6 }
 0x357   :  { %8852 = vmatprep.subr.msk.mxu0 %vm416_vm0, %v1372_v27 }
 0x35a   :  { %8853 = vmatpush3.xpose.msk.msra.mxu0 %vm416_vm0, %v1372_v27 }
 0x36c   :  { %v836_v10 = vpop.xlane.xlu1 %835 }
 0x36d   :  { %9352 = vrcp.f32 %v836_v10 }
 0x370   :  { %v833_v9 = vpop.xlane.xlu0 %832  ;;  %v1277_v25 = vpop.permute.xlu1 %1276 }
 0x371   :  { %9354 = vrcp.f32 %v833_v9 }
 0x374   :  { %v1368_v8 = vpop.permute.xlu0 %1367  ;;  %v1465_v3 = vpop.permute.xlu1 %1464 }
 0x375   :  { %8854 = vmatprep.mubr.msk.f32.mxu0 %vm416_vm0, %v1368_v8 }
 0x378   :  { %v1370_v11 = vpop.permute.xlu0 %1369 }
 0x379   :  { %8855 = vmatmul.mubr.msk.f32.vlgmr.msra.gmra.mxu0 %vm416_vm0, %v1370_v11 }
 0x37a   :  { %v9353_v12 = vpop.eup %9352 }
 0x37b   :  { %v852_v31 = vmul.f32 %v9353_v12, %v10089_v29  ;;  %v1463_v29 = vpop.permute.xlu1 %1462 }
 0x37c   :  { %v1279_v37 = vpop.permute.xlu0 %1278 }
 0x37e   :  { %v9355_v24 = vpop.eup %9354 }
 0x37f   :  { %v851_v26 = vmul.f32 %v9355_v24, %v10093_v35 }
 0x380   :  { %v1459_v35 = vpop.permute.xlu0 %1458 }
 0x381   :  { %8833 = vmatprep.mubr.msk.f32.mxu1 %vm416_vm0, %v851_v26 }
 0x382   :  { %8834 = vmatmul.mubr.msk.f32.vlgmr.msra.gmra.mxu1 %vm416_vm0, %v852_v31 }
 0x383   :  { %8844 = vmatpush3.xpose.msk.msra.mxu1 %vm416_vm0, %v10065_v19  ;;  %8847 = vmatprep.mubr.msk.f32.mxu1 %vm416_vm0, %v1277_v25  ;;  %v1461_v19 = vpop.permute.xlu1 %1460 }
 0x384   :  { %8845 = vmatprep.subr.msk.mxu1 %vm416_vm0, %v1281_v49 }
 0x387   :  { %8846 = vmatpush3.xpose.msk.msra.mxu1 %vm416_vm0, %v1281_v49 }
 0x388   :  { %8857 = vmatprep.subr.msk.mxu1 %vm416_vm0, %v1465_v3 }
 0x38a   :  { %8848 = vmatmul.mubr.msk.f32.vlgmr.msra.gmra.mxu1 %vm416_vm0, %v1279_v37 }
 0x38b   :  { %8858 = vmatpush3.xpose.msk.msra.mxu1 %vm416_vm0, %v1465_v3  ;;  %8861 = vmatprep.mubr.msk.f32.mxu1 %vm416_vm0, %v1459_v35 }
 0x38c   :  { %8859 = vmatprep.subr.msk.mxu1 %vm416_vm0, %v1463_v29 }
 0x38f   :  { %8860 = vmatpush3.xpose.msk.msra.mxu1 %vm416_vm0, %v1463_v29 }
 0x392   :  { %8862 = vmatmul.mubr.msk.f32.vlgmr.msra.gmra.mxu1 %vm416_vm0, %v1461_v19 }
 0x3fe   :  { %v8814_v6 = vpop.f32.mrf.mxu0 }
 0x3ff   :  { %1178 = vst.msk [vmem:[#allocation2 + $0x8] sm:$0xff] %vm416_vm0, %v8814_v6 }
 0x400   :  { %v925_v38 = vpop.f32.mrf.mxu0 }
 0x401   :  { %1177 = vst.msk [vmem:[#allocation2] sm:$0xff] %vm416_vm0, %v925_v38 }
 0x404   :  { %v8821_v47 = vpop.f32.mrf.mxu1 }
 0x405   :  { %1180 = vst.msk [vmem:[#allocation2 + $0x18] sm:$0xff] %vm416_vm0, %v8821_v47 }
 0x406   :  { %v1006_v50 = vpop.f32.mrf.mxu1 }
 0x407   :  { %1179 = vst.msk [vmem:[#allocation2 + $0x10] sm:$0xff] %vm416_vm0, %v1006_v50 }
 0x40d   :  { %v8828_v53 = vpop.f32.mrf.mxu0 }
 0x40e   :  { %1182 = vst.msk [vmem:[#allocation2 + $0x28] sm:$0xff] %vm416_vm0, %v8828_v53 }
 0x40f   :  { %v1087_v55 = vpop.f32.mrf.mxu0 }
 0x410   :  { %1181 = vst.msk [vmem:[#allocation2 + $0x20] sm:$0xff] %vm416_vm0, %v1087_v55 }
 0x415   :  { %v8842_v52 = vpop.f32.mrf.mxu0 }
 0x416   :  { %v1552_v54 = vsel %vm416_vm0, %v8842_v52, -inf }
 0x417   :  { %1553 = vmax.xlane.f32.xlu1 %v1552_v54  ;;  %v1267_v61 = vpop.f32.mrf.mxu0 }
 0x418   :  { %v1549_v60 = vsel %vm416_vm0, %v1267_v61, -inf }
 0x419   :  { %1550 = vmax.xlane.f32.xlu0 %v1549_v60 }
 0x439   :  { %v8856_v4 = vpop.f32.mrf.mxu0 }
 0x43a   :  { %v1564_v63 = vsel %vm416_vm0, %v8856_v4, -inf }
 0x43b   :  { %1565 = vmax.xlane.f32.xlu0 %v1564_v63  ;;  %v1449_v14 = vpop.f32.mrf.mxu0 }
 0x43c   :  { %v1561_v16 = vsel %vm416_vm0, %v1449_v14, -inf }
 0x43f   :  { %1562 = vmax.xlane.f32.xlu0 %v1561_v16 }
 0x442   :  { %v8835_v57 = vpop.f32.mrf.mxu1 }
 0x443   :  { %1184 = vst.msk [vmem:[#allocation2 + $0x38] sm:$0xff] %vm416_vm0, %v8835_v57 }
 0x444   :  { %v1168_v2 = vpop.f32.mrf.mxu1 }
 0x445   :  { %1183 = vst.msk [vmem:[#allocation2 + $0x30] sm:$0xff] %vm416_vm0, %v1168_v2 }
 0x44a   :  { %v8849_v21 = vpop.f32.mrf.mxu1 }
 0x44b   :  { %v1558_v56 = vsel %vm416_vm0, %v8849_v21, -inf }
 0x44c   :  { %1559 = vmax.xlane.f32.xlu1 %v1558_v56  ;;  %v1358_v23 = vpop.f32.mrf.mxu1 }
 0x44d   :  { %v1555_v27 = vsel %vm416_vm0, %v1358_v23, -inf }
 0x44e   :  { %1556 = vmax.xlane.f32.xlu0 %v1555_v27 }
 0x452   :  { %v8863_v49 = vpop.f32.mrf.mxu1 }
 0x453   :  { %v1570_v10 = vsel %vm416_vm0, %v8863_v49, -inf }
 0x454   :  { %1571 = vmax.xlane.f32.xlu1 %v1570_v10  ;;  %v10183_v9 = vpop.f32.mrf.mxu1 }
 0x455   :  { %v1567_v8 = vsel %vm416_vm0, %v10183_v9, -inf }
 0x456   :  { %1568 = vmax.xlane.f32.xlu0 %v1567_v8 }
 0x465   :  { %1639 = vrot.lane.b32.xlu1 %v10006_v42, %s9783_s25 }
 0x469   :  { %1819 = vrot.lane.b32.xlu1 %v10014_v43, %s9783_s25 }
 0x46c   :  { %1641 = vrot.lane.b32.xlu0 %v9994_v36, %s9783_s25 }
 0x46d   :  { %1817 = vrot.lane.b32.xlu1 %v9976_v32, %s9783_s25 }
 0x470   :  { %1730 = vrot.lane.b32.xlu0 %v10022_v44, %s9783_s25 }
 0x471   :  { %2040 = vrot.lane.b32.xlu1 %v9922_v7, %s9784_s2 }
 0x474   :  { %1728 = vrot.lane.b32.xlu0 %v10033_v46, %s9783_s25 }
 0x475   :  { %1908 = vrot.lane.b32.xlu1 %v10039_v48, %s9783_s25 }
 0x478   :  { %2038 = vrot.lane.b32.xlu0 %v9920_v5, %s9784_s2 }
 0x479   :  { %1906 = vrot.lane.b32.xlu1 %v10125_v51, %s9783_s25 }
 0x47c   :  { %2034 = vrot.lane.b32.xlu0 %v9912_v1, %s9784_s2 }
 0x47d   :  { %2131 = vrot.lane.b32.xlu1 %v9936_v13, %s9784_s2 }
 0x480   :  { %2222 = vrot.lane.b32.xlu0 %v9968_v28, %s9784_s2 }
 0x481   :  { %2036 = vrot.lane.b32.xlu1 %v9939_v15, %s9784_s2 }
 0x484   :  { %2129 = vrot.lane.b32.xlu0 %v9951_v20, %s9784_s2 }
 0x485   :  { %2220 = vrot.lane.b32.xlu1 %v9978_v33, %s9784_s2 }
 0x4a0   :  { %v1554_v11 = vpop.xlane.xlu1 %1553 }
 0x4a1   :  { %v1574_v12 = vsub.f32 %v8842_v52, %v1554_v11 }
 0x4a2   :  { %v1551_v24 = vpop.xlane.xlu0 %1550 }
 0x4a3   :  { %v1583_v25 = vmul.f32 1.442695, %v1574_v12  ;;  %v1573_v26 = vsub.f32 %v1267_v61, %v1551_v24 }
 0x4a5   :  { %9356 = vpow2.f32 %v1583_v25  ;;  %v1581_v31 = vmul.f32 1.442695, %v1573_v26 }
 0x4a7   :  { %9358 = vpow2.f32 %v1581_v31 }
 0x4b2   :  { %v10219_v37 = vpop.eup %9356 }
 0x4b3   :  { %v1600_v3 = vsel %vm416_vm0, %v10219_v37, 0.0 }
 0x4b4   :  { %v10223_v35 = vpop.eup %9358  ;;  %1601 = vadd.xlane.f32.xlu1 %v1600_v3 }
 0x4b5   :  { %v1597_v29 = vsel %vm416_vm0, %v10223_v35, 0.0 }
 0x4b6   :  { %1598 = vadd.xlane.f32.xlu0 %v1597_v29 }
 0x4c4   :  { %v1566_v19 = vpop.xlane.xlu0 %1565 }
 0x4c5   :  { %v1578_v6 = vsub.f32 %v8856_v4, %v1566_v19 }
 0x4c7   :  { %v1591_v38 = vmul.f32 1.442695, %v1578_v6 }
 0x4c8   :  { %v1563_v47 = vpop.xlane.xlu0 %1562 }
 0x4c9   :  { %9360 = vpow2.f32 %v1591_v38  ;;  %v1577_v50 = vsub.f32 %v1449_v14, %v1563_v47 }
 0x4cb   :  { %v1589_v53 = vmul.f32 1.442695, %v1577_v50 }
 0x4cd   :  { %9362 = vpow2.f32 %v1589_v53 }
 0x4d5   :  { %v1560_v55 = vpop.xlane.xlu1 %1559 }
 0x4d6   :  { %v10227_v52 = vpop.eup %9360  ;;  %v1576_v54 = vsub.f32 %v8849_v21, %v1560_v55 }
 0x4d7   :  { %v1557_v61 = vpop.xlane.xlu0 %1556  ;;  %v1612_v60 = vsel %vm416_vm0, %v10227_v52, 0.0 }
 0x4d8   :  { %v1587_v63 = vmul.f32 1.442695, %v1576_v54  ;;  %v1575_v16 = vsub.f32 %v1358_v23, %v1557_v61  ;;  %1613 = vadd.xlane.f32.xlu1 %v1612_v60 }
 0x4da   :  { %v10231_v57 = vpop.eup %9362  ;;  %9364 = vpow2.f32 %v1587_v63  ;;  %v1585_v4 = vmul.f32 1.442695, %v1575_v16 }
 0x4db   :  { %v1609_v14 = vsel %vm416_vm0, %v10231_v57, 0.0 }
 0x4dc   :  { %9366 = vpow2.f32 %v1585_v4  ;;  %1610 = vadd.xlane.f32.xlu0 %v1609_v14 }
 0x4dd   :  { %v1572_v2 = vpop.xlane.xlu1 %1571 }
 0x4de   :  { %v1580_v56 = vsub.f32 %v8863_v49, %v1572_v2 }
 0x4df   :  { %v1569_v27 = vpop.xlane.xlu0 %1568 }
 0x4e0   :  { %v1595_v21 = vmul.f32 1.442695, %v1580_v56  ;;  %v1579_v10 = vsub.f32 %v10183_v9, %v1569_v27 }
 0x4e1   :  { %v1640_v8 = vpop.permute.xlu1 %1639 }
 0x4e2   :  { %9368 = vpow2.f32 %v1595_v21  ;;  %v1593_v11 = vmul.f32 1.442695, %v1579_v10 }
 0x4e3   :  { %v1642_v23 = vpop.permute.xlu0 %1641 }
 0x4e4   :  { %9370 = vpow2.f32 %v1593_v11  ;;  %8864 = vmatprep.subr.mxu0 %v1642_v23 }
 0x4e5   :  { %v1820_v12 = vpop.permute.xlu1 %1819  ;;  %8865 = vmatpush3.msra.mxu0 %v1642_v23 }
 0x4e6   :  { %8866 = vmatprep.subr.mxu0 %v1640_v8 }
 0x4e7   :  { %v10236_v24 = vpop.eup %9364  ;;  %8867 = vmatpush3.msra.mxu0 %v1640_v8  ;;  %v1731_v25 = vpop.permute.xlu0 %1730 }
 0x4e8   :  { %8871 = vmatprep.subr.mxu1 %v1731_v25  ;;  %8878 = vmatprep.subr.mxu0 %v1820_v12  ;;  %v1606_v49 = vsel %vm416_vm0, %v10236_v24, 0.0 }
 0x4e9   :  { %v10240_v26 = vpop.eup %9366  ;;  %v1818_v9 = vpop.permute.xlu1 %1817  ;;  %1607 = vadd.xlane.f32.xlu1 %v1606_v49  ;;  %8872 = vmatpush3.msra.mxu1 %v1731_v25 }
 0x4ea   :  { %v1603_v31 = vsel %vm416_vm0, %v10240_v26, 0.0 }
 0x4eb   :  { %1604 = vadd.xlane.f32.xlu0 %v1603_v31  ;;  %v1729_v3 = vpop.permute.xlu0 %1728 }
 0x4ec   :  { %8873 = vmatprep.subr.mxu1 %v1729_v3 }
 0x4ed   :  { %v2041_v29 = vpop.permute.xlu1 %2040  ;;  %8874 = vmatpush3.msra.mxu1 %v1729_v3 }
 0x4ef   :  { %v10244_v19 = vpop.eup %9368  ;;  %v2039_v55 = vpop.permute.xlu0 %2038 }
 0x4f0   :  { %v1618_v6 = vsel %vm416_vm0, %v10244_v19, 0.0 }
 0x4f1   :  { %v10248_v38 = vpop.eup %9370  ;;  %v10250_v47 = vpop.permute.xlu1 %1908  ;;  %1619 = vadd.xlane.f32.xlu1 %v1618_v6 }
 0x4f2   :  { %8885 = vmatprep.subr.mxu1 %v10250_v47  ;;  %v1615_v50 = vsel %vm416_vm0, %v10248_v38, 0.0 }
 0x4f3   :  { %1616 = vadd.xlane.f32.xlu0 %v1615_v50  ;;  %v2035_v61 = vpop.permute.xlu0 %2034 }
 0x4f5   :  { %v1907_v53 = vpop.permute.xlu1 %1906 }
 0x4f7   :  { %v2223_v63 = vpop.permute.xlu0 %2222 }
 0x4f9   :  { %v10271_v54 = vpop.permute.xlu1 %2131 }
 0x4fb   :  { %v10273_v4 = vpop.permute.xlu0 %2129 }
 0x4fd   :  { %v2037_v60 = vpop.permute.xlu1 %2036 }
 0x501   :  { %v2221_v16 = vpop.permute.xlu1 %2220 }
 0x502   :  { %2125 = vrot.lane.b32.xlu1 %v9942_v17, %s9784_s2 }
 0x506   :  { %2313 = vrot.lane.b32.xlu1 %v10003_v41, %s9784_s2 }
 0x509   :  { %2216 = vrot.lane.b32.xlu0 %v9945_v18, %s9784_s2 }
 0x50a   :  { %2311 = vrot.lane.b32.xlu1 %v10001_v40, %s9784_s2 }
 0x50d   :  { %2218 = vrot.lane.b32.xlu0 %v9999_v39, %s9784_s2 }
 0x50e   :  { %2309 = vrot.lane.b32.xlu1 %v10027_v45, %s9784_s2 }
 0x511   :  { %2127 = vrot.lane.b32.xlu0 %v9973_v30, %s9784_s2 }
 0x515   :  { %2307 = vrot.lane.b32.xlu0 %v9981_v34, %s9784_s2 }
 0x53d   :  { %v1602_v14 = vpop.xlane.xlu1 %1601 }
 0x53e   :  { %9372 = vrcp.f32 %v1602_v14 }
 0x53f   :  { %v1599_v2 = vpop.xlane.xlu0 %1598 }
 0x540   :  { %9374 = vrcp.f32 %v1599_v2 }
 0x54b   :  { %v9373_v56 = vpop.eup %9372 }
 0x54c   :  { %v1630_v10 = vmul.f32 %v9373_v56, %v10219_v37 }
 0x54d   :  { %v9375_v27 = vpop.eup %9374 }
 0x54e   :  { %v1629_v21 = vmul.f32 %v9375_v27, %v10223_v35 }
 0x550   :  { %8868 = vmatprep.mubr.msk.f32.mxu0 %vm416_vm0, %v1629_v21 }
 0x551   :  { %8869 = vmatmul.mubr.msk.f32.vlgmr.msra.gmra.mxu0 %vm416_vm0, %v1630_v10 }
 0x552   :  { %8879 = vmatpush3.msra.mxu0 %v1820_v12 }
 0x553   :  { %8880 = vmatprep.subr.mxu0 %v1818_v9 }
 0x554   :  { %8881 = vmatpush3.msra.mxu0 %v1818_v9 }
 0x555   :  { %8892 = vmatprep.subr.msk.mxu0 %vm416_vm0, %v2041_v29 }
 0x561   :  { %v1614_v8 = vpop.xlane.xlu1 %1613 }
 0x562   :  { %9376 = vrcp.f32 %v1614_v8 }
 0x565   :  { %v1611_v11 = vpop.xlane.xlu0 %1610 }
 0x566   :  { %9378 = vrcp.f32 %v1611_v11 }
 0x56f   :  { %v9377_v23 = vpop.eup %9376 }
 0x570   :  { %v1634_v31 = vmul.f32 %v9377_v23, %v10227_v52 }
 0x572   :  { %v1608_v25 = vpop.xlane.xlu1 %1607 }
 0x573   :  { %v9379_v49 = vpop.eup %9378  ;;  %9380 = vrcp.f32 %v1608_v25 }
 0x574   :  { %v1605_v35 = vpop.xlane.xlu0 %1604  ;;  %v1633_v37 = vmul.f32 %v9379_v49, %v10231_v57 }
 0x575   :  { %9382 = vrcp.f32 %v1605_v35 }
 0x576   :  { %8882 = vmatprep.mubr.msk.f32.mxu0 %vm416_vm0, %v1633_v37 }
 0x577   :  { %8883 = vmatmul.mubr.msk.f32.vlgmr.msra.gmra.mxu0 %vm416_vm0, %v1634_v31 }
 0x578   :  { %8893 = vmatpush3.xpose.msk.msra.mxu0 %vm416_vm0, %v2041_v29  ;;  %8896 = vmatprep.mubr.msk.f32.mxu0 %vm416_vm0, %v2035_v61 }
 0x579   :  { %8894 = vmatprep.subr.msk.mxu0 %vm416_vm0, %v2039_v55 }
 0x57a   :  { %v1620_v12 = vpop.xlane.xlu1 %1619 }
 0x57b   :  { %9384 = vrcp.f32 %v1620_v12 }
 0x57c   :  { %8895 = vmatpush3.xpose.msk.msra.mxu0 %vm416_vm0, %v2039_v55  ;;  %v1617_v9 = vpop.xlane.xlu0 %1616 }
 0x57d   :  { %9386 = vrcp.f32 %v1617_v9  ;;  %8906 = vmatprep.subr.msk.mxu0 %vm416_vm0, %v2223_v63 }
 0x57f   :  { %8897 = vmatmul.mubr.msk.f32.vlgmr.msra.gmra.mxu0 %vm416_vm0, %v2037_v60 }
 0x580   :  { %8907 = vmatpush3.xpose.msk.msra.mxu0 %vm416_vm0, %v2223_v63  ;;  %v2217_v52 = vpop.permute.xlu0 %2216  ;;  %v9381_v57 = vpop.eup %9380 }
 0x581   :  { %8908 = vmatprep.subr.msk.mxu0 %vm416_vm0, %v2221_v16  ;;  %8910 = vmatprep.mubr.msk.f32.mxu0 %vm416_vm0, %v2217_v52  ;;  %v1632_v6 = vmul.f32 %v9381_v57, %v10236_v24 }
 0x582   :  { %v9383_v3 = vpop.eup %9382 }
 0x583   :  { %v1631_v29 = vmul.f32 %v9383_v3, %v10240_v26  ;;  %v2126_v26 = vpop.permute.xlu1 %2125 }
 0x584   :  { %8909 = vmatpush3.xpose.msk.msra.mxu0 %vm416_vm0, %v2221_v16  ;;  %v2219_v50 = vpop.permute.xlu0 %2218 }
 0x585   :  { %8875 = vmatprep.mubr.msk.f32.mxu1 %vm416_vm0, %v1631_v29 }
 0x586   :  { %8876 = vmatmul.mubr.msk.f32.vlgmr.msra.gmra.mxu1 %vm416_vm0, %v1632_v6 }
 0x587   :  { %8886 = vmatpush3.msra.mxu1 %v10250_v47  ;;  %8911 = vmatmul.mubr.msk.f32.vlgmr.msra.gmra.mxu0 %vm416_vm0, %v2219_v50 }
 0x588   :  { %8887 = vmatprep.subr.mxu1 %v1907_v53  ;;  %v9385_v55 = vpop.eup %9384  ;;  %v2128_v47 = vpop.permute.xlu0 %2127 }
 0x589   :  { %8888 = vmatpush3.msra.mxu1 %v1907_v53  ;;  %v1636_v24 = vmul.f32 %v9385_v55, %v10244_v19  ;;  %v2314_v53 = vpop.permute.xlu1 %2313 }
 0x58a   :  { %v9387_v61 = vpop.eup %9386  ;;  %8899 = vmatprep.subr.msk.mxu1 %vm416_vm0, %v10271_v54 }
 0x58b   :  { %v1635_v60 = vmul.f32 %v9387_v61, %v10248_v38 }
 0x58c   :  { %v2308_v19 = vpop.permute.xlu0 %2307 }
 0x58d   :  { %8889 = vmatprep.mubr.msk.f32.mxu1 %vm416_vm0, %v1635_v60  ;;  %v2312_v38 = vpop.permute.xlu1 %2311 }
 0x58e   :  { %8890 = vmatmul.mubr.msk.f32.vlgmr.msra.gmra.mxu1 %vm416_vm0, %v1636_v24 }
 0x58f   :  { %8900 = vmatpush3.xpose.msk.msra.mxu1 %vm416_vm0, %v10271_v54  ;;  %8903 = vmatprep.mubr.msk.f32.mxu1 %vm416_vm0, %v2126_v26 }
 0x590   :  { %8901 = vmatprep.subr.msk.mxu1 %vm416_vm0, %v10273_v4 }
 0x591   :  { %v2310_v54 = vpop.permute.xlu1 %2309 }
 0x593   :  { %8902 = vmatpush3.xpose.msk.msra.mxu1 %vm416_vm0, %v10273_v4 }
 0x594   :  { %8913 = vmatprep.subr.msk.mxu1 %vm416_vm0, %v2314_v53 }
 0x596   :  { %8904 = vmatmul.mubr.msk.f32.vlgmr.msra.gmra.mxu1 %vm416_vm0, %v2128_v47 }
 0x597   :  { %8914 = vmatpush3.xpose.msk.msra.mxu1 %vm416_vm0, %v2314_v53  ;;  %8917 = vmatprep.mubr.msk.f32.mxu1 %vm416_vm0, %v2308_v19 }
 0x598   :  { %8915 = vmatprep.subr.msk.mxu1 %vm416_vm0, %v2312_v38 }
 0x59b   :  { %8916 = vmatpush3.xpose.msk.msra.mxu1 %vm416_vm0, %v2312_v38 }
 0x59e   :  { %8918 = vmatmul.mubr.msk.f32.vlgmr.msra.gmra.mxu1 %vm416_vm0, %v2310_v54 }
 0x611   :  { %v10320_v63 = vpop.f32.mrf.mxu0 }
 0x613   :  { %v10322_v16 = vpop.f32.mrf.mxu0 }
 0x637   :  { %v10324_v4 = vpop.f32.mrf.mxu0 }
 0x638   :  { %11767 = vst [vmem:[#allocation21_spill] sm:$0xff] %v10324_v4 }
 0x639   :  { %v10326_v14 = vpop.f32.mrf.mxu0 }
 0x63a   :  { %11768 = vst [vmem:[#allocation22_spill] sm:$0xff] %v10326_v14 }
 0x63f   :  { %v8898_v2 = vpop.f32.mrf.mxu0 }
 0x640   :  { %v2401_v56 = vsel %vm416_vm0, %v8898_v2, -inf }
 0x641   :  { %2402 = vmax.xlane.f32.xlu1 %v2401_v56  ;;  %v2116_v27 = vpop.f32.mrf.mxu0 }
 0x642   :  { %v2398_v21 = vsel %vm416_vm0, %v2116_v27, -inf }
 0x643   :  { %2399 = vmax.xlane.f32.xlu0 %v2398_v21 }
 0x646   :  { %v10331_v23 = vpop.f32.mrf.mxu1 }
 0x647   :  { %v8912_v10 = vpop.f32.mrf.mxu0 }
 0x648   :  { %v2413_v8 = vsel %vm416_vm0, %v8912_v10, -inf  ;;  %v10334_v49 = vpop.f32.mrf.mxu1 }
 0x649   :  { %2414 = vmax.xlane.f32.xlu0 %v2413_v8  ;;  %v2298_v11 = vpop.f32.mrf.mxu0  ;;  %11769 = vst [vmem:[#allocation23_spill] sm:$0xff] %v10334_v49 }
 0x64a   :  { %v2410_v25 = vsel %vm416_vm0, %v2298_v11, -inf }
 0x64d   :  { %2411 = vmax.xlane.f32.xlu0 %v2410_v25 }
 0x64e   :  { %v10336_v35 = vpop.f32.mrf.mxu1 }
 0x64f   :  { %11770 = vst [vmem:[#allocation24_spill] sm:$0xff] %v10336_v35 }
 0x650   :  { %v10338_v37 = vpop.f32.mrf.mxu1 }
 0x651   :  { %11771 = vst [vmem:[#allocation25_spill] sm:$0xff] %v10338_v37 }
 0x656   :  { %v8905_v31 = vpop.f32.mrf.mxu1 }
 0x657   :  { %v2407_v12 = vsel %vm416_vm0, %v8905_v31, -inf }
 0x658   :  { %2408 = vmax.xlane.f32.xlu1 %v2407_v12  ;;  %v2207_v9 = vpop.f32.mrf.mxu1 }
 0x659   :  { %v2404_v52 = vsel %vm416_vm0, %v2207_v9, -inf }
 0x65a   :  { %2405 = vmax.xlane.f32.xlu0 %v2404_v52 }
 0x65e   :  { %v8919_v57 = vpop.f32.mrf.mxu1 }
 0x65f   :  { %v2419_v3 = vsel %vm416_vm0, %v8919_v57, -inf }
 0x660   :  { %2420 = vmax.xlane.f32.xlu1 %v2419_v3  ;;  %v10343_v29 = vpop.f32.mrf.mxu1 }
 0x661   :  { %v2416_v6 = vsel %vm416_vm0, %v10343_v29, -inf }
 0x662   :  { %2417 = vmax.xlane.f32.xlu0 %v2416_v6 }
 0x671   :  { %2486 = vrot.lane.b32.xlu1 %v10006_v42, %s9784_s2 }
 0x675   :  { %2662 = vrot.lane.b32.xlu1 %v10014_v43, %s9784_s2 }
 0x678   :  { %2488 = vrot.lane.b32.xlu0 %v9994_v36, %s9784_s2 }
 0x679   :  { %2660 = vrot.lane.b32.xlu1 %v9976_v32, %s9784_s2 }
 0x67c   :  { %2575 = vrot.lane.b32.xlu0 %v10022_v44, %s9784_s2 }
 0x67d   :  { %2881 = vrot.lane.b32.xlu1 %v9922_v7, %s9785_s26 }
 0x680   :  { %2573 = vrot.lane.b32.xlu0 %v10033_v46, %s9784_s2 }
 0x681   :  { %2749 = vrot.lane.b32.xlu1 %v10039_v48, %s9784_s2 }
 0x684   :  { %2879 = vrot.lane.b32.xlu0 %v9920_v5, %s9785_s26 }
 0x685   :  { %2747 = vrot.lane.b32.xlu1 %v10125_v51, %s9784_s2 }
 0x688   :  { %2875 = vrot.lane.b32.xlu0 %v9912_v1, %s9785_s26 }
 0x689   :  { %2972 = vrot.lane.b32.xlu1 %v9936_v13, %s9785_s26 }
 0x68c   :  { %3063 = vrot.lane.b32.xlu0 %v9968_v28, %s9785_s26 }
 0x68d   :  { %2877 = vrot.lane.b32.xlu1 %v9939_v15, %s9785_s26 }
 0x690   :  { %2970 = vrot.lane.b32.xlu0 %v9951_v20, %s9785_s26 }
 0x691   :  { %3061 = vrot.lane.b32.xlu1 %v9978_v33, %s9785_s26 }
 0x6ca   :  { %v2403_v50 = vpop.xlane.xlu1 %2402 }
 0x6cb   :  { %v2423_v55 = vsub.f32 %v8898_v2, %v2403_v50 }
 0x6cc   :  { %v2400_v61 = vpop.xlane.xlu0 %2399 }
 0x6cd   :  { %v2432_v26 = vmul.f32 1.442695, %v2423_v55  ;;  %v2422_v60 = vsub.f32 %v2116_v27, %v2400_v61 }
 0x6cf   :  { %9388 = vpow2.f32 %v2432_v26  ;;  %v2430_v24 = vmul.f32 1.442695, %v2422_v60 }
 0x6d1   :  { %9390 = vpow2.f32 %v2430_v24 }
 0x6d2   :  { %v2415_v47 = vpop.xlane.xlu0 %2414 }
 0x6d3   :  { %v2427_v53 = vsub.f32 %v8912_v10, %v2415_v47 }
 0x6d5   :  { %v2440_v19 = vmul.f32 1.442695, %v2427_v53 }
 0x6d6   :  { %v2412_v38 = vpop.xlane.xlu0 %2411 }
 0x6d7   :  { %9392 = vpow2.f32 %v2440_v19  ;;  %v2426_v54 = vsub.f32 %v2298_v11, %v2412_v38 }
 0x6d9   :  { %v2438_v56 = vmul.f32 1.442695, %v2426_v54 }
 0x6db   :  { %9394 = vpow2.f32 %v2438_v56 }
 0x6dc   :  { %v10379_v21 = vpop.eup %9388 }
 0x6dd   :  { %v2449_v8 = vsel %vm416_vm0, %v10379_v21, 0.0 }
 0x6de   :  { %v10383_v2 = vpop.eup %9390  ;;  %2450 = vadd.xlane.f32.xlu1 %v2449_v8 }
 0x6df   :  { %v2446_v27 = vsel %vm416_vm0, %v10383_v2, 0.0 }
 0x6e0   :  { %2447 = vadd.xlane.f32.xlu0 %v2446_v27 }
 0x6e1   :  { %v2409_v25 = vpop.xlane.xlu1 %2408 }
 0x6e2   :  { %v2425_v10 = vsub.f32 %v8905_v31, %v2409_v25 }
 0x6e3   :  { %v2406_v12 = vpop.xlane.xlu0 %2405 }
 0x6e4   :  { %v10387_v52 = vpop.eup %9392  ;;  %v2436_v11 = vmul.f32 1.442695, %v2425_v10  ;;  %v2424_v3 = vsub.f32 %v2207_v9, %v2406_v12 }
 0x6e5   :  { %v2461_v6 = vsel %vm416_vm0, %v10387_v52, 0.0 }
 0x6e6   :  { %9396 = vpow2.f32 %v2436_v11  ;;  %v2434_v50 = vmul.f32 1.442695, %v2424_v3  ;;  %2462 = vadd.xlane.f32.xlu1 %v2461_v6 }
 0x6e8   :  { %v10391_v55 = vpop.eup %9394  ;;  %9398 = vpow2.f32 %v2434_v50 }
 0x6e9   :  { %v2421_v61 = vpop.xlane.xlu1 %2420  ;;  %v2458_v26 = vsel %vm416_vm0, %v10391_v55, 0.0 }
 0x6ea   :  { %v2429_v60 = vsub.f32 %v8919_v57, %v2421_v61  ;;  %2459 = vadd.xlane.f32.xlu0 %v2458_v26 }
 0x6eb   :  { %v2418_v31 = vpop.xlane.xlu0 %2417 }
 0x6ec   :  { %v2444_v24 = vmul.f32 1.442695, %v2429_v60  ;;  %v2428_v47 = vsub.f32 %v10343_v29, %v2418_v31 }
 0x6ed   :  { %v2487_v9 = vpop.permute.xlu1 %2486 }
 0x6ee   :  { %9400 = vpow2.f32 %v2444_v24  ;;  %v2442_v53 = vmul.f32 1.442695, %v2428_v47 }
 0x6ef   :  { %v2489_v19 = vpop.permute.xlu0 %2488 }
 0x6f0   :  { %9402 = vpow2.f32 %v2442_v53  ;;  %8920 = vmatprep.subr.mxu0 %v2489_v19 }
 0x6f1   :  { %v2663_v38 = vpop.permute.xlu1 %2662  ;;  %8921 = vmatpush3.msra.mxu0 %v2489_v19 }
 0x6f2   :  { %8922 = vmatprep.subr.mxu0 %v2487_v9 }
 0x6f3   :  { %v10396_v54 = vpop.eup %9396  ;;  %8923 = vmatpush3.msra.mxu0 %v2487_v9  ;;  %v2576_v56 = vpop.permute.xlu0 %2575 }
 0x6f4   :  { %8927 = vmatprep.subr.mxu1 %v2576_v56  ;;  %8934 = vmatprep.subr.mxu0 %v2663_v38  ;;  %v2455_v57 = vsel %vm416_vm0, %v10396_v54, 0.0 }
 0x6f5   :  { %v10400_v8 = vpop.eup %9398  ;;  %v2661_v29 = vpop.permute.xlu1 %2660  ;;  %2456 = vadd.xlane.f32.xlu1 %v2455_v57  ;;  %8928 = vmatpush3.msra.mxu1 %v2576_v56 }
 0x6f6   :  { %v2452_v27 = vsel %vm416_vm0, %v10400_v8, 0.0 }
 0x6f7   :  { %2453 = vadd.xlane.f32.xlu0 %v2452_v27  ;;  %v2574_v25 = vpop.permute.xlu0 %2573 }
 0x6f8   :  { %8929 = vmatprep.subr.mxu1 %v2574_v25 }
 0x6f9   :  { %v2882_v10 = vpop.permute.xlu1 %2881  ;;  %8930 = vmatpush3.msra.mxu1 %v2574_v25 }
 0x6fb   :  { %v10404_v12 = vpop.eup %9400  ;;  %v2880_v26 = vpop.permute.xlu0 %2879 }
 0x6fc   :  { %v2467_v11 = vsel %vm416_vm0, %v10404_v12, 0.0 }
 0x6fd   :  { %v10408_v3 = vpop.eup %9402  ;;  %v10410_v6 = vpop.permute.xlu1 %2749  ;;  %2468 = vadd.xlane.f32.xlu1 %v2467_v11 }
 0x6fe   :  { %8941 = vmatprep.subr.mxu1 %v10410_v6  ;;  %v2464_v50 = vsel %vm416_vm0, %v10408_v3, 0.0 }
 0x6ff   :  { %2465 = vadd.xlane.f32.xlu0 %v2464_v50  ;;  %v2876_v31 = vpop.permute.xlu0 %2875 }
 0x701   :  { %v2748_v61 = vpop.permute.xlu1 %2747 }
 0x703   :  { %v3064_v47 = vpop.permute.xlu0 %3063 }
 0x705   :  { %v10431_v60 = vpop.permute.xlu1 %2972 }
 0x707   :  { %v10433_v53 = vpop.permute.xlu0 %2970 }
 0x709   :  { %v2878_v24 = vpop.permute.xlu1 %2877 }
 0x70d   :  { %v3062_v9 = vpop.permute.xlu1 %3061 }
 0x70e   :  { %2966 = vrot.lane.b32.xlu1 %v9942_v17, %s9785_s26 }
 0x712   :  { %3154 = vrot.lane.b32.xlu1 %v10003_v41, %s9785_s26 }
 0x715   :  { %3057 = vrot.lane.b32.xlu0 %v9945_v18, %s9785_s26 }
 0x716   :  { %3152 = vrot.lane.b32.xlu1 %v10001_v40, %s9785_s26 }
 0x719   :  { %3059 = vrot.lane.b32.xlu0 %v9999_v39, %s9785_s26 }
 0x71a   :  { %3150 = vrot.lane.b32.xlu1 %v10027_v45, %s9785_s26 }
 0x71d   :  { %2968 = vrot.lane.b32.xlu0 %v9973_v30, %s9785_s26 }
 0x721   :  { %3148 = vrot.lane.b32.xlu0 %v9981_v34, %s9785_s26 }
 0x767   :  { %v2451_v19 = vpop.xlane.xlu1 %2450 }
 0x768   :  { %9404 = vrcp.f32 %v2451_v19 }
 0x769   :  { %v2448_v56 = vpop.xlane.xlu0 %2447 }
 0x76a   :  { %9406 = vrcp.f32 %v2448_v56 }
 0x76f   :  { %v2463_v57 = vpop.xlane.xlu1 %2462 }
 0x770   :  { %9408 = vrcp.f32 %v2463_v57 }
 0x773   :  { %v2460_v27 = vpop.xlane.xlu0 %2459 }
 0x774   :  { %9410 = vrcp.f32 %v2460_v27 }
 0x775   :  { %v9405_v25 = vpop.eup %9404 }
 0x776   :  { %v2479_v62 = vmul.f32 %v9405_v25, %v10379_v21 }
 0x777   :  { %v9407_v11 = vpop.eup %9406 }
 0x778   :  { %v2478_v50 = vmul.f32 %v9407_v11, %v10383_v2 }
 0x77a   :  { %8924 = vmatprep.mubr.msk.f32.mxu0 %vm416_vm0, %v2478_v50 }
 0x77b   :  { %8925 = vmatmul.mubr.msk.f32.vlgmr.msra.gmra.mxu0 %vm416_vm0, %v2479_v62 }
 0x77c   :  { %8935 = vmatpush3.msra.mxu0 %v2663_v38 }
 0x77d   :  { %8936 = vmatprep.subr.mxu0 %v2661_v29  ;;  %v9409_v19 = vpop.eup %9408 }
 0x77e   :  { %v2457_v22 = vpop.xlane.xlu1 %2456  ;;  %8937 = vmatpush3.msra.mxu0 %v2661_v29  ;;  %v2483_v2 = vmul.f32 %v9409_v19, %v10387_v52 }
 0x77f   :  { %8948 = vmatprep.subr.msk.mxu0 %vm416_vm0, %v2882_v10  ;;  %9412 = vrcp.f32 %v2457_v22 }
 0x780   :  { %v2454_v56 = vpop.xlane.xlu0 %2453 }
 0x781   :  { %v9411_v57 = vpop.eup %9410  ;;  %9414 = vrcp.f32 %v2454_v56 }
 0x782   :  { %v2482_v27 = vmul.f32 %v9411_v57, %v10391_v55 }
 0x784   :  { %8938 = vmatprep.mubr.msk.f32.mxu0 %vm416_vm0, %v2482_v27 }
 0x785   :  { %8939 = vmatmul.mubr.msk.f32.vlgmr.msra.gmra.mxu0 %vm416_vm0, %v2483_v2 }
 0x786   :  { %v2469_v62 = vpop.xlane.xlu1 %2468  ;;  %8949 = vmatpush3.xpose.msk.msra.mxu0 %vm416_vm0, %v2882_v10  ;;  %8952 = vmatprep.mubr.msk.f32.mxu0 %vm416_vm0, %v2876_v31 }
 0x787   :  { %8950 = vmatprep.subr.msk.mxu0 %vm416_vm0, %v2880_v26  ;;  %9416 = vrcp.f32 %v2469_v62 }
 0x788   :  { %v2466_v22 = vpop.xlane.xlu0 %2465 }
 0x789   :  { %9418 = vrcp.f32 %v2466_v22 }
 0x78a   :  { %8951 = vmatpush3.xpose.msk.msra.mxu0 %vm416_vm0, %v2880_v26 }
 0x78b   :  { %8962 = vmatprep.subr.msk.mxu0 %vm416_vm0, %v3064_v47 }
 0x78c   :  { %v3058_v21 = vpop.permute.xlu0 %3057  ;;  %v9413_v52 = vpop.eup %9412 }
 0x78d   :  { %8953 = vmatmul.mubr.msk.f32.vlgmr.msra.gmra.mxu0 %vm416_vm0, %v2878_v24  ;;  %v2481_v29 = vmul.f32 %v9413_v52, %v10396_v54 }
 0x78e   :  { %v9415_v55 = vpop.eup %9414  ;;  %8963 = vmatpush3.xpose.msk.msra.mxu0 %vm416_vm0, %v3064_v47  ;;  %8966 = vmatprep.mubr.msk.f32.mxu0 %vm416_vm0, %v3058_v21 }
 0x78f   :  { %8964 = vmatprep.subr.msk.mxu0 %vm416_vm0, %v3062_v9  ;;  %v2480_v38 = vmul.f32 %v9415_v55, %v10400_v8  ;;  %v2967_v8 = vpop.permute.xlu1 %2966 }
 0x790   :  { %v3060_v10 = vpop.permute.xlu0 %3059 }
 0x791   :  { %8931 = vmatprep.mubr.msk.f32.mxu1 %vm416_vm0, %v2480_v38 }
 0x792   :  { %8932 = vmatmul.mubr.msk.f32.vlgmr.msra.gmra.mxu1 %vm416_vm0, %v2481_v29  ;;  %8965 = vmatpush3.xpose.msk.msra.mxu0 %vm416_vm0, %v3062_v9 }
 0x793   :  { %8942 = vmatpush3.msra.mxu1 %v10410_v6 }
 0x794   :  { %8943 = vmatprep.subr.mxu1 %v2748_v61  ;;  %v9417_v26 = vpop.eup %9416  ;;  %v2969_v6 = vpop.permute.xlu0 %2968 }
 0x795   :  { %8944 = vmatpush3.msra.mxu1 %v2748_v61  ;;  %8967 = vmatmul.mubr.msk.f32.vlgmr.msra.gmra.mxu0 %vm416_vm0, %v3060_v10  ;;  %v2485_v24 = vmul.f32 %v9417_v26, %v10404_v12  ;;  %v3155_v61 = vpop.permute.xlu1 %3154 }
 0x796   :  { %v9419_v31 = vpop.eup %9418  ;;  %8955 = vmatprep.subr.msk.mxu1 %vm416_vm0, %v10431_v60 }
 0x797   :  { %v2484_v54 = vmul.f32 %v9419_v31, %v10408_v3 }
 0x798   :  { %v3149_v12 = vpop.permute.xlu0 %3148 }
 0x799   :  { %8945 = vmatprep.mubr.msk.f32.mxu1 %vm416_vm0, %v2484_v54  ;;  %v3153_v3 = vpop.permute.xlu1 %3152 }
 0x79a   :  { %8946 = vmatmul.mubr.msk.f32.vlgmr.msra.gmra.mxu1 %vm416_vm0, %v2485_v24 }
 0x79b   :  { %8956 = vmatpush3.xpose.msk.msra.mxu1 %vm416_vm0, %v10431_v60  ;;  %8959 = vmatprep.mubr.msk.f32.mxu1 %vm416_vm0, %v2967_v8 }
 0x79c   :  { %8957 = vmatprep.subr.msk.mxu1 %vm416_vm0, %v10433_v53 }
 0x79d   :  { %v3151_v60 = vpop.permute.xlu1 %3150 }
 0x79f   :  { %8958 = vmatpush3.xpose.msk.msra.mxu1 %vm416_vm0, %v10433_v53 }
 0x7a0   :  { %8969 = vmatprep.subr.msk.mxu1 %vm416_vm0, %v3155_v61 }
 0x7a2   :  { %8960 = vmatmul.mubr.msk.f32.vlgmr.msra.gmra.mxu1 %vm416_vm0, %v2969_v6 }
 0x7a3   :  { %8970 = vmatpush3.xpose.msk.msra.mxu1 %vm416_vm0, %v3155_v61  ;;  %8973 = vmatprep.mubr.msk.f32.mxu1 %vm416_vm0, %v3149_v12 }
 0x7a4   :  { %8971 = vmatprep.subr.msk.mxu1 %vm416_vm0, %v3153_v3 }
 0x7a7   :  { %8972 = vmatpush3.xpose.msk.msra.mxu1 %vm416_vm0, %v3153_v3 }
 0x7aa   :  { %8974 = vmatmul.mubr.msk.f32.vlgmr.msra.gmra.mxu1 %vm416_vm0, %v3151_v60 }
 0x83b   :  { %v10480_v47 = vpop.f32.mrf.mxu0 }
 0x83d   :  { %v10482_v9 = vpop.f32.mrf.mxu0 }
 0x845   :  { %v10484_v53 = vpop.f32.mrf.mxu0 }
 0x846   :  { %11772 = vst [vmem:[#allocation26_spill] sm:$0xff] %v10484_v53 }
 0x847   :  { %v10486_v25 = vpop.f32.mrf.mxu0 }
 0x848   :  { %11773 = vst [vmem:[#allocation27_spill] sm:$0xff] %v10486_v25 }
 0x84d   :  { %v8954_v11 = vpop.f32.mrf.mxu0 }
 0x84e   :  { %v3242_v50 = vsel %vm416_vm0, %v8954_v11, -inf }
 0x84f   :  { %3243 = vmax.xlane.f32.xlu1 %v3242_v50  ;;  %v2957_v19 = vpop.f32.mrf.mxu0 }
 0x850   :  { %v3239_v56 = vsel %vm416_vm0, %v2957_v19, -inf }
 0x851   :  { %3240 = vmax.xlane.f32.xlu0 %v3239_v56 }
 0x852   :  { %v10490_v27 = vpop.f32.mrf.mxu1 }
 0x854   :  { %v10493_v22 = vpop.f32.mrf.mxu1 }
 0x855   :  { %v8968_v57 = vpop.f32.mrf.mxu0  ;;  %11774 = vst [vmem:[#allocation28_spill] sm:$0xff] %v10493_v22 }
 0x856   :  { %v3254_v2 = vsel %vm416_vm0, %v8968_v57, -inf }
 0x857   :  { %3255 = vmax.xlane.f32.xlu0 %v3254_v2  ;;  %v3139_v62 = vpop.f32.mrf.mxu0 }
 0x858   :  { %v3251_v21 = vsel %vm416_vm0, %v3139_v62, -inf }
 0x85a   :  { %v10496_v52 = vpop.f32.mrf.mxu1 }
 0x85b   :  { %3252 = vmax.xlane.f32.xlu0 %v3251_v21  ;;  %11775 = vst [vmem:[#allocation29_spill] sm:$0xff] %v10496_v52 }
 0x85c   :  { %v10498_v55 = vpop.f32.mrf.mxu1 }
 0x85d   :  { %11776 = vst [vmem:[#allocation30_spill] sm:$0xff] %v10498_v55 }
 0x862   :  { %v8961_v38 = vpop.f32.mrf.mxu1 }
 0x863   :  { %v3248_v29 = vsel %vm416_vm0, %v8961_v38, -inf }
 0x864   :  { %3249 = vmax.xlane.f32.xlu1 %v3248_v29  ;;  %v3048_v10 = vpop.f32.mrf.mxu1 }
 0x865   :  { %v3245_v26 = vsel %vm416_vm0, %v3048_v10, -inf }
 0x866   :  { %3246 = vmax.xlane.f32.xlu0 %v3245_v26 }
 0x86a   :  { %v8975_v31 = vpop.f32.mrf.mxu1 }
 0x86b   :  { %v3260_v8 = vsel %vm416_vm0, %v8975_v31, -inf }
 0x86c   :  { %3261 = vmax.xlane.f32.xlu1 %v3260_v8  ;;  %v10503_v54 = vpop.f32.mrf.mxu1 }
 0x86d   :  { %v3257_v24 = vsel %vm416_vm0, %v10503_v54, -inf }
 0x86e   :  { %3258 = vmax.xlane.f32.xlu0 %v3257_v24 }
 0x87d   :  { %3327 = vrot.lane.b32.xlu1 %v10006_v42, %s9785_s26 }
 0x881   :  { %3503 = vrot.lane.b32.xlu1 %v10014_v43, %s9785_s26 }
 0x884   :  { %3329 = vrot.lane.b32.xlu0 %v9994_v36, %s9785_s26 }
 0x885   :  { %3501 = vrot.lane.b32.xlu1 %v9976_v32, %s9785_s26 }
 0x888   :  { %3416 = vrot.lane.b32.xlu0 %v10022_v44, %s9785_s26 }
 0x889   :  { %3722 = vrot.lane.b32.xlu1 %v9922_v7, %s9786_s27 }
 0x88c   :  { %3414 = vrot.lane.b32.xlu0 %v10033_v46, %s9785_s26 }
 0x88d   :  { %3590 = vrot.lane.b32.xlu1 %v10039_v48, %s9785_s26 }
 0x890   :  { %3720 = vrot.lane.b32.xlu0 %v9920_v5, %s9786_s27 }
 0x891   :  { %3588 = vrot.lane.b32.xlu1 %v10125_v51, %s9785_s26 }
 0x894   :  { %3716 = vrot.lane.b32.xlu0 %v9912_v1, %s9786_s27 }
 0x895   :  { %3813 = vrot.lane.b32.xlu1 %v9936_v13, %s9786_s27 }
 0x898   :  { %3904 = vrot.lane.b32.xlu0 %v9968_v28, %s9786_s27 }
 0x899   :  { %3718 = vrot.lane.b32.xlu1 %v9939_v15, %s9786_s27 }
 0x89c   :  { %3811 = vrot.lane.b32.xlu0 %v9951_v20, %s9786_s27 }
 0x89d   :  { %3902 = vrot.lane.b32.xlu1 %v9978_v33, %s9786_s27 }
 0x8d8   :  { %v3244_v6 = vpop.xlane.xlu1 %3243 }
 0x8d9   :  { %v3264_v61 = vsub.f32 %v8954_v11, %v3244_v6 }
 0x8da   :  { %v3241_v12 = vpop.xlane.xlu0 %3240 }
 0x8db   :  { %v3273_v3 = vmul.f32 1.442695, %v3264_v61  ;;  %v3263_v60 = vsub.f32 %v2957_v19, %v3241_v12 }
 0x8dd   :  { %9420 = vpow2.f32 %v3273_v3  ;;  %v3271_v50 = vmul.f32 1.442695, %v3263_v60 }
 0x8df   :  { %9422 = vpow2.f32 %v3271_v50 }
 0x8e0   :  { %v3256_v56 = vpop.xlane.xlu0 %3255 }
 0x8e1   :  { %v3268_v2 = vsub.f32 %v8968_v57, %v3256_v56 }
 0x8e3   :  { %v3281_v21 = vmul.f32 1.442695, %v3268_v2 }
 0x8e4   :  { %v3253_v29 = vpop.xlane.xlu0 %3252 }
 0x8e5   :  { %9424 = vpow2.f32 %v3281_v21  ;;  %v3267_v26 = vsub.f32 %v3139_v62, %v3253_v29 }
 0x8e7   :  { %v3279_v8 = vmul.f32 1.442695, %v3267_v26 }
 0x8e9   :  { %9426 = vpow2.f32 %v3279_v8 }
 0x8ea   :  { %v10539_v24 = vpop.eup %9420 }
 0x8eb   :  { %v3290_v59 = vsel %vm416_vm0, %v10539_v24, 0.0 }
 0x8ec   :  { %v10543_v11 = vpop.eup %9422  ;;  %3291 = vadd.xlane.f32.xlu1 %v3290_v59 }
 0x8ed   :  { %v3250_v19 = vpop.xlane.xlu1 %3249  ;;  %v3287_v6 = vsel %vm416_vm0, %v10543_v11, 0.0 }
 0x8ee   :  { %v3266_v61 = vsub.f32 %v8961_v38, %v3250_v19  ;;  %3288 = vadd.xlane.f32.xlu0 %v3287_v6 }
 0x8ef   :  { %v3247_v57 = vpop.xlane.xlu0 %3246 }
 0x8f0   :  { %v3277_v12 = vmul.f32 1.442695, %v3266_v61  ;;  %v3265_v3 = vsub.f32 %v3048_v10, %v3247_v57 }
 0x8f2   :  { %v10547_v62 = vpop.eup %9424  ;;  %9428 = vpow2.f32 %v3277_v12  ;;  %v3275_v60 = vmul.f32 1.442695, %v3265_v3 }
 0x8f3   :  { %v3302_v50 = vsel %vm416_vm0, %v10547_v62, 0.0 }
 0x8f4   :  { %9430 = vpow2.f32 %v3275_v60  ;;  %3303 = vadd.xlane.f32.xlu1 %v3302_v50 }
 0x8f5   :  { %v3262_v56 = vpop.xlane.xlu1 %3261 }
 0x8f6   :  { %v10551_v59 = vpop.eup %9426  ;;  %v3270_v2 = vsub.f32 %v8975_v31, %v3262_v56 }
 0x8f7   :  { %v3259_v21 = vpop.xlane.xlu0 %3258  ;;  %v3299_v38 = vsel %vm416_vm0, %v10551_v59, 0.0 }
 0x8f8   :  { %v3285_v29 = vmul.f32 1.442695, %v3270_v2  ;;  %v3269_v10 = vsub.f32 %v10503_v54, %v3259_v21  ;;  %3300 = vadd.xlane.f32.xlu0 %v3299_v38 }
 0x8f9   :  { %v3328_v26 = vpop.permute.xlu1 %3327 }
 0x8fa   :  { %9432 = vpow2.f32 %v3285_v29  ;;  %v3283_v8 = vmul.f32 1.442695, %v3269_v10 }
 0x8fb   :  { %v3330_v19 = vpop.permute.xlu0 %3329 }
 0x8fc   :  { %9434 = vpow2.f32 %v3283_v8  ;;  %8976 = vmatprep.subr.mxu0 %v3330_v19 }
 0x8fd   :  { %v3504_v6 = vpop.permute.xlu1 %3503  ;;  %8977 = vmatpush3.msra.mxu0 %v3330_v19 }
 0x8fe   :  { %8978 = vmatprep.subr.mxu0 %v3328_v26 }
 0x8ff   :  { %v10556_v61 = vpop.eup %9428  ;;  %8979 = vmatpush3.msra.mxu0 %v3328_v26  ;;  %v3417_v31 = vpop.permute.xlu0 %3416 }
 0x900   :  { %8983 = vmatprep.subr.mxu1 %v3417_v31  ;;  %8990 = vmatprep.subr.mxu0 %v3504_v6  ;;  %v3296_v57 = vsel %vm416_vm0, %v10556_v61, 0.0 }
 0x901   :  { %v10560_v54 = vpop.eup %9430  ;;  %v3502_v12 = vpop.permute.xlu1 %3501  ;;  %3297 = vadd.xlane.f32.xlu1 %v3296_v57  ;;  %8984 = vmatpush3.msra.mxu1 %v3417_v31 }
 0x902   :  { %v3293_v3 = vsel %vm416_vm0, %v10560_v54, 0.0 }
 0x903   :  { %3294 = vadd.xlane.f32.xlu0 %v3293_v3  ;;  %v3415_v60 = vpop.permute.xlu0 %3414 }
 0x904   :  { %8985 = vmatprep.subr.mxu1 %v3415_v60 }
 0x905   :  { %v3723_v50 = vpop.permute.xlu1 %3722  ;;  %8986 = vmatpush3.msra.mxu1 %v3415_v60 }
 0x907   :  { %v10564_v56 = vpop.eup %9432  ;;  %v3721_v26 = vpop.permute.xlu0 %3720 }
 0x908   :  { %v3308_v2 = vsel %vm416_vm0, %v10564_v56, 0.0 }
 0x909   :  { %v10568_v21 = vpop.eup %9434  ;;  %v10570_v38 = vpop.permute.xlu1 %3590  ;;  %3309 = vadd.xlane.f32.xlu1 %v3308_v2 }
 0x90a   :  { %8997 = vmatprep.subr.mxu1 %v10570_v38  ;;  %v3305_v29 = vsel %vm416_vm0, %v10568_v21, 0.0 }
 0x90b   :  { %3306 = vadd.xlane.f32.xlu0 %v3305_v29  ;;  %v3717_v19 = vpop.permute.xlu0 %3716 }
 0x90d   :  { %v3589_v10 = vpop.permute.xlu1 %3588 }
 0x90f   :  { %v3905_v57 = vpop.permute.xlu0 %3904 }
 0x911   :  { %v10591_v8 = vpop.permute.xlu1 %3813 }
 0x913   :  { %v10593_v60 = vpop.permute.xlu0 %3811 }
 0x915   :  { %v3719_v31 = vpop.permute.xlu1 %3718 }
 0x919   :  { %v3903_v3 = vpop.permute.xlu1 %3902 }
 0x91a   :  { %3807 = vrot.lane.b32.xlu1 %v9942_v17, %s9786_s27 }
 0x91e   :  { %3995 = vrot.lane.b32.xlu1 %v10003_v41, %s9786_s27 }
 0x921   :  { %3898 = vrot.lane.b32.xlu0 %v9945_v18, %s9786_s27 }
 0x922   :  { %3993 = vrot.lane.b32.xlu1 %v10001_v40, %s9786_s27 }
 0x925   :  { %3900 = vrot.lane.b32.xlu0 %v9999_v39, %s9786_s27 }
 0x926   :  { %3991 = vrot.lane.b32.xlu1 %v10027_v45, %s9786_s27 }
 0x929   :  { %3809 = vrot.lane.b32.xlu0 %v9973_v30, %s9786_s27 }
 0x92d   :  { %3989 = vrot.lane.b32.xlu0 %v9981_v34, %s9786_s27 }
 0x975   :  { %v3292_v2 = vpop.xlane.xlu1 %3291 }
 0x976   :  { %9436 = vrcp.f32 %v3292_v2 }
 0x977   :  { %v3289_v29 = vpop.xlane.xlu0 %3288 }
 0x978   :  { %9438 = vrcp.f32 %v3289_v29 }
 0x97d   :  { %v3304_v0 = vpop.xlane.xlu1 %3303 }
 0x97e   :  { %9440 = vrcp.f32 %v3304_v0 }
 0x981   :  { %v3301_v58 = vpop.xlane.xlu0 %3300 }
 0x982   :  { %9442 = vrcp.f32 %v3301_v58 }
 0x983   :  { %v9437_v55 = vpop.eup %9436 }
 0x984   :  { %v3320_v35 = vmul.f32 %v9437_v55, %v10539_v24 }
 0x985   :  { %v9439_v37 = vpop.eup %9438 }
 0x986   :  { %v3319_v52 = vmul.f32 %v9439_v37, %v10543_v11 }
 0x988   :  { %8980 = vmatprep.mubr.msk.f32.mxu0 %vm416_vm0, %v3319_v52 }
 0x989   :  { %8981 = vmatmul.mubr.msk.f32.vlgmr.msra.gmra.mxu0 %vm416_vm0, %v3320_v35 }
 0x98a   :  { %v3298_v25 = vpop.xlane.xlu1 %3297  ;;  %8991 = vmatpush3.msra.mxu0 %v3504_v6 }
 0x98b   :  { %8992 = vmatprep.subr.mxu0 %v3502_v12  ;;  %9444 = vrcp.f32 %v3298_v25  ;;  %v9441_v0 = vpop.eup %9440 }
 0x98c   :  { %8993 = vmatpush3.msra.mxu0 %v3502_v12  ;;  %v3295_v2 = vpop.xlane.xlu0 %3294  ;;  %v3324_v37 = vmul.f32 %v9441_v0, %v10547_v62 }
 0x98d   :  { %9446 = vrcp.f32 %v3295_v2  ;;  %9004 = vmatprep.subr.msk.mxu0 %vm416_vm0, %v3723_v50 }
 0x98f   :  { %v9443_v58 = vpop.eup %9442 }
 0x990   :  { %v3323_v29 = vmul.f32 %v9443_v58, %v10551_v59 }
 0x992   :  { %v3310_v55 = vpop.xlane.xlu1 %3309  ;;  %8994 = vmatprep.mubr.msk.f32.mxu0 %vm416_vm0, %v3323_v29 }
 0x993   :  { %8995 = vmatmul.mubr.msk.f32.vlgmr.msra.gmra.mxu0 %vm416_vm0, %v3324_v37  ;;  %9448 = vrcp.f32 %v3310_v55 }
 0x994   :  { %9005 = vmatpush3.xpose.msk.msra.mxu0 %vm416_vm0, %v3723_v50  ;;  %v3307_v35 = vpop.xlane.xlu0 %3306  ;;  %9008 = vmatprep.mubr.msk.f32.mxu0 %vm416_vm0, %v3717_v19 }
 0x995   :  { %9450 = vrcp.f32 %v3307_v35  ;;  %9006 = vmatprep.subr.msk.mxu0 %vm416_vm0, %v3721_v26 }
 0x996   :  { %v3808_v12 = vpop.permute.xlu1 %3807 }
 0x998   :  { %9007 = vmatpush3.xpose.msk.msra.mxu0 %vm416_vm0, %v3721_v26  ;;  %v9445_v25 = vpop.eup %9444  ;;  %v3899_v24 = vpop.permute.xlu0 %3898 }
 0x999   :  { %9018 = vmatprep.subr.msk.mxu0 %vm416_vm0, %v3905_v57  ;;  %v3322_v62 = vmul.f32 %v9445_v25, %v10556_v61 }
 0x99a   :  { %v9447_v52 = vpop.eup %9446 }
 0x99b   :  { %9009 = vmatmul.mubr.msk.f32.vlgmr.msra.gmra.mxu0 %vm416_vm0, %v3719_v31  ;;  %v3321_v11 = vmul.f32 %v9447_v52, %v10560_v54 }
 0x99c   :  { %9019 = vmatpush3.xpose.msk.msra.mxu0 %vm416_vm0, %v3905_v57  ;;  %9022 = vmatprep.mubr.msk.f32.mxu0 %vm416_vm0, %v3899_v24  ;;  %v3901_v54 = vpop.permute.xlu0 %3900 }
 0x99d   :  { %8987 = vmatprep.mubr.msk.f32.mxu1 %vm416_vm0, %v3321_v11  ;;  %9020 = vmatprep.subr.msk.mxu0 %vm416_vm0, %v3903_v3 }
 0x99e   :  { %8988 = vmatmul.mubr.msk.f32.vlgmr.msra.gmra.mxu1 %vm416_vm0, %v3322_v62 }
 0x99f   :  { %8998 = vmatpush3.msra.mxu1 %v10570_v38 }
 0x9a0   :  { %8999 = vmatprep.subr.mxu1 %v3589_v10  ;;  %9021 = vmatpush3.xpose.msk.msra.mxu0 %vm416_vm0, %v3903_v3  ;;  %v9449_v59 = vpop.eup %9448  ;;  %v3810_v38 = vpop.permute.xlu0 %3809 }
 0x9a1   :  { %9000 = vmatpush3.msra.mxu1 %v3589_v10  ;;  %v3326_v50 = vmul.f32 %v9449_v59, %v10564_v56  ;;  %v3996_v10 = vpop.permute.xlu1 %3995 }
 0x9a2   :  { %v9451_v6 = vpop.eup %9450  ;;  %9011 = vmatprep.subr.msk.mxu1 %vm416_vm0, %v10591_v8 }
 0x9a3   :  { %9023 = vmatmul.mubr.msk.f32.vlgmr.msra.gmra.mxu0 %vm416_vm0, %v3901_v54  ;;  %v3325_v61 = vmul.f32 %v9451_v6, %v10568_v21 }
 0x9a4   :  { %v3990_v56 = vpop.permute.xlu0 %3989 }
 0x9a5   :  { %9001 = vmatprep.mubr.msk.f32.mxu1 %vm416_vm0, %v3325_v61  ;;  %v3994_v21 = vpop.permute.xlu1 %3993 }
 0x9a6   :  { %9002 = vmatmul.mubr.msk.f32.vlgmr.msra.gmra.mxu1 %vm416_vm0, %v3326_v50 }
 0x9a7   :  { %9012 = vmatpush3.xpose.msk.msra.mxu1 %vm416_vm0, %v10591_v8  ;;  %9015 = vmatprep.mubr.msk.f32.mxu1 %vm416_vm0, %v3808_v12 }
 0x9a8   :  { %9013 = vmatprep.subr.msk.mxu1 %vm416_vm0, %v10593_v60 }
 0x9a9   :  { %v3992_v26 = vpop.permute.xlu1 %3991 }
 0x9ab   :  { %9014 = vmatpush3.xpose.msk.msra.mxu1 %vm416_vm0, %v10593_v60 }
 0x9ac   :  { %9025 = vmatprep.subr.msk.mxu1 %vm416_vm0, %v3996_v10 }
 0x9ae   :  { %9016 = vmatmul.mubr.msk.f32.vlgmr.msra.gmra.mxu1 %vm416_vm0, %v3810_v38 }
 0x9af   :  { %9026 = vmatpush3.xpose.msk.msra.mxu1 %vm416_vm0, %v3996_v10  ;;  %9029 = vmatprep.mubr.msk.f32.mxu1 %vm416_vm0, %v3990_v56 }
 0x9b0   :  { %9027 = vmatprep.subr.msk.mxu1 %vm416_vm0, %v3994_v21 }
 0x9b3   :  { %9028 = vmatpush3.xpose.msk.msra.mxu1 %vm416_vm0, %v3994_v21 }
 0x9b6   :  { %9030 = vmatmul.mubr.msk.f32.vlgmr.msra.gmra.mxu1 %vm416_vm0, %v3992_v26 }
 0xa49   :  { %v10640_v8 = vpop.f32.mrf.mxu0 }
 0xa4b   :  { %v10642_v19 = vpop.f32.mrf.mxu0 }
 0xa53   :  { %v10644_v31 = vpop.f32.mrf.mxu0 }
 0xa54   :  { %11777 = vst [vmem:[#allocation31_spill] sm:$0xff] %v10644_v31 }
 0xa55   :  { %v10646_v57 = vpop.f32.mrf.mxu0 }
 0xa56   :  { %11778 = vst [vmem:[#allocation32_spill] sm:$0xff] %v10646_v57 }
 0xa5b   :  { %v9010_v3 = vpop.f32.mrf.mxu0 }
 0xa5c   :  { %v4083_v60 = vsel %vm416_vm0, %v9010_v3, -inf }
 0xa5d   :  { %4084 = vmax.xlane.f32.xlu1 %v4083_v60  ;;  %v3798_v2 = vpop.f32.mrf.mxu0 }
 0xa5e   :  { %v4080_v0 = vsel %vm416_vm0, %v3798_v2, -inf  ;;  %v10650_v58 = vpop.f32.mrf.mxu1 }
 0xa5f   :  { %4081 = vmax.xlane.f32.xlu0 %v4080_v0  ;;  %11779 = vst [vmem:[#allocation33_spill] sm:$0xff] %v10650_v58 }
 0xa60   :  { %v10653_v35 = vpop.f32.mrf.mxu1 }
 0xa61   :  { %11780 = vst [vmem:[#allocation34_spill] sm:$0xff] %v10653_v35 }
 0xa63   :  { %v9024_v29 = vpop.f32.mrf.mxu0 }
 0xa64   :  { %v4095_v37 = vsel %vm416_vm0, %v9024_v29, -inf }
 0xa65   :  { %4096 = vmax.xlane.f32.xlu0 %v4095_v37  ;;  %v3980_v55 = vpop.f32.mrf.mxu0 }
 0xa66   :  { %v10655_v25 = vpop.f32.mrf.mxu1  ;;  %v4092_v52 = vsel %vm416_vm0, %v3980_v55, -inf }
 0xa67   :  { %11781 = vst [vmem:[#allocation35_spill] sm:$0xff] %v10655_v25 }
 0xa68   :  { %v10658_v24 = vpop.f32.mrf.mxu1 }
 0xa69   :  { %4093 = vmax.xlane.f32.xlu0 %v4092_v52  ;;  %11782 = vst [vmem:[#allocation36_spill] sm:$0xff] %v10658_v24 }
 0xa6e   :  { %v9017_v11 = vpop.f32.mrf.mxu1 }
 0xa6f   :  { %v4089_v62 = vsel %vm416_vm0, %v9017_v11, -inf }
 0xa70   :  { %4090 = vmax.xlane.f32.xlu1 %v4089_v62  ;;  %v3889_v59 = vpop.f32.mrf.mxu1 }
 0xa71   :  { %v4086_v6 = vsel %vm416_vm0, %v3889_v59, -inf }
 0xa72   :  { %4087 = vmax.xlane.f32.xlu0 %v4086_v6 }
 0xa76   :  { %v9031_v54 = vpop.f32.mrf.mxu1 }
 0xa77   :  { %v4101_v12 = vsel %vm416_vm0, %v9031_v54, -inf }
 0xa78   :  { %4102 = vmax.xlane.f32.xlu1 %v4101_v12  ;;  %v4071_v61 = vpop.f32.mrf.mxu1 }
 0xa79   :  { %v4098_v50 = vsel %vm416_vm0, %v4071_v61, -inf }
 0xa7a   :  { %4099 = vmax.xlane.f32.xlu0 %v4098_v50 }
 0xa89   :  { %4168 = vrot.lane.b32.xlu1 %v10006_v42, %s9786_s27 }
 0xa8d   :  { %4344 = vrot.lane.b32.xlu1 %v10014_v43, %s9786_s27 }
 0xa90   :  { %4170 = vrot.lane.b32.xlu0 %v9994_v36, %s9786_s27 }
 0xa91   :  { %4342 = vrot.lane.b32.xlu1 %v9976_v32, %s9786_s27 }
 0xa94   :  { %4257 = vrot.lane.b32.xlu0 %v10022_v44, %s9786_s27 }
 0xa95   :  { %4563 = vrot.lane.b32.xlu1 %v9922_v7, %s9787_s28 }
 0xa98   :  { %4255 = vrot.lane.b32.xlu0 %v10033_v46, %s9786_s27 }
 0xa99   :  { %4431 = vrot.lane.b32.xlu1 %v10039_v48, %s9786_s27 }
 0xa9c   :  { %4561 = vrot.lane.b32.xlu0 %v9920_v5, %s9787_s28 }
 0xa9d   :  { %4429 = vrot.lane.b32.xlu1 %v10125_v51, %s9786_s27 }
 0xaa0   :  { %4557 = vrot.lane.b32.xlu0 %v9912_v1, %s9787_s28 }
 0xaa1   :  { %4654 = vrot.lane.b32.xlu1 %v9936_v13, %s9787_s28 }
 0xaa4   :  { %4745 = vrot.lane.b32.xlu0 %v9968_v28, %s9787_s28 }
 0xaa5   :  { %4559 = vrot.lane.b32.xlu1 %v9939_v15, %s9787_s28 }
 0xaa8   :  { %4652 = vrot.lane.b32.xlu0 %v9951_v20, %s9787_s28 }
 0xaa9   :  { %4743 = vrot.lane.b32.xlu1 %v9978_v33, %s9787_s28 }
 0xae6   :  { %v4085_v38 = vpop.xlane.xlu1 %4084 }
 0xae7   :  { %v4105_v10 = vsub.f32 %v9010_v3, %v4085_v38 }
 0xae8   :  { %v4082_v56 = vpop.xlane.xlu0 %4081 }
 0xae9   :  { %v4114_v21 = vmul.f32 1.442695, %v4105_v10  ;;  %v4104_v26 = vsub.f32 %v3798_v2, %v4082_v56 }
 0xaeb   :  { %9452 = vpow2.f32 %v4114_v21  ;;  %v4112_v60 = vmul.f32 1.442695, %v4104_v26 }
 0xaed   :  { %9454 = vpow2.f32 %v4112_v60 }
 0xaee   :  { %v4097_v0 = vpop.xlane.xlu0 %4096 }
 0xaef   :  { %v4109_v37 = vsub.f32 %v9024_v29, %v4097_v0 }
 0xaf1   :  { %v4122_v52 = vmul.f32 1.442695, %v4109_v37 }
 0xaf2   :  { %v4094_v62 = vpop.xlane.xlu0 %4093 }
 0xaf3   :  { %9456 = vpow2.f32 %v4122_v52  ;;  %v4108_v6 = vsub.f32 %v3980_v55, %v4094_v62 }
 0xaf5   :  { %v4120_v12 = vmul.f32 1.442695, %v4108_v6 }
 0xaf7   :  { %9458 = vpow2.f32 %v4120_v12 }
 0xaf8   :  { %v10696_v50 = vpop.eup %9452 }
 0xaf9   :  { %v4091_v24 = vpop.xlane.xlu1 %4090  ;;  %v4131_v3 = vsel %vm416_vm0, %v10696_v50, 0.0 }
 0xafa   :  { %v10700_v38 = vpop.eup %9454  ;;  %v4107_v2 = vsub.f32 %v9017_v11, %v4091_v24  ;;  %4132 = vadd.xlane.f32.xlu1 %v4131_v3 }
 0xafb   :  { %v4088_v10 = vpop.xlane.xlu0 %4087  ;;  %v4128_v29 = vsel %vm416_vm0, %v10700_v38, 0.0 }
 0xafc   :  { %v4118_v56 = vmul.f32 1.442695, %v4107_v2  ;;  %v4106_v21 = vsub.f32 %v3889_v59, %v4088_v10  ;;  %4129 = vadd.xlane.f32.xlu0 %v4128_v29 }
 0xafe   :  { %9460 = vpow2.f32 %v4118_v56  ;;  %v4116_v55 = vmul.f32 1.442695, %v4106_v21 }
 0xb00   :  { %v10704_v26 = vpop.eup %9456  ;;  %9462 = vpow2.f32 %v4116_v55 }
 0xb01   :  { %v4103_v60 = vpop.xlane.xlu1 %4102  ;;  %v4143_v0 = vsel %vm416_vm0, %v10704_v26, 0.0 }
 0xb02   :  { %v4111_v37 = vsub.f32 %v9031_v54, %v4103_v60  ;;  %4144 = vadd.xlane.f32.xlu1 %v4143_v0 }
 0xb03   :  { %v4100_v24 = vpop.xlane.xlu0 %4099 }
 0xb04   :  { %v10708_v11 = vpop.eup %9458  ;;  %v4126_v52 = vmul.f32 1.442695, %v4111_v37  ;;  %v4110_v62 = vsub.f32 %v4071_v61, %v4100_v24 }
 0xb05   :  { %v4169_v6 = vpop.permute.xlu1 %4168  ;;  %v4140_v59 = vsel %vm416_vm0, %v10708_v11, 0.0 }
 0xb06   :  { %9464 = vpow2.f32 %v4126_v52  ;;  %v4124_v12 = vmul.f32 1.442695, %v4110_v62  ;;  %4141 = vadd.xlane.f32.xlu0 %v4140_v59 }
 0xb07   :  { %v4171_v3 = vpop.permute.xlu0 %4170 }
 0xb08   :  { %9466 = vpow2.f32 %v4124_v12  ;;  %9032 = vmatprep.subr.mxu0 %v4171_v3 }
 0xb09   :  { %v4345_v2 = vpop.permute.xlu1 %4344  ;;  %9033 = vmatpush3.msra.mxu0 %v4171_v3 }
 0xb0a   :  { %9034 = vmatprep.subr.mxu0 %v4169_v6 }
 0xb0b   :  { %v10712_v54 = vpop.eup %9460  ;;  %9035 = vmatpush3.msra.mxu0 %v4169_v6  ;;  %v4258_v10 = vpop.permute.xlu0 %4257 }
 0xb0c   :  { %9039 = vmatprep.subr.mxu1 %v4258_v10  ;;  %9046 = vmatprep.subr.mxu0 %v4345_v2  ;;  %v4137_v61 = vsel %vm416_vm0, %v10712_v54, 0.0 }
 0xb0d   :  { %v10716_v29 = vpop.eup %9462  ;;  %v4343_v56 = vpop.permute.xlu1 %4342  ;;  %4138 = vadd.xlane.f32.xlu1 %v4137_v61  ;;  %9040 = vmatpush3.msra.mxu1 %v4258_v10 }
 0xb0e   :  { %v4134_v21 = vsel %vm416_vm0, %v10716_v29, 0.0 }
 0xb0f   :  { %4135 = vadd.xlane.f32.xlu0 %v4134_v21  ;;  %v4256_v55 = vpop.permute.xlu0 %4255 }
 0xb10   :  { %9041 = vmatprep.subr.mxu1 %v4256_v55 }
 0xb11   :  { %v4564_v60 = vpop.permute.xlu1 %4563  ;;  %9042 = vmatpush3.msra.mxu1 %v4256_v55 }
 0xb13   :  { %v10720_v0 = vpop.eup %9464  ;;  %v4562_v59 = vpop.permute.xlu0 %4561 }
 0xb14   :  { %v4149_v37 = vsel %vm416_vm0, %v10720_v0, 0.0 }
 0xb15   :  { %v10724_v24 = vpop.eup %9466  ;;  %v10726_v52 = vpop.permute.xlu1 %4431  ;;  %4150 = vadd.xlane.f32.xlu1 %v4149_v37 }
 0xb16   :  { %9053 = vmatprep.subr.mxu1 %v10726_v52  ;;  %v4146_v62 = vsel %vm416_vm0, %v10724_v24, 0.0 }
 0xb17   :  { %4147 = vadd.xlane.f32.xlu0 %v4146_v62  ;;  %v4558_v3 = vpop.permute.xlu0 %4557 }
 0xb19   :  { %v4430_v6 = vpop.permute.xlu1 %4429 }
 0xb1b   :  { %v4746_v61 = vpop.permute.xlu0 %4745 }
 0xb1d   :  { %v10747_v12 = vpop.permute.xlu1 %4654 }
 0xb1f   :  { %v10749_v55 = vpop.permute.xlu0 %4652 }
 0xb21   :  { %v4560_v10 = vpop.permute.xlu1 %4559 }
 0xb25   :  { %v4744_v21 = vpop.permute.xlu1 %4743 }
 0xb26   :  { %4648 = vrot.lane.b32.xlu1 %v9942_v17, %s9787_s28 }
 0xb2a   :  { %4836 = vrot.lane.b32.xlu1 %v10003_v41, %s9787_s28 }
 0xb2d   :  { %4739 = vrot.lane.b32.xlu0 %v9945_v18, %s9787_s28 }
 0xb2e   :  { %4834 = vrot.lane.b32.xlu1 %v10001_v40, %s9787_s28 }
 0xb31   :  { %4741 = vrot.lane.b32.xlu0 %v9999_v39, %s9787_s28 }
 0xb32   :  { %4832 = vrot.lane.b32.xlu1 %v10027_v45, %s9787_s28 }
 0xb35   :  { %4650 = vrot.lane.b32.xlu0 %v9973_v30, %s9787_s28 }
 0xb39   :  { %4830 = vrot.lane.b32.xlu0 %v9981_v34, %s9787_s28 }
 0xb83   :  { %v4133_v37 = vpop.xlane.xlu1 %4132 }
 0xb84   :  { %9468 = vrcp.f32 %v4133_v37 }
 0xb85   :  { %v4130_v62 = vpop.xlane.xlu0 %4129 }
 0xb86   :  { %9470 = vrcp.f32 %v4130_v62 }
 0xb8b   :  { %v4145_v25 = vpop.xlane.xlu1 %4144 }
 0xb8c   :  { %9472 = vrcp.f32 %v4145_v25 }
 0xb8f   :  { %v4142_v57 = vpop.xlane.xlu0 %4141 }
 0xb90   :  { %9474 = vrcp.f32 %v4142_v57 }
 0xb91   :  { %v9469_v14 = vpop.eup %9468 }
 0xb92   :  { %v4161_v4 = vmul.f32 %v9469_v14, %v10696_v50 }
 0xb93   :  { %v9471_v31 = vpop.eup %9470 }
 0xb94   :  { %v4160_v53 = vmul.f32 %v9471_v31, %v10700_v38 }
 0xb96   :  { %v4139_v35 = vpop.xlane.xlu1 %4138  ;;  %9036 = vmatprep.mubr.msk.f32.mxu0 %vm416_vm0, %v4160_v53 }
 0xb97   :  { %9037 = vmatmul.mubr.msk.f32.vlgmr.msra.gmra.mxu0 %vm416_vm0, %v4161_v4  ;;  %9476 = vrcp.f32 %v4139_v35 }
 0xb98   :  { %9047 = vmatpush3.msra.mxu0 %v4345_v2  ;;  %v4136_v37 = vpop.xlane.xlu0 %4135 }
 0xb99   :  { %9478 = vrcp.f32 %v4136_v37  ;;  %9048 = vmatprep.subr.mxu0 %v4343_v56  ;;  %v9473_v57 = vpop.eup %9472 }
 0xb9a   :  { %9049 = vmatpush3.msra.mxu0 %v4343_v56  ;;  %v4165_v14 = vmul.f32 %v9473_v57, %v10704_v26 }
 0xb9b   :  { %9060 = vmatprep.subr.msk.mxu0 %vm416_vm0, %v4564_v60 }
 0xb9d   :  { %v9475_v25 = vpop.eup %9474 }
 0xb9e   :  { %v4151_v62 = vpop.xlane.xlu1 %4150  ;;  %v4164_v31 = vmul.f32 %v9475_v25, %v10708_v11 }
 0xb9f   :  { %9480 = vrcp.f32 %v4151_v62 }
 0xba0   :  { %v4148_v50 = vpop.xlane.xlu0 %4147  ;;  %9050 = vmatprep.mubr.msk.f32.mxu0 %vm416_vm0, %v4164_v31 }
 0xba1   :  { %9482 = vrcp.f32 %v4148_v50  ;;  %9051 = vmatmul.mubr.msk.f32.vlgmr.msra.gmra.mxu0 %vm416_vm0, %v4165_v14 }
 0xba2   :  { %9061 = vmatpush3.xpose.msk.msra.mxu0 %vm416_vm0, %v4564_v60  ;;  %9064 = vmatprep.mubr.msk.f32.mxu0 %vm416_vm0, %v4558_v3 }
 0xba3   :  { %9062 = vmatprep.subr.msk.mxu0 %vm416_vm0, %v4562_v59 }
 0xba4   :  { %v9477_v4 = vpop.eup %9476  ;;  %v4740_v38 = vpop.permute.xlu0 %4739 }
 0xba5   :  { %v4163_v26 = vmul.f32 %v9477_v4, %v10712_v54  ;;  %v4649_v54 = vpop.permute.xlu1 %4648 }
 0xba6   :  { %v9479_v53 = vpop.eup %9478  ;;  %9063 = vmatpush3.xpose.msk.msra.mxu0 %vm416_vm0, %v4562_v59 }
 0xba7   :  { %9074 = vmatprep.subr.msk.mxu0 %vm416_vm0, %v4746_v61  ;;  %v4162_v35 = vmul.f32 %v9479_v53, %v10716_v29 }
 0xba8   :  { %v4742_v29 = vpop.permute.xlu0 %4741 }
 0xba9   :  { %9043 = vmatprep.mubr.msk.f32.mxu1 %vm416_vm0, %v4162_v35  ;;  %9065 = vmatmul.mubr.msk.f32.vlgmr.msra.gmra.mxu0 %vm416_vm0, %v4560_v10 }
 0xbaa   :  { %9044 = vmatmul.mubr.msk.f32.vlgmr.msra.gmra.mxu1 %vm416_vm0, %v4163_v26  ;;  %9075 = vmatpush3.xpose.msk.msra.mxu0 %vm416_vm0, %v4746_v61 }
 0xbab   :  { %9054 = vmatpush3.msra.mxu1 %v10726_v52  ;;  %9078 = vmatprep.mubr.msk.f32.mxu0 %vm416_vm0, %v4740_v38 }
 0xbac   :  { %9055 = vmatprep.subr.mxu1 %v4430_v6  ;;  %9076 = vmatprep.subr.msk.mxu0 %vm416_vm0, %v4744_v21  ;;  %v9481_v11 = vpop.eup %9480  ;;  %v4651_v52 = vpop.permute.xlu0 %4650 }
 0xbad   :  { %9056 = vmatpush3.msra.mxu1 %v4430_v6  ;;  %v4167_v60 = vmul.f32 %v9481_v11, %v10720_v0  ;;  %v4837_v6 = vpop.permute.xlu1 %4836 }
 0xbae   :  { %v9483_v2 = vpop.eup %9482  ;;  %9067 = vmatprep.subr.msk.mxu1 %vm416_vm0, %v10747_v12  ;;  %9077 = vmatpush3.xpose.msk.msra.mxu0 %vm416_vm0, %v4744_v21 }
 0xbaf   :  { %v4166_v56 = vmul.f32 %v9483_v2, %v10724_v24 }
 0xbb0   :  { %v4831_v0 = vpop.permute.xlu0 %4830 }
 0xbb1   :  { %9057 = vmatprep.mubr.msk.f32.mxu1 %vm416_vm0, %v4166_v56  ;;  %9079 = vmatmul.mubr.msk.f32.vlgmr.msra.gmra.mxu0 %vm416_vm0, %v4742_v29  ;;  %v4835_v24 = vpop.permute.xlu1 %4834 }
 0xbb2   :  { %9058 = vmatmul.mubr.msk.f32.vlgmr.msra.gmra.mxu1 %vm416_vm0, %v4167_v60 }
 0xbb3   :  { %9068 = vmatpush3.xpose.msk.msra.mxu1 %vm416_vm0, %v10747_v12  ;;  %9071 = vmatprep.mubr.msk.f32.mxu1 %vm416_vm0, %v4649_v54 }
 0xbb4   :  { %9069 = vmatprep.subr.msk.mxu1 %vm416_vm0, %v10749_v55 }
 0xbb5   :  { %v4833_v59 = vpop.permute.xlu1 %4832 }
 0xbb7   :  { %9070 = vmatpush3.xpose.msk.msra.mxu1 %vm416_vm0, %v10749_v55 }
 0xbb8   :  { %9081 = vmatprep.subr.msk.mxu1 %vm416_vm0, %v4837_v6 }
 0xbba   :  { %9072 = vmatmul.mubr.msk.f32.vlgmr.msra.gmra.mxu1 %vm416_vm0, %v4651_v52 }
 0xbbb   :  { %9082 = vmatpush3.xpose.msk.msra.mxu1 %vm416_vm0, %v4837_v6  ;;  %9085 = vmatprep.mubr.msk.f32.mxu1 %vm416_vm0, %v4831_v0 }
 0xbbc   :  { %9083 = vmatprep.subr.msk.mxu1 %vm416_vm0, %v4835_v24 }
 0xbbf   :  { %9084 = vmatpush3.xpose.msk.msra.mxu1 %vm416_vm0, %v4835_v24 }
 0xbc2   :  { %9086 = vmatmul.mubr.msk.f32.vlgmr.msra.gmra.mxu1 %vm416_vm0, %v4833_v59 }
 0xc57   :  { %v10796_v12 = vpop.f32.mrf.mxu0 }
 0xc59   :  { %v10798_v3 = vpop.f32.mrf.mxu0 }
 0xc61   :  { %v10800_v10 = vpop.f32.mrf.mxu0 }
 0xc62   :  { %11783 = vst [vmem:[#allocation37_spill] sm:$0xff] %v10800_v10 }
 0xc63   :  { %v10802_v61 = vpop.f32.mrf.mxu0 }
 0xc64   :  { %11784 = vst [vmem:[#allocation38_spill] sm:$0xff] %v10802_v61 }
 0xc69   :  { %v9066_v21 = vpop.f32.mrf.mxu0 }
 0xc6a   :  { %v4924_v55 = vsel %vm416_vm0, %v9066_v21, -inf  ;;  %v10806_v25 = vpop.f32.mrf.mxu1 }
 0xc6b   :  { %4925 = vmax.xlane.f32.xlu1 %v4924_v55  ;;  %v4639_v37 = vpop.f32.mrf.mxu0  ;;  %11785 = vst [vmem:[#allocation39_spill] sm:$0xff] %v10806_v25 }
 0xc6c   :  { %v4921_v57 = vsel %vm416_vm0, %v4639_v37, -inf  ;;  %v10808_v31 = vpop.f32.mrf.mxu1 }
 0xc6d   :  { %4922 = vmax.xlane.f32.xlu0 %v4921_v57  ;;  %11786 = vst [vmem:[#allocation40_spill] sm:$0xff] %v10808_v31 }
 0xc71   :  { %v9080_v62 = vpop.f32.mrf.mxu0 }
 0xc72   :  { %v4936_v14 = vsel %vm416_vm0, %v9080_v62, -inf  ;;  %v10811_v4 = vpop.f32.mrf.mxu1 }
 0xc73   :  { %4937 = vmax.xlane.f32.xlu0 %v4936_v14  ;;  %v4821_v50 = vpop.f32.mrf.mxu0  ;;  %11787 = vst [vmem:[#allocation41_spill] sm:$0xff] %v10811_v4 }
 0xc74   :  { %v4933_v53 = vsel %vm416_vm0, %v4821_v50, -inf  ;;  %v10814_v35 = vpop.f32.mrf.mxu1 }
 0xc75   :  { %11788 = vst [vmem:[#allocation42_spill] sm:$0xff] %v10814_v35 }
 0xc77   :  { %4934 = vmax.xlane.f32.xlu0 %v4933_v53 }
 0xc7a   :  { %v9073_v38 = vpop.f32.mrf.mxu1 }
 0xc7b   :  { %v4930_v26 = vsel %vm416_vm0, %v9073_v38, -inf }
 0xc7c   :  { %4931 = vmax.xlane.f32.xlu1 %v4930_v26  ;;  %v4730_v11 = vpop.f32.mrf.mxu1 }
 0xc7d   :  { %v4927_v2 = vsel %vm416_vm0, %v4730_v11, -inf }
 0xc7e   :  { %4928 = vmax.xlane.f32.xlu0 %v4927_v2 }
 0xc82   :  { %v9087_v29 = vpop.f32.mrf.mxu1 }
 0xc83   :  { %v4942_v54 = vsel %vm416_vm0, %v9087_v29, -inf }
 0xc84   :  { %4943 = vmax.xlane.f32.xlu1 %v4942_v54  ;;  %v4912_v56 = vpop.f32.mrf.mxu1 }
 0xc85   :  { %v4939_v60 = vsel %vm416_vm0, %v4912_v56, -inf }
 0xc86   :  { %4940 = vmax.xlane.f32.xlu0 %v4939_v60 }
 0xc95   :  { %5009 = vrot.lane.b32.xlu1 %v10006_v42, %s9787_s28 }
 0xc99   :  { %5185 = vrot.lane.b32.xlu1 %v10014_v43, %s9787_s28 }
 0xc9c   :  { %5011 = vrot.lane.b32.xlu0 %v9994_v36, %s9787_s28 }
 0xc9d   :  { %5183 = vrot.lane.b32.xlu1 %v9976_v32, %s9787_s28 }
 0xca0   :  { %5098 = vrot.lane.b32.xlu0 %v10022_v44, %s9787_s28 }
 0xca1   :  { %5404 = vrot.lane.b32.xlu1 %v9922_v7, %s9780_s17 }
 0xca4   :  { %5096 = vrot.lane.b32.xlu0 %v10033_v46, %s9787_s28 }
 0xca5   :  { %5272 = vrot.lane.b32.xlu1 %v10039_v48, %s9787_s28 }
 0xca8   :  { %5402 = vrot.lane.b32.xlu0 %v9920_v5, %s9780_s17 }
 0xca9   :  { %5270 = vrot.lane.b32.xlu1 %v10125_v51, %s9787_s28 }
 0xcac   :  { %5398 = vrot.lane.b32.xlu0 %v9912_v1, %s9780_s17 }
 0xcad   :  { %5495 = vrot.lane.b32.xlu1 %v9936_v13, %s9780_s17 }
 0xcb0   :  { %5586 = vrot.lane.b32.xlu0 %v9968_v28, %s9780_s17 }
 0xcb1   :  { %5400 = vrot.lane.b32.xlu1 %v9939_v15, %s9780_s17 }
 0xcb4   :  { %5493 = vrot.lane.b32.xlu0 %v9951_v20, %s9780_s17 }
 0xcb5   :  { %5584 = vrot.lane.b32.xlu1 %v9978_v33, %s9780_s17 }
 0xcf4   :  { %v4926_v52 = vpop.xlane.xlu1 %4925 }
 0xcf5   :  { %v4946_v6 = vsub.f32 %v9066_v21, %v4926_v52 }
 0xcf6   :  { %v4923_v0 = vpop.xlane.xlu0 %4922 }
 0xcf7   :  { %v4955_v24 = vmul.f32 1.442695, %v4946_v6  ;;  %v4945_v59 = vsub.f32 %v4639_v37, %v4923_v0 }
 0xcf9   :  { %9484 = vpow2.f32 %v4955_v24  ;;  %v4953_v55 = vmul.f32 1.442695, %v4945_v59 }
 0xcfb   :  { %9486 = vpow2.f32 %v4953_v55 }
 0xcfc   :  { %v4938_v57 = vpop.xlane.xlu0 %4937 }
 0xcfd   :  { %v4950_v14 = vsub.f32 %v9080_v62, %v4938_v57 }
 0xcff   :  { %v4963_v53 = vmul.f32 1.442695, %v4950_v14 }
 0xd00   :  { %v4935_v26 = vpop.xlane.xlu0 %4934 }
 0xd01   :  { %9488 = vpow2.f32 %v4963_v53  ;;  %v4949_v2 = vsub.f32 %v4821_v50, %v4935_v26 }
 0xd03   :  { %v4961_v54 = vmul.f32 1.442695, %v4949_v2 }
 0xd05   :  { %9490 = vpow2.f32 %v4961_v54  ;;  %v4932_v60 = vpop.xlane.xlu1 %4931 }
 0xd06   :  { %v10852_v35 = vpop.eup %9484  ;;  %v4948_v4 = vsub.f32 %v9073_v38, %v4932_v60 }
 0xd07   :  { %v4929_v61 = vpop.xlane.xlu0 %4928  ;;  %v4972_v21 = vsel %vm416_vm0, %v10852_v35, 0.0 }
 0xd08   :  { %v10856_v37 = vpop.eup %9486  ;;  %v4959_v52 = vmul.f32 1.442695, %v4948_v4  ;;  %v4947_v6 = vsub.f32 %v4730_v11, %v4929_v61  ;;  %4973 = vadd.xlane.f32.xlu1 %v4972_v21 }
 0xd09   :  { %v4969_v62 = vsel %vm416_vm0, %v10856_v37, 0.0 }
 0xd0a   :  { %9492 = vpow2.f32 %v4959_v52  ;;  %v4957_v50 = vmul.f32 1.442695, %v4947_v6  ;;  %4970 = vadd.xlane.f32.xlu0 %v4969_v62 }
 0xd0c   :  { %9494 = vpow2.f32 %v4957_v50 }
 0xd0d   :  { %v4944_v0 = vpop.xlane.xlu1 %4943 }
 0xd0e   :  { %v10860_v24 = vpop.eup %9488  ;;  %v4952_v38 = vsub.f32 %v9087_v29, %v4944_v0 }
 0xd0f   :  { %v4941_v59 = vpop.xlane.xlu0 %4940  ;;  %v4984_v55 = vsel %vm416_vm0, %v10860_v24, 0.0 }
 0xd10   :  { %v4967_v57 = vmul.f32 1.442695, %v4952_v38  ;;  %v4951_v14 = vsub.f32 %v4912_v56, %v4941_v59  ;;  %4985 = vadd.xlane.f32.xlu1 %v4984_v55 }
 0xd11   :  { %v5010_v61 = vpop.permute.xlu1 %5009 }
 0xd12   :  { %v10864_v4 = vpop.eup %9490  ;;  %9496 = vpow2.f32 %v4967_v57  ;;  %v4965_v11 = vmul.f32 1.442695, %v4951_v14 }
 0xd13   :  { %v5012_v53 = vpop.permute.xlu0 %5011  ;;  %v4981_v26 = vsel %vm416_vm0, %v10864_v4, 0.0 }
 0xd14   :  { %9498 = vpow2.f32 %v4965_v11  ;;  %9088 = vmatprep.subr.mxu0 %v5012_v53  ;;  %4982 = vadd.xlane.f32.xlu0 %v4981_v26 }
 0xd15   :  { %v5186_v29 = vpop.permute.xlu1 %5185  ;;  %9089 = vmatpush3.msra.mxu0 %v5012_v53 }
 0xd16   :  { %9090 = vmatprep.subr.mxu0 %v5010_v61 }
 0xd17   :  { %v10868_v2 = vpop.eup %9492  ;;  %9091 = vmatpush3.msra.mxu0 %v5010_v61  ;;  %v5099_v56 = vpop.permute.xlu0 %5098 }
 0xd18   :  { %9095 = vmatprep.subr.mxu1 %v5099_v56  ;;  %9102 = vmatprep.subr.mxu0 %v5186_v29  ;;  %v4978_v54 = vsel %vm416_vm0, %v10868_v2, 0.0 }
 0xd19   :  { %v10872_v60 = vpop.eup %9494  ;;  %v5184_v21 = vpop.permute.xlu1 %5183  ;;  %4979 = vadd.xlane.f32.xlu1 %v4978_v54  ;;  %9096 = vmatpush3.msra.mxu1 %v5099_v56 }
 0xd1a   :  { %v4975_v52 = vsel %vm416_vm0, %v10872_v60, 0.0 }
 0xd1b   :  { %4976 = vadd.xlane.f32.xlu0 %v4975_v52  ;;  %v5097_v6 = vpop.permute.xlu0 %5096 }
 0xd1c   :  { %9097 = vmatprep.subr.mxu1 %v5097_v6 }
 0xd1d   :  { %v5405_v62 = vpop.permute.xlu1 %5404  ;;  %9098 = vmatpush3.msra.mxu1 %v5097_v6 }
 0xd1f   :  { %v10876_v50 = vpop.eup %9496  ;;  %v5403_v14 = vpop.permute.xlu0 %5402 }
 0xd20   :  { %v4990_v0 = vsel %vm416_vm0, %v10876_v50, 0.0 }
 0xd21   :  { %v10880_v38 = vpop.eup %9498  ;;  %v10882_v59 = vpop.permute.xlu1 %5272  ;;  %4991 = vadd.xlane.f32.xlu1 %v4990_v0 }
 0xd22   :  { %9109 = vmatprep.subr.mxu1 %v10882_v59  ;;  %v4987_v55 = vsel %vm416_vm0, %v10880_v38, 0.0 }
 0xd23   :  { %4988 = vadd.xlane.f32.xlu0 %v4987_v55  ;;  %v5399_v11 = vpop.permute.xlu0 %5398 }
 0xd25   :  { %v5271_v57 = vpop.permute.xlu1 %5270 }
 0xd27   :  { %v5587_v26 = vpop.permute.xlu0 %5586 }
 0xd29   :  { %v10903_v61 = vpop.permute.xlu1 %5495 }
 0xd2b   :  { %v10905_v54 = vpop.permute.xlu0 %5493 }
 0xd2d   :  { %v5401_v53 = vpop.permute.xlu1 %5400 }
 0xd31   :  { %v5585_v56 = vpop.permute.xlu1 %5584 }
 0xd32   :  { %5489 = vrot.lane.b32.xlu1 %v9942_v17, %s9780_s17 }
 0xd36   :  { %5677 = vrot.lane.b32.xlu1 %v10003_v41, %s9780_s17 }
 0xd39   :  { %5580 = vrot.lane.b32.xlu0 %v9945_v18, %s9780_s17 }
 0xd3a   :  { %5675 = vrot.lane.b32.xlu1 %v10001_v40, %s9780_s17 }
 0xd3d   :  { %5582 = vrot.lane.b32.xlu0 %v9999_v39, %s9780_s17 }
 0xd3e   :  { %5673 = vrot.lane.b32.xlu1 %v10027_v45, %s9780_s17 }
 0xd41   :  { %5491 = vrot.lane.b32.xlu0 %v9973_v30, %s9780_s17 }
 0xd45   :  { %5671 = vrot.lane.b32.xlu0 %v9981_v34, %s9780_s17 }
 0xd91   :  { %v4974_v52 = vpop.xlane.xlu1 %4973 }
 0xd92   :  { %9500 = vrcp.f32 %v4974_v52 }
 0xd93   :  { %v4971_v6 = vpop.xlane.xlu0 %4970 }
 0xd94   :  { %9502 = vrcp.f32 %v4971_v6 }
 0xd99   :  { %v4986_v0 = vpop.xlane.xlu1 %4985 }
 0xd9a   :  { %9504 = vrcp.f32 %v4986_v0 }
 0xd9d   :  { %v4983_v55 = vpop.xlane.xlu0 %4982 }
 0xd9e   :  { %9506 = vrcp.f32 %v4983_v55 }
 0xd9f   :  { %v9501_v10 = vpop.eup %9500 }
 0xda0   :  { %v5002_v49 = vmul.f32 %v9501_v10, %v10852_v35 }
 0xda1   :  { %v9503_v31 = vpop.eup %9502 }
 0xda2   :  { %v4980_v22 = vpop.xlane.xlu1 %4979  ;;  %v5001_v25 = vmul.f32 %v9503_v31, %v10856_v37 }
 0xda3   :  { %9508 = vrcp.f32 %v4980_v22 }
 0xda4   :  { %v4977_v58 = vpop.xlane.xlu0 %4976  ;;  %9092 = vmatprep.mubr.msk.f32.mxu0 %vm416_vm0, %v5001_v25 }
 0xda5   :  { %9510 = vrcp.f32 %v4977_v58  ;;  %9093 = vmatmul.mubr.msk.f32.vlgmr.msra.gmra.mxu0 %vm416_vm0, %v5002_v49 }
 0xda6   :  { %9103 = vmatpush3.msra.mxu0 %v5186_v29 }
 0xda7   :  { %9104 = vmatprep.subr.mxu0 %v5184_v21  ;;  %v9505_v52 = vpop.eup %9504 }
 0xda8   :  { %9105 = vmatpush3.msra.mxu0 %v5184_v21  ;;  %v5006_v22 = vmul.f32 %v9505_v52, %v10860_v24 }
 0xda9   :  { %9116 = vmatprep.subr.msk.mxu0 %vm416_vm0, %v5405_v62 }
 0xdaa   :  { %v4992_v6 = vpop.xlane.xlu1 %4991 }
 0xdab   :  { %v9507_v0 = vpop.eup %9506  ;;  %9512 = vrcp.f32 %v4992_v6 }
 0xdac   :  { %v4989_v55 = vpop.xlane.xlu0 %4988  ;;  %v5005_v31 = vmul.f32 %v9507_v0, %v10864_v4 }
 0xdad   :  { %9514 = vrcp.f32 %v4989_v55 }
 0xdae   :  { %9106 = vmatprep.mubr.msk.f32.mxu0 %vm416_vm0, %v5005_v31  ;;  %v5490_v29 = vpop.permute.xlu1 %5489 }
 0xdaf   :  { %9107 = vmatmul.mubr.msk.f32.vlgmr.msra.gmra.mxu0 %vm416_vm0, %v5006_v22 }
 0xdb0   :  { %9117 = vmatpush3.xpose.msk.msra.mxu0 %vm416_vm0, %v5405_v62  ;;  %9120 = vmatprep.mubr.msk.f32.mxu0 %vm416_vm0, %v5399_v11  ;;  %v9509_v49 = vpop.eup %9508  ;;  %v5581_v25 = vpop.permute.xlu0 %5580 }
 0xdb1   :  { %9118 = vmatprep.subr.msk.mxu0 %vm416_vm0, %v5403_v14  ;;  %v5004_v35 = vmul.f32 %v9509_v49, %v10868_v2 }
 0xdb2   :  { %v9511_v58 = vpop.eup %9510  ;;  %v5678_v62 = vpop.permute.xlu1 %5677 }
 0xdb3   :  { %v5003_v10 = vmul.f32 %v9511_v58, %v10872_v60 }
 0xdb4   :  { %9119 = vmatpush3.xpose.msk.msra.mxu0 %vm416_vm0, %v5403_v14  ;;  %v5583_v4 = vpop.permute.xlu0 %5582 }
 0xdb5   :  { %9099 = vmatprep.mubr.msk.f32.mxu1 %vm416_vm0, %v5003_v10  ;;  %9130 = vmatprep.subr.msk.mxu0 %vm416_vm0, %v5587_v26 }
 0xdb6   :  { %9100 = vmatmul.mubr.msk.f32.vlgmr.msra.gmra.mxu1 %vm416_vm0, %v5004_v35 }
 0xdb7   :  { %9110 = vmatpush3.msra.mxu1 %v10882_v59  ;;  %9121 = vmatmul.mubr.msk.f32.vlgmr.msra.gmra.mxu0 %vm416_vm0, %v5401_v53 }
 0xdb8   :  { %9111 = vmatprep.subr.mxu1 %v5271_v57  ;;  %9131 = vmatpush3.xpose.msk.msra.mxu0 %vm416_vm0, %v5587_v26  ;;  %v9513_v37 = vpop.eup %9512  ;;  %v5492_v21 = vpop.permute.xlu0 %5491 }
 0xdb9   :  { %9112 = vmatpush3.msra.mxu1 %v5271_v57  ;;  %9134 = vmatprep.mubr.msk.f32.mxu0 %vm416_vm0, %v5581_v25  ;;  %v5008_v60 = vmul.f32 %v9513_v37, %v10876_v50 }
 0xdba   :  { %v9515_v24 = vpop.eup %9514  ;;  %9123 = vmatprep.subr.msk.mxu1 %vm416_vm0, %v10903_v61  ;;  %9132 = vmatprep.subr.msk.mxu0 %vm416_vm0, %v5585_v56 }
 0xdbb   :  { %v5007_v2 = vmul.f32 %v9515_v24, %v10880_v38  ;;  %v5676_v38 = vpop.permute.xlu1 %5675 }
 0xdbc   :  { %9133 = vmatpush3.xpose.msk.msra.mxu0 %vm416_vm0, %v5585_v56  ;;  %v5672_v50 = vpop.permute.xlu0 %5671 }
 0xdbd   :  { %9113 = vmatprep.mubr.msk.f32.mxu1 %vm416_vm0, %v5007_v2 }
 0xdbe   :  { %9114 = vmatmul.mubr.msk.f32.vlgmr.msra.gmra.mxu1 %vm416_vm0, %v5008_v60 }
 0xdbf   :  { %9124 = vmatpush3.xpose.msk.msra.mxu1 %vm416_vm0, %v10903_v61  ;;  %9127 = vmatprep.mubr.msk.f32.mxu1 %vm416_vm0, %v5490_v29  ;;  %v5674_v59 = vpop.permute.xlu1 %5673 }
 0xdc0   :  { %9125 = vmatprep.subr.msk.mxu1 %vm416_vm0, %v10905_v54  ;;  %9135 = vmatmul.mubr.msk.f32.vlgmr.msra.gmra.mxu0 %vm416_vm0, %v5583_v4 }
 0xdc3   :  { %9126 = vmatpush3.xpose.msk.msra.mxu1 %vm416_vm0, %v10905_v54 }
 0xdc4   :  { %9137 = vmatprep.subr.msk.mxu1 %vm416_vm0, %v5678_v62 }
 0xdc6   :  { %9128 = vmatmul.mubr.msk.f32.vlgmr.msra.gmra.mxu1 %vm416_vm0, %v5492_v21 }
 0xdc7   :  { %9138 = vmatpush3.xpose.msk.msra.mxu1 %vm416_vm0, %v5678_v62  ;;  %9141 = vmatprep.mubr.msk.f32.mxu1 %vm416_vm0, %v5672_v50 }
 0xdc8   :  { %9139 = vmatprep.subr.msk.mxu1 %vm416_vm0, %v5676_v38 }
 0xdcb   :  { %9140 = vmatpush3.xpose.msk.msra.mxu1 %vm416_vm0, %v5676_v38 }
 0xdce   :  { %9142 = vmatmul.mubr.msk.f32.vlgmr.msra.gmra.mxu1 %vm416_vm0, %v5674_v59 }
 0xe65   :  { %v10952_v57 = vpop.f32.mrf.mxu0 }
 0xe67   :  { %v10954_v14 = vpop.f32.mrf.mxu0 }
 0xe6f   :  { %v10956_v61 = vpop.f32.mrf.mxu0 }
 0xe71   :  { %v10958_v11 = vpop.f32.mrf.mxu0 }
 0xe76   :  { %v10961_v54 = vpop.f32.mrf.mxu1 }
 0xe77   :  { %v9122_v53 = vpop.f32.mrf.mxu0 }
 0xe78   :  { %v5765_v26 = vsel %vm416_vm0, %v9122_v53, -inf  ;;  %v10964_v6 = vpop.f32.mrf.mxu1 }
 0xe79   :  { %5766 = vmax.xlane.f32.xlu1 %v5765_v26  ;;  %v5480_v56 = vpop.f32.mrf.mxu0 }
 0xe7a   :  { %v5762_v52 = vsel %vm416_vm0, %v5480_v56, -inf }
 0xe7b   :  { %5763 = vmax.xlane.f32.xlu0 %v5762_v52 }
 0xe7e   :  { %v10966_v0 = vpop.f32.mrf.mxu1 }
 0xe80   :  { %v9136_v55 = vpop.f32.mrf.mxu0  ;;  %v10969_v49 = vpop.f32.mrf.mxu1 }
 0xe81   :  { %v5777_v31 = vsel %vm416_vm0, %v9136_v55, -inf }
 0xe82   :  { %5778 = vmax.xlane.f32.xlu0 %v5777_v31  ;;  %v5662_v22 = vpop.f32.mrf.mxu0 }
 0xe83   :  { %v5774_v58 = vsel %vm416_vm0, %v5662_v22, -inf }
 0xe86   :  { %5775 = vmax.xlane.f32.xlu0 %v5774_v58  ;;  %v9129_v10 = vpop.f32.mrf.mxu1 }
 0xe87   :  { %v5771_v25 = vsel %vm416_vm0, %v9129_v10, -inf }
 0xe88   :  { %5772 = vmax.xlane.f32.xlu1 %v5771_v25  ;;  %v5571_v35 = vpop.f32.mrf.mxu1 }
 0xe89   :  { %v5768_v37 = vsel %vm416_vm0, %v5571_v35, -inf }
 0xe8a   :  { %5769 = vmax.xlane.f32.xlu0 %v5768_v37 }
 0xe8e   :  { %v9143_v24 = vpop.f32.mrf.mxu1 }
 0xe8f   :  { %v5783_v4 = vsel %vm416_vm0, %v9143_v24, -inf }
 0xe90   :  { %5784 = vmax.xlane.f32.xlu1 %v5783_v4  ;;  %v5753_v29 = vpop.f32.mrf.mxu1 }
 0xe91   :  { %v5780_v2 = vsel %vm416_vm0, %v5753_v29, -inf }
 0xe92   :  { %5781 = vmax.xlane.f32.xlu0 %v5780_v2 }
 0xea1   :  { %5850 = vrot.lane.b32.xlu1 %v10006_v42, %s9780_s17 }
 0xea5   :  { %6026 = vrot.lane.b32.xlu1 %v10014_v43, %s9780_s17 }
 0xea8   :  { %5852 = vrot.lane.b32.xlu0 %v9994_v36, %s9780_s17 }
 0xea9   :  { %6024 = vrot.lane.b32.xlu1 %v9976_v32, %s9780_s17 }
 0xeac   :  { %5939 = vrot.lane.b32.xlu0 %v10022_v44, %s9780_s17 }
 0xead   :  { %6245 = vrot.lane.b32.xlu1 %v9922_v7, %s9788_s4 }
 0xeb0   :  { %5937 = vrot.lane.b32.xlu0 %v10033_v46, %s9780_s17 }
 0xeb1   :  { %6113 = vrot.lane.b32.xlu1 %v10039_v48, %s9780_s17 }
 0xeb4   :  { %6243 = vrot.lane.b32.xlu0 %v9920_v5, %s9788_s4 }
 0xeb5   :  { %6111 = vrot.lane.b32.xlu1 %v10125_v51, %s9780_s17 }
 0xeb8   :  { %6239 = vrot.lane.b32.xlu0 %v9912_v1, %s9788_s4 }
 0xeb9   :  { %6241 = vrot.lane.b32.xlu1 %v9939_v15, %s9788_s4 }
 0xf02   :  { %v5767_v60 = vpop.xlane.xlu1 %5766 }
 0xf03   :  { %v5787_v7 = vsub.f32 %v9122_v53, %v5767_v60 }
 0xf04   :  { %v5764_v21 = vpop.xlane.xlu0 %5763 }
 0xf05   :  { %v5796_v62 = vmul.f32 1.442695, %v5787_v7  ;;  %v5786_v50 = vsub.f32 %v5480_v56, %v5764_v21 }
 0xf07   :  { %9516 = vpow2.f32 %v5796_v62  ;;  %v5794_v38 = vmul.f32 1.442695, %v5786_v50 }
 0xf09   :  { %9518 = vpow2.f32 %v5794_v38 }
 0xf0b   :  { %v5779_v59 = vpop.xlane.xlu0 %5778 }
 0xf0c   :  { %v5791_v26 = vsub.f32 %v9136_v55, %v5779_v59 }
 0xf0e   :  { %v5804_v5 = vmul.f32 1.442695, %v5791_v26 }
 0xf0f   :  { %v5776_v52 = vpop.xlane.xlu0 %5775 }
 0xf10   :  { %9520 = vpow2.f32 %v5804_v5  ;;  %v5790_v31 = vsub.f32 %v5662_v22, %v5776_v52 }
 0xf11   :  { %v5773_v58 = vpop.xlane.xlu1 %5772 }
 0xf12   :  { %v5802_v25 = vmul.f32 1.442695, %v5790_v31  ;;  %v5789_v1 = vsub.f32 %v9129_v10, %v5773_v58 }
 0xf13   :  { %v5770_v37 = vpop.xlane.xlu0 %5769 }
 0xf14   :  { %v11000_v4 = vpop.eup %9516  ;;  %9522 = vpow2.f32 %v5802_v25  ;;  %v5800_v15 = vmul.f32 1.442695, %v5789_v1  ;;  %v5788_v53 = vsub.f32 %v5571_v35, %v5770_v37 }
 0xf15   :  { %v5813_v56 = vsel %vm416_vm0, %v11000_v4, 0.0 }
 0xf16   :  { %v11004_v2 = vpop.eup %9518  ;;  %9524 = vpow2.f32 %v5800_v15  ;;  %v5798_v55 = vmul.f32 1.442695, %v5788_v53  ;;  %5814 = vadd.xlane.f32.xlu1 %v5813_v56 }
 0xf17   :  { %v5810_v22 = vsel %vm416_vm0, %v11004_v2, 0.0 }
 0xf18   :  { %9526 = vpow2.f32 %v5798_v55  ;;  %5811 = vadd.xlane.f32.xlu0 %v5810_v22 }
 0xf19   :  { %v5785_v10 = vpop.xlane.xlu1 %5784 }
 0xf1a   :  { %v5793_v60 = vsub.f32 %v9143_v24, %v5785_v10 }
 0xf1b   :  { %v5782_v7 = vpop.xlane.xlu0 %5781 }
 0xf1c   :  { %v5808_v21 = vmul.f32 1.442695, %v5793_v60  ;;  %v5792_v62 = vsub.f32 %v5753_v29, %v5782_v7 }
 0xf1d   :  { %v11008_v50 = vpop.eup %9520  ;;  %v5851_v35 = vpop.permute.xlu1 %5850 }
 0xf1e   :  { %9528 = vpow2.f32 %v5808_v21  ;;  %v5806_v38 = vmul.f32 1.442695, %v5792_v62  ;;  %v5825_v59 = vsel %vm416_vm0, %v11008_v50, 0.0 }
 0xf1f   :  { %5826 = vadd.xlane.f32.xlu1 %v5825_v59  ;;  %v5853_v26 = vpop.permute.xlu0 %5852 }
 0xf20   :  { %9530 = vpow2.f32 %v5806_v38  ;;  %9144 = vmatprep.subr.mxu0 %v5853_v26 }
 0xf21   :  { %v11012_v5 = vpop.eup %9522  ;;  %v11014_v52 = vpop.permute.xlu1 %6026  ;;  %9145 = vmatpush3.msra.mxu0 %v5853_v26 }
 0xf22   :  { %9146 = vmatprep.subr.mxu0 %v5851_v35  ;;  %v5822_v24 = vsel %vm416_vm0, %v11012_v5, 0.0 }
 0xf23   :  { %v11018_v29 = vpop.eup %9524  ;;  %5823 = vadd.xlane.f32.xlu0 %v5822_v24  ;;  %9147 = vmatpush3.msra.mxu0 %v5851_v35  ;;  %v5940_v31 = vpop.permute.xlu0 %5939 }
 0xf24   :  { %9151 = vmatprep.subr.mxu1 %v5940_v31  ;;  %9158 = vmatprep.subr.mxu0 %v11014_v52  ;;  %v5819_v58 = vsel %vm416_vm0, %v11018_v29, 0.0 }
 0xf25   :  { %v11023_v25 = vpop.eup %9526  ;;  %v6025_v1 = vpop.permute.xlu1 %6024  ;;  %5820 = vadd.xlane.f32.xlu1 %v5819_v58  ;;  %9152 = vmatpush3.msra.mxu1 %v5940_v31 }
 0xf26   :  { %v5816_v37 = vsel %vm416_vm0, %v11023_v25, 0.0 }
 0xf27   :  { %5817 = vadd.xlane.f32.xlu0 %v5816_v37  ;;  %v5938_v15 = vpop.permute.xlu0 %5937 }
 0xf28   :  { %9153 = vmatprep.subr.mxu1 %v5938_v15 }
 0xf29   :  { %v6246_v53 = vpop.permute.xlu1 %6245  ;;  %9154 = vmatpush3.msra.mxu1 %v5938_v15 }
 0xf2b   :  { %v11027_v56 = vpop.eup %9528 }
 0xf2c   :  { %v5831_v55 = vsel %vm416_vm0, %v11027_v56, 0.0 }
 0xf2d   :  { %v11031_v22 = vpop.eup %9530  ;;  %v11033_v10 = vpop.permute.xlu1 %6113  ;;  %5832 = vadd.xlane.f32.xlu1 %v5831_v55 }
 0xf2e   :  { %9165 = vmatprep.subr.mxu1 %v11033_v10  ;;  %v5828_v60 = vsel %vm416_vm0, %v11031_v22, 0.0 }
 0xf2f   :  { %5829 = vadd.xlane.f32.xlu0 %v5828_v60 }
 0xf3e   :  { %6334 = vrot.lane.b32.xlu1 %v9951_v20, %s9788_s4 }
 0xf42   :  { %6332 = vrot.lane.b32.xlu1 %v9973_v30, %s9788_s4 }
 0xf45   :  { %6336 = vrot.lane.b32.xlu0 %v9936_v13, %s9788_s4  ;;  %v6112_v13 = vpop.permute.xlu1 %6111 }
 0xf46   :  { %6425 = vrot.lane.b32.xlu1 %v9978_v33, %s9788_s4 }
 0xf49   :  { %6330 = vrot.lane.b32.xlu0 %v9942_v17, %s9788_s4  ;;  %v6244_v17 = vpop.permute.xlu0 %6243  ;;  %v6242_v20 = vpop.permute.xlu1 %6241 }
 0xf4a   :  { %6423 = vrot.lane.b32.xlu1 %v9999_v39, %s9788_s4 }
 0xf4d   :  { %6427 = vrot.lane.b32.xlu0 %v9968_v28, %s9788_s4  ;;  %v6240_v30 = vpop.permute.xlu0 %6239 }
 0xf4e   :  { %6516 = vrot.lane.b32.xlu1 %v10001_v40, %s9788_s4 }
 0xf51   :  { %6421 = vrot.lane.b32.xlu0 %v9945_v18, %s9788_s4 }
 0xf52   :  { %6514 = vrot.lane.b32.xlu1 %v10027_v45, %s9788_s4 }
 0xf55   :  { %6518 = vrot.lane.b32.xlu0 %v10003_v41, %s9788_s4 }
 0xf59   :  { %6512 = vrot.lane.b32.xlu0 %v9981_v34, %s9788_s4 }
 0xf9f   :  { %v5815_v28 = vpop.xlane.xlu1 %5814 }
 0xfa0   :  { %9532 = vrcp.f32 %v5815_v28 }
 0xfa1   :  { %v5812_v33 = vpop.xlane.xlu0 %5811 }
 0xfa2   :  { %9534 = vrcp.f32 %v5812_v33 }
 0xfa8   :  { %v5827_v39 = vpop.xlane.xlu1 %5826 }
 0xfa9   :  { %9536 = vrcp.f32 %v5827_v39 }
 0xfac   :  { %v5824_v18 = vpop.xlane.xlu0 %5823 }
 0xfad   :  { %9538 = vrcp.f32 %v5824_v18  ;;  %v9533_v40 = vpop.eup %9532 }
 0xfae   :  { %v5821_v45 = vpop.xlane.xlu1 %5820  ;;  %v5843_v34 = vmul.f32 %v9533_v40, %v11000_v4 }
 0xfaf   :  { %v9535_v7 = vpop.eup %9534  ;;  %9540 = vrcp.f32 %v5821_v45 }
 0xfb0   :  { %v5818_v41 = vpop.xlane.xlu0 %5817  ;;  %v5842_v21 = vmul.f32 %v9535_v7, %v11004_v2 }
 0xfb1   :  { %9542 = vrcp.f32 %v5818_v41 }
 0xfb2   :  { %9148 = vmatprep.mubr.msk.f32.mxu0 %vm416_vm0, %v5842_v21 }
 0xfb3   :  { %9149 = vmatmul.mubr.msk.f32.vlgmr.msra.gmra.mxu0 %vm416_vm0, %v5843_v34 }
 0xfb4   :  { %9159 = vmatpush3.msra.mxu0 %v11014_v52 }
 0xfb5   :  { %9160 = vmatprep.subr.mxu0 %v6025_v1 }
 0xfb6   :  { %v5833_v62 = vpop.xlane.xlu1 %5832  ;;  %9161 = vmatpush3.msra.mxu0 %v6025_v1  ;;  %v9537_v38 = vpop.eup %9536 }
 0xfb7   :  { %9172 = vmatprep.subr.msk.mxu0 %vm416_vm0, %v6246_v53  ;;  %9544 = vrcp.f32 %v5833_v62  ;;  %v5847_v24 = vmul.f32 %v9537_v38, %v11008_v50 }
 0xfb8   :  { %v5830_v35 = vpop.xlane.xlu0 %5829 }
 0xfb9   :  { %9546 = vrcp.f32 %v5830_v35 }
 0xfba   :  { %v9539_v59 = vpop.eup %9538  ;;  %v6335_v2 = vpop.permute.xlu1 %6334 }
 0xfbb   :  { %v5846_v26 = vmul.f32 %v9539_v59, %v11012_v5 }
 0xfbc   :  { %v6337_v4 = vpop.permute.xlu0 %6336  ;;  %v9541_v31 = vpop.eup %9540 }
 0xfbd   :  { %9162 = vmatprep.mubr.msk.f32.mxu0 %vm416_vm0, %v5846_v26  ;;  %v5845_v5 = vmul.f32 %v9541_v31, %v11018_v29 }
 0xfbe   :  { %v9543_v52 = vpop.eup %9542  ;;  %9163 = vmatmul.mubr.msk.f32.vlgmr.msra.gmra.mxu0 %vm416_vm0, %v5847_v24  ;;  %v6333_v37 = vpop.permute.xlu1 %6332 }
 0xfbf   :  { %9173 = vmatpush3.xpose.msk.msra.mxu0 %vm416_vm0, %v6246_v53  ;;  %9176 = vmatprep.mubr.msk.f32.mxu0 %vm416_vm0, %v6240_v30  ;;  %v5844_v58 = vmul.f32 %v9543_v52, %v11023_v25 }
 0xfc0   :  { %9174 = vmatprep.subr.msk.mxu0 %vm416_vm0, %v6244_v17  ;;  %v6331_v1 = vpop.permute.xlu0 %6330 }
 0xfc1   :  { %9155 = vmatprep.mubr.msk.f32.mxu1 %vm416_vm0, %v5844_v58 }
 0xfc2   :  { %9156 = vmatmul.mubr.msk.f32.vlgmr.msra.gmra.mxu1 %vm416_vm0, %v5845_v5  ;;  %v6426_v29 = vpop.permute.xlu1 %6425 }
 0xfc3   :  { %9166 = vmatpush3.msra.mxu1 %v11033_v10  ;;  %9175 = vmatpush3.xpose.msk.msra.mxu0 %vm416_vm0, %v6244_v17 }
 0xfc4   :  { %9167 = vmatprep.subr.mxu1 %v6112_v13  ;;  %v6428_v50 = vpop.permute.xlu0 %6427  ;;  %v9545_v15 = vpop.eup %9544 }
 0xfc5   :  { %9168 = vmatpush3.msra.mxu1 %v6112_v13  ;;  %9186 = vmatprep.subr.msk.mxu0 %vm416_vm0, %v6428_v50  ;;  %v5849_v10 = vmul.f32 %v9545_v15, %v11027_v56 }
 0xfc6   :  { %v9547_v25 = vpop.eup %9546  ;;  %9177 = vmatmul.mubr.msk.f32.vlgmr.msra.gmra.mxu0 %vm416_vm0, %v6242_v20  ;;  %9179 = vmatprep.subr.msk.mxu1 %vm416_vm0, %v6337_v4  ;;  %v6424_v60 = vpop.permute.xlu1 %6423 }
 0xfc7   :  { %9187 = vmatpush3.xpose.msk.msra.mxu0 %vm416_vm0, %v6428_v50  ;;  %v5848_v53 = vmul.f32 %v9547_v25, %v11031_v22 }
 0xfc8   :  { %9188 = vmatprep.subr.msk.mxu0 %vm416_vm0, %v6426_v29  ;;  %v6422_v55 = vpop.permute.xlu0 %6421 }
 0xfc9   :  { %9169 = vmatprep.mubr.msk.f32.mxu1 %vm416_vm0, %v5848_v53  ;;  %9190 = vmatprep.mubr.msk.f32.mxu0 %vm416_vm0, %v6422_v55 }
 0xfca   :  { %9170 = vmatmul.mubr.msk.f32.vlgmr.msra.gmra.mxu1 %vm416_vm0, %v5849_v10  ;;  %v6517_v13 = vpop.permute.xlu1 %6516 }
 0xfcb   :  { %9180 = vmatpush3.xpose.msk.msra.mxu1 %vm416_vm0, %v6337_v4  ;;  %9189 = vmatpush3.xpose.msk.msra.mxu0 %vm416_vm0, %v6426_v29 }
 0xfcc   :  { %9181 = vmatprep.subr.msk.mxu1 %vm416_vm0, %v6335_v2  ;;  %9183 = vmatprep.mubr.msk.f32.mxu1 %vm416_vm0, %v6331_v1  ;;  %v6519_v22 = vpop.permute.xlu0 %6518 }
 0xfce   :  { %9191 = vmatmul.mubr.msk.f32.vlgmr.msra.gmra.mxu0 %vm416_vm0, %v6424_v60  ;;  %v6515_v17 = vpop.permute.xlu1 %6514 }
 0xfcf   :  { %9182 = vmatpush3.xpose.msk.msra.mxu1 %vm416_vm0, %v6335_v2 }
 0xfd0   :  { %9193 = vmatprep.subr.msk.mxu1 %vm416_vm0, %v6519_v22  ;;  %v6513_v56 = vpop.permute.xlu0 %6512 }
 0xfd2   :  { %9184 = vmatmul.mubr.msk.f32.vlgmr.msra.gmra.mxu1 %vm416_vm0, %v6333_v37 }
 0xfd3   :  { %9194 = vmatpush3.xpose.msk.msra.mxu1 %vm416_vm0, %v6519_v22  ;;  %9197 = vmatprep.mubr.msk.f32.mxu1 %vm416_vm0, %v6513_v56 }
 0xfd4   :  { %9195 = vmatprep.subr.msk.mxu1 %vm416_vm0, %v6517_v13 }
 0xfd7   :  { %9196 = vmatpush3.xpose.msk.msra.mxu1 %vm416_vm0, %v6517_v13 }
 0xfda   :  { %9198 = vmatmul.mubr.msk.f32.vlgmr.msra.gmra.mxu1 %vm416_vm0, %v6515_v17 }
0x1073   :  { %v11104_v20 = vpop.f32.mrf.mxu0 }
0x1075   :  { %v11106_v30 = vpop.f32.mrf.mxu0 }
0x107e   :  { %v11108_v28 = vpop.f32.mrf.mxu0 }
0x1080   :  { %v11110_v33 = vpop.f32.mrf.mxu0 }
0x1082   :  { %v11112_v39 = vpop.f32.mrf.mxu1 }
0x1084   :  { %v11116_v41 = vpop.f32.mrf.mxu1 }
0x1086   :  { %v9178_v18 = vpop.f32.mrf.mxu0 }
0x1087   :  { %v6606_v40 = vsel %vm416_vm0, %v9178_v18, -inf }
0x1088   :  { %6607 = vmax.xlane.f32.xlu1 %v6606_v40  ;;  %v6321_v45 = vpop.f32.mrf.mxu0 }
0x1089   :  { %v6603_v7 = vsel %vm416_vm0, %v6321_v45, -inf }
0x108a   :  { %6604 = vmax.xlane.f32.xlu0 %v6603_v7  ;;  %v11118_v21 = vpop.f32.mrf.mxu1 }
0x108c   :  { %v11121_v35 = vpop.f32.mrf.mxu1 }
0x108e   :  { %v9192_v34 = vpop.f32.mrf.mxu0 }
0x108f   :  { %v6618_v62 = vsel %vm416_vm0, %v9192_v34, -inf }
0x1090   :  { %6619 = vmax.xlane.f32.xlu1 %v6618_v62  ;;  %v11125_v4 = vpop.f32.mrf.mxu0 }
0x1091   :  { %v6615_v31 = vsel %vm416_vm0, %v11125_v4, -inf }
0x1092   :  { %v9185_v38 = vpop.f32.mrf.mxu1 }
0x1093   :  { %v6612_v59 = vsel %vm416_vm0, %v9185_v38, -inf }
0x1094   :  { %6613 = vmax.xlane.f32.xlu0 %v6612_v59  ;;  %v6412_v2 = vpop.f32.mrf.mxu1 }
0x1095   :  { %v6609_v26 = vsel %vm416_vm0, %v6412_v2, -inf }
0x1098   :  { %6610 = vmax.xlane.f32.xlu0 %v6609_v26 }
0x109a   :  { %v11127_v24 = vpop.f32.mrf.mxu1 }
0x109b   :  { %v6624_v52 = vsel %vm416_vm0, %v11127_v24, -inf }
0x109c   :  { %6616 = vmax.xlane.f32.xlu0 %v6615_v31  ;;  %6625 = vmax.xlane.f32.xlu1 %v6624_v52  ;;  %v11133_v58 = vpop.f32.mrf.mxu1 }
0x109d   :  { %v6621_v1 = vsel %vm416_vm0, %v11133_v58, -inf }
0x10a0   :  { %6622 = vmax.xlane.f32.xlu0 %v6621_v1 }
0x10ad   :  { %6691 = vrot.lane.b32.xlu1 %v10006_v42, %s9788_s4 }
0x10b1   :  { %6780 = vrot.lane.b32.xlu1 %v10022_v44, %s9788_s4 }
0x10b5   :  { %6778 = vrot.lane.b32.xlu1 %v10033_v46, %s9788_s4 }
0x10b6   :  { %6693 = vrot.lane.b32.xlu0 %v9994_v36, %s9788_s4 }
0x1111   :  { %v6608_v5 = vpop.xlane.xlu1 %6607 }
0x1112   :  { %v6628_v37 = vsub.f32 %v9178_v18, %v6608_v5 }
0x1113   :  { %v6605_v50 = vpop.xlane.xlu0 %6604 }
0x1114   :  { %v6637_v15 = vmul.f32 1.442695, %v6628_v37  ;;  %v6627_v25 = vsub.f32 %v6321_v45, %v6605_v50 }
0x1116   :  { %9548 = vpow2.f32 %v6637_v15  ;;  %v6635_v29 = vmul.f32 1.442695, %v6627_v25 }
0x1118   :  { %9550 = vpow2.f32 %v6635_v29 }
0x1119   :  { %v6620_v53 = vpop.xlane.xlu1 %6619 }
0x111a   :  { %v6632_v55 = vsub.f32 %v9192_v34, %v6620_v53 }
0x111c   :  { %v6645_v22 = vmul.f32 1.442695, %v6632_v55 }
0x111d   :  { %v6614_v42 = vpop.xlane.xlu0 %6613 }
0x111e   :  { %v6630_v10 = vsub.f32 %v9185_v38, %v6614_v42 }
0x1120   :  { %v6641_v44 = vmul.f32 1.442695, %v6630_v10 }
0x1121   :  { %v6611_v60 = vpop.xlane.xlu0 %6610 }
0x1122   :  { %9552 = vpow2.f32 %v6641_v44  ;;  %v6629_v46 = vsub.f32 %v6412_v2, %v6611_v60  ;;  %v11803_v60 = vld [vmem:[#allocation24_spill] sm:$0xff] }
0x1123   :  { %v11145_v56 = vpop.eup %9548  ;;  %9554 = vpow2.f32 %v6645_v22 }
0x1124   :  { %v6639_v36 = vmul.f32 1.442695, %v6629_v46  ;;  %v6654_v13 = vsel %vm416_vm0, %v11145_v56, 0.0  ;;  %v11804_v46 = vld [vmem:[#allocation29_spill] sm:$0xff] }
0x1125   :  { %v11149_v17 = vpop.eup %9550  ;;  %6655 = vadd.xlane.f32.xlu1 %v6654_v13  ;;  %v6626_v18 = vpop.xlane.xlu1 %6625  ;;  %v11805_v13 = vld [vmem:[#allocation35_spill] sm:$0xff] }
0x1126   :  { %v6617_v40 = vpop.xlane.xlu0 %6616  ;;  %9556 = vpow2.f32 %v6639_v36  ;;  %v6651_v45 = vsel %vm416_vm0, %v11149_v17, 0.0  ;;  %v6634_v37 = vsub.f32 %v11127_v24, %v6626_v18  ;;  %v11806_v18 = vld [vmem:[#allocation25_spill] sm:$0xff] }
0x1127   :  { %6652 = vadd.xlane.f32.xlu0 %v6651_v45  ;;  %v6631_v50 = vsub.f32 %v11125_v4, %v6617_v40 }
0x1128   :  { %v6649_v15 = vmul.f32 1.442695, %v6634_v37 }
0x1129   :  { %v6692_v7 = vpop.permute.xlu1 %6691  ;;  %v6643_v25 = vmul.f32 1.442695, %v6631_v50 }
0x112a   :  { %v6623_v34 = vpop.xlane.xlu0 %6622  ;;  %9558 = vpow2.f32 %v6649_v15 }
0x112b   :  { %v6633_v29 = vsub.f32 %v11133_v58, %v6623_v34  ;;  %9560 = vpow2.f32 %v6643_v25  ;;  %v11801_v58 = vld [vmem:[#allocation32_spill] sm:$0xff] }
0x112d   :  { %v6781_v62 = vpop.permute.xlu1 %6780  ;;  %v6647_v53 = vmul.f32 1.442695, %v6633_v29 }
0x112e   :  { %v6694_v38 = vpop.permute.xlu0 %6693  ;;  %9207 = vmatprep.subr.mxu1 %v6781_v62 }
0x112f   :  { %9200 = vmatprep.subr.mxu0 %v6694_v38  ;;  %v11153_v59 = vpop.eup %9552  ;;  %9208 = vmatpush3.msra.mxu1 %v6781_v62  ;;  %9562 = vpow2.f32 %v6647_v53 }
0x1130   :  { %9201 = vmatpush3.msra.mxu0 %v6694_v38  ;;  %v6660_v2 = vsel %vm416_vm0, %v11153_v59, 0.0  ;;  %v11157_v26 = vpop.eup %9554 }
0x1131   :  { %9202 = vmatprep.subr.mxu0 %v6692_v7  ;;  %v6779_v31 = vpop.permute.xlu1 %6778  ;;  %6661 = vadd.xlane.f32.xlu1 %v6660_v2  ;;  %v6666_v1 = vsel %vm416_vm0, %v11157_v26, 0.0 }
0x1132   :  { %9203 = vmatpush3.msra.mxu0 %v6692_v7  ;;  %9209 = vmatprep.subr.mxu1 %v6779_v31 }
0x1133   :  { %v11159_v52 = vpop.eup %9556  ;;  %9210 = vmatpush3.msra.mxu1 %v6779_v31 }
0x1134   :  { %v6657_v5 = vsel %vm416_vm0, %v11159_v52, 0.0 }
0x1135   :  { %6667 = vadd.xlane.f32.xlu1 %v6666_v1  ;;  %6658 = vadd.xlane.f32.xlu0 %v6657_v5 }
0x1137   :  { %v11172_v55 = vpop.eup %9558 }
0x1138   :  { %v11174_v42 = vpop.eup %9560 }
0x113c   :  { %v11180_v24 = vpop.eup %9562 }
0x113d   :  { %v6669_v4 = vsel %vm416_vm0, %v11180_v24, 0.0 }
0x1146   :  { %6865 = vrot.lane.b32.xlu1 %v9976_v32, %s9788_s4  ;;  %v6672_v32 = vsel %vm416_vm0, %v11172_v55, 0.0 }
0x114b   :  { %6867 = vrot.lane.b32.xlu0 %v10014_v43, %s9788_s4  ;;  %v6663_v43 = vsel %vm416_vm0, %v11174_v42, 0.0 }
0x116a   :  { %6673 = vadd.xlane.f32.xlu1 %v6672_v32  ;;  %6664 = vadd.xlane.f32.xlu0 %v6663_v43 }
0x116e   :  { %6670 = vadd.xlane.f32.xlu0 %v6669_v4 }
0x117b   :  { %6952 = vrot.lane.b32.xlu1 %v10125_v51, %s9788_s4  ;;  %v11790_v51 = vld [vmem:[#allocation23_spill] sm:$0xff] }
0x117f   :  { %2003 = vrot.lane.b32.xlu1 %v10320_v63, %s9788_s4  ;;  %v11791_v63 = vld [vmem:[#allocation39_spill] sm:$0xff] }
0x1183   :  { %2844 = vrot.lane.b32.xlu1 %v10480_v47, %s9780_s17  ;;  %v11794_v47 = vld [vmem:[#allocation40_spill] sm:$0xff] }
0x1184   :  { %6954 = vrot.lane.b32.xlu0 %v10039_v48, %s9788_s4  ;;  %v11789_v48 = vld [vmem:[#allocation33_spill] sm:$0xff] }
0x1187   :  { %3685 = vrot.lane.b32.xlu1 %v10640_v8, %s9787_s28 }
0x1188   :  { %2001 = vrot.lane.b32.xlu0 %v10322_v16, %s9788_s4  ;;  %v11792_v16 = vld [vmem:[#allocation28_spill] sm:$0xff] }
0x118b   :  { %4526 = vrot.lane.b32.xlu1 %v10796_v12, %s9786_s27  ;;  %v11797_v12 = vld [vmem:[#allocation31_spill] sm:$0xff] }
0x118c   :  { %2842 = vrot.lane.b32.xlu0 %v10482_v9, %s9780_s17 }
0x118f   :  { %5367 = vrot.lane.b32.xlu1 %v10952_v57, %s9785_s26 }
0x1190   :  { %3683 = vrot.lane.b32.xlu0 %v10642_v19, %s9787_s28  ;;  %v11796_v19 = vld [vmem:[#allocation26_spill] sm:$0xff] }
0x1193   :  { %6208 = vrot.lane.b32.xlu1 %v11104_v20, %s9784_s2 }
0x1194   :  { %4524 = vrot.lane.b32.xlu0 %v10798_v3, %s9786_s27  ;;  %v11798_v3 = vld [vmem:[#allocation22_spill] sm:$0xff] }
0x1197   :  { %2007 = vrot.lane.b32.xlu1 %v10331_v23, %s9788_s4  ;;  %v11793_v23 = vld [vmem:[#allocation34_spill] sm:$0xff] }
0x1198   :  { %5365 = vrot.lane.b32.xlu0 %v10954_v14, %s9785_s26  ;;  %v11799_v14 = vld [vmem:[#allocation37_spill] sm:$0xff] }
0x119b   :  { %2848 = vrot.lane.b32.xlu1 %v10490_v27, %s9780_s17  ;;  %v11795_v27 = vld [vmem:[#allocation21_spill] sm:$0xff] }
0x119c   :  { %6206 = vrot.lane.b32.xlu0 %v11106_v30, %s9784_s2 }
0x119f   :  { %3689 = vrot.lane.b32.xlu1 %v11789_v48, %s9787_s28 }
0x11a0   :  { %2005 = vrot.lane.b32.xlu0 %v11790_v51, %s9788_s4 }
0x11a3   :  { %4530 = vrot.lane.b32.xlu1 %v11791_v63, %s9786_s27 }
0x11a4   :  { %2846 = vrot.lane.b32.xlu0 %v11792_v16, %s9780_s17 }
0x11a7   :  { %5371 = vrot.lane.b32.xlu1 %v10961_v54, %s9785_s26  ;;  %v11800_v54 = vld [vmem:[#allocation27_spill] sm:$0xff] }
0x11a8   :  { %3687 = vrot.lane.b32.xlu0 %v11793_v23, %s9787_s28 }
0x11ab   :  { %6212 = vrot.lane.b32.xlu1 %v11112_v39, %s9784_s2 }
0x11ac   :  { %4528 = vrot.lane.b32.xlu0 %v11794_v47, %s9786_s27 }
0x11ae   :  { %v6656_v9 = vpop.xlane.xlu1 %6655 }
0x11af   :  { %2011 = vrot.lane.b32.xlu1 %v11795_v27, %s9788_s4  ;;  %9564 = vrcp.f32 %v6656_v9 }
0x11b0   :  { %5369 = vrot.lane.b32.xlu0 %v10964_v6, %s9785_s26  ;;  %v6653_v8 = vpop.xlane.xlu0 %6652 }
0x11b1   :  { %9566 = vrcp.f32 %v6653_v8 }
0x11b3   :  { %2852 = vrot.lane.b32.xlu1 %v11796_v19, %s9780_s17 }
0x11b4   :  { %6210 = vrot.lane.b32.xlu0 %v11116_v41, %s9784_s2 }
0x11b7   :  { %3693 = vrot.lane.b32.xlu1 %v11797_v12, %s9787_s28 }
0x11b8   :  { %2009 = vrot.lane.b32.xlu0 %v11798_v3, %s9788_s4 }
0x11ba   :  { %v6662_v57 = vpop.xlane.xlu1 %6661 }
0x11bb   :  { %4534 = vrot.lane.b32.xlu1 %v11799_v14, %s9786_s27  ;;  %9568 = vrcp.f32 %v6662_v57 }
0x11bc   :  { %2850 = vrot.lane.b32.xlu0 %v11800_v54, %s9780_s17  ;;  %v9565_v6 = vpop.eup %9564 }
0x11bd   :  { %v6684_v10 = vmul.f32 %v9565_v6, %v11145_v56 }
0x11be   :  { %v9567_v20 = vpop.eup %9566  ;;  %v6668_v30 = vpop.xlane.xlu1 %6667 }
0x11bf   :  { %v6659_v39 = vpop.xlane.xlu0 %6658  ;;  %5375 = vrot.lane.b32.xlu1 %v10956_v61, %s9785_s26  ;;  %v6683_v41 = vmul.f32 %v9567_v20, %v11149_v17  ;;  %v11802_v61 = vld [vmem:[#allocation38_spill] sm:$0xff] }
0x11c0   :  { %9570 = vrcp.f32 %v6659_v39  ;;  %3691 = vrot.lane.b32.xlu0 %v11801_v58, %s9787_s28 }
0x11c1   :  { %9204 = vmatprep.mubr.msk.f32.mxu0 %vm416_vm0, %v6683_v41  ;;  %9572 = vrcp.f32 %v6668_v30 }
0x11c2   :  { %9205 = vmatmul.mubr.msk.f32.vlgmr.msra.gmra.mxu0 %vm416_vm0, %v6684_v10  ;;  %v6866_v44 = vpop.permute.xlu1 %6865 }
0x11c3   :  { %v6868_v22 = vpop.permute.xlu0 %6867  ;;  %6216 = vrot.lane.b32.xlu1 %v11108_v28, %s9784_s2 }
0x11c4   :  { %9214 = vmatprep.subr.mxu0 %v6868_v22  ;;  %4532 = vrot.lane.b32.xlu0 %v11802_v61, %s9786_s27 }
0x11c5   :  { %9215 = vmatpush3.msra.mxu0 %v6868_v22 }
0x11c6   :  { %9216 = vmatprep.subr.mxu0 %v6866_v44 }
0x11c7   :  { %9217 = vmatpush3.msra.mxu0 %v6866_v44  ;;  %2015 = vrot.lane.b32.xlu1 %v11803_v60, %s9788_s4 }
0x11c8   :  { %5373 = vrot.lane.b32.xlu0 %v10958_v11, %s9785_s26  ;;  %v9569_v56 = vpop.eup %9568  ;;  %v11807_v11 = vld [vmem:[#allocation30_spill] sm:$0xff] }
0x11c9   :  { %v6686_v17 = vmul.f32 %v9569_v56, %v11153_v59 }
0x11cb   :  { %2856 = vrot.lane.b32.xlu1 %v11804_v46, %s9780_s17 }
0x11cc   :  { %6214 = vrot.lane.b32.xlu0 %v11110_v33, %s9784_s2  ;;  %v11808_v33 = vld [vmem:[#allocation36_spill] sm:$0xff] }
0x11cd   :  { %v9571_v28 = vpop.eup %9570 }
0x11ce   :  { %v6685_v36 = vmul.f32 %v9571_v28, %v11159_v52  ;;  %v9573_v31 = vpop.eup %9572 }
0x11cf   :  { %3697 = vrot.lane.b32.xlu1 %v11805_v13, %s9787_s28  ;;  %v6688_v15 = vmul.f32 %v9573_v31, %v11157_v26  ;;  %v11809_v26 = vmov 0.0   ;;  %v7091_v31 = vld [vmem:[#allocation8 + $0x18] sm:$0xff] }
0x11d0   :  { %9211 = vmatprep.mubr.msk.f32.mxu1 %vm416_vm0, %v6685_v36  ;;  %2013 = vrot.lane.b32.xlu0 %v11806_v18, %s9788_s4  ;;  %v7102_v18 = vld [vmem:[#allocation8 + $0x70] sm:$0xff] }
0x11d1   :  { %9212 = vmatmul.mubr.msk.f32.vlgmr.msra.gmra.mxu1 %vm416_vm0, %v6686_v17  ;;  %v7103_v17 = vld [vmem:[#allocation8 + $0x78] sm:$0xff] }
0x11d2   :  { %9228 = vmatprep.subr.mxu0 %v7103_v17 }
0x11d4   :  { %2854 = vrot.lane.b32.xlu0 %v11807_v11, %s9780_s17  ;;  %v7101_v11 = vld [vmem:[#allocation8 + $0x68] sm:$0xff] }
0x11d8   :  { %3695 = vrot.lane.b32.xlu0 %v11808_v33, %s9787_s28  ;;  %v7100_v33 = vld [vmem:[#allocation8 + $0x60] sm:$0xff] }
0x11f3   :  { %v6674_v40 = vpop.xlane.xlu1 %6673  ;;  %v6665_v45 = vpop.xlane.xlu0 %6664 }
0x11f4   :  { %9574 = vrcp.f32 %v6665_v45  ;;  %v7098_v45 = vld [vmem:[#allocation8 + $0x50] sm:$0xff] }
0x11f5   :  { %9576 = vrcp.f32 %v6674_v40  ;;  %v7099_v40 = vld [vmem:[#allocation8 + $0x58] sm:$0xff] }
0x11f7   :  { %v6953_v7 = vpop.permute.xlu1 %6952  ;;  %v6671_v34 = vpop.xlane.xlu0 %6670 }
0x11f8   :  { %9578 = vrcp.f32 %v6671_v34  ;;  %v7096_v34 = vld [vmem:[#allocation8 + $0x40] sm:$0xff] }
0x11fb   :  { %v2004_v62 = vpop.permute.xlu1 %2003  ;;  %v6955_v38 = vpop.permute.xlu0 %6954 }
0x11fc   :  { %2027 = vst.msk [vmem:[#allocation2 + $0x8] sm:$0xff] %vm2025_vm1, %v2004_v62  ;;  %9221 = vmatprep.subr.mxu1 %v6955_v38  ;;  %v7095_v62 = vld [vmem:[#allocation8 + $0x38] sm:$0xff] }
0x11fd   :  { %9222 = vmatpush3.msra.mxu1 %v6955_v38  ;;  %v7094_v38 = vld [vmem:[#allocation8 + $0x30] sm:$0xff] }
0x11fe   :  { %9223 = vmatprep.subr.mxu1 %v6953_v7 }
0x11ff   :  { %v2845_v59 = vpop.permute.xlu1 %2844  ;;  %9224 = vmatpush3.msra.mxu1 %v6953_v7  ;;  %v2002_v2 = vpop.permute.xlu0 %2001  ;;  %v7097_v7 = vld [vmem:[#allocation8 + $0x48] sm:$0xff] }
0x1200   :  { %2868 = vst.msk [vmem:[#allocation2 + $0x8] sm:$0xff] %vm2866_vm2, %v2845_v59  ;;  %v7093_v59 = vld [vmem:[#allocation8 + $0x28] sm:$0xff] }
0x1201   :  { %2026 = vst.msk [vmem:[#allocation2] sm:$0xff] %vm2025_vm1, %v2002_v2  ;;  %v9575_v52 = vpop.eup %9574  ;;  %v7092_v2 = vld [vmem:[#allocation8 + $0x20] sm:$0xff] }
0x1202   :  { %v6687_v37 = vmul.f32 %v9575_v52, %v11174_v42  ;;  %v9577_v50 = vpop.eup %9576  ;;  %v7090_v52 = vld [vmem:[#allocation8 + $0x10] sm:$0xff] }
0x1203   :  { %v3686_v1 = vpop.permute.xlu1 %3685  ;;  %v2843_v5 = vpop.permute.xlu0 %2842  ;;  %v6690_v43 = vmul.f32 %v9577_v50, %v11172_v55 }
0x1204   :  { %3709 = vst.msk [vmem:[#allocation2 + $0x8] sm:$0xff] %vm3707_vm3, %v3686_v1  ;;  %9218 = vmatprep.mubr.msk.f32.mxu0 %vm416_vm0, %v6687_v37  ;;  %v7089_v1 = vld [vmem:[#allocation8 + $0x8] sm:$0xff] }
0x1205   :  { %2867 = vst.msk [vmem:[#allocation2] sm:$0xff] %vm2866_vm2, %v2843_v5  ;;  %v9579_v25 = vpop.eup %9578  ;;  %9219 = vmatmul.mubr.msk.f32.vlgmr.msra.gmra.mxu0 %vm416_vm0, %v6688_v15  ;;  %v7088_v5 = vld [vmem:[#allocation8] sm:$0xff]  ;;  %v11810_v15 = vld [vmem:[#allocation41_spill] sm:$0xff] }
0x1206   :  { %v6689_v29 = vmul.f32 %v9579_v25, %v11180_v24  ;;  %9229 = vmatpush3.msra.mxu0 %v7103_v17  ;;  %v11811_v25 = vld [vmem:[#allocation42_spill] sm:$0xff] }
0x1207   :  { %v4527_v53 = vpop.permute.xlu1 %4526  ;;  %v3684_v32 = vpop.permute.xlu0 %3683  ;;  %9230 = vmatprep.subr.mxu0 %v7102_v18  ;;  %v9615_v17 = vld [vmem:[#allocation3 + $0x18] sm:$0xff] }
0x1208   :  { %4550 = vst.msk [vmem:[#allocation2 + $0x8] sm:$0xff] %vm4548_vm4, %v4527_v53  ;;  %9225 = vmatprep.mubr.msk.f32.mxu1 %vm416_vm0, %v6689_v29  ;;  %9231 = vmatpush3.msra.mxu0 %v7102_v18 }
0x1209   :  { %3708 = vst.msk [vmem:[#allocation2] sm:$0xff] %vm3707_vm3, %v3684_v32  ;;  %9226 = vmatmul.mubr.msk.f32.vlgmr.msra.gmra.mxu1 %vm416_vm0, %v6690_v43  ;;  %9232 = vmatprep.subr.mxu0 %v7101_v11 }
0x120a   :  { %7493 = vmatprep.mubr.f32.mxu1 %v11809_v26  ;;  %9233 = vmatpush3.msra.mxu0 %v7101_v11 }
0x120b   :  { %v5368_v42 = vpop.permute.xlu1 %5367  ;;  %v4525_v4 = vpop.permute.xlu0 %4524  ;;  %9234 = vmatprep.subr.mxu0 %v7100_v33 }
0x120c   :  { %5391 = vst.msk [vmem:[#allocation2 + $0x8] sm:$0xff] %vm5389_vm5, %v5368_v42  ;;  %9235 = vmatpush3.msra.mxu0 %v7100_v33 }
0x120d   :  { %4549 = vst.msk [vmem:[#allocation2] sm:$0xff] %vm4548_vm4, %v4525_v4  ;;  %9236 = vmatprep.subr.mxu0 %v7099_v40 }
0x120e   :  { %9237 = vmatpush3.msra.mxu0 %v7099_v40 }
0x120f   :  { %v6209_v24 = vpop.permute.xlu1 %6208  ;;  %v5366_v55 = vpop.permute.xlu0 %5365  ;;  %9238 = vmatprep.subr.mxu0 %v7098_v45 }
0x1210   :  { %6232 = vst.msk [vmem:[#allocation2 + $0x8] sm:$0xff] %vm6230_vm6, %v6209_v24  ;;  %9239 = vmatpush3.msra.mxu0 %v7098_v45  ;;  %v9616_v45 = vld [vmem:[#allocation3 + $0x28] sm:$0xff] }
0x1211   :  { %5390 = vst.msk [vmem:[#allocation2] sm:$0xff] %vm5389_vm5, %v5366_v55  ;;  %9240 = vmatprep.subr.mxu0 %v7097_v7 }
0x1212   :  { %9241 = vmatpush3.msra.mxu0 %v7097_v7 }
0x1213   :  { %v2008_v48 = vpop.permute.xlu1 %2007  ;;  %v6207_v51 = vpop.permute.xlu0 %6206  ;;  %9242 = vmatprep.subr.mxu0 %v7096_v34 }
0x1214   :  { %2029 = vst.msk [vmem:[#allocation2 + $0x18] sm:$0xff] %vm2025_vm1, %v2008_v48  ;;  %9243 = vmatpush3.msra.mxu0 %v7096_v34 }
0x1215   :  { %6231 = vst.msk [vmem:[#allocation2] sm:$0xff] %vm6230_vm6, %v6207_v51  ;;  %9244 = vmatprep.subr.mxu0 %v7095_v62 }
0x1216   :  { %9245 = vmatpush3.msra.mxu0 %v7095_v62  ;;  %v9617_v62 = vld [vmem:[#allocation3 + $0x20] sm:$0xff] }
0x1217   :  { %v2849_v63 = vpop.permute.xlu1 %2848  ;;  %v2006_v16 = vpop.permute.xlu0 %2005  ;;  %9246 = vmatprep.subr.mxu0 %v7094_v38 }
0x1218   :  { %2870 = vst.msk [vmem:[#allocation2 + $0x18] sm:$0xff] %vm2866_vm2, %v2849_v63  ;;  %9247 = vmatpush3.msra.mxu0 %v7094_v38 }
0x1219   :  { %2028 = vst.msk [vmem:[#allocation2 + $0x10] sm:$0xff] %vm2025_vm1, %v2006_v16  ;;  %9248 = vmatprep.subr.mxu0 %v7093_v59 }
0x121a   :  { %9249 = vmatpush3.msra.mxu0 %v7093_v59 }
0x121b   :  { %v3690_v23 = vpop.permute.xlu1 %3689  ;;  %v2847_v47 = vpop.permute.xlu0 %2846  ;;  %9250 = vmatprep.subr.mxu0 %v7092_v2 }
0x121c   :  { %3711 = vst.msk [vmem:[#allocation2 + $0x18] sm:$0xff] %vm3707_vm3, %v3690_v23  ;;  %9251 = vmatpush3.msra.mxu0 %v7092_v2 }
0x121d   :  { %2869 = vst.msk [vmem:[#allocation2 + $0x10] sm:$0xff] %vm2866_vm2, %v2847_v47  ;;  %9252 = vmatprep.subr.mxu0 %v7091_v31 }
0x121e   :  { %9253 = vmatpush3.msra.mxu0 %v7091_v31 }
0x121f   :  { %v4531_v9 = vpop.permute.xlu1 %4530  ;;  %v3688_v27 = vpop.permute.xlu0 %3687  ;;  %9254 = vmatprep.subr.mxu0 %v7090_v52 }
0x1220   :  { %4552 = vst.msk [vmem:[#allocation2 + $0x18] sm:$0xff] %vm4548_vm4, %v4531_v9  ;;  %9255 = vmatpush3.msra.mxu0 %v7090_v52  ;;  %v9618_v52 = vld [vmem:[#allocation3 + $0x38] sm:$0xff] }
0x1221   :  { %3710 = vst.msk [vmem:[#allocation2 + $0x10] sm:$0xff] %vm3707_vm3, %v3688_v27  ;;  %9256 = vmatprep.subr.mxu0 %v7089_v1 }
0x1222   :  { %9257 = vmatpush3.msra.mxu0 %v7089_v1 }
0x1223   :  { %v5372_v8 = vpop.permute.xlu1 %5371  ;;  %v4529_v19 = vpop.permute.xlu0 %4528  ;;  %9258 = vmatprep.subr.mxu0 %v7088_v5 }
0x1224   :  { %5393 = vst.msk [vmem:[#allocation2 + $0x18] sm:$0xff] %vm5389_vm5, %v5372_v8  ;;  %9259 = vmatpush3.msra.mxu0 %v7088_v5 }
0x1225   :  { %4551 = vst.msk [vmem:[#allocation2 + $0x10] sm:$0xff] %vm4548_vm4, %v4529_v19 }
0x1227   :  { %v6213_v12 = vpop.permute.xlu1 %6212  ;;  %v5370_v3 = vpop.permute.xlu0 %5369 }
0x1228   :  { %6234 = vst.msk [vmem:[#allocation2 + $0x18] sm:$0xff] %vm6230_vm6, %v6213_v12 }
0x1229   :  { %5392 = vst.msk [vmem:[#allocation2 + $0x10] sm:$0xff] %vm5389_vm5, %v5370_v3 }
0x122b   :  { %v2012_v57 = vpop.permute.xlu1 %2011  ;;  %v6211_v14 = vpop.permute.xlu0 %6210 }
0x122c   :  { %2031 = vst.msk [vmem:[#allocation2 + $0x28] sm:$0xff] %vm2025_vm1, %v2012_v57 }
0x122d   :  { %6233 = vst.msk [vmem:[#allocation2 + $0x10] sm:$0xff] %vm6230_vm6, %v6211_v14 }
0x122f   :  { %v2853_v54 = vpop.permute.xlu1 %2852  ;;  %v2010_v6 = vpop.permute.xlu0 %2009 }
0x1230   :  { %2872 = vst.msk [vmem:[#allocation2 + $0x28] sm:$0xff] %vm2866_vm2, %v2853_v54 }
0x1231   :  { %2030 = vst.msk [vmem:[#allocation2 + $0x20] sm:$0xff] %vm2025_vm1, %v2010_v6 }
0x1233   :  { %v3694_v20 = vpop.permute.xlu1 %3693  ;;  %v2851_v30 = vpop.permute.xlu0 %2850 }
0x1234   :  { %3713 = vst.msk [vmem:[#allocation2 + $0x28] sm:$0xff] %vm3707_vm3, %v3694_v20  ;;  %v8314_v20 = vld [vmem:[#allocation9] ss:$0 sm:$0xff] }
0x1235   :  { %2871 = vst.msk [vmem:[#allocation2 + $0x20] sm:$0xff] %vm2866_vm2, %v2851_v30 }
0x1237   :  { %v4535_v39 = vpop.permute.xlu1 %4534  ;;  %v3692_v41 = vpop.permute.xlu0 %3691 }
0x1238   :  { %4554 = vst.msk [vmem:[#allocation2 + $0x28] sm:$0xff] %vm4548_vm4, %v4535_v39 }
0x1239   :  { %3712 = vst.msk [vmem:[#allocation2 + $0x20] sm:$0xff] %vm3707_vm3, %v3692_v41 }
0x123b   :  { %v5376_v58 = vpop.permute.xlu1 %5375  ;;  %v4533_v10 = vpop.permute.xlu0 %4532 }
0x123c   :  { %5395 = vst.msk [vmem:[#allocation2 + $0x28] sm:$0xff] %vm5389_vm5, %v5376_v58  ;;  %v9612_v58 = vld [vmem:[#allocation3 + $0x8] sm:$0xff] }
0x123d   :  { %4553 = vst.msk [vmem:[#allocation2 + $0x20] sm:$0xff] %vm4548_vm4, %v4533_v10 }
0x123f   :  { %v6217_v22 = vpop.permute.xlu1 %6216  ;;  %v5374_v44 = vpop.permute.xlu0 %5373 }
0x1240   :  { %6236 = vst.msk [vmem:[#allocation2 + $0x28] sm:$0xff] %vm6230_vm6, %v6217_v22 }
0x1241   :  { %5394 = vst.msk [vmem:[#allocation2 + $0x20] sm:$0xff] %vm5389_vm5, %v5374_v44  ;;  %v9613_v44 = vld [vmem:[#allocation3] sm:$0xff] }
0x1243   :  { %v2016_v61 = vpop.permute.xlu1 %2015  ;;  %v6215_v60 = vpop.permute.xlu0 %6214 }
0x1244   :  { %2033 = vst.msk [vmem:[#allocation2 + $0x38] sm:$0xff] %vm2025_vm1, %v2016_v61 }
0x1245   :  { %6235 = vst.msk [vmem:[#allocation2 + $0x20] sm:$0xff] %vm6230_vm6, %v6215_v60 }
0x1247   :  { %v2857_v46 = vpop.permute.xlu1 %2856  ;;  %v2014_v56 = vpop.permute.xlu0 %2013 }
0x1248   :  { %2874 = vst.msk [vmem:[#allocation2 + $0x38] sm:$0xff] %vm2866_vm2, %v2857_v46 }
0x1249   :  { %2032 = vst.msk [vmem:[#allocation2 + $0x30] sm:$0xff] %vm2025_vm1, %v2014_v56 }
0x124b   :  { %v3698_v28 = vpop.permute.xlu1 %3697  ;;  %v2855_v36 = vpop.permute.xlu0 %2854 }
0x124c   :  { %3715 = vst.msk [vmem:[#allocation2 + $0x38] sm:$0xff] %vm3707_vm3, %v3698_v28 }
0x124d   :  { %2873 = vst.msk [vmem:[#allocation2 + $0x30] sm:$0xff] %vm2866_vm2, %v2855_v36  ;;  %v9614_v36 = vld [vmem:[#allocation3 + $0x10] sm:$0xff] }
0x124f   :  { %v3696_v13 = vpop.permute.xlu0 %3695 }
0x1250   :  { %3714 = vst.msk [vmem:[#allocation2 + $0x30] sm:$0xff] %vm3707_vm3, %v3696_v13 }
0x1282   :  { %v9206_v37 = vpop.f32.mrf.mxu0 }
0x1283   :  { %7049 = vrot.lane.b32.xlu1 %v9206_v37, %s9783_s25  ;;  %v9619_v37 = vld [vmem:[#allocation3 + $0x30] sm:$0xff] }
0x1284   :  { %v6769_v50 = vpop.f32.mrf.mxu0 }
0x1285   :  { %7047 = vrot.lane.b32.xlu0 %v6769_v50, %s9783_s25 }
0x1287   :  { %4538 = vrot.lane.b32.xlu1 %v11810_v15, %s9786_s27  ;;  %v7404_v15 = vld [vmem:[#allocation11 + $0x1e8] sm:$0xff] }
0x1288   :  { %7429 = vmatprep.subr.mxu1 %v7404_v15  ;;  %v7365_v15 = vld [vmem:[#allocation11 + $0xb0] sm:$0xff] }
0x1289   :  { %4536 = vrot.lane.b32.xlu0 %v11811_v25, %s9786_s27  ;;  %v7406_v25 = vld [vmem:[#allocation11 + $0x1f8] sm:$0xff] }
0x128a   :  { %7542 = vmatprep.subr.mxu0 %v7406_v25  ;;  %v7360_v25 = vld [vmem:[#allocation11 + $0x88] sm:$0xff] }
0x1291   :  { %v9213_v29 = vpop.f32.mrf.mxu1 }
0x1292   :  { %7053 = vrot.lane.b32.xlu1 %v9213_v29, %s9783_s25  ;;  %v7403_v29 = vld [vmem:[#allocation11 + $0x1e0] sm:$0xff] }
0x1293   :  { %v6856_v53 = vpop.f32.mrf.mxu1  ;;  %7430 = vmatpush1.msra.mxu1 %v7403_v29  ;;  %v7362_v29 = vld [vmem:[#allocation11 + $0x98] sm:$0xff] }
0x1294   :  { %7051 = vrot.lane.b32.xlu0 %v6856_v53, %s9783_s25  ;;  %v7405_v53 = vld [vmem:[#allocation11 + $0x1f0] sm:$0xff] }
0x1298   :  { %5377 = vrot.lane.b32.xlu0 %v10969_v49, %s9785_s26 }
0x12c5   :  { %v9220_v32 = vpop.f32.mrf.mxu0 }
0x12c6   :  { %7057 = vrot.lane.b32.xlu1 %v9220_v32, %s9783_s25  ;;  %v7400_v32 = vld [vmem:[#allocation11 + $0x1c8] sm:$0xff] }
0x12c7   :  { %v6943_v43 = vpop.f32.mrf.mxu0  ;;  %7431 = vmatprep.subr.mxu1 %v7400_v32  ;;  %v7361_v32 = vld [vmem:[#allocation11 + $0x90] sm:$0xff] }
0x12c8   :  { %7055 = vrot.lane.b32.xlu0 %v6943_v43, %s9783_s25  ;;  %v7402_v43 = vld [vmem:[#allocation11 + $0x1d8] sm:$0xff] }
0x12c9   :  { %v9227_v42 = vpop.f32.mrf.mxu1 }
0x12ca   :  { %5379 = vrot.lane.b32.xlu1 %v10966_v0, %s9785_s26 }
0x12cb   :  { %v7030_v4 = vpop.f32.mrf.mxu1 }
0x12cc   :  { %6218 = vrot.lane.b32.xlu0 %v11121_v35, %s9784_s2 }
0x12ce   :  { %6220 = vrot.lane.b32.xlu1 %v11118_v21, %s9784_s2 }
0x12d0   :  { %7059 = vrot.lane.b32.xlu0 %v7030_v4, %s9783_s25  ;;  %v7401_v4 = vld [vmem:[#allocation11 + $0x1d0] sm:$0xff] }
0x12d2   :  { %7061 = vrot.lane.b32.xlu1 %v9227_v42, %s9783_s25  ;;  %v7399_v42 = vld [vmem:[#allocation11 + $0x1c0] sm:$0xff] }
0x12d3   :  { %7432 = vmatpush1.msra.mxu1 %v7399_v42  ;;  %v7358_v42 = vld [vmem:[#allocation11 + $0x78] sm:$0xff] }
0x12f5   :  { %v7050_v49 = vpop.permute.xlu1 %7049 }
0x12f6   :  { %7073 = vst.msk [vmem:[#allocation2 + $0x8] sm:$0xff] %vm7071_vm7, %v7050_v49  ;;  %v7396_v49 = vld [vmem:[#allocation11 + $0x1a8] sm:$0xff] }
0x12f7   :  { %v7048_v24 = vpop.permute.xlu0 %7047  ;;  %7433 = vmatprep.subr.mxu1 %v7396_v49  ;;  %v7357_v49 = vld [vmem:[#allocation11 + $0x70] sm:$0xff] }
0x12f8   :  { %7072 = vst.msk [vmem:[#allocation2] sm:$0xff] %vm7071_vm7, %v7048_v24  ;;  %v7398_v24 = vld [vmem:[#allocation11 + $0x1b8] sm:$0xff] }
0x12f9   :  { %v4539_v0 = vpop.permute.xlu1 %4538 }
0x12fa   :  { %4556 = vst.msk [vmem:[#allocation2 + $0x38] sm:$0xff] %vm4548_vm4, %v4539_v0  ;;  %v7395_v0 = vld [vmem:[#allocation11 + $0x1a0] sm:$0xff] }
0x12fb   :  { %v4537_v55 = vpop.permute.xlu0 %4536  ;;  %7434 = vmatpush1.msra.mxu1 %v7395_v0  ;;  %v7354_v0 = vld [vmem:[#allocation11 + $0x58] sm:$0xff] }
0x12fc   :  { %4555 = vst.msk [vmem:[#allocation2 + $0x30] sm:$0xff] %vm4548_vm4, %v4537_v55  ;;  %v7397_v55 = vld [vmem:[#allocation11 + $0x1b0] sm:$0xff] }
0x12fd   :  { %v7081_v21 = vld [vmem:[#allocation2 + $0x8] sm:$0xff] }
0x12ff   :  { %v7080_v35 = vld [vmem:[#allocation2] sm:$0xff] }
0x1300   :  { %9260 = vmatprep.mubr.f32.mxu0 %v7080_v35 }
0x1301   :  { %9261 = vmatmul.mubr.f32.vlgmr.msra.gmra.mxu0 %v7081_v21 }
0x1302   :  { %7543 = vmatpush1.msra.mxu0 %v7405_v53  ;;  %v7359_v53 = vld [vmem:[#allocation11 + $0x80] sm:$0xff] }
0x1303   :  { %7544 = vmatprep.subr.mxu0 %v7402_v43  ;;  %v7356_v43 = vld [vmem:[#allocation11 + $0x68] sm:$0xff] }
0x1304   :  { %v7054_v48 = vpop.permute.xlu1 %7053  ;;  %7545 = vmatpush1.msra.mxu0 %v7401_v4  ;;  %v7355_v4 = vld [vmem:[#allocation11 + $0x60] sm:$0xff] }
0x1305   :  { %7075 = vst.msk [vmem:[#allocation2 + $0x18] sm:$0xff] %vm7071_vm7, %v7054_v48  ;;  %7546 = vmatprep.subr.mxu0 %v7398_v24  ;;  %v7352_v24 = vld [vmem:[#allocation11 + $0x48] sm:$0xff] }
0x1306   :  { %v7052_v51 = vpop.permute.xlu0 %7051  ;;  %7547 = vmatpush1.msra.mxu0 %v7397_v55  ;;  %v7351_v55 = vld [vmem:[#allocation11 + $0x40] sm:$0xff] }
0x1307   :  { %7074 = vst.msk [vmem:[#allocation2 + $0x10] sm:$0xff] %vm7071_vm7, %v7052_v51 }
0x130a   :  { %v5378_v63 = vpop.permute.xlu0 %5377 }
0x130b   :  { %5396 = vst.msk [vmem:[#allocation2 + $0x30] sm:$0xff] %vm5389_vm5, %v5378_v63 }
0x130c   :  { %v7083_v23 = vld [vmem:[#allocation2 + $0x18] sm:$0xff] }
0x130e   :  { %v7082_v16 = vld [vmem:[#allocation2 + $0x10] sm:$0xff] }
0x130f   :  { %9263 = vmatprep.mubr.f32.mxu0 %v7082_v16 }
0x1310   :  { %9264 = vmatmul.mubr.f32.gmra.mxu0 %v7083_v23 }
0x1338   :  { %v7058_v47 = vpop.permute.xlu1 %7057 }
0x1339   :  { %7077 = vst.msk [vmem:[#allocation2 + $0x28] sm:$0xff] %vm7071_vm7, %v7058_v47 }
0x133a   :  { %v7056_v9 = vpop.permute.xlu0 %7055 }
0x133b   :  { %7076 = vst.msk [vmem:[#allocation2 + $0x20] sm:$0xff] %vm7071_vm7, %v7056_v9 }
0x133c   :  { %v5380_v27 = vpop.permute.xlu1 %5379 }
0x133d   :  { %5397 = vst.msk [vmem:[#allocation2 + $0x38] sm:$0xff] %vm5389_vm5, %v5380_v27  ;;  %v7392_v27 = vld [vmem:[#allocation11 + $0x188] sm:$0xff] }
0x133e   :  { %v6219_v8 = vpop.permute.xlu0 %6218  ;;  %7435 = vmatprep.subr.mxu1 %v7392_v27  ;;  %v7343_v27 = vld [vmem:[#allocation11] sm:$0xff] }
0x133f   :  { %6237 = vst.msk [vmem:[#allocation2 + $0x30] sm:$0xff] %vm6230_vm6, %v6219_v8  ;;  %v7394_v8 = vld [vmem:[#allocation11 + $0x198] sm:$0xff] }
0x1340   :  { %v6221_v19 = vpop.permute.xlu1 %6220  ;;  %v7085_v57 = vld [vmem:[#allocation2 + $0x28] sm:$0xff]  ;;  %7548 = vmatprep.subr.mxu0 %v7394_v8  ;;  %v7345_v8 = vld [vmem:[#allocation11 + $0x10] sm:$0xff] }
0x1341   :  { %6238 = vst.msk [vmem:[#allocation2 + $0x38] sm:$0xff] %vm6230_vm6, %v6221_v19 }
0x1342   :  { %v7060_v12 = vpop.permute.xlu0 %7059  ;;  %v7084_v3 = vld [vmem:[#allocation2 + $0x20] sm:$0xff] }
0x1343   :  { %7078 = vst.msk [vmem:[#allocation2 + $0x30] sm:$0xff] %vm7071_vm7, %v7060_v12  ;;  %9266 = vmatprep.mubr.f32.mxu0 %v7084_v3  ;;  %v7391_v12 = vld [vmem:[#allocation11 + $0x180] sm:$0xff]  ;;  %v7393_v3 = vld [vmem:[#allocation11 + $0x190] sm:$0xff] }
0x1344   :  { %v7062_v14 = vpop.permute.xlu1 %7061  ;;  %9267 = vmatmul.mubr.f32.gmra.mxu0 %v7085_v57  ;;  %7436 = vmatpush1.msra.mxu1 %v7391_v12  ;;  %v7388_v57 = vld [vmem:[#allocation11 + $0x168] sm:$0xff] }
0x1345   :  { %7079 = vst.msk [vmem:[#allocation2 + $0x38] sm:$0xff] %vm7071_vm7, %v7062_v14  ;;  %7549 = vmatpush1.msra.mxu0 %v7393_v3  ;;  %v7390_v14 = vld [vmem:[#allocation11 + $0x178] sm:$0xff]  ;;  %7437 = vmatprep.subr.mxu1 %v7388_v57 }
0x1346   :  { %7550 = vmatprep.subr.mxu0 %v7390_v14 }
0x134a   :  { %v7086_v54 = vld [vmem:[#allocation2 + $0x30] sm:$0xff] }
0x134b   :  { %9269 = vmatprep.mubr.f32.mxu0 %v7086_v54 }
0x134c   :  { %v7087_v6 = vld [vmem:[#allocation2 + $0x38] sm:$0xff] }
0x134d   :  { %9270 = vmatmul.mubr.f32.gmra.mxu0 %v7087_v6  ;;  %v7387_v6 = vld [vmem:[#allocation11 + $0x160] sm:$0xff] }
0x134e   :  { %7606 = vmatprep.mubr.f32.mxu0 %v11809_v26  ;;  %7438 = vmatpush1.msra.mxu1 %v7387_v6 }
0x13c1   :  { %v9262_v30 = vpop.f32.mrf.mxu0 }
0x13c2   :  { %v7183_v39 = vadd.f32 %v9262_v30, %v8314_v20 }
0x13c3   :  { %v7177_v41 = vpop.f32.mrf.mxu0 }
0x13c4   :  { %v11366_v10 = vadd.f32 %v9612_v58, %v7183_v39  ;;  %v7178_v22 = vadd.f32 %v8314_v20, %v7177_v41  ;;  %v7384_v39 = vld [vmem:[#allocation11 + $0x148] sm:$0xff]  ;;  %v7386_v41 = vld [vmem:[#allocation11 + $0x158] sm:$0xff] }
0x13c5   :  { %7439 = vmatprep.subr.mxu1 %v7384_v39 }
0x13c6   :  { %v7216_v61 = vadd.f32 %v9613_v44, %v7178_v22  ;;  %7228 = vadd.xlane.f32.xlu1 %v11366_v10  ;;  %v7383_v22 = vld [vmem:[#allocation11 + $0x140] sm:$0xff]  ;;  %v7385_v44 = vld [vmem:[#allocation11 + $0x150] sm:$0xff] }
0x13c7   :  { %7440 = vmatpush1.msra.mxu1 %v7383_v22 }
0x13c8   :  { %7226 = vadd.xlane.f32.xlu0 %v7216_v61 }
0x13d0   :  { %v9265_v60 = vpop.f32.mrf.mxu0 }
0x13d1   :  { %v7193_v28 = vadd.f32 %v9265_v60, %v8314_v20  ;;  %v7382_v60 = vld [vmem:[#allocation11 + $0x138] sm:$0xff] }
0x13d2   :  { %v7187_v46 = vpop.f32.mrf.mxu0 }
0x13d3   :  { %v7188_v56 = vadd.f32 %v8314_v20, %v7187_v46  ;;  %v11372_v18 = vadd.f32 %v9615_v17, %v7193_v28  ;;  %v7379_v46 = vld [vmem:[#allocation11 + $0x120] sm:$0xff]  ;;  %v7381_v28 = vld [vmem:[#allocation11 + $0x130] sm:$0xff] }
0x13d4   :  { %v7375_v17 = vld [vmem:[#allocation11 + $0x100] sm:$0xff] }
0x13d5   :  { %v11369_v13 = vadd.f32 %v9614_v36, %v7188_v56  ;;  %v7376_v36 = vld [vmem:[#allocation11 + $0x108] sm:$0xff] }
0x13d7   :  { %7230 = vadd.xlane.f32.xlu0 %v11369_v13 }
0x13db   :  { %7232 = vadd.xlane.f32.xlu0 %v11372_v18 }
0x1404   :  { %v9268_v11 = vpop.f32.mrf.mxu0 }
0x1405   :  { %v7203_v33 = vadd.f32 %v9268_v11, %v8314_v20  ;;  %v7377_v11 = vld [vmem:[#allocation11 + $0x110] sm:$0xff] }
0x1406   :  { %v7197_v40 = vpop.f32.mrf.mxu0 }
0x1407   :  { %v11375_v7 = vadd.f32 %v9616_v45, %v7203_v33  ;;  %v7198_v34 = vadd.f32 %v8314_v20, %v7197_v40  ;;  %v7372_v40 = vld [vmem:[#allocation11 + $0xe8] sm:$0xff]  ;;  %v7374_v45 = vld [vmem:[#allocation11 + $0xf8] sm:$0xff] }
0x1409   :  { %v11377_v38 = vadd.f32 %v9617_v62, %v7198_v34  ;;  %7236 = vadd.xlane.f32.xlu1 %v11375_v7  ;;  %v7373_v34 = vld [vmem:[#allocation11 + $0xf0] sm:$0xff]  ;;  %v7368_v62 = vld [vmem:[#allocation11 + $0xc8] sm:$0xff] }
0x140b   :  { %7234 = vadd.xlane.f32.xlu0 %v11377_v38 }
0x140d   :  { %v9271_v59 = vpop.f32.mrf.mxu0 }
0x140e   :  { %v7213_v2 = vadd.f32 %v9271_v59, %v8314_v20  ;;  %v7370_v59 = vld [vmem:[#allocation11 + $0xd8] sm:$0xff] }
0x140f   :  { %v7207_v31 = vpop.f32.mrf.mxu0 }
0x1410   :  { %v11381_v1 = vadd.f32 %v9618_v52, %v7213_v2  ;;  %v7208_v5 = vadd.f32 %v8314_v20, %v7207_v31  ;;  %v7389_v20 = vld [vmem:[#allocation11 + $0x170] sm:$0xff]  ;;  %v7367_v2 = vld [vmem:[#allocation11 + $0xc0] sm:$0xff]  ;;  %v7364_v52 = vld [vmem:[#allocation11 + $0xa8] sm:$0xff] }
0x1411   :  { %7551 = vmatpush1.msra.mxu0 %v7389_v20  ;;  %v7369_v31 = vld [vmem:[#allocation11 + $0xd0] sm:$0xff] }
0x1412   :  { %v11383_v50 = vadd.f32 %v9619_v37, %v7208_v5  ;;  %7240 = vadd.xlane.f32.xlu1 %v11381_v1  ;;  %7552 = vmatprep.subr.mxu0 %v7386_v41  ;;  %v7366_v5 = vld [vmem:[#allocation11 + $0xb8] sm:$0xff]  ;;  %v7363_v37 = vld [vmem:[#allocation11 + $0xa0] sm:$0xff] }
0x1413   :  { %7553 = vmatpush1.msra.mxu0 %v7385_v44 }
0x1414   :  { %7238 = vadd.xlane.f32.xlu0 %v11383_v50  ;;  %7554 = vmatprep.subr.mxu0 %v7382_v60  ;;  %v11426_v60 = vld [vmem:[#allocation12 + $0x1f8] sm:$0xff] }
0x1415   :  { %7555 = vmatpush1.msra.mxu0 %v7381_v28 }
0x144f   :  { %v7229_v35 = vpop.xlane.xlu1 %7228 }
0x1450   :  { %v7244_v21 = vmul.f32 0.0078125, %v7229_v35  ;;  %v7353_v35 = vld [vmem:[#allocation11 + $0x50] sm:$0xff] }
0x1451   :  { %v7227_v48 = vpop.xlane.xlu0 %7226 }
0x1452   :  { %v11388_v51 = vsub.f32 %v11366_v10, %v7244_v21  ;;  %v7243_v63 = vmul.f32 0.0078125, %v7227_v48  ;;  %v7348_v21 = vld [vmem:[#allocation11 + $0x28] sm:$0xff]  ;;  %v7350_v48 = vld [vmem:[#allocation11 + $0x38] sm:$0xff] }
0x1454   :  { %v11390_v16 = vsub.f32 %v7216_v61, %v7243_v63  ;;  %v7260_v23 = vmul.f32 %v11388_v51, %v11388_v51  ;;  %v7380_v61 = vld [vmem:[#allocation11 + $0x128] sm:$0xff]  ;;  %v7347_v63 = vld [vmem:[#allocation11 + $0x20] sm:$0xff] }
0x1455   :  { %7441 = vmatprep.subr.mxu1 %v7380_v61  ;;  %v7718_v61 = vld [vmem:[#allocation12 + $0xf8] sm:$0xff] }
0x1456   :  { %7269 = vadd.xlane.f32.xlu1 %v7260_v23  ;;  %v7259_v47 = vmul.f32 %v11390_v16, %v11390_v16  ;;  %7442 = vmatpush1.msra.mxu1 %v7379_v46  ;;  %v7349_v23 = vld [vmem:[#allocation11 + $0x30] sm:$0xff] }
0x1457   :  { %7443 = vmatprep.subr.mxu1 %v7376_v36 }
0x1458   :  { %7267 = vadd.xlane.f32.xlu0 %v7259_v47  ;;  %7444 = vmatpush1.msra.mxu1 %v7375_v17  ;;  %v7344_v47 = vld [vmem:[#allocation11 + $0x8] sm:$0xff] }
0x1459   :  { %7445 = vmatprep.subr.mxu1 %v7372_v40 }
0x1460   :  { %v7231_v9 = vpop.xlane.xlu0 %7230 }
0x1461   :  { %v7245_v19 = vmul.f32 0.0078125, %v7231_v9  ;;  %v7346_v9 = vld [vmem:[#allocation11 + $0x18] sm:$0xff] }
0x1463   :  { %v11397_v54 = vsub.f32 %v11369_v13, %v7245_v19  ;;  %v7378_v13 = vld [vmem:[#allocation11 + $0x118] sm:$0xff] }
0x1464   :  { %v7233_v30 = vpop.xlane.xlu0 %7232  ;;  %7556 = vmatprep.subr.mxu0 %v7378_v13 }
0x1465   :  { %v7246_v58 = vmul.f32 0.0078125, %v7233_v30  ;;  %v7261_v10 = vmul.f32 %v11397_v54, %v11397_v54  ;;  %7557 = vmatpush1.msra.mxu0 %v7377_v11 }
0x1466   :  { %7558 = vmatprep.subr.mxu0 %v7374_v45 }
0x1467   :  { %v11402_v56 = vsub.f32 %v11372_v18, %v7246_v58  ;;  %7271 = vadd.xlane.f32.xlu0 %v7261_v10  ;;  %v7371_v18 = vld [vmem:[#allocation11 + $0xe0] sm:$0xff]  ;;  %7559 = vmatpush1.msra.mxu0 %v7373_v34 }
0x1468   :  { %7446 = vmatpush1.msra.mxu1 %v7371_v18  ;;  %7560 = vmatprep.subr.mxu0 %v7370_v59 }
0x1469   :  { %v7262_v33 = vmul.f32 %v11402_v56, %v11402_v56  ;;  %7447 = vmatprep.subr.mxu1 %v7368_v62  ;;  %7561 = vmatpush1.msra.mxu0 %v7369_v31 }
0x146a   :  { %7448 = vmatpush1.msra.mxu1 %v7367_v2  ;;  %7562 = vmatprep.subr.mxu0 %v7366_v5  ;;  %v11434_v2 = vld [vmem:[%s11750_s5] ss:$0 sm:$0xff] }
0x146b   :  { %7273 = vadd.xlane.f32.xlu1 %v7262_v33  ;;  %7449 = vmatprep.subr.mxu1 %v7364_v52  ;;  %v11440_v5 = vld [vmem:[%s11751_s6] ss:$0 sm:$0xff] }
0x146c   :  { %7450 = vmatpush1.msra.mxu1 %v7363_v37  ;;  %7563 = vmatpush1.msra.mxu0 %v7365_v15  ;;  %v11446_v15 = vld [vmem:[#allocation12 + $0x178] sm:$0xff] }
0x146d   :  { %7451 = vmatprep.subr.mxu1 %v7360_v25  ;;  %7564 = vmatprep.subr.mxu0 %v7362_v29  ;;  %v7717_v25 = vld [vmem:[#allocation12 + $0xf0] sm:$0xff] }
0x146e   :  { %7452 = vmatpush1.msra.mxu1 %v7359_v53  ;;  %7565 = vmatpush1.msra.mxu0 %v7361_v32  ;;  %v11450_v29 = vld [vmem:[#allocation12 + $0x1f0] sm:$0xff] }
0x146f   :  { %7453 = vmatprep.subr.mxu1 %v7356_v43  ;;  %7566 = vmatprep.subr.mxu0 %v7358_v42  ;;  %v7701_v32 = vld [vmem:[#allocation12 + $0x70] sm:$0xff]  ;;  %v7716_v42 = vld [vmem:[#allocation12 + $0xe8] sm:$0xff] }
0x1470   :  { %7454 = vmatpush1.msra.mxu1 %v7355_v4  ;;  %7567 = vmatpush1.msra.mxu0 %v7357_v49  ;;  %v11459_v43 = vld [vmem:[#allocation12 + $0x170] sm:$0xff]  ;;  %v11463_v4 = vld [vmem:[#allocation12 + $0x1e8] sm:$0xff] }
0x1471   :  { %7455 = vmatprep.subr.mxu1 %v7352_v24  ;;  %7568 = vmatprep.subr.mxu0 %v7354_v0  ;;  %v7700_v49 = vld [vmem:[#allocation12 + $0x68] sm:$0xff]  ;;  %v7715_v0 = vld [vmem:[#allocation12 + $0xe0] sm:$0xff] }
0x1472   :  { %7456 = vmatpush1.msra.mxu1 %v7351_v55  ;;  %7569 = vmatpush1.msra.mxu0 %v7353_v35  ;;  %v11467_v24 = vld [vmem:[#allocation12 + $0x168] sm:$0xff]  ;;  %v11470_v55 = vld [vmem:[#allocation12 + $0x1e0] sm:$0xff] }
0x1473   :  { %7457 = vmatprep.subr.mxu1 %v7348_v21  ;;  %7570 = vmatprep.subr.mxu0 %v7350_v48  ;;  %v7699_v35 = vld [vmem:[#allocation12 + $0x60] sm:$0xff] }
0x1474   :  { %7458 = vmatpush1.msra.mxu1 %v7347_v63  ;;  %7571 = vmatpush1.msra.mxu0 %v7349_v23  ;;  %v11473_v21 = vld [vmem:[#allocation12 + $0x160] sm:$0xff]  ;;  %v7714_v63 = vld [vmem:[#allocation12 + $0xd8] sm:$0xff] }
0x1475   :  { %7459 = vmatprep.subr.mxu1 %v7344_v47  ;;  %7572 = vmatprep.subr.mxu0 %v7346_v9  ;;  %v11476_v23 = vld [vmem:[#allocation12 + $0x1d8] sm:$0xff] }
0x1476   :  { %7460 = vmatpush1.msra.mxu1 %v7343_v27  ;;  %7573 = vmatpush1.msra.mxu0 %v7345_v8  ;;  %v7698_v9 = vld [vmem:[#allocation12 + $0x58] sm:$0xff]  ;;  %v7713_v8 = vld [vmem:[#allocation12 + $0xd0] sm:$0xff] }
0x1477   :  { %8624 = vmatprep.subr.mxu1 %v7718_v61  ;;  %8680 = vmatprep.subr.mxu0 %v11426_v60  ;;  %v11480_v27 = vld [vmem:[#allocation12 + $0x158] sm:$0xff]  ;;  %v11510_v61 = vld [vmem:[#allocation12 + $0x1c0] sm:$0xff] }
0x1492   :  { %v7237_v19 = vpop.xlane.xlu1 %7236 }
0x1493   :  { %v7248_v12 = vmul.f32 0.0078125, %v7237_v19  ;;  %v11483_v19 = vld [vmem:[#allocation12 + $0x1d0] sm:$0xff] }
0x1494   :  { %v7235_v3 = vpop.xlane.xlu0 %7234 }
0x1495   :  { %v11407_v57 = vsub.f32 %v11375_v7, %v7248_v12  ;;  %v7247_v14 = vmul.f32 0.0078125, %v7235_v3  ;;  %v7697_v3 = vld [vmem:[#allocation12 + $0x50] sm:$0xff] }
0x1497   :  { %v11410_v6 = vsub.f32 %v11377_v38, %v7247_v14  ;;  %v7264_v20 = vmul.f32 %v11407_v57, %v11407_v57  ;;  %v11487_v14 = vld [vmem:[#allocation12 + $0x150] sm:$0xff] }
0x1499   :  { %7277 = vadd.xlane.f32.xlu1 %v7264_v20  ;;  %v7263_v30 = vmul.f32 %v11410_v6, %v11410_v6 }
0x149b   :  { %v7241_v39 = vpop.xlane.xlu1 %7240  ;;  %7275 = vadd.xlane.f32.xlu0 %v7263_v30 }
0x149c   :  { %v7250_v41 = vmul.f32 0.0078125, %v7241_v39  ;;  %v7712_v39 = vld [vmem:[#allocation12 + $0xc8] sm:$0xff] }
0x149d   :  { %v7239_v58 = vpop.xlane.xlu0 %7238 }
0x149e   :  { %v11417_v10 = vsub.f32 %v11381_v1, %v7250_v41  ;;  %v7249_v7 = vmul.f32 0.0078125, %v7239_v58  ;;  %v11496_v41 = vld [vmem:[#allocation12 + $0x1c8] sm:$0xff] }
0x14a0   :  { %v11420_v22 = vsub.f32 %v11383_v50, %v7249_v7  ;;  %v7266_v38 = vmul.f32 %v11417_v10, %v11417_v10  ;;  %v7696_v7 = vld [vmem:[#allocation12 + $0x48] sm:$0xff] }
0x14a2   :  { %7281 = vadd.xlane.f32.xlu1 %v7266_v38  ;;  %v7265_v44 = vmul.f32 %v11420_v22, %v11420_v22  ;;  %v11501_v38 = vld [vmem:[#allocation12 + $0x148] sm:$0xff] }
0x14a4   :  { %7279 = vadd.xlane.f32.xlu0 %v7265_v44  ;;  %v7711_v44 = vld [vmem:[#allocation12 + $0xc0] sm:$0xff] }
0x14df   :  { %v7270_v1 = vpop.xlane.xlu1 %7269 }
0x14e0   :  { %v7284_v46 = vmul.f32 0.0078125, %v7270_v1  ;;  %v7695_v1 = vld [vmem:[#allocation12 + $0x40] sm:$0xff] }
0x14e1   :  { %v7268_v28 = vpop.xlane.xlu0 %7267 }
0x14e2   :  { %v7292_v36 = vadd.f32 1e-05, %v7284_v46  ;;  %v7283_v50 = vmul.f32 0.0078125, %v7268_v28  ;;  %v11514_v46 = vld [vmem:[#allocation12 + $0x140] sm:$0xff]  ;;  %v7710_v28 = vld [vmem:[#allocation12 + $0xb8] sm:$0xff] }
0x14e4   :  { %9580 = vrsqrt.f32 %v7292_v36  ;;  %v7291_v13 = vadd.f32 1e-05, %v7283_v50  ;;  %v11518_v36 = vld [vmem:[#allocation12 + $0x1b8] sm:$0xff] }
0x14e5   :  { %v7694_v50 = vld [vmem:[#allocation12 + $0x38] sm:$0xff] }
0x14e6   :  { %9582 = vrsqrt.f32 %v7291_v13  ;;  %v11521_v13 = vld [vmem:[#allocation12 + $0x138] sm:$0xff] }
0x14f0   :  { %v7272_v17 = vpop.xlane.xlu0 %7271 }
0x14f1   :  { %v9581_v11 = vpop.eup %9580  ;;  %v7285_v33 = vmul.f32 0.0078125, %v7272_v17  ;;  %v7709_v17 = vld [vmem:[#allocation12 + $0xb0] sm:$0xff] }
0x14f2   :  { %v7308_v62 = vmul.f32 %v9581_v11, %v11388_v51  ;;  %v11524_v11 = vld [vmem:[#allocation12 + $0x1b0] sm:$0xff] }
0x14f3   :  { %v9583_v40 = vpop.eup %9582  ;;  %v7293_v45 = vadd.f32 1e-05, %v7285_v33  ;;  %v7693_v33 = vld [vmem:[#allocation12 + $0x30] sm:$0xff] }
0x14f4   :  { %v7274_v18 = vpop.xlane.xlu1 %7273  ;;  %v7307_v34 = vmul.f32 %v9583_v40, %v11390_v16  ;;  %v7322_v51 = vmul.f32 %v11434_v2, %v7308_v62  ;;  %v7702_v16 = vld [vmem:[#allocation12 + $0x78] sm:$0xff]  ;;  %v11527_v40 = vld [vmem:[#allocation12 + $0x130] sm:$0xff]  ;;  %v11533_v62 = vld [vmem:[#allocation12 + $0x128] sm:$0xff] }
0x14f5   :  { %9584 = vrsqrt.f32 %v7293_v45  ;;  %v7286_v59 = vmul.f32 0.0078125, %v7274_v18  ;;  %v7708_v45 = vld [vmem:[#allocation12 + $0xa8] sm:$0xff] }
0x14f6   :  { %v7321_v31 = vmul.f32 %v11434_v2, %v7307_v34  ;;  %v11455_v53 = vadd.f32 %v11440_v5, %v7322_v51  ;;  %v11530_v18 = vld [vmem:[#allocation12 + $0x1a8] sm:$0xff]  ;;  %v11539_v51 = vld [vmem:[#allocation12 + $0x120] sm:$0xff] }
0x14f7   :  { %v7294_v52 = vadd.f32 1e-05, %v7286_v59  ;;  %v7692_v34 = vld [vmem:[#allocation12 + $0x28] sm:$0xff]  ;;  %v7707_v59 = vld [vmem:[#allocation12 + $0xa0] sm:$0xff] }
0x14f8   :  { %v11443_v37 = vadd.f32 %v11440_v5, %v7321_v31  ;;  %v11536_v31 = vld [vmem:[#allocation12 + $0x1a0] sm:$0xff] }
0x14f9   :  { %9586 = vrsqrt.f32 %v7294_v52  ;;  %v7691_v52 = vld [vmem:[#allocation12 + $0x20] sm:$0xff] }
0x14fa   :  { %7494 = vmatmul.mubr.f32.vlgmr.msra.gmra.mxu1 %v11443_v37  ;;  %7607 = vmatmul.mubr.f32.vlgmr.msra.gmra.mxu0 %v11443_v37 }
0x14fb   :  { %7499 = vmatprep.mubr.f32.mxu1 %v11809_v26  ;;  %7612 = vmatprep.mubr.f32.mxu0 %v11809_v26 }
0x14fc   :  { %8625 = vmatpush3.msra.mxu1 %v7702_v16  ;;  %8681 = vmatpush3.msra.mxu0 %v11446_v15 }
0x14fd   :  { %8626 = vmatprep.subr.mxu1 %v7717_v25  ;;  %8682 = vmatprep.subr.mxu0 %v11450_v29 }
0x14fe   :  { %7500 = vmatmul.mubr.f32.gmra.mxu1 %v11455_v53  ;;  %7613 = vmatmul.mubr.f32.gmra.mxu0 %v11455_v53 }
0x14ff   :  { %7505 = vmatprep.mubr.f32.mxu1 %v11809_v26  ;;  %7618 = vmatprep.mubr.f32.mxu0 %v11809_v26 }
0x1500   :  { %8627 = vmatpush3.msra.mxu1 %v7701_v32  ;;  %8683 = vmatpush3.msra.mxu0 %v11459_v43 }
0x1501   :  { %8628 = vmatprep.subr.mxu1 %v7716_v42  ;;  %8684 = vmatprep.subr.mxu0 %v11463_v4 }
0x1502   :  { %v9585_v48 = vpop.eup %9584  ;;  %8629 = vmatpush3.msra.mxu1 %v7700_v49  ;;  %8685 = vmatpush3.msra.mxu0 %v11467_v24 }
0x1503   :  { %v7309_v47 = vmul.f32 %v9585_v48, %v11397_v54  ;;  %8630 = vmatprep.subr.mxu1 %v7715_v0  ;;  %8686 = vmatprep.subr.mxu0 %v11470_v55 }
0x1504   :  { %8631 = vmatpush3.msra.mxu1 %v7699_v35  ;;  %8687 = vmatpush3.msra.mxu0 %v11473_v21 }
0x1505   :  { %v7323_v12 = vmul.f32 %v11434_v2, %v7309_v47  ;;  %8632 = vmatprep.subr.mxu1 %v7714_v63  ;;  %8688 = vmatprep.subr.mxu0 %v11476_v23 }
0x1506   :  { %v9587_v54 = vpop.eup %9586  ;;  %8633 = vmatpush3.msra.mxu1 %v7698_v9  ;;  %8689 = vmatpush3.msra.mxu0 %v11480_v27 }
0x1507   :  { %v11491_v20 = vadd.f32 %v11440_v5, %v7323_v12  ;;  %v7310_v30 = vmul.f32 %v9587_v54, %v11402_v56  ;;  %8634 = vmatprep.subr.mxu1 %v7713_v8  ;;  %8690 = vmatprep.subr.mxu0 %v11483_v19 }
0x1508   :  { %8635 = vmatpush3.msra.mxu1 %v7697_v3  ;;  %8691 = vmatpush3.msra.mxu0 %v11487_v14 }
0x1509   :  { %7506 = vmatmul.mubr.f32.gmra.mxu1 %v11491_v20  ;;  %7619 = vmatmul.mubr.f32.gmra.mxu0 %v11491_v20  ;;  %v7324_v58 = vmul.f32 %v11434_v2, %v7310_v30 }
0x150a   :  { %7511 = vmatprep.mubr.f32.mxu1 %v11809_v26  ;;  %7624 = vmatprep.mubr.f32.mxu0 %v11809_v26 }
0x150b   :  { %v11506_v56 = vadd.f32 %v11440_v5, %v7324_v58  ;;  %8636 = vmatprep.subr.mxu1 %v7712_v39  ;;  %8692 = vmatprep.subr.mxu0 %v11496_v41  ;;  %v7706_v58 = vld [vmem:[#allocation12 + $0x98] sm:$0xff] }
0x150c   :  { %8637 = vmatpush3.msra.mxu1 %v7696_v7  ;;  %8693 = vmatpush3.msra.mxu0 %v11501_v38  ;;  %v11547_v7 = vld [vmem:[#allocation12 + $0x198] sm:$0xff] }
0x150d   :  { %7512 = vmatmul.mubr.f32.gmra.mxu1 %v11506_v56  ;;  %7625 = vmatmul.mubr.f32.gmra.mxu0 %v11506_v56 }
0x150e   :  { %7517 = vmatprep.mubr.f32.mxu1 %v11809_v26  ;;  %7630 = vmatprep.mubr.f32.mxu0 %v11809_v26 }
0x150f   :  { %8638 = vmatprep.subr.mxu1 %v7711_v44  ;;  %8694 = vmatprep.subr.mxu0 %v11510_v61  ;;  %v7690_v44 = vld [vmem:[#allocation12 + $0x18] sm:$0xff] }
0x1510   :  { %8639 = vmatpush3.msra.mxu1 %v7695_v1  ;;  %8695 = vmatpush3.msra.mxu0 %v11514_v46  ;;  %v11550_v1 = vld [vmem:[#allocation12 + $0x118] sm:$0xff] }
0x1511   :  { %8640 = vmatprep.subr.mxu1 %v7710_v28  ;;  %8696 = vmatprep.subr.mxu0 %v11518_v36 }
0x1512   :  { %8641 = vmatpush3.msra.mxu1 %v7694_v50  ;;  %8697 = vmatpush3.msra.mxu0 %v11521_v13 }
0x1513   :  { %8642 = vmatprep.subr.mxu1 %v7709_v17  ;;  %8698 = vmatprep.subr.mxu0 %v11524_v11  ;;  %v7689_v17 = vld [vmem:[#allocation12 + $0x10] sm:$0xff] }
0x1514   :  { %8643 = vmatpush3.msra.mxu1 %v7693_v33  ;;  %8699 = vmatpush3.msra.mxu0 %v11527_v40  ;;  %v11560_v33 = vld [vmem:[#allocation12 + $0x110] sm:$0xff] }
0x1515   :  { %8644 = vmatprep.subr.mxu1 %v7708_v45  ;;  %8700 = vmatprep.subr.mxu0 %v11530_v18 }
0x1516   :  { %8645 = vmatpush3.msra.mxu1 %v7692_v34  ;;  %8701 = vmatpush3.msra.mxu0 %v11533_v62  ;;  %v7704_v34 = vld [vmem:[#allocation12 + $0x88] sm:$0xff] }
0x1517   :  { %8646 = vmatprep.subr.mxu1 %v7707_v59  ;;  %8702 = vmatprep.subr.mxu0 %v11536_v31  ;;  %v11564_v59 = vld [vmem:[#allocation12 + $0x188] sm:$0xff] }
0x1518   :  { %8647 = vmatpush3.msra.mxu1 %v7691_v52  ;;  %8703 = vmatpush3.msra.mxu0 %v11539_v51 }
0x1519   :  { %8648 = vmatprep.subr.mxu1 %v7706_v58  ;;  %8704 = vmatprep.subr.mxu0 %v11547_v7 }
0x151a   :  { %8649 = vmatpush3.msra.mxu1 %v7690_v44  ;;  %8705 = vmatpush3.msra.mxu0 %v11550_v1 }
0x1522   :  { %v7278_v16 = vpop.xlane.xlu1 %7277 }
0x1523   :  { %v7288_v25 = vmul.f32 0.0078125, %v7278_v16 }
0x1524   :  { %v7276_v32 = vpop.xlane.xlu0 %7275 }
0x1525   :  { %v7296_v42 = vadd.f32 1e-05, %v7288_v25  ;;  %v7287_v49 = vmul.f32 0.0078125, %v7276_v32 }
0x1527   :  { %9588 = vrsqrt.f32 %v7296_v42  ;;  %v7295_v0 = vadd.f32 1e-05, %v7287_v49  ;;  %v7688_v42 = vld [vmem:[#allocation12 + $0x8] sm:$0xff] }
0x1528   :  { %v11575_v49 = vld [vmem:[#allocation12 + $0x108] sm:$0xff] }
0x1529   :  { %9590 = vrsqrt.f32 %v7295_v0  ;;  %v7703_v0 = vld [vmem:[#allocation12 + $0x80] sm:$0xff] }
0x152b   :  { %v7282_v35 = vpop.xlane.xlu1 %7281 }
0x152c   :  { %v7290_v48 = vmul.f32 0.0078125, %v7282_v35  ;;  %v11579_v35 = vld [vmem:[#allocation12 + $0x180] sm:$0xff] }
0x152d   :  { %v7280_v63 = vpop.xlane.xlu0 %7279 }
0x152e   :  { %v7298_v47 = vadd.f32 1e-05, %v7290_v48  ;;  %v7289_v9 = vmul.f32 0.0078125, %v7280_v63  ;;  %v11584_v48 = vld [vmem:[#allocation12 + $0x100] sm:$0xff] }
0x1530   :  { %9592 = vrsqrt.f32 %v7298_v47  ;;  %v7297_v8 = vadd.f32 1e-05, %v7289_v9 }
0x1532   :  { %9594 = vrsqrt.f32 %v7297_v8  ;;  %v11812_v8 = vld [vmem:[#allocation20_spill] sm:$0xff] }
0x1534   :  { %v9589_v12 = vpop.eup %9588 }
0x1535   :  { %v7312_v30 = vmul.f32 %v9589_v12, %v11407_v57  ;;  %v7705_v57 = vld [vmem:[#allocation12 + $0x90] sm:$0xff]  ;;  %v7423_v12 = vsub.s32 3, %v11812_v8 }
0x1536   :  { %v9591_v3 = vpop.eup %9590  ;;  %8650 = vmatprep.subr.mxu1 %v7705_v57 }
0x1537   :  { %v7311_v54 = vmul.f32 %v9591_v3, %v11410_v6  ;;  %v7326_v50 = vmul.f32 %v11434_v2, %v7312_v30  ;;  %v11557_v6 = vld [vmem:[#allocation12 + $0x190] sm:$0xff]  ;;  %8651 = vmatpush3.msra.mxu1 %v7689_v17  ;;  %v11813_v3 = vsub.s32 0, %v11812_v8 }
0x1538   :  { %8706 = vmatprep.subr.mxu0 %v11557_v6  ;;  %8652 = vmatprep.subr.mxu1 %v7704_v34 }
0x1539   :  { %v7325_v39 = vmul.f32 %v11434_v2, %v7311_v54  ;;  %v11569_v16 = vadd.f32 %v11440_v5, %v7326_v50  ;;  %8707 = vmatpush3.msra.mxu0 %v11560_v33  ;;  %8653 = vmatpush3.msra.mxu1 %v7688_v42 }
0x153a   :  { %8708 = vmatprep.subr.mxu0 %v11564_v59  ;;  %8654 = vmatprep.subr.mxu1 %v7703_v0 }
0x153b   :  { %v11553_v28 = vadd.f32 %v11440_v5, %v7325_v39  ;;  %8709 = vmatpush3.msra.mxu0 %v11575_v49 }
0x153c   :  { %8710 = vmatprep.subr.mxu0 %v11579_v35 }
0x153d   :  { %v9593_v45 = vpop.eup %9592  ;;  %7518 = vmatmul.mubr.f32.gmra.mxu1 %v11553_v28  ;;  %7631 = vmatmul.mubr.f32.gmra.mxu0 %v11553_v28 }
0x153e   :  { %7523 = vmatprep.mubr.f32.mxu1 %v11809_v26  ;;  %7636 = vmatprep.mubr.f32.mxu0 %v11809_v26  ;;  %v7314_v32 = vmul.f32 %v9593_v45, %v11417_v10  ;;  %v7687_v10 = vld [vmem:[#allocation12] sm:$0xff] }
0x153f   :  { %v9595_v52 = vpop.eup %9594  ;;  %8655 = vmatpush3.msra.mxu1 %v7687_v10  ;;  %8711 = vmatpush3.msra.mxu0 %v11584_v48 }
0x1540   :  { %v7313_v25 = vmul.f32 %v9595_v52, %v11420_v22  ;;  %v7328_v47 = vmul.f32 %v11434_v2, %v7314_v32  ;;  %9272 = vmatprep.subr.mxu1 %v11426_v60  ;;  %v11815_v60 = vsub.s32 1, %v11812_v8 }
0x1541   :  { %7524 = vmatmul.mubr.f32.gmra.mxu1 %v11569_v16  ;;  %7637 = vmatmul.mubr.f32.gmra.mxu0 %v11569_v16 }
0x1542   :  { %7529 = vmatprep.mubr.f32.mxu1 %v11809_v26  ;;  %7642 = vmatprep.mubr.f32.mxu0 %v11809_v26  ;;  %v7327_v22 = vmul.f32 %v11434_v2, %v7313_v25  ;;  %v11598_v9 = vadd.f32 %v11440_v5, %v7328_v47  ;;  %v7407_v2 = vld [vmem:[%s11753_s8] sm:$0xf] }
0x1543   :  { %v11609_v54 = vrot.slane %v7407_v2, %v11813_v3  ;;  %v11617_v30 = vrot.slane %v7407_v2, %v11815_v60  ;;  %v11619_v39 = vrot.slane %v7407_v2, %v7423_v12 }
0x1544   :  { %v11588_v63 = vadd.f32 %v11440_v5, %v7327_v22 }
0x1546   :  { %7530 = vmatmul.mubr.f32.gmra.mxu1 %v11588_v63  ;;  %7643 = vmatmul.mubr.f32.gmra.mxu0 %v11588_v63 }
0x1547   :  { %7535 = vmatprep.mubr.f32.mxu1 %v11809_v26  ;;  %7648 = vmatprep.mubr.f32.mxu0 %v11809_v26  ;;  %v11814_v26 = vsub.s32 2, %v11812_v8 }
0x1549   :  { %v11613_v5 = vrot.slane %v7407_v2, %v11814_v26 }
0x154a   :  { %7536 = vmatmul.mubr.f32.gmra.mxu1 %v11598_v9  ;;  %7649 = vmatmul.mubr.f32.gmra.mxu0 %v11598_v9 }
0x15ba   :  { %v7495_v58 = vpop.f32.mrf.mxu1  ;;  %v7608_v44 = vpop.f32.mrf.mxu0 }
0x15bb   :  { %v7496_v50 = vadd.f32 %v7495_v58, %v11609_v54  ;;  %v7609_v57 = vadd.f32 %v7608_v44, %v11613_v5 }
0x15bc   :  { %v7497_v17 = vpop.f32.mrf.mxu1  ;;  %v7610_v45 = vpop.f32.mrf.mxu0 }
0x15bd   :  { %v7498_v34 = vadd.f32 %v7497_v17, %v11617_v30  ;;  %v7611_v52 = vadd.f32 %v7610_v45, %v11619_v39  ;;  %v7655_v22 = vmax.f32 %v7496_v50, 0.0  ;;  %v7657_v10 = vmax.f32 %v7609_v57, 0.0 }
0x15be   :  { %v7501_v25 = vpop.f32.mrf.mxu1  ;;  %v7614_v32 = vpop.f32.mrf.mxu0 }
0x15bf   :  { %v7656_v42 = vmax.f32 %v7498_v34, 0.0  ;;  %v7658_v0 = vmax.f32 %v7611_v52, 0.0  ;;  %v7502_v47 = vadd.f32 %v7501_v25, %v11609_v54  ;;  %v7615_v2 = vadd.f32 %v7614_v32, %v11613_v5 }
0x15c0   :  { %v7503_v8 = vpop.f32.mrf.mxu1  ;;  %v7616_v12 = vpop.f32.mrf.mxu0 }
0x15c1   :  { %v7504_v3 = vadd.f32 %v7503_v8, %v11617_v30  ;;  %v7617_v26 = vadd.f32 %v7616_v12, %v11619_v39  ;;  %7822 = vmatprep.mubr.f32.mxu1 %v7656_v42  ;;  %7927 = vmatprep.mubr.f32.mxu0 %v7658_v0  ;;  %v7659_v44 = vmax.f32 %v7502_v47, 0.0  ;;  %v7661_v50 = vmax.f32 %v7615_v2, 0.0 }
0x15c2   :  { %7823 = vmatmul.mubr.f32.vlgmr.msra.gmra.mxu1 %v7655_v22  ;;  %7928 = vmatmul.mubr.f32.vlgmr.msra.gmra.mxu0 %v7657_v10 }
0x15c3   :  { %v7660_v60 = vmax.f32 %v7504_v3, 0.0  ;;  %v7662_v58 = vmax.f32 %v7617_v26, 0.0  ;;  %9288 = vmatpush3.msra.mxu1 %v11446_v15 }
0x15c4   :  { %9273 = vmatprep.subr.mxu1 %v11450_v29 }
0x15c5   :  { %7827 = vmatprep.mubr.f32.mxu1 %v7660_v60  ;;  %7932 = vmatprep.mubr.f32.mxu0 %v7662_v58 }
0x15c6   :  { %7828 = vmatmul.mubr.f32.gmra.mxu1 %v7659_v44  ;;  %7933 = vmatmul.mubr.f32.gmra.mxu0 %v7661_v50 }
0x15c7   :  { %9289 = vmatpush3.msra.mxu1 %v11459_v43 }
0x15c8   :  { %9274 = vmatprep.subr.mxu1 %v11463_v4 }
0x15c9   :  { %v7507_v57 = vpop.f32.mrf.mxu1  ;;  %v7620_v17 = vpop.f32.mrf.mxu0  ;;  %9290 = vmatpush3.msra.mxu1 %v11467_v24 }
0x15ca   :  { %9275 = vmatprep.subr.mxu1 %v11470_v55  ;;  %v7508_v15 = vadd.f32 %v7507_v57, %v11609_v54  ;;  %v7621_v45 = vadd.f32 %v7620_v17, %v11613_v5 }
0x15cb   :  { %v7509_v34 = vpop.f32.mrf.mxu1  ;;  %v7622_v29 = vpop.f32.mrf.mxu0  ;;  %9291 = vmatpush3.msra.mxu1 %v11473_v21 }
0x15cc   :  { %v7510_v52 = vadd.f32 %v7509_v34, %v11617_v30  ;;  %v7623_v43 = vadd.f32 %v7622_v29, %v11619_v39  ;;  %9276 = vmatprep.subr.mxu1 %v11476_v23  ;;  %v7663_v32 = vmax.f32 %v7508_v15, 0.0  ;;  %v7665_v42 = vmax.f32 %v7621_v45, 0.0 }
0x15cd   :  { %v7513_v4 = vpop.f32.mrf.mxu1  ;;  %v7626_v25 = vpop.f32.mrf.mxu0  ;;  %9292 = vmatpush3.msra.mxu1 %v11480_v27 }
0x15ce   :  { %v7664_v24 = vmax.f32 %v7510_v52, 0.0  ;;  %v7666_v55 = vmax.f32 %v7623_v43, 0.0  ;;  %9277 = vmatprep.subr.mxu1 %v11483_v19  ;;  %v7514_v0 = vadd.f32 %v7513_v4, %v11609_v54  ;;  %v7627_v21 = vadd.f32 %v7626_v25, %v11613_v5 }
0x15cf   :  { %v7515_v22 = vpop.f32.mrf.mxu1  ;;  %v7628_v10 = vpop.f32.mrf.mxu0  ;;  %9293 = vmatpush3.msra.mxu1 %v11487_v14 }
0x15d0   :  { %v7516_v23 = vadd.f32 %v7515_v22, %v11617_v30  ;;  %v7629_v47 = vadd.f32 %v7628_v10, %v11619_v39  ;;  %7832 = vmatprep.mubr.f32.mxu1 %v7664_v24  ;;  %7937 = vmatprep.mubr.f32.mxu0 %v7666_v55  ;;  %v7667_v2 = vmax.f32 %v7514_v0, 0.0  ;;  %v7669_v8 = vmax.f32 %v7627_v21, 0.0 }
0x15d1   :  { %7833 = vmatmul.mubr.f32.gmra.mxu1 %v7663_v32  ;;  %7938 = vmatmul.mubr.f32.gmra.mxu0 %v7665_v42 }
0x15d2   :  { %v7668_v27 = vmax.f32 %v7516_v23, 0.0  ;;  %v7670_v19 = vmax.f32 %v7629_v47, 0.0  ;;  %9278 = vmatprep.subr.mxu1 %v11496_v41 }
0x15d3   :  { %9294 = vmatpush3.msra.mxu1 %v11501_v38 }
0x15d4   :  { %7837 = vmatprep.mubr.f32.mxu1 %v7668_v27  ;;  %7942 = vmatprep.mubr.f32.mxu0 %v7670_v19  ;;  %v11687_v27 = vld [vmem:[%s11755_s10] ss:$0 sm:$0xff] }
0x15d5   :  { %7838 = vmatmul.mubr.f32.gmra.mxu1 %v7667_v2  ;;  %7943 = vmatmul.mubr.f32.gmra.mxu0 %v7669_v8 }
0x15d6   :  { %9279 = vmatprep.subr.mxu1 %v11510_v61 }
0x15d7   :  { %9295 = vmatpush3.msra.mxu1 %v11514_v46 }
0x15d8   :  { %9280 = vmatprep.subr.mxu1 %v11518_v36 }
0x15d9   :  { %9296 = vmatpush3.msra.mxu1 %v11521_v13 }
0x15da   :  { %9281 = vmatprep.subr.mxu1 %v11524_v11 }
0x15db   :  { %9297 = vmatpush3.msra.mxu1 %v11527_v40 }
0x15dc   :  { %9282 = vmatprep.subr.mxu1 %v11530_v18 }
0x15dd   :  { %9298 = vmatpush3.msra.mxu1 %v11533_v62 }
0x15de   :  { %9283 = vmatprep.subr.mxu1 %v11536_v31 }
0x15df   :  { %9299 = vmatpush3.msra.mxu1 %v11539_v51 }
0x15e0   :  { %9284 = vmatprep.subr.mxu1 %v11547_v7 }
0x15e1   :  { %9300 = vmatpush3.msra.mxu1 %v11550_v1 }
0x15e2   :  { %9285 = vmatprep.subr.mxu1 %v11557_v6 }
0x15e3   :  { %9301 = vmatpush3.msra.mxu1 %v11560_v33 }
0x15e4   :  { %9286 = vmatprep.subr.mxu1 %v11564_v59 }
0x15e5   :  { %9302 = vmatpush3.msra.mxu1 %v11575_v49 }
0x15e6   :  { %9287 = vmatprep.subr.mxu1 %v11579_v35 }
0x15e7   :  { %9303 = vmatpush3.msra.mxu1 %v11584_v48 }
0x15fd   :  { %v7519_v14 = vpop.f32.mrf.mxu1  ;;  %v7632_v41 = vpop.f32.mrf.mxu0 }
0x15fe   :  { %v7520_v38 = vadd.f32 %v7519_v14, %v11609_v54  ;;  %v7633_v15 = vadd.f32 %v7632_v41, %v11613_v5 }
0x15ff   :  { %v7521_v61 = vpop.f32.mrf.mxu1  ;;  %v7634_v46 = vpop.f32.mrf.mxu0 }
0x1600   :  { %v7522_v36 = vadd.f32 %v7521_v61, %v11617_v30  ;;  %v7671_v18 = vmax.f32 %v7520_v38, 0.0  ;;  %v7635_v44 = vadd.f32 %v7634_v46, %v11619_v39 }
0x1601   :  { %v7525_v13 = vpop.f32.mrf.mxu1  ;;  %v7638_v40 = vpop.f32.mrf.mxu0 }
0x1602   :  { %v7672_v11 = vmax.f32 %v7522_v36, 0.0  ;;  %v7526_v62 = vadd.f32 %v7525_v13, %v11609_v54  ;;  %v7674_v34 = vmax.f32 %v7635_v44, 0.0  ;;  %v7639_v43 = vadd.f32 %v7638_v40, %v11613_v5 }
0x1603   :  { %v7527_v31 = vpop.f32.mrf.mxu1  ;;  %v7640_v1 = vpop.f32.mrf.mxu0 }
0x1604   :  { %v7528_v51 = vadd.f32 %v7527_v31, %v11617_v30  ;;  %7842 = vmatprep.mubr.f32.mxu1 %v7672_v11  ;;  %v7675_v33 = vmax.f32 %v7526_v62, 0.0  ;;  %v7641_v29 = vadd.f32 %v7640_v1, %v11619_v39  ;;  %v7677_v24 = vmax.f32 %v7639_v43, 0.0 }
0x1605   :  { %7843 = vmatmul.mubr.f32.gmra.mxu1 %v7671_v18 }
0x1606   :  { %v7676_v7 = vmax.f32 %v7528_v51, 0.0  ;;  %v7531_v6 = vpop.f32.mrf.mxu1  ;;  %v7644_v48 = vpop.f32.mrf.mxu0  ;;  %v7678_v4 = vmax.f32 %v7641_v29, 0.0 }
0x1607   :  { %v7532_v59 = vadd.f32 %v7531_v6, %v11609_v54  ;;  %v7645_v55 = vadd.f32 %v7644_v48, %v11613_v5 }
0x1608   :  { %v7533_v49 = vpop.f32.mrf.mxu1  ;;  %7847 = vmatprep.mubr.f32.mxu1 %v7676_v7  ;;  %v7646_v57 = vpop.f32.mrf.mxu0 }
0x1609   :  { %v7534_v35 = vadd.f32 %v7533_v49, %v11617_v30  ;;  %7848 = vmatmul.mubr.f32.gmra.mxu1 %v7675_v33  ;;  %v7679_v26 = vmax.f32 %v7532_v59, 0.0  ;;  %v7681_v0 = vmax.f32 %v7645_v55, 0.0 }
0x160a   :  { %v7537_v12 = vpop.f32.mrf.mxu1  ;;  %v7650_v52 = vpop.f32.mrf.mxu0 }
0x160b   :  { %v7680_v3 = vmax.f32 %v7534_v35, 0.0  ;;  %v7538_v60 = vadd.f32 %v7537_v12, %v11609_v54  ;;  %v7673_v54 = vmax.f32 %v7633_v15, 0.0  ;;  %v7651_v21 = vadd.f32 %v7650_v52, %v11613_v5 }
0x160c   :  { %v7539_v58 = vpop.f32.mrf.mxu1  ;;  %v7652_v25 = vpop.f32.mrf.mxu0 }
0x160d   :  { %v7540_v50 = vadd.f32 %v7539_v58, %v11617_v30  ;;  %7852 = vmatprep.mubr.f32.mxu1 %v7680_v3  ;;  %v7683_v45 = vmax.f32 %v7538_v60, 0.0  ;;  %v7647_v30 = vadd.f32 %v7646_v57, %v11619_v39  ;;  %v7653_v42 = vadd.f32 %v7652_v25, %v11619_v39 }
0x160e   :  { %7853 = vmatmul.mubr.f32.gmra.mxu1 %v7679_v26  ;;  %v7685_v10 = vmax.f32 %v7651_v21, 0.0 }
0x160f   :  { %v7684_v17 = vmax.f32 %v7540_v50, 0.0  ;;  %v7682_v32 = vmax.f32 %v7647_v30, 0.0  ;;  %v7686_v22 = vmax.f32 %v7653_v42, 0.0 }
0x1611   :  { %7857 = vmatprep.mubr.f32.mxu1 %v7684_v17 }
0x1612   :  { %7858 = vmatmul.mubr.f32.gmra.mxu1 %v7683_v45 }
0x1613   :  { %7947 = vmatprep.mubr.f32.mxu1 %v7674_v34 }
0x1616   :  { %7948 = vmatmul.mubr.f32.vlgmr.msra.gmra.mxu1 %v7673_v54 }
0x1617   :  { %7952 = vmatprep.mubr.f32.mxu1 %v7678_v4 }
0x161a   :  { %7953 = vmatmul.mubr.f32.gmra.mxu1 %v7677_v24 }
0x161b   :  { %7957 = vmatprep.mubr.f32.mxu1 %v7682_v32 }
0x161e   :  { %7958 = vmatmul.mubr.f32.gmra.mxu1 %v7681_v0 }
0x161f   :  { %7962 = vmatprep.mubr.f32.mxu1 %v7686_v22 }
0x1622   :  { %7963 = vmatmul.mubr.f32.gmra.mxu1 %v7685_v10 }
0x1682   :  { %v8656_v23 = vpop.f32.mrf.mxu1  ;;  %v8712_v47 = vpop.f32.mrf.mxu0 }
0x1684   :  { %v8657_v19 = vpop.f32.mrf.mxu1  ;;  %v8713_v2 = vpop.f32.mrf.mxu0 }
0x1685   :  { %v8658_v39 = vadd.f32 %v8657_v19, %v8656_v23  ;;  %v8714_v5 = vadd.f32 %v8713_v2, %v8712_v47 }
0x1686   :  { %v8659_v8 = vpop.f32.mrf.mxu1  ;;  %v8715_v14 = vpop.f32.mrf.mxu0 }
0x1687   :  { %v7825_v41 = vadd.f32 %v8658_v39, %v11687_v27 }
0x1688   :  { %v8660_v38 = vpop.f32.mrf.mxu1  ;;  %v8716_v61 = vpop.f32.mrf.mxu0 }
0x1689   :  { %v7930_v46 = vadd.f32 %v8714_v5, %v7825_v41  ;;  %v8661_v36 = vadd.f32 %v8660_v38, %v8659_v8  ;;  %v8717_v11 = vadd.f32 %v8716_v61, %v8715_v14 }
0x168b   :  { %v7830_v13 = vadd.f32 %v8661_v36, %v11687_v27  ;;  %v11692_v40 = vadd.f32 %v7930_v46, %v11443_v37 }
0x168d   :  { %v7935_v18 = vadd.f32 %v8717_v11, %v7830_v13  ;;  %7978 = vadd.xlane.f32.xlu0 %v11692_v40 }
0x168f   :  { %v11696_v62 = vadd.f32 %v7935_v18, %v11455_v53 }
0x1691   :  { %v8662_v31 = vpop.f32.mrf.mxu1  ;;  %v8718_v51 = vpop.f32.mrf.mxu0  ;;  %7980 = vadd.xlane.f32.xlu1 %v11696_v62 }
0x1693   :  { %v8663_v7 = vpop.f32.mrf.mxu1  ;;  %v8719_v1 = vpop.f32.mrf.mxu0 }
0x1694   :  { %v8664_v6 = vadd.f32 %v8663_v7, %v8662_v31  ;;  %v8720_v35 = vadd.f32 %v8719_v1, %v8718_v51 }
0x1695   :  { %v8665_v33 = vpop.f32.mrf.mxu1  ;;  %v8721_v59 = vpop.f32.mrf.mxu0 }
0x1696   :  { %v7835_v49 = vadd.f32 %v8664_v6, %v11687_v27 }
0x1697   :  { %v8666_v37 = vpop.f32.mrf.mxu1  ;;  %v8722_v48 = vpop.f32.mrf.mxu0 }
0x1698   :  { %v7940_v12 = vadd.f32 %v8720_v35, %v7835_v49  ;;  %v8667_v3 = vadd.f32 %v8666_v37, %v8665_v33  ;;  %v8723_v53 = vadd.f32 %v8722_v48, %v8721_v59 }
0x169a   :  { %v7840_v26 = vadd.f32 %v8667_v3, %v11687_v27  ;;  %v7970_v60 = vadd.f32 %v7940_v12, %v11491_v20 }
0x169c   :  { %v7945_v58 = vadd.f32 %v8723_v53, %v7840_v26  ;;  %7982 = vadd.xlane.f32.xlu0 %v7970_v60 }
0x169e   :  { %v7971_v44 = vadd.f32 %v7945_v58, %v11506_v56 }
0x16a0   :  { %7984 = vadd.xlane.f32.xlu1 %v7971_v44 }
0x16c5   :  { %v8668_v50 = vpop.f32.mrf.mxu1 }
0x16c7   :  { %v8669_v57 = vpop.f32.mrf.mxu1 }
0x16c8   :  { %v8670_v54 = vadd.f32 %v8669_v57, %v8668_v50 }
0x16c9   :  { %v8671_v17 = vpop.f32.mrf.mxu1 }
0x16ca   :  { %v7845_v30 = vadd.f32 %v8670_v54, %v11687_v27 }
0x16cb   :  { %v8672_v15 = vpop.f32.mrf.mxu1 }
0x16cc   :  { %v8673_v25 = vadd.f32 %v8672_v15, %v8671_v17 }
0x16ce   :  { %v8674_v45 = vpop.f32.mrf.mxu1  ;;  %v7850_v56 = vadd.f32 %v8673_v25, %v11687_v27 }
0x16d0   :  { %v8675_v34 = vpop.f32.mrf.mxu1 }
0x16d1   :  { %v8676_v42 = vadd.f32 %v8675_v34, %v8674_v45 }
0x16d2   :  { %v8677_v29 = vpop.f32.mrf.mxu1 }
0x16d3   :  { %v7855_v47 = vadd.f32 %v8676_v42, %v11687_v27 }
0x16d4   :  { %v8678_v52 = vpop.f32.mrf.mxu1 }
0x16d5   :  { %v8679_v19 = vadd.f32 %v8678_v52, %v8677_v29 }
0x16d6   :  { %v8724_v43 = vpop.f32.mrf.mxu1 }
0x16d7   :  { %v7860_v5 = vadd.f32 %v8679_v19, %v11687_v27 }
0x16d8   :  { %v8725_v4 = vpop.f32.mrf.mxu1 }
0x16d9   :  { %v8726_v20 = vadd.f32 %v8725_v4, %v8724_v43 }
0x16da   :  { %v8727_v24 = vpop.f32.mrf.mxu1 }
0x16db   :  { %v7950_v55 = vadd.f32 %v8726_v20, %v7845_v30  ;;  %v8318_v20 = vld [vmem:[%s11756_s11] ss:$0 sm:$0xff]  ;;  %s9789_s11 = smov [#allocation14]  }
0x16dc   :  { %v8728_v32 = vpop.f32.mrf.mxu1 }
0x16dd   :  { %v8729_v0 = vadd.f32 %v8728_v32, %v8727_v24  ;;  %v7972_v21 = vadd.f32 %v7950_v55, %v11553_v28 }
0x16de   :  { %v8730_v22 = vpop.f32.mrf.mxu1 }
0x16df   :  { %v7955_v10 = vadd.f32 %v8729_v0, %v7850_v56  ;;  %7986 = vadd.xlane.f32.xlu0 %v7972_v21  ;;  %v8319_v56 = vld [vmem:[%s11757_s12] ss:$0 sm:$0xff]  ;;  %s8107_s12 = sshll.u32 %s9789_s11, 4  ;;  %s8108_s12 = int_to_ptr.vmem [resolvable:$true] %s8107_s12 }
0x16e0   :  { %v8731_v23 = vpop.f32.mrf.mxu1  ;;  %s9740_s19 = scalar_lea.vmem %s8108_s12, 1024  ;;  %p9745_p3 = scmp.lt.s32.totalorder %s8108_s12, %s8108_s12 }
0x16e1   :  { %v8732_v2 = vadd.f32 %v8731_v23, %v8730_v22  ;;  %v7973_v39 = vadd.f32 %v7955_v10, %v11569_v16  ;;  %p9741_p2 = scmp.ne.s32.totalorder %s8108_s12, %s9740_s19  ;;  %p9746_p4 = scmp.lt.s32.totalorder %s9740_s19, %s9740_s19 }
0x16e2   :  { %v8733_v8 = vpop.f32.mrf.mxu1 }
0x16e3   :  { %v7960_v14 = vadd.f32 %v8732_v2, %v7855_v47  ;;  %7988 = vadd.xlane.f32.xlu1 %v7973_v39  ;;  %p9747_p5 = por %p9746_p4, %p9745_p3 }
0x16e4   :  { %v8734_v41 = vpop.f32.mrf.mxu1 }
0x16e5   :  { %v8735_v38 = vadd.f32 %v8734_v41, %v8733_v8  ;;  %v7974_v61 = vadd.f32 %v7960_v14, %v11588_v63  ;;  %p9748_p6 = pnand %p9747_p5, %p9741_p2 }
0x16e7   :  { %v7965_v28 = vadd.f32 %v8735_v38, %v7860_v5  ;;  %7990 = vadd.xlane.f32.xlu0 %v7974_v61 }
0x16e9   :  { %v7975_v46 = vadd.f32 %v7965_v28, %v11598_v9 }
0x16eb   :  { %7992 = vadd.xlane.f32.xlu1 %v7975_v46 }
0x1716   :  { %v7979_v36 = vpop.xlane.xlu0 %7978 }
0x1717   :  { %v7994_v13 = vmul.f32 0.0078125, %v7979_v36 }
0x1719   :  { %v8002_v11 = vsub.f32 %v11692_v40, %v7994_v13 }
0x171a   :  { %v7981_v18 = vpop.xlane.xlu1 %7980 }
0x171b   :  { %v7995_v16 = vmul.f32 0.0078125, %v7981_v18  ;;  %v8010_v31 = vmul.f32 %v8002_v11, %v8002_v11 }
0x171d   :  { %v8003_v51 = vsub.f32 %v11696_v62, %v7995_v16  ;;  %8018 = vadd.xlane.f32.xlu0 %v8010_v31 }
0x171f   :  { %v8011_v7 = vmul.f32 %v8003_v51, %v8003_v51 }
0x1721   :  { %8020 = vadd.xlane.f32.xlu1 %v8011_v7 }
0x1725   :  { %v7983_v27 = vpop.xlane.xlu0 %7982 }
0x1726   :  { %v7996_v1 = vmul.f32 0.0078125, %v7983_v27 }
0x1728   :  { %v8004_v63 = vsub.f32 %v7970_v60, %v7996_v1 }
0x1729   :  { %v7985_v6 = vpop.xlane.xlu1 %7984 }
0x172a   :  { %v7997_v33 = vmul.f32 0.0078125, %v7985_v6  ;;  %v8012_v59 = vmul.f32 %v8004_v63, %v8004_v63 }
0x172c   :  { %v8005_v9 = vsub.f32 %v7971_v44, %v7997_v33  ;;  %8022 = vadd.xlane.f32.xlu0 %v8012_v59 }
0x172e   :  { %v8013_v49 = vmul.f32 %v8005_v9, %v8005_v9 }
0x1730   :  { %8024 = vadd.xlane.f32.xlu1 %v8013_v49 }
0x1768   :  { %v7987_v35 = vpop.xlane.xlu0 %7986 }
0x1769   :  { %v7998_v40 = vmul.f32 0.0078125, %v7987_v35 }
0x176b   :  { %v11713_v37 = vsub.f32 %v7972_v21, %v7998_v40 }
0x176c   :  { %v7989_v48 = vpop.xlane.xlu1 %7988 }
0x176d   :  { %v7999_v12 = vmul.f32 0.0078125, %v7989_v48  ;;  %v8014_v62 = vmul.f32 %v11713_v37, %v11713_v37 }
0x176f   :  { %v11717_v3 = vsub.f32 %v7973_v39, %v7999_v12  ;;  %8026 = vadd.xlane.f32.xlu0 %v8014_v62 }
0x1770   :  { %v7991_v26 = vpop.xlane.xlu0 %7990 }
0x1771   :  { %v8000_v53 = vmul.f32 0.0078125, %v7991_v26  ;;  %v8015_v60 = vmul.f32 %v11717_v3, %v11717_v3 }
0x1773   :  { %v11721_v58 = vsub.f32 %v7974_v61, %v8000_v53  ;;  %8028 = vadd.xlane.f32.xlu1 %v8015_v60 }
0x1774   :  { %v7993_v44 = vpop.xlane.xlu1 %7992 }
0x1775   :  { %v8001_v50 = vmul.f32 0.0078125, %v7993_v44  ;;  %v8016_v57 = vmul.f32 %v11721_v58, %v11721_v58 }
0x1777   :  { %v11725_v17 = vsub.f32 %v7975_v46, %v8001_v50  ;;  %8030 = vadd.xlane.f32.xlu0 %v8016_v57 }
0x1779   :  { %v8017_v15 = vmul.f32 %v11725_v17, %v11725_v17 }
0x177b   :  { %8032 = vadd.xlane.f32.xlu1 %v8017_v15 }
0x17a6   :  { %v8019_v45 = vpop.xlane.xlu0 %8018 }
0x17a7   :  { %v8034_v34 = vmul.f32 0.0078125, %v8019_v45 }
0x17a9   :  { %v8042_v29 = vadd.f32 1e-05, %v8034_v34 }
0x17aa   :  { %v8021_v52 = vpop.xlane.xlu1 %8020 }
0x17ab   :  { %9596 = vrsqrt.f32 %v8042_v29  ;;  %v8035_v54 = vmul.f32 0.0078125, %v8021_v52 }
0x17ad   :  { %v8043_v43 = vadd.f32 1e-05, %v8035_v54 }
0x17af   :  { %9598 = vrsqrt.f32 %v8043_v43 }
0x17b5   :  { %v8023_v4 = vpop.xlane.xlu0 %8022 }
0x17b6   :  { %v8036_v30 = vmul.f32 0.0078125, %v8023_v4 }
0x17b8   :  { %v9597_v25 = vpop.eup %9596  ;;  %v8044_v24 = vadd.f32 1e-05, %v8036_v30 }
0x17b9   :  { %v8058_v55 = vmul.f32 %v9597_v25, %v8002_v11  ;;  %v8025_v32 = vpop.xlane.xlu1 %8024 }
0x17ba   :  { %9600 = vrsqrt.f32 %v8044_v24  ;;  %v8037_v42 = vmul.f32 0.0078125, %v8025_v32 }
0x17bb   :  { %v8072_v0 = vmul.f32 %v8318_v20, %v8058_v55 }
0x17bc   :  { %v9599_v21 = vpop.eup %9598  ;;  %v8045_v22 = vadd.f32 1e-05, %v8037_v42 }
0x17bd   :  { %v8086_v10 = vadd.f32 %v8319_v56, %v8072_v0  ;;  %v8059_v23 = vmul.f32 %v9599_v21, %v8003_v51 }
0x17be   :  { %9602 = vrsqrt.f32 %v8045_v22 }
0x17bf   :  { %8094 = vst [vmem:[#allocation14] sm:$0xff] %v8086_v10  ;;  %v8073_v47 = vmul.f32 %v8318_v20, %v8059_v23 }
0x17c1   :  { %v8087_v19 = vadd.f32 %v8319_v56, %v8073_v47 }
0x17c3   :  { %8095 = vst [vmem:[#allocation14 + $0x8] sm:$0xff] %v8087_v19 }
0x17c7   :  { %v9601_v2 = vpop.eup %9600 }
0x17c8   :  { %v8060_v39 = vmul.f32 %v9601_v2, %v8004_v63 }
0x17ca   :  { %v8074_v8 = vmul.f32 %v8318_v20, %v8060_v39 }
0x17cb   :  { %v9603_v14 = vpop.eup %9602 }
0x17cc   :  { %v8088_v41 = vadd.f32 %v8319_v56, %v8074_v8  ;;  %v8061_v5 = vmul.f32 %v9603_v14, %v8005_v9 }
0x17ce   :  { %8096 = vst [vmem:[#allocation14 + $0x10] sm:$0xff] %v8088_v41  ;;  %v8075_v38 = vmul.f32 %v8318_v20, %v8061_v5 }
0x17d0   :  { %v8089_v61 = vadd.f32 %v8319_v56, %v8075_v38 }
0x17d2   :  { %8097 = vst [vmem:[#allocation14 + $0x18] sm:$0xff] %v8089_v61 }
0x17f8   :  { %v8027_v28 = vpop.xlane.xlu0 %8026 }
0x17f9   :  { %v8038_v46 = vmul.f32 0.0078125, %v8027_v28 }
0x17fb   :  { %v8046_v36 = vadd.f32 1e-05, %v8038_v46 }
0x17fc   :  { %v8029_v13 = vpop.xlane.xlu1 %8028 }
0x17fd   :  { %9604 = vrsqrt.f32 %v8046_v36  ;;  %v8039_v11 = vmul.f32 0.0078125, %v8029_v13 }
0x17ff   :  { %v8047_v18 = vadd.f32 1e-05, %v8039_v11 }
0x1800   :  { %v8031_v16 = vpop.xlane.xlu0 %8030 }
0x1801   :  { %9606 = vrsqrt.f32 %v8047_v18  ;;  %v8040_v31 = vmul.f32 0.0078125, %v8031_v16 }
0x1803   :  { %v8048_v51 = vadd.f32 1e-05, %v8040_v31 }
0x1804   :  { %v8033_v7 = vpop.xlane.xlu1 %8032 }
0x1805   :  { %9608 = vrsqrt.f32 %v8048_v51  ;;  %v8041_v27 = vmul.f32 0.0078125, %v8033_v7 }
0x1807   :  { %v8049_v1 = vadd.f32 1e-05, %v8041_v27 }
0x1809   :  { %9610 = vrsqrt.f32 %v8049_v1 }
0x180a   :  { %v9605_v63 = vpop.eup %9604 }
0x180b   :  { %v8062_v6 = vmul.f32 %v9605_v63, %v11713_v37 }
0x180d   :  { %v8076_v33 = vmul.f32 %v8318_v20, %v8062_v6 }
0x180e   :  { %v9607_v59 = vpop.eup %9606 }
0x180f   :  { %v8090_v9 = vadd.f32 %v8319_v56, %v8076_v33  ;;  %v8063_v49 = vmul.f32 %v9607_v59, %v11717_v3 }
0x1811   :  { %8098 = vst [vmem:[#allocation14 + $0x20] sm:$0xff] %v8090_v9  ;;  %v8077_v35 = vmul.f32 %v8318_v20, %v8063_v49 }
0x1812   :  { %v9609_v40 = vpop.eup %9608 }
0x1813   :  { %v8091_v48 = vadd.f32 %v8319_v56, %v8077_v35  ;;  %v8064_v12 = vmul.f32 %v9609_v40, %v11721_v58 }
0x1815   :  { %8099 = vst [vmem:[#allocation14 + $0x28] sm:$0xff] %v8091_v48  ;;  %v8078_v62 = vmul.f32 %v8318_v20, %v8064_v12 }
0x1816   :  { %v9611_v26 = vpop.eup %9610 }
0x1817   :  { %v8092_v53 = vadd.f32 %v8319_v56, %v8078_v62  ;;  %v8065_v60 = vmul.f32 %v9611_v26, %v11725_v17 }
0x1819   :  { %8100 = vst [vmem:[#allocation14 + $0x30] sm:$0xff] %v8092_v53  ;;  %v8079_v37 = vmul.f32 %v8318_v20, %v8065_v60 }
0x181b   :  { %v8093_v44 = vadd.f32 %v8319_v56, %v8079_v37 }
0x181d   :  { %8101 = vst [vmem:[#allocation14 + $0x38] sm:$0xff] %v8093_v44 }
0x181e   :  { %9751 = shalt.err (!%p9748_p6)
}
0x181f   :  { %8113 = dma.vmem_to_hbm [thread:$0]  %s8108_s12, 1024, %s11758_s13, [#allocation5], %s9775_s1, %s9775_s1, %s9776_s24  }
0x1820   :  { %9768 = dma.done.wait [#allocation5], 1024  }
0x1821   :  { %9769 = vsyncadd [#allocation5], 4294966272 }
0x1822   :  { %8117 = vsyncpa [#allocation4], 1 }
0x1823   :  { %8118 = vsyncpa [#allocation7], 1 }
0x1824   :  { %8119 = vsyncpa [#allocation10], 1 }
0x1825   :  { %8120 = vsyncpa [#allocation13], 1 }
0x1826   :  { %8121 = vsyncpa [#allocation5], 1 }

// kernel: tpu_custom_call.1
= control target key start
LH: loop header
LB: loop body
LE: loop exit
PB: predicated region body
PF: predicated region fallthrough
CT: control target
= control target key end

     0   :  { %18 = vsyncpa [#allocation4], 0  ;;  %s11745_s0 = inlined_call_operand.hbm [shape: f32[4,16,128], index: 0, kind: input, shape index: {}]   ;;  %s11746_s1 = inlined_call_operand.hbm [shape: f32[128,384], index: 1, kind: input, shape index: {}]   ;;  %s11747_s2 = inlined_call_operand.vmem [shape: f32[1,384], index: 2, kind: input, shape index: {}]   ;;  %s11748_s3 = inlined_call_operand.hbm [shape: f32[128,128], index: 3, kind: input, shape index: {}]   ;;  %s11749_s4 = inlined_call_operand.hbm [shape: f32[1,128], index: 4, kind: input, shape index: {}]   ;;  %s11750_s5 = inlined_call_operand.vmem [shape: f32[1,128], index: 5, kind: input, shape index: {}]   ;;  %s11751_s6 = inlined_call_operand.vmem [shape: f32[1,128], index: 6, kind: input, shape index: {}]   ;;  %s11752_s7 = inlined_call_operand.hbm [shape: f32[128,512], index: 7, kind: input, shape index: {}]   ;;  %s11753_s8 = inlined_call_operand.vmem [shape: f32[1,512], index: 8, kind: input, shape index: {}]   ;;  %s11754_s9 = inlined_call_operand.hbm [shape: f32[512,128], index: 9, kind: input, shape index: {}]   ;;  %s11755_s10 = inlined_call_operand.vmem [shape: f32[1,128], index: 10, kind: input, shape index: {}]   ;;  %s11756_s11 = inlined_call_operand.vmem [shape: f32[1,128], index: 11, kind: input, shape index: {}]   ;;  %s11757_s12 = inlined_call_operand.vmem [shape: f32[1,128], index: 12, kind: input, shape index: {}]   ;;  %s11758_s13 = inlined_call_operand.hbm [shape: f32[4,16,128], index: 13, kind: output, shape index: {}]  }
   0x1   :  { %19 = vsyncpa [#allocation7], 0 }
   0x2   :  { %20 = vsyncpa [#allocation10], 0 }
   0x3   :  { %21 = vsyncpa [#allocation13], 0 }
   0x4   :  { %22 = vsyncpa [#allocation5], 0  ;;  %s9770_s25 = smov [#allocation6]  }
   0x5   :  { %s40_s26 = sshll.u32 %s9770_s25, 4  ;;  %s41_s26 = int_to_ptr.vmem [resolvable:$true] %s40_s26 }
   0x6   :  { %s9628_s27 = scalar_lea.vmem %s41_s26, 6144  ;;  %p9633_p1 = scmp.lt.s32.totalorder %s41_s26, %s41_s26 }
   0x7   :  { %p9629_p0 = scmp.ne.s32.totalorder %s41_s26, %s9628_s27  ;;  %p9634_p2 = scmp.lt.s32.totalorder %s9628_s27, %s9628_s27 }
   0x9   :  { %p9635_p3 = por %p9634_p2, %p9633_p1 }
   0xb   :  { %p9636_p4 = pnand %p9635_p3, %p9629_p0 }
   0xd   :  { %9639 = shalt.err (!%p9636_p4)
}
   0xe   :  { %s9771_s28 = smov 384   ;;  %s9772_s29 = smov 24  }
   0xf   :  { %46 = dma.hbm_to_vmem [thread:$0]  %s11746_s1, 6144, %s41_s26, [#allocation7], %s9771_s28, %s9771_s28, %s9772_s29  }
  0x10   :  { %s9773_s15 = smov [#allocation9]   ;;  %s9774_s17 = smov [#allocation3]  }
  0x11   :  { %s67_s16 = sshll.u32 %s9773_s15, 4  ;;  %s28_s18 = sshll.u32 %s9774_s17, 4  ;;  %s68_s16 = int_to_ptr.vmem [resolvable:$true] %s67_s16  ;;  %s29_s18 = int_to_ptr.vmem [resolvable:$true] %s28_s18 }
  0x12   :  { %s9648_s19 = scalar_lea.vmem %s68_s16, 16  ;;  %s9652_s20 = scalar_lea.vmem %s68_s16, 32 }
  0x13   :  { %p9649_p5 = scmp.ne.s32.totalorder %s68_s16, %s9648_s19  ;;  %p9653_p6 = scmp.lt.s32.totalorder %s68_s16, %s68_s16 }
  0x14   :  { %p9654_p7 = scmp.lt.s32.totalorder %s9652_s20, %s9648_s19 }
  0x16   :  { %p9655_p8 = por %p9654_p7, %p9653_p6 }
  0x18   :  { %p9656_p9 = pnand %p9655_p8, %p9649_p5 }
  0x1a   :  { %9659 = shalt.err (!%p9656_p9)
}
  0x1b   :  { %70 = dma.hbm_to_vmem [thread:$0]  %s11749_s4, 16, %s68_s16, [#allocation10]  }
  0x1c   :  { %s9668_s23 = scalar_lea.vmem %s29_s18, 1024  ;;  %p9673_p11 = scmp.lt.s32.totalorder %s29_s18, %s29_s18 }
  0x1d   :  { %p9669_p10 = scmp.ne.s32.totalorder %s29_s18, %s9668_s23  ;;  %p9674_p12 = scmp.lt.s32.totalorder %s9668_s23, %s9668_s23 }
  0x1f   :  { %p9675_p13 = por %p9674_p12, %p9673_p11 }
  0x21   :  { %p9676_p0 = pnand %p9675_p13, %p9669_p10 }
  0x23   :  { %9679 = shalt.err (!%p9676_p0)
}
  0x24   :  { %s9775_s1 = smov 128   ;;  %s9776_s24 = smov 8  }
  0x25   :  { %34 = dma.hbm_to_vmem [thread:$0]  %s11745_s0, 1024, %s29_s18, [#allocation4], %s9775_s1, %s9775_s1, %s9776_s24  }
  0x26   :  { %s9777_s27 = smov [#allocation8]   ;;  %s9778_s4 = smov [#allocation11]  }
  0x27   :  { %s54_s28 = sshll.u32 %s9777_s27, 4  ;;  %s80_s29 = sshll.u32 %s9778_s4, 4  ;;  %s55_s28 = int_to_ptr.vmem [resolvable:$true] %s54_s28  ;;  %s81_s29 = int_to_ptr.vmem [resolvable:$true] %s80_s29 }
  0x28   :  { %s9688_s30 = scalar_lea.vmem %s55_s28, 2048  ;;  %p9693_p2 = scmp.lt.s32.totalorder %s55_s28, %s55_s28 }
  0x29   :  { %p9689_p1 = scmp.ne.s32.totalorder %s55_s28, %s9688_s30  ;;  %p9694_p3 = scmp.lt.s32.totalorder %s9688_s30, %s9688_s30 }
  0x2b   :  { %p9695_p4 = por %p9694_p3, %p9693_p2 }
  0x2d   :  { %p9696_p5 = pnand %p9695_p4, %p9689_p1 }
  0x2f   :  { %9699 = shalt.err (!%p9696_p5)
}
  0x30   :  { %60 = dma.hbm_to_vmem [thread:$0]  %s11748_s3, 2048, %s55_s28, [#allocation7], %s9775_s1, %s9775_s1, %s9776_s24  }
  0x31   :  { %s9708_s0 = scalar_lea.vmem %s81_s29, 8192  ;;  %p9713_p7 = scmp.lt.s32.totalorder %s81_s29, %s81_s29 }
  0x32   :  { %p9709_p6 = scmp.ne.s32.totalorder %s81_s29, %s9708_s0  ;;  %p9714_p8 = scmp.lt.s32.totalorder %s9708_s0, %s9708_s0 }
  0x34   :  { %p9715_p9 = por %p9714_p8, %p9713_p7 }
  0x36   :  { %p9716_p10 = pnand %p9715_p9, %p9709_p6 }
  0x38   :  { %9719 = shalt.err (!%p9716_p10)
}
  0x39   :  { %s9779_s16 = smov 512   ;;  %s9780_s17 = smov 32  }
  0x3a   :  { %86 = dma.hbm_to_vmem [thread:$0]  %s11752_s7, 8192, %s81_s29, [#allocation10], %s9779_s16, %s9779_s16, %s9780_s17  }
  0x3b   :  { %s9781_s20 = smov [#allocation12]  }
  0x3c   :  { %s94_s21 = sshll.u32 %s9781_s20, 4  ;;  %s95_s21 = int_to_ptr.vmem [resolvable:$true] %s94_s21 }
  0x3d   :  { %s9728_s22 = scalar_lea.vmem %s95_s21, 8192  ;;  %p9733_p12 = scmp.lt.s32.totalorder %s95_s21, %s95_s21 }
  0x3e   :  { %p9729_p11 = scmp.ne.s32.totalorder %s95_s21, %s9728_s22  ;;  %p9734_p13 = scmp.lt.s32.totalorder %s9728_s22, %s9728_s22 }
  0x40   :  { %p9735_p0 = por %p9734_p13, %p9733_p12 }
  0x42   :  { %p9736_p1 = pnand %p9735_p0, %p9729_p11 }
  0x44   :  { %9739 = shalt.err (!%p9736_p1)
}
  0x45   :  { %100 = dma.hbm_to_vmem [thread:$0]  %s11754_s9, 8192, %s95_s21, [#allocation13], %s9775_s1, %s9775_s1, %s9776_s24  }
  0x46   :  { %9760 = dma.done.wait [#allocation4], 1024  }
  0x47   :  { %9761 = vsyncadd [#allocation4], 4294966272 }
  0x48   :  { %9762 = dma.done.wait [#allocation7], 8192  }
  0x49   :  { %9763 = vsyncadd [#allocation7], 4294959104 }
  0x4a   :  { %9764 = dma.done.wait [#allocation10], 8208  }
  0x4b   :  { %9765 = vsyncadd [#allocation10], 4294959088 }
  0x4c   :  { %9766 = dma.done.wait [#allocation13], 8192  }
  0x4d   :  { %9767 = vsyncadd [#allocation13], 4294959104  ;;  %v11762_v0 = vmov 0.0   ;;  %v179_v1 = vld [vmem:[#allocation6 + $0x170] sm:$0xff]  ;;  %v178_v2 = vld [vmem:[#allocation6 + $0x168] sm:$0xff]  ;;  %v183_v57 = vlaneseq  ;;  %vm416_vm0 = vcmask 130048  }
  0x4e   :  { %262 = vmatprep.mubr.f32.mxu0 %v11762_v0  ;;  %v176_v3 = vld [vmem:[#allocation6 + $0x158] sm:$0xff]  ;;  %198 = vmatprep.subr.mxu0 %v179_v1  ;;  %v175_v4 = vld [vmem:[#allocation6 + $0x150] sm:$0xff]  ;;  %v173_v5 = vld [vmem:[#allocation6 + $0x140] sm:$0xff]  ;;  %s9783_s25 = smov 112   ;;  %s9785_s26 = smov 80   ;;  %vm2025_vm1 = vcmask 261248  }
  0x4f   :  { %199 = vmatpush1.msra.mxu0 %v178_v2  ;;  %v172_v6 = vld [vmem:[#allocation6 + $0x138] sm:$0xff]  ;;  %v170_v7 = vld [vmem:[#allocation6 + $0x128] sm:$0xff]  ;;  %v169_v8 = vld [vmem:[#allocation6 + $0x120] sm:$0xff]  ;;  %v9900_v58 = vshrl.u32 %v183_v57, 7  ;;  %s9786_s27 = smov 64   ;;  %s9787_s28 = smov 48  }
  0x50   :  { %200 = vmatprep.subr.mxu0 %v176_v3  ;;  %v167_v9 = vld [vmem:[#allocation6 + $0x110] sm:$0xff]  ;;  %v166_v10 = vld [vmem:[#allocation6 + $0x108] sm:$0xff]  ;;  %v164_v11 = vld [vmem:[#allocation6 + $0xf8] sm:$0xff]  ;;  %s9788_s4 = smov 16   ;;  %vm2866_vm2 = vcmask 392448   ;;  %vm3707_vm3 = vcmask 523648  }
  0x51   :  { %201 = vmatpush1.msra.mxu0 %v175_v4  ;;  %v163_v12 = vld [vmem:[#allocation6 + $0xf0] sm:$0xff]  ;;  %v161_v13 = vld [vmem:[#allocation6 + $0xe0] sm:$0xff]  ;;  %v160_v15 = vld [vmem:[#allocation6 + $0xd8] sm:$0xff]  ;;  %11766 = vst [vmem:[#allocation20_spill] sm:$0xff] %v9900_v58  ;;  %v11761_v59 = vsub.s32 0, %v9900_v58  ;;  %v11759_v62 = vsub.s32 1, %v9900_v58 }
  0x52   :  { %202 = vmatprep.subr.mxu0 %v173_v5  ;;  %v9889_v14 = vld [vmem:[#allocation3] sm:$0xff]  ;;  %v158_v16 = vld [vmem:[#allocation6 + $0xc8] sm:$0xff]  ;;  %v180_v18 = vld [vmem:[#allocation6 + $0x178] sm:$0xff]  ;;  %vm4548_vm4 = vcmask 654848   ;;  %vm5389_vm5 = vcmask 786048   ;;  %vm6230_vm6 = vcmask 917248  }
  0x53   :  { %203 = vmatpush1.msra.mxu0 %v172_v6  ;;  %8768 = vmatprep.mubr.f32.mxu1 %v9889_v14  ;;  %v157_v17 = vld [vmem:[#allocation6 + $0xc0] sm:$0xff]  ;;  %v155_v20 = vld [vmem:[#allocation6 + $0xb0] sm:$0xff]  ;;  %v154_v21 = vld [vmem:[#allocation6 + $0xa8] sm:$0xff]  ;;  %vm7071_vm7 = vcmask 1048448  }
  0x54   :  { %204 = vmatprep.subr.mxu0 %v170_v7  ;;  %v177_v19 = vld [vmem:[#allocation6 + $0x160] sm:$0xff]  ;;  %8736 = vmatprep.subr.mxu1 %v180_v18  ;;  %v174_v22 = vld [vmem:[#allocation6 + $0x148] sm:$0xff]  ;;  %v152_v23 = vld [vmem:[#allocation6 + $0x98] sm:$0xff] }
  0x55   :  { %205 = vmatpush1.msra.mxu0 %v169_v8  ;;  %8737 = vmatpush3.msra.mxu1 %v180_v18  ;;  %v151_v24 = vld [vmem:[#allocation6 + $0x90] sm:$0xff]  ;;  %v149_v26 = vld [vmem:[#allocation6 + $0x80] sm:$0xff]  ;;  %v148_v27 = vld [vmem:[#allocation6 + $0x78] sm:$0xff] }
  0x56   :  { %206 = vmatprep.subr.mxu0 %v167_v9  ;;  %8738 = vmatprep.subr.mxu1 %v177_v19  ;;  %v171_v25 = vld [vmem:[#allocation6 + $0x130] sm:$0xff]  ;;  %v168_v28 = vld [vmem:[#allocation6 + $0x118] sm:$0xff]  ;;  %v146_v29 = vld [vmem:[#allocation6 + $0x68] sm:$0xff] }
  0x57   :  { %207 = vmatpush1.msra.mxu0 %v166_v10  ;;  %8739 = vmatpush3.msra.mxu1 %v177_v19  ;;  %v145_v30 = vld [vmem:[#allocation6 + $0x60] sm:$0xff]  ;;  %v143_v32 = vld [vmem:[#allocation6 + $0x50] sm:$0xff]  ;;  %v142_v33 = vld [vmem:[#allocation6 + $0x48] sm:$0xff] }
  0x58   :  { %208 = vmatprep.subr.mxu0 %v164_v11  ;;  %8740 = vmatprep.subr.mxu1 %v174_v22  ;;  %v165_v31 = vld [vmem:[#allocation6 + $0x100] sm:$0xff]  ;;  %v162_v34 = vld [vmem:[#allocation6 + $0xe8] sm:$0xff]  ;;  %v140_v35 = vld [vmem:[#allocation6 + $0x38] sm:$0xff] }
  0x59   :  { %209 = vmatpush1.msra.mxu0 %v163_v12  ;;  %8741 = vmatpush3.msra.mxu1 %v174_v22  ;;  %v139_v36 = vld [vmem:[#allocation6 + $0x30] sm:$0xff]  ;;  %v137_v38 = vld [vmem:[#allocation6 + $0x20] sm:$0xff]  ;;  %v136_v39 = vld [vmem:[#allocation6 + $0x18] sm:$0xff]  ;;  %v11760_v22 = vsub.s32 2, %v9900_v58 }
  0x5a   :  { %210 = vmatprep.subr.mxu0 %v161_v13  ;;  %8742 = vmatprep.subr.mxu1 %v171_v25  ;;  %v159_v37 = vld [vmem:[#allocation6 + $0xd0] sm:$0xff]  ;;  %v156_v40 = vld [vmem:[#allocation6 + $0xb8] sm:$0xff]  ;;  %v134_v41 = vld [vmem:[#allocation6 + $0x8] sm:$0xff] }
  0x5b   :  { %211 = vmatpush1.msra.mxu0 %v160_v15  ;;  %8743 = vmatpush3.msra.mxu1 %v171_v25  ;;  %v133_v42 = vld [vmem:[#allocation6] sm:$0xff]  ;;  %v150_v44 = vld [vmem:[#allocation6 + $0x88] sm:$0xff]  ;;  %v147_v45 = vld [vmem:[#allocation6 + $0x70] sm:$0xff] }
  0x5c   :  { %212 = vmatprep.subr.mxu0 %v158_v16  ;;  %8744 = vmatprep.subr.mxu1 %v168_v28  ;;  %v153_v43 = vld [vmem:[#allocation6 + $0xa0] sm:$0xff]  ;;  %v126_v46 = vld [vmem:[#allocation3 + $0x8] sm:$0xff]  ;;  %v144_v47 = vld [vmem:[#allocation6 + $0x58] sm:$0xff] }
  0x5d   :  { %213 = vmatpush1.msra.mxu0 %v157_v17  ;;  %8745 = vmatpush3.msra.mxu1 %v168_v28  ;;  %v141_v48 = vld [vmem:[#allocation6 + $0x40] sm:$0xff]  ;;  %v127_v49 = vld [vmem:[#allocation3 + $0x10] sm:$0xff]  ;;  %v138_v50 = vld [vmem:[#allocation6 + $0x28] sm:$0xff] }
  0x5e   :  { %214 = vmatprep.subr.mxu0 %v155_v20  ;;  %8746 = vmatprep.subr.mxu1 %v165_v31  ;;  %v135_v51 = vld [vmem:[#allocation6 + $0x10] sm:$0xff]  ;;  %v128_v52 = vld [vmem:[#allocation3 + $0x18] sm:$0xff]  ;;  %v129_v53 = vld [vmem:[#allocation3 + $0x20] sm:$0xff] }
  0x5f   :  { %215 = vmatpush1.msra.mxu0 %v154_v21  ;;  %8747 = vmatpush3.msra.mxu1 %v165_v31  ;;  %v130_v54 = vld [vmem:[#allocation3 + $0x28] sm:$0xff]  ;;  %v131_v55 = vld [vmem:[#allocation3 + $0x30] sm:$0xff]  ;;  %v132_v56 = vld [vmem:[#allocation3 + $0x38] sm:$0xff] }
  0x60   :  { %216 = vmatprep.subr.mxu0 %v152_v23  ;;  %8748 = vmatprep.subr.mxu1 %v162_v34  ;;  %v181_v60 = vld [vmem:[%s11747_s2] sm:$0x7]  ;;  %s9784_s2 = smov 96  }
  0x61   :  { %217 = vmatpush1.msra.mxu0 %v151_v24  ;;  %8749 = vmatpush3.msra.mxu1 %v162_v34  ;;  %v9908_v61 = vrot.slane %v181_v60, %v11761_v59  ;;  %v190_v2 = vrot.slane %v181_v60, %v11759_v62 }
  0x62   :  { %218 = vmatprep.subr.mxu0 %v149_v26  ;;  %8750 = vmatprep.subr.mxu1 %v159_v37 }
  0x63   :  { %219 = vmatpush1.msra.mxu0 %v148_v27  ;;  %8751 = vmatpush3.msra.mxu1 %v159_v37  ;;  %v9966_v27 = vrot.slane %v181_v60, %v11760_v22 }
  0x64   :  { %220 = vmatprep.subr.mxu0 %v146_v29  ;;  %8752 = vmatprep.subr.mxu1 %v156_v40 }
  0x65   :  { %221 = vmatpush1.msra.mxu0 %v145_v30  ;;  %8753 = vmatpush3.msra.mxu1 %v156_v40 }
  0x66   :  { %222 = vmatprep.subr.mxu0 %v143_v32  ;;  %8754 = vmatprep.subr.mxu1 %v153_v43 }
  0x67   :  { %223 = vmatpush1.msra.mxu0 %v142_v33  ;;  %8755 = vmatpush3.msra.mxu1 %v153_v43 }
  0x68   :  { %224 = vmatprep.subr.mxu0 %v140_v35  ;;  %8756 = vmatprep.subr.mxu1 %v150_v44 }
  0x69   :  { %225 = vmatpush1.msra.mxu0 %v139_v36  ;;  %8757 = vmatpush3.msra.mxu1 %v150_v44 }
  0x6a   :  { %226 = vmatprep.subr.mxu0 %v137_v38  ;;  %8758 = vmatprep.subr.mxu1 %v147_v45 }
  0x6b   :  { %227 = vmatpush1.msra.mxu0 %v136_v39  ;;  %8759 = vmatpush3.msra.mxu1 %v147_v45 }
  0x6c   :  { %228 = vmatprep.subr.mxu0 %v134_v41  ;;  %8760 = vmatprep.subr.mxu1 %v144_v47 }
  0x6d   :  { %229 = vmatpush1.msra.mxu0 %v133_v42  ;;  %8761 = vmatpush3.msra.mxu1 %v144_v47 }
  0x6e   :  { %263 = vmatmul.mubr.f32.vlgmr.msra.gmra.mxu0 %v9889_v14  ;;  %8762 = vmatprep.subr.mxu1 %v141_v48 }
  0x6f   :  { %268 = vmatprep.mubr.f32.mxu0 %v11762_v0  ;;  %8763 = vmatpush3.msra.mxu1 %v141_v48 }
  0x70   :  { %8764 = vmatprep.subr.mxu1 %v138_v50 }
  0x71   :  { %8765 = vmatpush3.msra.mxu1 %v138_v50 }
  0x72   :  { %269 = vmatmul.mubr.f32.gmra.mxu0 %v126_v46  ;;  %8766 = vmatprep.subr.mxu1 %v135_v51 }
  0x73   :  { %274 = vmatprep.mubr.f32.mxu0 %v11762_v0  ;;  %8767 = vmatpush3.msra.mxu1 %v135_v51 }
  0x74   :  { %8769 = vmatmul.mubr.f32.vlgmr.msra.gmra.mxu1 %v126_v46 }
  0x75   :  { %8771 = vmatprep.mubr.f32.mxu1 %v127_v49 }
  0x76   :  { %275 = vmatmul.mubr.f32.gmra.mxu0 %v127_v49 }
  0x77   :  { %280 = vmatprep.mubr.f32.mxu0 %v11762_v0 }
  0x78   :  { %8772 = vmatmul.mubr.f32.gmra.mxu1 %v128_v52 }
  0x79   :  { %8774 = vmatprep.mubr.f32.mxu1 %v129_v53 }
  0x7a   :  { %281 = vmatmul.mubr.f32.gmra.mxu0 %v128_v52 }
  0x7b   :  { %286 = vmatprep.mubr.f32.mxu0 %v11762_v0 }
  0x7c   :  { %8775 = vmatmul.mubr.f32.gmra.mxu1 %v130_v54 }
  0x7d   :  { %8777 = vmatprep.mubr.f32.mxu1 %v131_v55 }
  0x7e   :  { %287 = vmatmul.mubr.f32.gmra.mxu0 %v129_v53 }
  0x7f   :  { %292 = vmatprep.mubr.f32.mxu0 %v11762_v0 }
  0x80   :  { %8778 = vmatmul.mubr.f32.gmra.mxu1 %v132_v56 }
  0x82   :  { %293 = vmatmul.mubr.f32.gmra.mxu0 %v130_v54 }
  0x83   :  { %298 = vmatprep.mubr.f32.mxu0 %v11762_v0 }
  0x86   :  { %299 = vmatmul.mubr.f32.gmra.mxu0 %v131_v55 }
  0x87   :  { %304 = vmatprep.mubr.f32.mxu0 %v11762_v0 }
  0x8a   :  { %305 = vmatmul.mubr.f32.gmra.mxu0 %v132_v56 }
 0x12e   :  { %v264_v63 = vpop.f32.mrf.mxu0 }
 0x12f   :  { %v9912_v1 = vadd.f32 %v264_v63, %v9908_v61 }
 0x130   :  { %v266_v3 = vpop.f32.mrf.mxu0 }
 0x131   :  { %1185 = vrot.lane.b32.xlu1 %v9912_v1, %s9783_s25  ;;  %8784 = vmatprep.mubr.msk.f32.mxu1 %vm416_vm0, %v9912_v1  ;;  %v9920_v5 = vadd.f32 %v266_v3, %v190_v2 }
 0x132   :  { %v270_v4 = vpop.f32.mrf.mxu0 }
 0x133   :  { %v9939_v15 = vadd.f32 %v270_v4, %v9908_v61 }
 0x134   :  { %v272_v6 = vpop.f32.mrf.mxu0  ;;  %v8770_v11 = vpop.f32.mrf.mxu1 }
 0x135   :  { %v9922_v7 = vadd.f32 %v272_v6, %v190_v2  ;;  %1189 = vrot.lane.b32.xlu1 %v9920_v5, %s9783_s25  ;;  %v9994_v36 = vadd.f32 %v8770_v11, %v9966_v27 }
 0x136   :  { %v276_v8 = vpop.f32.mrf.mxu0  ;;  %v377_v14 = vpop.f32.mrf.mxu1 }
 0x137   :  { %1191 = vrot.lane.b32.xlu0 %v9922_v7, %s9783_s25  ;;  %8780 = vmatprep.subr.msk.mxu1 %vm416_vm0, %v9922_v7  ;;  %v9942_v17 = vadd.f32 %v276_v8, %v9908_v61  ;;  %v10006_v42 = vadd.f32 %v377_v14, %v9966_v27 }
 0x138   :  { %v278_v9 = vpop.f32.mrf.mxu0  ;;  %8781 = vmatpush3.xpose.msk.msra.mxu1 %vm416_vm0, %v9922_v7  ;;  %v8773_v19 = vpop.f32.mrf.mxu1 }
 0x139   :  { %8782 = vmatprep.subr.msk.mxu1 %vm416_vm0, %v9920_v5  ;;  %v9951_v20 = vadd.f32 %v278_v9, %v190_v2  ;;  %v10022_v44 = vadd.f32 %v8773_v19, %v9966_v27 }
 0x13a   :  { %v282_v10 = vpop.f32.mrf.mxu0  ;;  %v387_v23 = vpop.f32.mrf.mxu1 }
 0x13b   :  { %v9973_v30 = vadd.f32 %v282_v10, %v9908_v61  ;;  %v10033_v46 = vadd.f32 %v387_v23, %v9966_v27 }
 0x13c   :  { %v284_v12 = vpop.f32.mrf.mxu0  ;;  %8783 = vmatpush3.xpose.msk.msra.mxu1 %vm416_vm0, %v9920_v5  ;;  %v8776_v25 = vpop.f32.mrf.mxu1 }
 0x13d   :  { %v9936_v13 = vadd.f32 %v284_v12, %v190_v2  ;;  %v10014_v43 = vadd.f32 %v8776_v25, %v9966_v27 }
 0x13e   :  { %v288_v16 = vpop.f32.mrf.mxu0  ;;  %v397_v29 = vpop.f32.mrf.mxu1 }
 0x13f   :  { %v9945_v18 = vadd.f32 %v288_v16, %v9908_v61  ;;  %8787 = vmatprep.subr.msk.mxu1 %vm416_vm0, %v9936_v13  ;;  %1282 = vrot.lane.b32.xlu1 %v9936_v13, %s9783_s25  ;;  %v9976_v32 = vadd.f32 %v397_v29, %v9966_v27 }
 0x140   :  { %8785 = vmatmul.mubr.msk.f32.vlgmr.msra.gmra.mxu1 %vm416_vm0, %v9939_v15  ;;  %v290_v21 = vpop.f32.mrf.mxu0  ;;  %v8779_v47 = vpop.f32.mrf.mxu1 }
 0x141   :  { %8788 = vmatpush3.xpose.msk.msra.mxu1 %vm416_vm0, %v9936_v13  ;;  %8791 = vmatprep.mubr.msk.f32.mxu1 %vm416_vm0, %v9942_v17  ;;  %v9978_v33 = vadd.f32 %v290_v21, %v190_v2  ;;  %v10039_v48 = vadd.f32 %v8779_v47, %v9966_v27 }
 0x142   :  { %8789 = vmatprep.subr.msk.mxu1 %vm416_vm0, %v9951_v20  ;;  %8798 = vmatprep.mubr.msk.f32.mxu0 %vm416_vm0, %v9945_v18  ;;  %v294_v24 = vpop.f32.mrf.mxu0  ;;  %v10045_v49 = vpop.f32.mrf.mxu1 }
 0x143   :  { %v9999_v39 = vadd.f32 %v294_v24, %v9908_v61 }
 0x144   :  { %v296_v26 = vpop.f32.mrf.mxu0 }
 0x145   :  { %v9968_v28 = vadd.f32 %v296_v26, %v190_v2  ;;  %8790 = vmatpush3.xpose.msk.msra.mxu1 %vm416_vm0, %v9951_v20 }
 0x146   :  { %v300_v31 = vpop.f32.mrf.mxu0 }
 0x147   :  { %v9981_v34 = vadd.f32 %v300_v31, %v9908_v61  ;;  %8794 = vmatprep.subr.msk.mxu0 %vm416_vm0, %v9968_v28 }
 0x148   :  { %8792 = vmatmul.mubr.msk.f32.vlgmr.msra.gmra.mxu1 %vm416_vm0, %v9973_v30  ;;  %v302_v35 = vpop.f32.mrf.mxu0  ;;  %8795 = vmatpush3.xpose.msk.msra.mxu0 %vm416_vm0, %v9968_v28 }
 0x149   :  { %8796 = vmatprep.subr.msk.mxu0 %vm416_vm0, %v9978_v33  ;;  %8805 = vmatprep.mubr.msk.f32.mxu1 %vm416_vm0, %v9981_v34  ;;  %v10001_v40 = vadd.f32 %v302_v35, %v190_v2 }
 0x14a   :  { %v306_v37 = vpop.f32.mrf.mxu0 }
 0x14b   :  { %v10027_v45 = vadd.f32 %v306_v37, %v9908_v61 }
 0x14c   :  { %v308_v38 = vpop.f32.mrf.mxu0  ;;  %8797 = vmatpush3.xpose.msk.msra.mxu0 %vm416_vm0, %v9978_v33 }
 0x14d   :  { %v10003_v41 = vadd.f32 %v308_v38, %v190_v2  ;;  %8808 = vmatprep.subr.mxu0 %v9994_v36 }
 0x14f   :  { %8799 = vmatmul.mubr.msk.f32.vlgmr.msra.gmra.mxu0 %vm416_vm0, %v9999_v39  ;;  %8801 = vmatprep.subr.msk.mxu1 %vm416_vm0, %v10003_v41 }
 0x150   :  { %8802 = vmatpush3.xpose.msk.msra.mxu1 %vm416_vm0, %v10003_v41  ;;  %8809 = vmatpush3.msra.mxu0 %v9994_v36 }
 0x151   :  { %8803 = vmatprep.subr.msk.mxu1 %vm416_vm0, %v10001_v40  ;;  %8810 = vmatprep.subr.mxu0 %v10006_v42 }
 0x152   :  { %8811 = vmatpush3.msra.mxu0 %v10006_v42 }
 0x153   :  { %8822 = vmatprep.subr.mxu0 %v10014_v43 }
 0x154   :  { %8804 = vmatpush3.xpose.msk.msra.mxu1 %vm416_vm0, %v10001_v40 }
 0x155   :  { %8815 = vmatprep.subr.mxu1 %v10022_v44 }
 0x157   :  { %8806 = vmatmul.mubr.msk.f32.vlgmr.msra.gmra.mxu1 %vm416_vm0, %v10027_v45 }
 0x158   :  { %8816 = vmatpush3.msra.mxu1 %v10022_v44 }
 0x159   :  { %8817 = vmatprep.subr.mxu1 %v10033_v46 }
 0x15a   :  { %8818 = vmatpush3.msra.mxu1 %v10033_v46 }
 0x15b   :  { %8829 = vmatprep.subr.mxu1 %v10039_v48 }
 0x1a3   :  { %v10059_v9 = vpop.permute.xlu1 %1185 }
 0x1a7   :  { %v10063_v11 = vpop.permute.xlu1 %1189 }
 0x1a9   :  { %v10061_v10 = vpop.permute.xlu0 %1191 }
 0x1b1   :  { %v10065_v19 = vpop.permute.xlu1 %1282 }
 0x200   :  { %v8786_v50 = vpop.f32.mrf.mxu1 }
 0x201   :  { %v768_v51 = vsel %vm416_vm0, %v8786_v50, -inf }
 0x202   :  { %769 = vmax.xlane.f32.xlu0 %v768_v51  ;;  %v495_v52 = vpop.f32.mrf.mxu1 }
 0x203   :  { %v765_v53 = vsel %vm416_vm0, %v495_v52, -inf }
 0x206   :  { %766 = vmax.xlane.f32.xlu0 %v765_v53 }
 0x208   :  { %v8793_v54 = vpop.f32.mrf.mxu1 }
 0x209   :  { %v774_v55 = vsel %vm416_vm0, %v8793_v54, -inf }
 0x20a   :  { %775 = vmax.xlane.f32.xlu1 %v774_v55  ;;  %v582_v56 = vpop.f32.mrf.mxu1 }
 0x20b   :  { %v771_v57 = vsel %vm416_vm0, %v582_v56, -inf }
 0x20c   :  { %772 = vmax.xlane.f32.xlu0 %v771_v57 }
 0x20f   :  { %v8800_v60 = vpop.f32.mrf.mxu0 }
 0x210   :  { %v780_v61 = vsel %vm416_vm0, %v8800_v60, -inf }
 0x211   :  { %v669_v63 = vpop.f32.mrf.mxu0  ;;  %781 = vmax.xlane.f32.xlu1 %v780_v61 }
 0x212   :  { %v777_v2 = vsel %vm416_vm0, %v669_v63, -inf }
 0x215   :  { %778 = vmax.xlane.f32.xlu1 %v777_v2 }
 0x217   :  { %v8807_v3 = vpop.f32.mrf.mxu1 }
 0x218   :  { %v786_v4 = vsel %vm416_vm0, %v8807_v3, -inf }
 0x219   :  { %787 = vmax.xlane.f32.xlu1 %v786_v4  ;;  %v756_v6 = vpop.f32.mrf.mxu1 }
 0x21a   :  { %v783_v8 = vsel %vm416_vm0, %v756_v6, -inf }
 0x21b   :  { %784 = vmax.xlane.f32.xlu0 %v783_v8 }
 0x22a   :  { %1187 = vrot.lane.b32.xlu1 %v9939_v15, %s9783_s25 }
 0x231   :  { %1373 = vrot.lane.b32.xlu0 %v9968_v28, %s9783_s25 }
 0x28b   :  { %v770_v12 = vpop.xlane.xlu0 %769 }
 0x28c   :  { %v790_v14 = vsub.f32 %v8786_v50, %v770_v12 }
 0x28e   :  { %v799_v16 = vmul.f32 1.442695, %v790_v14 }
 0x28f   :  { %v767_v21 = vpop.xlane.xlu0 %766 }
 0x290   :  { %9324 = vpow2.f32 %v799_v16  ;;  %v789_v23 = vsub.f32 %v495_v52, %v767_v21 }
 0x292   :  { %v797_v24 = vmul.f32 1.442695, %v789_v23 }
 0x293   :  { %v776_v25 = vpop.xlane.xlu1 %775 }
 0x294   :  { %9326 = vpow2.f32 %v797_v24  ;;  %v792_v26 = vsub.f32 %v8793_v54, %v776_v25 }
 0x295   :  { %v773_v29 = vpop.xlane.xlu0 %772 }
 0x296   :  { %v803_v31 = vmul.f32 1.442695, %v792_v26  ;;  %v791_v35 = vsub.f32 %v582_v56, %v773_v29 }
 0x298   :  { %9328 = vpow2.f32 %v803_v31  ;;  %v801_v37 = vmul.f32 1.442695, %v791_v35 }
 0x29a   :  { %9330 = vpow2.f32 %v801_v37  ;;  %v782_v38 = vpop.xlane.xlu1 %781 }
 0x29b   :  { %v794_v47 = vsub.f32 %v8800_v60, %v782_v38 }
 0x29d   :  { %v10067_v51 = vpop.eup %9324  ;;  %v807_v50 = vmul.f32 1.442695, %v794_v47 }
 0x29e   :  { %v779_v53 = vpop.xlane.xlu1 %778  ;;  %v816_v55 = vsel %vm416_vm0, %v10067_v51, 0.0 }
 0x29f   :  { %9332 = vpow2.f32 %v807_v50  ;;  %v793_v52 = vsub.f32 %v669_v63, %v779_v53  ;;  %817 = vadd.xlane.f32.xlu1 %v816_v55 }
 0x2a1   :  { %v9327_v57 = vpop.eup %9326  ;;  %v805_v54 = vmul.f32 1.442695, %v793_v52 }
 0x2a2   :  { %v813_v61 = vsel %vm416_vm0, %v9327_v57, 0.0  ;;  %v788_v16 = vpop.xlane.xlu1 %787 }
 0x2a3   :  { %9334 = vpow2.f32 %v805_v54  ;;  %814 = vadd.xlane.f32.xlu0 %v813_v61  ;;  %v796_v21 = vsub.f32 %v8807_v3, %v788_v16 }
 0x2a4   :  { %v785_v23 = vpop.xlane.xlu0 %784 }
 0x2a5   :  { %v10072_v56 = vpop.eup %9328  ;;  %v811_v24 = vmul.f32 1.442695, %v796_v21  ;;  %v795_v25 = vsub.f32 %v756_v6, %v785_v23 }
 0x2a6   :  { %v822_v60 = vsel %vm416_vm0, %v10072_v56, 0.0  ;;  %v1188_v3 = vpop.permute.xlu1 %1187 }
 0x2a7   :  { %v9331_v2 = vpop.eup %9330  ;;  %823 = vadd.xlane.f32.xlu1 %v822_v60  ;;  %9336 = vpow2.f32 %v811_v24  ;;  %v809_v26 = vmul.f32 1.442695, %v795_v25 }
 0x2a8   :  { %v819_v4 = vsel %vm416_vm0, %v9331_v2, 0.0  ;;  %v1374_v6 = vpop.permute.xlu0 %1373 }
 0x2a9   :  { %820 = vadd.xlane.f32.xlu0 %v819_v4  ;;  %9338 = vpow2.f32 %v809_v26 }
 0x2ac   :  { %v10077_v8 = vpop.eup %9332 }
 0x2ad   :  { %v828_v63 = vsel %vm416_vm0, %v10077_v8, 0.0 }
 0x2ae   :  { %829 = vadd.xlane.f32.xlu1 %v828_v63 }
 0x2b0   :  { %v10081_v12 = vpop.eup %9334 }
 0x2b1   :  { %v825_v14 = vsel %vm416_vm0, %v10081_v12, 0.0 }
 0x2b2   :  { %826 = vadd.xlane.f32.xlu0 %v825_v14 }
 0x2b4   :  { %v10089_v29 = vpop.eup %9336 }
 0x2b5   :  { %v834_v31 = vsel %vm416_vm0, %v10089_v29, 0.0 }
 0x2b6   :  { %v10093_v35 = vpop.eup %9338 }
 0x2b7   :  { %v831_v37 = vsel %vm416_vm0, %v10093_v35, 0.0 }
 0x2bf   :  { %1371 = vrot.lane.b32.xlu1 %v9978_v33, %s9783_s25 }
 0x2c8   :  { %1280 = vrot.lane.b32.xlu0 %v9951_v20, %s9783_s25 }
 0x2e3   :  { %835 = vadd.xlane.f32.xlu1 %v834_v31 }
 0x2e7   :  { %832 = vadd.xlane.f32.xlu0 %v831_v37 }
 0x2f4   :  { %1276 = vrot.lane.b32.xlu1 %v9942_v17, %s9783_s25 }
 0x2f8   :  { %1464 = vrot.lane.b32.xlu1 %v10003_v41, %s9783_s25 }
 0x2fc   :  { %1462 = vrot.lane.b32.xlu1 %v10001_v40, %s9783_s25 }
 0x2fd   :  { %1367 = vrot.lane.b32.xlu0 %v9945_v18, %s9783_s25 }
 0x300   :  { %1460 = vrot.lane.b32.xlu1 %v10027_v45, %s9783_s25 }
 0x301   :  { %1369 = vrot.lane.b32.xlu0 %v9999_v39, %s9783_s25 }
 0x305   :  { %1278 = vrot.lane.b32.xlu0 %v9973_v30, %s9783_s25 }
 0x309   :  { %1458 = vrot.lane.b32.xlu0 %v9981_v34, %s9783_s25 }
 0x328   :  { %v818_v38 = vpop.xlane.xlu1 %817 }
 0x329   :  { %9340 = vrcp.f32 %v818_v38 }
 0x32c   :  { %v815_v47 = vpop.xlane.xlu0 %814 }
 0x32d   :  { %9342 = vrcp.f32 %v815_v47 }
 0x330   :  { %v824_v50 = vpop.xlane.xlu1 %823 }
 0x331   :  { %9344 = vrcp.f32 %v824_v50 }
 0x332   :  { %v821_v53 = vpop.xlane.xlu0 %820 }
 0x333   :  { %9346 = vrcp.f32 %v821_v53 }
 0x336   :  { %v9341_v52 = vpop.eup %9340 }
 0x337   :  { %v830_v55 = vpop.xlane.xlu1 %829  ;;  %v846_v4 = vmul.f32 %v9341_v52, %v10067_v51  ;;  %v10125_v51 = vadd.f32 %v10045_v49, %v9966_v27 }
 0x338   :  { %9348 = vrcp.f32 %v830_v55 }
 0x33a   :  { %v9343_v54 = vpop.eup %9342 }
 0x33b   :  { %v827_v61 = vpop.xlane.xlu0 %826  ;;  %v845_v60 = vmul.f32 %v9343_v54, %v9327_v57  ;;  %v1372_v27 = vpop.permute.xlu1 %1371 }
 0x33c   :  { %9350 = vrcp.f32 %v827_v61 }
 0x33d   :  { %8812 = vmatprep.mubr.msk.f32.mxu0 %vm416_vm0, %v845_v60 }
 0x33e   :  { %8813 = vmatmul.mubr.msk.f32.vlgmr.msra.gmra.mxu0 %vm416_vm0, %v846_v4  ;;  %v9345_v63 = vpop.eup %9344 }
 0x33f   :  { %8823 = vmatpush3.msra.mxu0 %v10014_v43  ;;  %v848_v57 = vmul.f32 %v9345_v63, %v10072_v56  ;;  %v1281_v49 = vpop.permute.xlu0 %1280 }
 0x340   :  { %v9347_v14 = vpop.eup %9346  ;;  %8824 = vmatprep.subr.mxu0 %v9976_v32 }
 0x341   :  { %8825 = vmatpush3.msra.mxu0 %v9976_v32  ;;  %v847_v16 = vmul.f32 %v9347_v14, %v9331_v2 }
 0x342   :  { %8836 = vmatprep.subr.msk.mxu0 %vm416_vm0, %v10061_v10 }
 0x343   :  { %8819 = vmatprep.mubr.msk.f32.mxu1 %vm416_vm0, %v847_v16 }
 0x344   :  { %8820 = vmatmul.mubr.msk.f32.vlgmr.msra.gmra.mxu1 %vm416_vm0, %v848_v57 }
 0x345   :  { %8830 = vmatpush3.msra.mxu1 %v10039_v48  ;;  %v9349_v2 = vpop.eup %9348 }
 0x346   :  { %8831 = vmatprep.subr.mxu1 %v10125_v51  ;;  %v850_v23 = vmul.f32 %v9349_v2, %v10077_v8 }
 0x347   :  { %8832 = vmatpush3.msra.mxu1 %v10125_v51 }
 0x348   :  { %8843 = vmatprep.subr.msk.mxu1 %vm416_vm0, %v10065_v19 }
 0x349   :  { %v9351_v21 = vpop.eup %9350 }
 0x34a   :  { %v849_v56 = vmul.f32 %v9351_v21, %v10081_v12 }
 0x34c   :  { %8826 = vmatprep.mubr.msk.f32.mxu0 %vm416_vm0, %v849_v56 }
 0x34d   :  { %8827 = vmatmul.mubr.msk.f32.vlgmr.msra.gmra.mxu0 %vm416_vm0, %v850_v23 }
 0x34e   :  { %8837 = vmatpush3.xpose.msk.msra.mxu0 %vm416_vm0, %v10061_v10  ;;  %8840 = vmatprep.mubr.msk.f32.mxu0 %vm416_vm0, %v10059_v9 }
 0x34f   :  { %8838 = vmatprep.subr.msk.mxu0 %vm416_vm0, %v10063_v11 }
 0x352   :  { %8839 = vmatpush3.xpose.msk.msra.mxu0 %vm416_vm0, %v10063_v11 }
 0x353   :  { %8850 = vmatprep.subr.msk.mxu0 %vm416_vm0, %v1374_v6 }
 0x355   :  { %8841 = vmatmul.mubr.msk.f32.vlgmr.msra.gmra.mxu0 %vm416_vm0, %v1188_v3 }
 0x356   :  { %8851 = vmatpush3.xpose.msk.msra.mxu0 %vm416_vm0, %v1374_v6 }
 0x357   :  { %8852 = vmatprep.subr.msk.mxu0 %vm416_vm0, %v1372_v27 }
 0x35a   :  { %8853 = vmatpush3.xpose.msk.msra.mxu0 %vm416_vm0, %v1372_v27 }
 0x36c   :  { %v836_v10 = vpop.xlane.xlu1 %835 }
 0x36d   :  { %9352 = vrcp.f32 %v836_v10 }
 0x370   :  { %v833_v9 = vpop.xlane.xlu0 %832  ;;  %v1277_v25 = vpop.permute.xlu1 %1276 }
 0x371   :  { %9354 = vrcp.f32 %v833_v9 }
 0x374   :  { %v1368_v8 = vpop.permute.xlu0 %1367  ;;  %v1465_v3 = vpop.permute.xlu1 %1464 }
 0x375   :  { %8854 = vmatprep.mubr.msk.f32.mxu0 %vm416_vm0, %v1368_v8 }
 0x378   :  { %v1370_v11 = vpop.permute.xlu0 %1369 }
 0x379   :  { %8855 = vmatmul.mubr.msk.f32.vlgmr.msra.gmra.mxu0 %vm416_vm0, %v1370_v11 }
 0x37a   :  { %v9353_v12 = vpop.eup %9352 }
 0x37b   :  { %v852_v31 = vmul.f32 %v9353_v12, %v10089_v29  ;;  %v1463_v29 = vpop.permute.xlu1 %1462 }
 0x37c   :  { %v1279_v37 = vpop.permute.xlu0 %1278 }
 0x37e   :  { %v9355_v24 = vpop.eup %9354 }
 0x37f   :  { %v851_v26 = vmul.f32 %v9355_v24, %v10093_v35 }
 0x380   :  { %v1459_v35 = vpop.permute.xlu0 %1458 }
 0x381   :  { %8833 = vmatprep.mubr.msk.f32.mxu1 %vm416_vm0, %v851_v26 }
 0x382   :  { %8834 = vmatmul.mubr.msk.f32.vlgmr.msra.gmra.mxu1 %vm416_vm0, %v852_v31 }
 0x383   :  { %8844 = vmatpush3.xpose.msk.msra.mxu1 %vm416_vm0, %v10065_v19  ;;  %8847 = vmatprep.mubr.msk.f32.mxu1 %vm416_vm0, %v1277_v25  ;;  %v1461_v19 = vpop.permute.xlu1 %1460 }
 0x384   :  { %8845 = vmatprep.subr.msk.mxu1 %vm416_vm0, %v1281_v49 }
 0x387   :  { %8846 = vmatpush3.xpose.msk.msra.mxu1 %vm416_vm0, %v1281_v49 }
 0x388   :  { %8857 = vmatprep.subr.msk.mxu1 %vm416_vm0, %v1465_v3 }
 0x38a   :  { %8848 = vmatmul.mubr.msk.f32.vlgmr.msra.gmra.mxu1 %vm416_vm0, %v1279_v37 }
 0x38b   :  { %8858 = vmatpush3.xpose.msk.msra.mxu1 %vm416_vm0, %v1465_v3  ;;  %8861 = vmatprep.mubr.msk.f32.mxu1 %vm416_vm0, %v1459_v35 }
 0x38c   :  { %8859 = vmatprep.subr.msk.mxu1 %vm416_vm0, %v1463_v29 }
 0x38f   :  { %8860 = vmatpush3.xpose.msk.msra.mxu1 %vm416_vm0, %v1463_v29 }
 0x392   :  { %8862 = vmatmul.mubr.msk.f32.vlgmr.msra.gmra.mxu1 %vm416_vm0, %v1461_v19 }
 0x3fe   :  { %v8814_v6 = vpop.f32.mrf.mxu0 }
 0x3ff   :  { %1178 = vst.msk [vmem:[#allocation2 + $0x8] sm:$0xff] %vm416_vm0, %v8814_v6 }
 0x400   :  { %v925_v38 = vpop.f32.mrf.mxu0 }
 0x401   :  { %1177 = vst.msk [vmem:[#allocation2] sm:$0xff] %vm416_vm0, %v925_v38 }
 0x404   :  { %v8821_v47 = vpop.f32.mrf.mxu1 }
 0x405   :  { %1180 = vst.msk [vmem:[#allocation2 + $0x18] sm:$0xff] %vm416_vm0, %v8821_v47 }
 0x406   :  { %v1006_v50 = vpop.f32.mrf.mxu1 }
 0x407   :  { %1179 = vst.msk [vmem:[#allocation2 + $0x10] sm:$0xff] %vm416_vm0, %v1006_v50 }
 0x40d   :  { %v8828_v53 = vpop.f32.mrf.mxu0 }
 0x40e   :  { %1182 = vst.msk [vmem:[#allocation2 + $0x28] sm:$0xff] %vm416_vm0, %v8828_v53 }
 0x40f   :  { %v1087_v55 = vpop.f32.mrf.mxu0 }
 0x410   :  { %1181 = vst.msk [vmem:[#allocation2 + $0x20] sm:$0xff] %vm416_vm0, %v1087_v55 }
 0x415   :  { %v8842_v52 = vpop.f32.mrf.mxu0 }
 0x416   :  { %v1552_v54 = vsel %vm416_vm0, %v8842_v52, -inf }
 0x417   :  { %1553 = vmax.xlane.f32.xlu1 %v1552_v54  ;;  %v1267_v61 = vpop.f32.mrf.mxu0 }
 0x418   :  { %v1549_v60 = vsel %vm416_vm0, %v1267_v61, -inf }
 0x419   :  { %1550 = vmax.xlane.f32.xlu0 %v1549_v60 }
 0x439   :  { %v8856_v4 = vpop.f32.mrf.mxu0 }
 0x43a   :  { %v1564_v63 = vsel %vm416_vm0, %v8856_v4, -inf }
 0x43b   :  { %1565 = vmax.xlane.f32.xlu0 %v1564_v63  ;;  %v1449_v14 = vpop.f32.mrf.mxu0 }
 0x43c   :  { %v1561_v16 = vsel %vm416_vm0, %v1449_v14, -inf }
 0x43f   :  { %1562 = vmax.xlane.f32.xlu0 %v1561_v16 }
 0x442   :  { %v8835_v57 = vpop.f32.mrf.mxu1 }
 0x443   :  { %1184 = vst.msk [vmem:[#allocation2 + $0x38] sm:$0xff] %vm416_vm0, %v8835_v57 }
 0x444   :  { %v1168_v2 = vpop.f32.mrf.mxu1 }
 0x445   :  { %1183 = vst.msk [vmem:[#allocation2 + $0x30] sm:$0xff] %vm416_vm0, %v1168_v2 }
 0x44a   :  { %v8849_v21 = vpop.f32.mrf.mxu1 }
 0x44b   :  { %v1558_v56 = vsel %vm416_vm0, %v8849_v21, -inf }
 0x44c   :  { %1559 = vmax.xlane.f32.xlu1 %v1558_v56  ;;  %v1358_v23 = vpop.f32.mrf.mxu1 }
 0x44d   :  { %v1555_v27 = vsel %vm416_vm0, %v1358_v23, -inf }
 0x44e   :  { %1556 = vmax.xlane.f32.xlu0 %v1555_v27 }
 0x452   :  { %v8863_v49 = vpop.f32.mrf.mxu1 }
 0x453   :  { %v1570_v10 = vsel %vm416_vm0, %v8863_v49, -inf }
 0x454   :  { %1571 = vmax.xlane.f32.xlu1 %v1570_v10  ;;  %v10183_v9 = vpop.f32.mrf.mxu1 }
 0x455   :  { %v1567_v8 = vsel %vm416_vm0, %v10183_v9, -inf }
 0x456   :  { %1568 = vmax.xlane.f32.xlu0 %v1567_v8 }
 0x465   :  { %1639 = vrot.lane.b32.xlu1 %v10006_v42, %s9783_s25 }
 0x469   :  { %1819 = vrot.lane.b32.xlu1 %v10014_v43, %s9783_s25 }
 0x46c   :  { %1641 = vrot.lane.b32.xlu0 %v9994_v36, %s9783_s25 }
 0x46d   :  { %1817 = vrot.lane.b32.xlu1 %v9976_v32, %s9783_s25 }
 0x470   :  { %1730 = vrot.lane.b32.xlu0 %v10022_v44, %s9783_s25 }
 0x471   :  { %2040 = vrot.lane.b32.xlu1 %v9922_v7, %s9784_s2 }
 0x474   :  { %1728 = vrot.lane.b32.xlu0 %v10033_v46, %s9783_s25 }
 0x475   :  { %1908 = vrot.lane.b32.xlu1 %v10039_v48, %s9783_s25 }
 0x478   :  { %2038 = vrot.lane.b32.xlu0 %v9920_v5, %s9784_s2 }
 0x479   :  { %1906 = vrot.lane.b32.xlu1 %v10125_v51, %s9783_s25 }
 0x47c   :  { %2034 = vrot.lane.b32.xlu0 %v9912_v1, %s9784_s2 }
 0x47d   :  { %2131 = vrot.lane.b32.xlu1 %v9936_v13, %s9784_s2 }
 0x480   :  { %2222 = vrot.lane.b32.xlu0 %v9968_v28, %s9784_s2 }
 0x481   :  { %2036 = vrot.lane.b32.xlu1 %v9939_v15, %s9784_s2 }
 0x484   :  { %2129 = vrot.lane.b32.xlu0 %v9951_v20, %s9784_s2 }
 0x485   :  { %2220 = vrot.lane.b32.xlu1 %v9978_v33, %s9784_s2 }
 0x4a0   :  { %v1554_v11 = vpop.xlane.xlu1 %1553 }
 0x4a1   :  { %v1574_v12 = vsub.f32 %v8842_v52, %v1554_v11 }
 0x4a2   :  { %v1551_v24 = vpop.xlane.xlu0 %1550 }
 0x4a3   :  { %v1583_v25 = vmul.f32 1.442695, %v1574_v12  ;;  %v1573_v26 = vsub.f32 %v1267_v61, %v1551_v24 }
 0x4a5   :  { %9356 = vpow2.f32 %v1583_v25  ;;  %v1581_v31 = vmul.f32 1.442695, %v1573_v26 }
 0x4a7   :  { %9358 = vpow2.f32 %v1581_v31 }
 0x4b2   :  { %v10219_v37 = vpop.eup %9356 }
 0x4b3   :  { %v1600_v3 = vsel %vm416_vm0, %v10219_v37, 0.0 }
 0x4b4   :  { %v10223_v35 = vpop.eup %9358  ;;  %1601 = vadd.xlane.f32.xlu1 %v1600_v3 }
 0x4b5   :  { %v1597_v29 = vsel %vm416_vm0, %v10223_v35, 0.0 }
 0x4b6   :  { %1598 = vadd.xlane.f32.xlu0 %v1597_v29 }
 0x4c4   :  { %v1566_v19 = vpop.xlane.xlu0 %1565 }
 0x4c5   :  { %v1578_v6 = vsub.f32 %v8856_v4, %v1566_v19 }
 0x4c7   :  { %v1591_v38 = vmul.f32 1.442695, %v1578_v6 }
 0x4c8   :  { %v1563_v47 = vpop.xlane.xlu0 %1562 }
 0x4c9   :  { %9360 = vpow2.f32 %v1591_v38  ;;  %v1577_v50 = vsub.f32 %v1449_v14, %v1563_v47 }
 0x4cb   :  { %v1589_v53 = vmul.f32 1.442695, %v1577_v50 }
 0x4cd   :  { %9362 = vpow2.f32 %v1589_v53 }
 0x4d5   :  { %v1560_v55 = vpop.xlane.xlu1 %1559 }
 0x4d6   :  { %v10227_v52 = vpop.eup %9360  ;;  %v1576_v54 = vsub.f32 %v8849_v21, %v1560_v55 }
 0x4d7   :  { %v1557_v61 = vpop.xlane.xlu0 %1556  ;;  %v1612_v60 = vsel %vm416_vm0, %v10227_v52, 0.0 }
 0x4d8   :  { %v1587_v63 = vmul.f32 1.442695, %v1576_v54  ;;  %v1575_v16 = vsub.f32 %v1358_v23, %v1557_v61  ;;  %1613 = vadd.xlane.f32.xlu1 %v1612_v60 }
 0x4da   :  { %v10231_v57 = vpop.eup %9362  ;;  %9364 = vpow2.f32 %v1587_v63  ;;  %v1585_v4 = vmul.f32 1.442695, %v1575_v16 }
 0x4db   :  { %v1609_v14 = vsel %vm416_vm0, %v10231_v57, 0.0 }
 0x4dc   :  { %9366 = vpow2.f32 %v1585_v4  ;;  %1610 = vadd.xlane.f32.xlu0 %v1609_v14 }
 0x4dd   :  { %v1572_v2 = vpop.xlane.xlu1 %1571 }
 0x4de   :  { %v1580_v56 = vsub.f32 %v8863_v49, %v1572_v2 }
 0x4df   :  { %v1569_v27 = vpop.xlane.xlu0 %1568 }
 0x4e0   :  { %v1595_v21 = vmul.f32 1.442695, %v1580_v56  ;;  %v1579_v10 = vsub.f32 %v10183_v9, %v1569_v27 }
 0x4e1   :  { %v1640_v8 = vpop.permute.xlu1 %1639 }
 0x4e2   :  { %9368 = vpow2.f32 %v1595_v21  ;;  %v1593_v11 = vmul.f32 1.442695, %v1579_v10 }
 0x4e3   :  { %v1642_v23 = vpop.permute.xlu0 %1641 }
 0x4e4   :  { %9370 = vpow2.f32 %v1593_v11  ;;  %8864 = vmatprep.subr.mxu0 %v1642_v23 }
 0x4e5   :  { %v1820_v12 = vpop.permute.xlu1 %1819  ;;  %8865 = vmatpush3.msra.mxu0 %v1642_v23 }
 0x4e6   :  { %8866 = vmatprep.subr.mxu0 %v1640_v8 }
 0x4e7   :  { %v10236_v24 = vpop.eup %9364  ;;  %8867 = vmatpush3.msra.mxu0 %v1640_v8  ;;  %v1731_v25 = vpop.permute.xlu0 %1730 }
 0x4e8   :  { %8871 = vmatprep.subr.mxu1 %v1731_v25  ;;  %8878 = vmatprep.subr.mxu0 %v1820_v12  ;;  %v1606_v49 = vsel %vm416_vm0, %v10236_v24, 0.0 }
 0x4e9   :  { %v10240_v26 = vpop.eup %9366  ;;  %v1818_v9 = vpop.permute.xlu1 %1817  ;;  %1607 = vadd.xlane.f32.xlu1 %v1606_v49  ;;  %8872 = vmatpush3.msra.mxu1 %v1731_v25 }
 0x4ea   :  { %v1603_v31 = vsel %vm416_vm0, %v10240_v26, 0.0 }
 0x4eb   :  { %1604 = vadd.xlane.f32.xlu0 %v1603_v31  ;;  %v1729_v3 = vpop.permute.xlu0 %1728 }
 0x4ec   :  { %8873 = vmatprep.subr.mxu1 %v1729_v3 }
 0x4ed   :  { %v2041_v29 = vpop.permute.xlu1 %2040  ;;  %8874 = vmatpush3.msra.mxu1 %v1729_v3 }
 0x4ef   :  { %v10244_v19 = vpop.eup %9368  ;;  %v2039_v55 = vpop.permute.xlu0 %2038 }
 0x4f0   :  { %v1618_v6 = vsel %vm416_vm0, %v10244_v19, 0.0 }
 0x4f1   :  { %v10248_v38 = vpop.eup %9370  ;;  %v10250_v47 = vpop.permute.xlu1 %1908  ;;  %1619 = vadd.xlane.f32.xlu1 %v1618_v6 }
 0x4f2   :  { %8885 = vmatprep.subr.mxu1 %v10250_v47  ;;  %v1615_v50 = vsel %vm416_vm0, %v10248_v38, 0.0 }
 0x4f3   :  { %1616 = vadd.xlane.f32.xlu0 %v1615_v50  ;;  %v2035_v61 = vpop.permute.xlu0 %2034 }
 0x4f5   :  { %v1907_v53 = vpop.permute.xlu1 %1906 }
 0x4f7   :  { %v2223_v63 = vpop.permute.xlu0 %2222 }
 0x4f9   :  { %v10271_v54 = vpop.permute.xlu1 %2131 }
 0x4fb   :  { %v10273_v4 = vpop.permute.xlu0 %2129 }
 0x4fd   :  { %v2037_v60 = vpop.permute.xlu1 %2036 }
 0x501   :  { %v2221_v16 = vpop.permute.xlu1 %2220 }
 0x502   :  { %2125 = vrot.lane.b32.xlu1 %v9942_v17, %s9784_s2 }
 0x506   :  { %2313 = vrot.lane.b32.xlu1 %v10003_v41, %s9784_s2 }
 0x509   :  { %2216 = vrot.lane.b32.xlu0 %v9945_v18, %s9784_s2 }
 0x50a   :  { %2311 = vrot.lane.b32.xlu1 %v10001_v40, %s9784_s2 }
 0x50d   :  { %2218 = vrot.lane.b32.xlu0 %v9999_v39, %s9784_s2 }
 0x50e   :  { %2309 = vrot.lane.b32.xlu1 %v10027_v45, %s9784_s2 }
 0x511   :  { %2127 = vrot.lane.b32.xlu0 %v9973_v30, %s9784_s2 }
 0x515   :  { %2307 = vrot.lane.b32.xlu0 %v9981_v34, %s9784_s2 }
 0x53d   :  { %v1602_v14 = vpop.xlane.xlu1 %1601 }
 0x53e   :  { %9372 = vrcp.f32 %v1602_v14 }
 0x53f   :  { %v1599_v2 = vpop.xlane.xlu0 %1598 }
 0x540   :  { %9374 = vrcp.f32 %v1599_v2 }
 0x54b   :  { %v9373_v56 = vpop.eup %9372 }
 0x54c   :  { %v1630_v10 = vmul.f32 %v9373_v56, %v10219_v37 }
 0x54d   :  { %v9375_v27 = vpop.eup %9374 }
 0x54e   :  { %v1629_v21 = vmul.f32 %v9375_v27, %v10223_v35 }
 0x550   :  { %8868 = vmatprep.mubr.msk.f32.mxu0 %vm416_vm0, %v1629_v21 }
 0x551   :  { %8869 = vmatmul.mubr.msk.f32.vlgmr.msra.gmra.mxu0 %vm416_vm0, %v1630_v10 }
 0x552   :  { %8879 = vmatpush3.msra.mxu0 %v1820_v12 }
 0x553   :  { %8880 = vmatprep.subr.mxu0 %v1818_v9 }
 0x554   :  { %8881 = vmatpush3.msra.mxu0 %v1818_v9 }
 0x555   :  { %8892 = vmatprep.subr.msk.mxu0 %vm416_vm0, %v2041_v29 }
 0x561   :  { %v1614_v8 = vpop.xlane.xlu1 %1613 }
 0x562   :  { %9376 = vrcp.f32 %v1614_v8 }
 0x565   :  { %v1611_v11 = vpop.xlane.xlu0 %1610 }
 0x566   :  { %9378 = vrcp.f32 %v1611_v11 }
 0x56f   :  { %v9377_v23 = vpop.eup %9376 }
 0x570   :  { %v1634_v31 = vmul.f32 %v9377_v23, %v10227_v52 }
 0x572   :  { %v1608_v25 = vpop.xlane.xlu1 %1607 }
 0x573   :  { %v9379_v49 = vpop.eup %9378  ;;  %9380 = vrcp.f32 %v1608_v25 }
 0x574   :  { %v1605_v35 = vpop.xlane.xlu0 %1604  ;;  %v1633_v37 = vmul.f32 %v9379_v49, %v10231_v57 }
 0x575   :  { %9382 = vrcp.f32 %v1605_v35 }
 0x576   :  { %8882 = vmatprep.mubr.msk.f32.mxu0 %vm416_vm0, %v1633_v37 }
 0x577   :  { %8883 = vmatmul.mubr.msk.f32.vlgmr.msra.gmra.mxu0 %vm416_vm0, %v1634_v31 }
 0x578   :  { %8893 = vmatpush3.xpose.msk.msra.mxu0 %vm416_vm0, %v2041_v29  ;;  %8896 = vmatprep.mubr.msk.f32.mxu0 %vm416_vm0, %v2035_v61 }
 0x579   :  { %8894 = vmatprep.subr.msk.mxu0 %vm416_vm0, %v2039_v55 }
 0x57a   :  { %v1620_v12 = vpop.xlane.xlu1 %1619 }
 0x57b   :  { %9384 = vrcp.f32 %v1620_v12 }
 0x57c   :  { %8895 = vmatpush3.xpose.msk.msra.mxu0 %vm416_vm0, %v2039_v55  ;;  %v1617_v9 = vpop.xlane.xlu0 %1616 }
 0x57d   :  { %9386 = vrcp.f32 %v1617_v9  ;;  %8906 = vmatprep.subr.msk.mxu0 %vm416_vm0, %v2223_v63 }
 0x57f   :  { %8897 = vmatmul.mubr.msk.f32.vlgmr.msra.gmra.mxu0 %vm416_vm0, %v2037_v60 }
 0x580   :  { %8907 = vmatpush3.xpose.msk.msra.mxu0 %vm416_vm0, %v2223_v63  ;;  %v2217_v52 = vpop.permute.xlu0 %2216  ;;  %v9381_v57 = vpop.eup %9380 }
 0x581   :  { %8908 = vmatprep.subr.msk.mxu0 %vm416_vm0, %v2221_v16  ;;  %8910 = vmatprep.mubr.msk.f32.mxu0 %vm416_vm0, %v2217_v52  ;;  %v1632_v6 = vmul.f32 %v9381_v57, %v10236_v24 }
 0x582   :  { %v9383_v3 = vpop.eup %9382 }
 0x583   :  { %v1631_v29 = vmul.f32 %v9383_v3, %v10240_v26  ;;  %v2126_v26 = vpop.permute.xlu1 %2125 }
 0x584   :  { %8909 = vmatpush3.xpose.msk.msra.mxu0 %vm416_vm0, %v2221_v16  ;;  %v2219_v50 = vpop.permute.xlu0 %2218 }
 0x585   :  { %8875 = vmatprep.mubr.msk.f32.mxu1 %vm416_vm0, %v1631_v29 }
 0x586   :  { %8876 = vmatmul.mubr.msk.f32.vlgmr.msra.gmra.mxu1 %vm416_vm0, %v1632_v6 }
 0x587   :  { %8886 = vmatpush3.msra.mxu1 %v10250_v47  ;;  %8911 = vmatmul.mubr.msk.f32.vlgmr.msra.gmra.mxu0 %vm416_vm0, %v2219_v50 }
 0x588   :  { %8887 = vmatprep.subr.mxu1 %v1907_v53  ;;  %v9385_v55 = vpop.eup %9384  ;;  %v2128_v47 = vpop.permute.xlu0 %2127 }
 0x589   :  { %8888 = vmatpush3.msra.mxu1 %v1907_v53  ;;  %v1636_v24 = vmul.f32 %v9385_v55, %v10244_v19  ;;  %v2314_v53 = vpop.permute.xlu1 %2313 }
 0x58a   :  { %v9387_v61 = vpop.eup %9386  ;;  %8899 = vmatprep.subr.msk.mxu1 %vm416_vm0, %v10271_v54 }
 0x58b   :  { %v1635_v60 = vmul.f32 %v9387_v61, %v10248_v38 }
 0x58c   :  { %v2308_v19 = vpop.permute.xlu0 %2307 }
 0x58d   :  { %8889 = vmatprep.mubr.msk.f32.mxu1 %vm416_vm0, %v1635_v60  ;;  %v2312_v38 = vpop.permute.xlu1 %2311 }
 0x58e   :  { %8890 = vmatmul.mubr.msk.f32.vlgmr.msra.gmra.mxu1 %vm416_vm0, %v1636_v24 }
 0x58f   :  { %8900 = vmatpush3.xpose.msk.msra.mxu1 %vm416_vm0, %v10271_v54  ;;  %8903 = vmatprep.mubr.msk.f32.mxu1 %vm416_vm0, %v2126_v26 }
 0x590   :  { %8901 = vmatprep.subr.msk.mxu1 %vm416_vm0, %v10273_v4 }
 0x591   :  { %v2310_v54 = vpop.permute.xlu1 %2309 }
 0x593   :  { %8902 = vmatpush3.xpose.msk.msra.mxu1 %vm416_vm0, %v10273_v4 }
 0x594   :  { %8913 = vmatprep.subr.msk.mxu1 %vm416_vm0, %v2314_v53 }
 0x596   :  { %8904 = vmatmul.mubr.msk.f32.vlgmr.msra.gmra.mxu1 %vm416_vm0, %v2128_v47 }
 0x597   :  { %8914 = vmatpush3.xpose.msk.msra.mxu1 %vm416_vm0, %v2314_v53  ;;  %8917 = vmatprep.mubr.msk.f32.mxu1 %vm416_vm0, %v2308_v19 }
 0x598   :  { %8915 = vmatprep.subr.msk.mxu1 %vm416_vm0, %v2312_v38 }
 0x59b   :  { %8916 = vmatpush3.xpose.msk.msra.mxu1 %vm416_vm0, %v2312_v38 }
 0x59e   :  { %8918 = vmatmul.mubr.msk.f32.vlgmr.msra.gmra.mxu1 %vm416_vm0, %v2310_v54 }
 0x611   :  { %v10320_v63 = vpop.f32.mrf.mxu0 }
 0x613   :  { %v10322_v16 = vpop.f32.mrf.mxu0 }
 0x637   :  { %v10324_v4 = vpop.f32.mrf.mxu0 }
 0x638   :  { %11767 = vst [vmem:[#allocation21_spill] sm:$0xff] %v10324_v4 }
 0x639   :  { %v10326_v14 = vpop.f32.mrf.mxu0 }
 0x63a   :  { %11768 = vst [vmem:[#allocation22_spill] sm:$0xff] %v10326_v14 }
 0x63f   :  { %v8898_v2 = vpop.f32.mrf.mxu0 }
 0x640   :  { %v2401_v56 = vsel %vm416_vm0, %v8898_v2, -inf }
 0x641   :  { %2402 = vmax.xlane.f32.xlu1 %v2401_v56  ;;  %v2116_v27 = vpop.f32.mrf.mxu0 }
 0x642   :  { %v2398_v21 = vsel %vm416_vm0, %v2116_v27, -inf }
 0x643   :  { %2399 = vmax.xlane.f32.xlu0 %v2398_v21 }
 0x646   :  { %v10331_v23 = vpop.f32.mrf.mxu1 }
 0x647   :  { %v8912_v10 = vpop.f32.mrf.mxu0 }
 0x648   :  { %v2413_v8 = vsel %vm416_vm0, %v8912_v10, -inf  ;;  %v10334_v49 = vpop.f32.mrf.mxu1 }
 0x649   :  { %2414 = vmax.xlane.f32.xlu0 %v2413_v8  ;;  %v2298_v11 = vpop.f32.mrf.mxu0  ;;  %11769 = vst [vmem:[#allocation23_spill] sm:$0xff] %v10334_v49 }
 0x64a   :  { %v2410_v25 = vsel %vm416_vm0, %v2298_v11, -inf }
 0x64d   :  { %2411 = vmax.xlane.f32.xlu0 %v2410_v25 }
 0x64e   :  { %v10336_v35 = vpop.f32.mrf.mxu1 }
 0x64f   :  { %11770 = vst [vmem:[#allocation24_spill] sm:$0xff] %v10336_v35 }
 0x650   :  { %v10338_v37 = vpop.f32.mrf.mxu1 }
 0x651   :  { %11771 = vst [vmem:[#allocation25_spill] sm:$0xff] %v10338_v37 }
 0x656   :  { %v8905_v31 = vpop.f32.mrf.mxu1 }
 0x657   :  { %v2407_v12 = vsel %vm416_vm0, %v8905_v31, -inf }
 0x658   :  { %2408 = vmax.xlane.f32.xlu1 %v2407_v12  ;;  %v2207_v9 = vpop.f32.mrf.mxu1 }
 0x659   :  { %v2404_v52 = vsel %vm416_vm0, %v2207_v9, -inf }
 0x65a   :  { %2405 = vmax.xlane.f32.xlu0 %v2404_v52 }
 0x65e   :  { %v8919_v57 = vpop.f32.mrf.mxu1 }
 0x65f   :  { %v2419_v3 = vsel %vm416_vm0, %v8919_v57, -inf }
 0x660   :  { %2420 = vmax.xlane.f32.xlu1 %v2419_v3  ;;  %v10343_v29 = vpop.f32.mrf.mxu1 }
 0x661   :  { %v2416_v6 = vsel %vm416_vm0, %v10343_v29, -inf }
 0x662   :  { %2417 = vmax.xlane.f32.xlu0 %v2416_v6 }
 0x671   :  { %2486 = vrot.lane.b32.xlu1 %v10006_v42, %s9784_s2 }
 0x675   :  { %2662 = vrot.lane.b32.xlu1 %v10014_v43, %s9784_s2 }
 0x678   :  { %2488 = vrot.lane.b32.xlu0 %v9994_v36, %s9784_s2 }
 0x679   :  { %2660 = vrot.lane.b32.xlu1 %v9976_v32, %s9784_s2 }
 0x67c   :  { %2575 = vrot.lane.b32.xlu0 %v10022_v44, %s9784_s2 }
 0x67d   :  { %2881 = vrot.lane.b32.xlu1 %v9922_v7, %s9785_s26 }
 0x680   :  { %2573 = vrot.lane.b32.xlu0 %v10033_v46, %s9784_s2 }
 0x681   :  { %2749 = vrot.lane.b32.xlu1 %v10039_v48, %s9784_s2 }
 0x684   :  { %2879 = vrot.lane.b32.xlu0 %v9920_v5, %s9785_s26 }
 0x685   :  { %2747 = vrot.lane.b32.xlu1 %v10125_v51, %s9784_s2 }
 0x688   :  { %2875 = vrot.lane.b32.xlu0 %v9912_v1, %s9785_s26 }
 0x689   :  { %2972 = vrot.lane.b32.xlu1 %v9936_v13, %s9785_s26 }
 0x68c   :  { %3063 = vrot.lane.b32.xlu0 %v9968_v28, %s9785_s26 }
 0x68d   :  { %2877 = vrot.lane.b32.xlu1 %v9939_v15, %s9785_s26 }
 0x690   :  { %2970 = vrot.lane.b32.xlu0 %v9951_v20, %s9785_s26 }
 0x691   :  { %3061 = vrot.lane.b32.xlu1 %v9978_v33, %s9785_s26 }
 0x6ca   :  { %v2403_v50 = vpop.xlane.xlu1 %2402 }
 0x6cb   :  { %v2423_v55 = vsub.f32 %v8898_v2, %v2403_v50 }
 0x6cc   :  { %v2400_v61 = vpop.xlane.xlu0 %2399 }
 0x6cd   :  { %v2432_v26 = vmul.f32 1.442695, %v2423_v55  ;;  %v2422_v60 = vsub.f32 %v2116_v27, %v2400_v61 }
 0x6cf   :  { %9388 = vpow2.f32 %v2432_v26  ;;  %v2430_v24 = vmul.f32 1.442695, %v2422_v60 }
 0x6d1   :  { %9390 = vpow2.f32 %v2430_v24 }
 0x6d2   :  { %v2415_v47 = vpop.xlane.xlu0 %2414 }
 0x6d3   :  { %v2427_v53 = vsub.f32 %v8912_v10, %v2415_v47 }
 0x6d5   :  { %v2440_v19 = vmul.f32 1.442695, %v2427_v53 }
 0x6d6   :  { %v2412_v38 = vpop.xlane.xlu0 %2411 }
 0x6d7   :  { %9392 = vpow2.f32 %v2440_v19  ;;  %v2426_v54 = vsub.f32 %v2298_v11, %v2412_v38 }
 0x6d9   :  { %v2438_v56 = vmul.f32 1.442695, %v2426_v54 }
 0x6db   :  { %9394 = vpow2.f32 %v2438_v56 }
 0x6dc   :  { %v10379_v21 = vpop.eup %9388 }
 0x6dd   :  { %v2449_v8 = vsel %vm416_vm0, %v10379_v21, 0.0 }
 0x6de   :  { %v10383_v2 = vpop.eup %9390  ;;  %2450 = vadd.xlane.f32.xlu1 %v2449_v8 }
 0x6df   :  { %v2446_v27 = vsel %vm416_vm0, %v10383_v2, 0.0 }
 0x6e0   :  { %2447 = vadd.xlane.f32.xlu0 %v2446_v27 }
 0x6e1   :  { %v2409_v25 = vpop.xlane.xlu1 %2408 }
 0x6e2   :  { %v2425_v10 = vsub.f32 %v8905_v31, %v2409_v25 }
 0x6e3   :  { %v2406_v12 = vpop.xlane.xlu0 %2405 }
 0x6e4   :  { %v10387_v52 = vpop.eup %9392  ;;  %v2436_v11 = vmul.f32 1.442695, %v2425_v10  ;;  %v2424_v3 = vsub.f32 %v2207_v9, %v2406_v12 }
 0x6e5   :  { %v2461_v6 = vsel %vm416_vm0, %v10387_v52, 0.0 }
 0x6e6   :  { %9396 = vpow2.f32 %v2436_v11  ;;  %v2434_v50 = vmul.f32 1.442695, %v2424_v3  ;;  %2462 = vadd.xlane.f32.xlu1 %v2461_v6 }
 0x6e8   :  { %v10391_v55 = vpop.eup %9394  ;;  %9398 = vpow2.f32 %v2434_v50 }
 0x6e9   :  { %v2421_v61 = vpop.xlane.xlu1 %2420  ;;  %v2458_v26 = vsel %vm416_vm0, %v10391_v55, 0.0 }
 0x6ea   :  { %v2429_v60 = vsub.f32 %v8919_v57, %v2421_v61  ;;  %2459 = vadd.xlane.f32.xlu0 %v2458_v26 }
 0x6eb   :  { %v2418_v31 = vpop.xlane.xlu0 %2417 }
 0x6ec   :  { %v2444_v24 = vmul.f32 1.442695, %v2429_v60  ;;  %v2428_v47 = vsub.f32 %v10343_v29, %v2418_v31 }
 0x6ed   :  { %v2487_v9 = vpop.permute.xlu1 %2486 }
 0x6ee   :  { %9400 = vpow2.f32 %v2444_v24  ;;  %v2442_v53 = vmul.f32 1.442695, %v2428_v47 }
 0x6ef   :  { %v2489_v19 = vpop.permute.xlu0 %2488 }
 0x6f0   :  { %9402 = vpow2.f32 %v2442_v53  ;;  %8920 = vmatprep.subr.mxu0 %v2489_v19 }
 0x6f1   :  { %v2663_v38 = vpop.permute.xlu1 %2662  ;;  %8921 = vmatpush3.msra.mxu0 %v2489_v19 }
 0x6f2   :  { %8922 = vmatprep.subr.mxu0 %v2487_v9 }
 0x6f3   :  { %v10396_v54 = vpop.eup %9396  ;;  %8923 = vmatpush3.msra.mxu0 %v2487_v9  ;;  %v2576_v56 = vpop.permute.xlu0 %2575 }
 0x6f4   :  { %8927 = vmatprep.subr.mxu1 %v2576_v56  ;;  %8934 = vmatprep.subr.mxu0 %v2663_v38  ;;  %v2455_v57 = vsel %vm416_vm0, %v10396_v54, 0.0 }
 0x6f5   :  { %v10400_v8 = vpop.eup %9398  ;;  %v2661_v29 = vpop.permute.xlu1 %2660  ;;  %2456 = vadd.xlane.f32.xlu1 %v2455_v57  ;;  %8928 = vmatpush3.msra.mxu1 %v2576_v56 }
 0x6f6   :  { %v2452_v27 = vsel %vm416_vm0, %v10400_v8, 0.0 }
 0x6f7   :  { %2453 = vadd.xlane.f32.xlu0 %v2452_v27  ;;  %v2574_v25 = vpop.permute.xlu0 %2573 }
 0x6f8   :  { %8929 = vmatprep.subr.mxu1 %v2574_v25 }
 0x6f9   :  { %v2882_v10 = vpop.permute.xlu1 %2881  ;;  %8930 = vmatpush3.msra.mxu1 %v2574_v25 }
 0x6fb   :  { %v10404_v12 = vpop.eup %9400  ;;  %v2880_v26 = vpop.permute.xlu0 %2879 }
 0x6fc   :  { %v2467_v11 = vsel %vm416_vm0, %v10404_v12, 0.0 }
 0x6fd   :  { %v10408_v3 = vpop.eup %9402  ;;  %v10410_v6 = vpop.permute.xlu1 %2749  ;;  %2468 = vadd.xlane.f32.xlu1 %v2467_v11 }
 0x6fe   :  { %8941 = vmatprep.subr.mxu1 %v10410_v6  ;;  %v2464_v50 = vsel %vm416_vm0, %v10408_v3, 0.0 }
 0x6ff   :  { %2465 = vadd.xlane.f32.xlu0 %v2464_v50  ;;  %v2876_v31 = vpop.permute.xlu0 %2875 }
 0x701   :  { %v2748_v61 = vpop.permute.xlu1 %2747 }
 0x703   :  { %v3064_v47 = vpop.permute.xlu0 %3063 }
 0x705   :  { %v10431_v60 = vpop.permute.xlu1 %2972 }
 0x707   :  { %v10433_v53 = vpop.permute.xlu0 %2970 }
 0x709   :  { %v2878_v24 = vpop.permute.xlu1 %2877 }
 0x70d   :  { %v3062_v9 = vpop.permute.xlu1 %3061 }
 0x70e   :  { %2966 = vrot.lane.b32.xlu1 %v9942_v17, %s9785_s26 }
 0x712   :  { %3154 = vrot.lane.b32.xlu1 %v10003_v41, %s9785_s26 }
 0x715   :  { %3057 = vrot.lane.b32.xlu0 %v9945_v18, %s9785_s26 }
 0x716   :  { %3152 = vrot.lane.b32.xlu1 %v10001_v40, %s9785_s26 }
 0x719   :  { %3059 = vrot.lane.b32.xlu0 %v9999_v39, %s9785_s26 }
 0x71a   :  { %3150 = vrot.lane.b32.xlu1 %v10027_v45, %s9785_s26 }
 0x71d   :  { %2968 = vrot.lane.b32.xlu0 %v9973_v30, %s9785_s26 }
 0x721   :  { %3148 = vrot.lane.b32.xlu0 %v9981_v34, %s9785_s26 }
 0x767   :  { %v2451_v19 = vpop.xlane.xlu1 %2450 }
 0x768   :  { %9404 = vrcp.f32 %v2451_v19 }
 0x769   :  { %v2448_v56 = vpop.xlane.xlu0 %2447 }
 0x76a   :  { %9406 = vrcp.f32 %v2448_v56 }
 0x76f   :  { %v2463_v57 = vpop.xlane.xlu1 %2462 }
 0x770   :  { %9408 = vrcp.f32 %v2463_v57 }
 0x773   :  { %v2460_v27 = vpop.xlane.xlu0 %2459 }
 0x774   :  { %9410 = vrcp.f32 %v2460_v27 }
 0x775   :  { %v9405_v25 = vpop.eup %9404 }
 0x776   :  { %v2479_v62 = vmul.f32 %v9405_v25, %v10379_v21 }
 0x777   :  { %v9407_v11 = vpop.eup %9406 }
 0x778   :  { %v2478_v50 = vmul.f32 %v9407_v11, %v10383_v2 }
 0x77a   :  { %8924 = vmatprep.mubr.msk.f32.mxu0 %vm416_vm0, %v2478_v50 }
 0x77b   :  { %8925 = vmatmul.mubr.msk.f32.vlgmr.msra.gmra.mxu0 %vm416_vm0, %v2479_v62 }
 0x77c   :  { %8935 = vmatpush3.msra.mxu0 %v2663_v38 }
 0x77d   :  { %8936 = vmatprep.subr.mxu0 %v2661_v29  ;;  %v9409_v19 = vpop.eup %9408 }
 0x77e   :  { %v2457_v22 = vpop.xlane.xlu1 %2456  ;;  %8937 = vmatpush3.msra.mxu0 %v2661_v29  ;;  %v2483_v2 = vmul.f32 %v9409_v19, %v10387_v52 }
 0x77f   :  { %8948 = vmatprep.subr.msk.mxu0 %vm416_vm0, %v2882_v10  ;;  %9412 = vrcp.f32 %v2457_v22 }
 0x780   :  { %v2454_v56 = vpop.xlane.xlu0 %2453 }
 0x781   :  { %v9411_v57 = vpop.eup %9410  ;;  %9414 = vrcp.f32 %v2454_v56 }
 0x782   :  { %v2482_v27 = vmul.f32 %v9411_v57, %v10391_v55 }
 0x784   :  { %8938 = vmatprep.mubr.msk.f32.mxu0 %vm416_vm0, %v2482_v27 }
 0x785   :  { %8939 = vmatmul.mubr.msk.f32.vlgmr.msra.gmra.mxu0 %vm416_vm0, %v2483_v2 }
 0x786   :  { %v2469_v62 = vpop.xlane.xlu1 %2468  ;;  %8949 = vmatpush3.xpose.msk.msra.mxu0 %vm416_vm0, %v2882_v10  ;;  %8952 = vmatprep.mubr.msk.f32.mxu0 %vm416_vm0, %v2876_v31 }
 0x787   :  { %8950 = vmatprep.subr.msk.mxu0 %vm416_vm0, %v2880_v26  ;;  %9416 = vrcp.f32 %v2469_v62 }
 0x788   :  { %v2466_v22 = vpop.xlane.xlu0 %2465 }
 0x789   :  { %9418 = vrcp.f32 %v2466_v22 }
 0x78a   :  { %8951 = vmatpush3.xpose.msk.msra.mxu0 %vm416_vm0, %v2880_v26 }
 0x78b   :  { %8962 = vmatprep.subr.msk.mxu0 %vm416_vm0, %v3064_v47 }
 0x78c   :  { %v3058_v21 = vpop.permute.xlu0 %3057  ;;  %v9413_v52 = vpop.eup %9412 }
 0x78d   :  { %8953 = vmatmul.mubr.msk.f32.vlgmr.msra.gmra.mxu0 %vm416_vm0, %v2878_v24  ;;  %v2481_v29 = vmul.f32 %v9413_v52, %v10396_v54 }
 0x78e   :  { %v9415_v55 = vpop.eup %9414  ;;  %8963 = vmatpush3.xpose.msk.msra.mxu0 %vm416_vm0, %v3064_v47  ;;  %8966 = vmatprep.mubr.msk.f32.mxu0 %vm416_vm0, %v3058_v21 }
 0x78f   :  { %8964 = vmatprep.subr.msk.mxu0 %vm416_vm0, %v3062_v9  ;;  %v2480_v38 = vmul.f32 %v9415_v55, %v10400_v8  ;;  %v2967_v8 = vpop.permute.xlu1 %2966 }
 0x790   :  { %v3060_v10 = vpop.permute.xlu0 %3059 }
 0x791   :  { %8931 = vmatprep.mubr.msk.f32.mxu1 %vm416_vm0, %v2480_v38 }
 0x792   :  { %8932 = vmatmul.mubr.msk.f32.vlgmr.msra.gmra.mxu1 %vm416_vm0, %v2481_v29  ;;  %8965 = vmatpush3.xpose.msk.msra.mxu0 %vm416_vm0, %v3062_v9 }
 0x793   :  { %8942 = vmatpush3.msra.mxu1 %v10410_v6 }
 0x794   :  { %8943 = vmatprep.subr.mxu1 %v2748_v61  ;;  %v9417_v26 = vpop.eup %9416  ;;  %v2969_v6 = vpop.permute.xlu0 %2968 }
 0x795   :  { %8944 = vmatpush3.msra.mxu1 %v2748_v61  ;;  %8967 = vmatmul.mubr.msk.f32.vlgmr.msra.gmra.mxu0 %vm416_vm0, %v3060_v10  ;;  %v2485_v24 = vmul.f32 %v9417_v26, %v10404_v12  ;;  %v3155_v61 = vpop.permute.xlu1 %3154 }
 0x796   :  { %v9419_v31 = vpop.eup %9418  ;;  %8955 = vmatprep.subr.msk.mxu1 %vm416_vm0, %v10431_v60 }
 0x797   :  { %v2484_v54 = vmul.f32 %v9419_v31, %v10408_v3 }
 0x798   :  { %v3149_v12 = vpop.permute.xlu0 %3148 }
 0x799   :  { %8945 = vmatprep.mubr.msk.f32.mxu1 %vm416_vm0, %v2484_v54  ;;  %v3153_v3 = vpop.permute.xlu1 %3152 }
 0x79a   :  { %8946 = vmatmul.mubr.msk.f32.vlgmr.msra.gmra.mxu1 %vm416_vm0, %v2485_v24 }
 0x79b   :  { %8956 = vmatpush3.xpose.msk.msra.mxu1 %vm416_vm0, %v10431_v60  ;;  %8959 = vmatprep.mubr.msk.f32.mxu1 %vm416_vm0, %v2967_v8 }
 0x79c   :  { %8957 = vmatprep.subr.msk.mxu1 %vm416_vm0, %v10433_v53 }
 0x79d   :  { %v3151_v60 = vpop.permute.xlu1 %3150 }
 0x79f   :  { %8958 = vmatpush3.xpose.msk.msra.mxu1 %vm416_vm0, %v10433_v53 }
 0x7a0   :  { %8969 = vmatprep.subr.msk.mxu1 %vm416_vm0, %v3155_v61 }
 0x7a2   :  { %8960 = vmatmul.mubr.msk.f32.vlgmr.msra.gmra.mxu1 %vm416_vm0, %v2969_v6 }
 0x7a3   :  { %8970 = vmatpush3.xpose.msk.msra.mxu1 %vm416_vm0, %v3155_v61  ;;  %8973 = vmatprep.mubr.msk.f32.mxu1 %vm416_vm0, %v3149_v12 }
 0x7a4   :  { %8971 = vmatprep.subr.msk.mxu1 %vm416_vm0, %v3153_v3 }
 0x7a7   :  { %8972 = vmatpush3.xpose.msk.msra.mxu1 %vm416_vm0, %v3153_v3 }
 0x7aa   :  { %8974 = vmatmul.mubr.msk.f32.vlgmr.msra.gmra.mxu1 %vm416_vm0, %v3151_v60 }
 0x83b   :  { %v10480_v47 = vpop.f32.mrf.mxu0 }
 0x83d   :  { %v10482_v9 = vpop.f32.mrf.mxu0 }
 0x845   :  { %v10484_v53 = vpop.f32.mrf.mxu0 }
 0x846   :  { %11772 = vst [vmem:[#allocation26_spill] sm:$0xff] %v10484_v53 }
 0x847   :  { %v10486_v25 = vpop.f32.mrf.mxu0 }
 0x848   :  { %11773 = vst [vmem:[#allocation27_spill] sm:$0xff] %v10486_v25 }
 0x84d   :  { %v8954_v11 = vpop.f32.mrf.mxu0 }
 0x84e   :  { %v3242_v50 = vsel %vm416_vm0, %v8954_v11, -inf }
 0x84f   :  { %3243 = vmax.xlane.f32.xlu1 %v3242_v50  ;;  %v2957_v19 = vpop.f32.mrf.mxu0 }
 0x850   :  { %v3239_v56 = vsel %vm416_vm0, %v2957_v19, -inf }
 0x851   :  { %3240 = vmax.xlane.f32.xlu0 %v3239_v56 }
 0x852   :  { %v10490_v27 = vpop.f32.mrf.mxu1 }
 0x854   :  { %v10493_v22 = vpop.f32.mrf.mxu1 }
 0x855   :  { %v8968_v57 = vpop.f32.mrf.mxu0  ;;  %11774 = vst [vmem:[#allocation28_spill] sm:$0xff] %v10493_v22 }
 0x856   :  { %v3254_v2 = vsel %vm416_vm0, %v8968_v57, -inf }
 0x857   :  { %3255 = vmax.xlane.f32.xlu0 %v3254_v2  ;;  %v3139_v62 = vpop.f32.mrf.mxu0 }
 0x858   :  { %v3251_v21 = vsel %vm416_vm0, %v3139_v62, -inf }
 0x85a   :  { %v10496_v52 = vpop.f32.mrf.mxu1 }
 0x85b   :  { %3252 = vmax.xlane.f32.xlu0 %v3251_v21  ;;  %11775 = vst [vmem:[#allocation29_spill] sm:$0xff] %v10496_v52 }
 0x85c   :  { %v10498_v55 = vpop.f32.mrf.mxu1 }
 0x85d   :  { %11776 = vst [vmem:[#allocation30_spill] sm:$0xff] %v10498_v55 }
 0x862   :  { %v8961_v38 = vpop.f32.mrf.mxu1 }
 0x863   :  { %v3248_v29 = vsel %vm416_vm0, %v8961_v38, -inf }
 0x864   :  { %3249 = vmax.xlane.f32.xlu1 %v3248_v29  ;;  %v3048_v10 = vpop.f32.mrf.mxu1 }
 0x865   :  { %v3245_v26 = vsel %vm416_vm0, %v3048_v10, -inf }
 0x866   :  { %3246 = vmax.xlane.f32.xlu0 %v3245_v26 }
 0x86a   :  { %v8975_v31 = vpop.f32.mrf.mxu1 }
 0x86b   :  { %v3260_v8 = vsel %vm416_vm0, %v8975_v31, -inf }
 0x86c   :  { %3261 = vmax.xlane.f32.xlu1 %v3260_v8  ;;  %v10503_v54 = vpop.f32.mrf.mxu1 }
 0x86d   :  { %v3257_v24 = vsel %vm416_vm0, %v10503_v54, -inf }
 0x86e   :  { %3258 = vmax.xlane.f32.xlu0 %v3257_v24 }
 0x87d   :  { %3327 = vrot.lane.b32.xlu1 %v10006_v42, %s9785_s26 }
 0x881   :  { %3503 = vrot.lane.b32.xlu1 %v10014_v43, %s9785_s26 }
 0x884   :  { %3329 = vrot.lane.b32.xlu0 %v9994_v36, %s9785_s26 }
 0x885   :  { %3501 = vrot.lane.b32.xlu1 %v9976_v32, %s9785_s26 }
 0x888   :  { %3416 = vrot.lane.b32.xlu0 %v10022_v44, %s9785_s26 }
 0x889   :  { %3722 = vrot.lane.b32.xlu1 %v9922_v7, %s9786_s27 }
 0x88c   :  { %3414 = vrot.lane.b32.xlu0 %v10033_v46, %s9785_s26 }
 0x88d   :  { %3590 = vrot.lane.b32.xlu1 %v10039_v48, %s9785_s26 }
 0x890   :  { %3720 = vrot.lane.b32.xlu0 %v9920_v5, %s9786_s27 }
 0x891   :  { %3588 = vrot.lane.b32.xlu1 %v10125_v51, %s9785_s26 }
 0x894   :  { %3716 = vrot.lane.b32.xlu0 %v9912_v1, %s9786_s27 }
 0x895   :  { %3813 = vrot.lane.b32.xlu1 %v9936_v13, %s9786_s27 }
 0x898   :  { %3904 = vrot.lane.b32.xlu0 %v9968_v28, %s9786_s27 }
 0x899   :  { %3718 = vrot.lane.b32.xlu1 %v9939_v15, %s9786_s27 }
 0x89c   :  { %3811 = vrot.lane.b32.xlu0 %v9951_v20, %s9786_s27 }
 0x89d   :  { %3902 = vrot.lane.b32.xlu1 %v9978_v33, %s9786_s27 }
 0x8d8   :  { %v3244_v6 = vpop.xlane.xlu1 %3243 }
 0x8d9   :  { %v3264_v61 = vsub.f32 %v8954_v11, %v3244_v6 }
 0x8da   :  { %v3241_v12 = vpop.xlane.xlu0 %3240 }
 0x8db   :  { %v3273_v3 = vmul.f32 1.442695, %v3264_v61  ;;  %v3263_v60 = vsub.f32 %v2957_v19, %v3241_v12 }
 0x8dd   :  { %9420 = vpow2.f32 %v3273_v3  ;;  %v3271_v50 = vmul.f32 1.442695, %v3263_v60 }
 0x8df   :  { %9422 = vpow2.f32 %v3271_v50 }
 0x8e0   :  { %v3256_v56 = vpop.xlane.xlu0 %3255 }
 0x8e1   :  { %v3268_v2 = vsub.f32 %v8968_v57, %v3256_v56 }
 0x8e3   :  { %v3281_v21 = vmul.f32 1.442695, %v3268_v2 }
 0x8e4   :  { %v3253_v29 = vpop.xlane.xlu0 %3252 }
 0x8e5   :  { %9424 = vpow2.f32 %v3281_v21  ;;  %v3267_v26 = vsub.f32 %v3139_v62, %v3253_v29 }
 0x8e7   :  { %v3279_v8 = vmul.f32 1.442695, %v3267_v26 }
 0x8e9   :  { %9426 = vpow2.f32 %v3279_v8 }
 0x8ea   :  { %v10539_v24 = vpop.eup %9420 }
 0x8eb   :  { %v3290_v59 = vsel %vm416_vm0, %v10539_v24, 0.0 }
 0x8ec   :  { %v10543_v11 = vpop.eup %9422  ;;  %3291 = vadd.xlane.f32.xlu1 %v3290_v59 }
 0x8ed   :  { %v3250_v19 = vpop.xlane.xlu1 %3249  ;;  %v3287_v6 = vsel %vm416_vm0, %v10543_v11, 0.0 }
 0x8ee   :  { %v3266_v61 = vsub.f32 %v8961_v38, %v3250_v19  ;;  %3288 = vadd.xlane.f32.xlu0 %v3287_v6 }
 0x8ef   :  { %v3247_v57 = vpop.xlane.xlu0 %3246 }
 0x8f0   :  { %v3277_v12 = vmul.f32 1.442695, %v3266_v61  ;;  %v3265_v3 = vsub.f32 %v3048_v10, %v3247_v57 }
 0x8f2   :  { %v10547_v62 = vpop.eup %9424  ;;  %9428 = vpow2.f32 %v3277_v12  ;;  %v3275_v60 = vmul.f32 1.442695, %v3265_v3 }
 0x8f3   :  { %v3302_v50 = vsel %vm416_vm0, %v10547_v62, 0.0 }
 0x8f4   :  { %9430 = vpow2.f32 %v3275_v60  ;;  %3303 = vadd.xlane.f32.xlu1 %v3302_v50 }
 0x8f5   :  { %v3262_v56 = vpop.xlane.xlu1 %3261 }
 0x8f6   :  { %v10551_v59 = vpop.eup %9426  ;;  %v3270_v2 = vsub.f32 %v8975_v31, %v3262_v56 }
 0x8f7   :  { %v3259_v21 = vpop.xlane.xlu0 %3258  ;;  %v3299_v38 = vsel %vm416_vm0, %v10551_v59, 0.0 }
 0x8f8   :  { %v3285_v29 = vmul.f32 1.442695, %v3270_v2  ;;  %v3269_v10 = vsub.f32 %v10503_v54, %v3259_v21  ;;  %3300 = vadd.xlane.f32.xlu0 %v3299_v38 }
 0x8f9   :  { %v3328_v26 = vpop.permute.xlu1 %3327 }
 0x8fa   :  { %9432 = vpow2.f32 %v3285_v29  ;;  %v3283_v8 = vmul.f32 1.442695, %v3269_v10 }
 0x8fb   :  { %v3330_v19 = vpop.permute.xlu0 %3329 }
 0x8fc   :  { %9434 = vpow2.f32 %v3283_v8  ;;  %8976 = vmatprep.subr.mxu0 %v3330_v19 }
 0x8fd   :  { %v3504_v6 = vpop.permute.xlu1 %3503  ;;  %8977 = vmatpush3.msra.mxu0 %v3330_v19 }
 0x8fe   :  { %8978 = vmatprep.subr.mxu0 %v3328_v26 }
 0x8ff   :  { %v10556_v61 = vpop.eup %9428  ;;  %8979 = vmatpush3.msra.mxu0 %v3328_v26  ;;  %v3417_v31 = vpop.permute.xlu0 %3416 }
 0x900   :  { %8983 = vmatprep.subr.mxu1 %v3417_v31  ;;  %8990 = vmatprep.subr.mxu0 %v3504_v6  ;;  %v3296_v57 = vsel %vm416_vm0, %v10556_v61, 0.0 }
 0x901   :  { %v10560_v54 = vpop.eup %9430  ;;  %v3502_v12 = vpop.permute.xlu1 %3501  ;;  %3297 = vadd.xlane.f32.xlu1 %v3296_v57  ;;  %8984 = vmatpush3.msra.mxu1 %v3417_v31 }
 0x902   :  { %v3293_v3 = vsel %vm416_vm0, %v10560_v54, 0.0 }
 0x903   :  { %3294 = vadd.xlane.f32.xlu0 %v3293_v3  ;;  %v3415_v60 = vpop.permute.xlu0 %3414 }
 0x904   :  { %8985 = vmatprep.subr.mxu1 %v3415_v60 }
 0x905   :  { %v3723_v50 = vpop.permute.xlu1 %3722  ;;  %8986 = vmatpush3.msra.mxu1 %v3415_v60 }
 0x907   :  { %v10564_v56 = vpop.eup %9432  ;;  %v3721_v26 = vpop.permute.xlu0 %3720 }
 0x908   :  { %v3308_v2 = vsel %vm416_vm0, %v10564_v56, 0.0 }
 0x909   :  { %v10568_v21 = vpop.eup %9434  ;;  %v10570_v38 = vpop.permute.xlu1 %3590  ;;  %3309 = vadd.xlane.f32.xlu1 %v3308_v2 }
 0x90a   :  { %8997 = vmatprep.subr.mxu1 %v10570_v38  ;;  %v3305_v29 = vsel %vm416_vm0, %v10568_v21, 0.0 }
 0x90b   :  { %3306 = vadd.xlane.f32.xlu0 %v3305_v29  ;;  %v3717_v19 = vpop.permute.xlu0 %3716 }
 0x90d   :  { %v3589_v10 = vpop.permute.xlu1 %3588 }
 0x90f   :  { %v3905_v57 = vpop.permute.xlu0 %3904 }
 0x911   :  { %v10591_v8 = vpop.permute.xlu1 %3813 }
 0x913   :  { %v10593_v60 = vpop.permute.xlu0 %3811 }
 0x915   :  { %v3719_v31 = vpop.permute.xlu1 %3718 }
 0x919   :  { %v3903_v3 = vpop.permute.xlu1 %3902 }
 0x91a   :  { %3807 = vrot.lane.b32.xlu1 %v9942_v17, %s9786_s27 }
 0x91e   :  { %3995 = vrot.lane.b32.xlu1 %v10003_v41, %s9786_s27 }
 0x921   :  { %3898 = vrot.lane.b32.xlu0 %v9945_v18, %s9786_s27 }
 0x922   :  { %3993 = vrot.lane.b32.xlu1 %v10001_v40, %s9786_s27 }
 0x925   :  { %3900 = vrot.lane.b32.xlu0 %v9999_v39, %s9786_s27 }
 0x926   :  { %3991 = vrot.lane.b32.xlu1 %v10027_v45, %s9786_s27 }
 0x929   :  { %3809 = vrot.lane.b32.xlu0 %v9973_v30, %s9786_s27 }
 0x92d   :  { %3989 = vrot.lane.b32.xlu0 %v9981_v34, %s9786_s27 }
 0x975   :  { %v3292_v2 = vpop.xlane.xlu1 %3291 }
 0x976   :  { %9436 = vrcp.f32 %v3292_v2 }
 0x977   :  { %v3289_v29 = vpop.xlane.xlu0 %3288 }
 0x978   :  { %9438 = vrcp.f32 %v3289_v29 }
 0x97d   :  { %v3304_v0 = vpop.xlane.xlu1 %3303 }
 0x97e   :  { %9440 = vrcp.f32 %v3304_v0 }
 0x981   :  { %v3301_v58 = vpop.xlane.xlu0 %3300 }
 0x982   :  { %9442 = vrcp.f32 %v3301_v58 }
 0x983   :  { %v9437_v55 = vpop.eup %9436 }
 0x984   :  { %v3320_v35 = vmul.f32 %v9437_v55, %v10539_v24 }
 0x985   :  { %v9439_v37 = vpop.eup %9438 }
 0x986   :  { %v3319_v52 = vmul.f32 %v9439_v37, %v10543_v11 }
 0x988   :  { %8980 = vmatprep.mubr.msk.f32.mxu0 %vm416_vm0, %v3319_v52 }
 0x989   :  { %8981 = vmatmul.mubr.msk.f32.vlgmr.msra.gmra.mxu0 %vm416_vm0, %v3320_v35 }
 0x98a   :  { %v3298_v25 = vpop.xlane.xlu1 %3297  ;;  %8991 = vmatpush3.msra.mxu0 %v3504_v6 }
 0x98b   :  { %8992 = vmatprep.subr.mxu0 %v3502_v12  ;;  %9444 = vrcp.f32 %v3298_v25  ;;  %v9441_v0 = vpop.eup %9440 }
 0x98c   :  { %8993 = vmatpush3.msra.mxu0 %v3502_v12  ;;  %v3295_v2 = vpop.xlane.xlu0 %3294  ;;  %v3324_v37 = vmul.f32 %v9441_v0, %v10547_v62 }
 0x98d   :  { %9446 = vrcp.f32 %v3295_v2  ;;  %9004 = vmatprep.subr.msk.mxu0 %vm416_vm0, %v3723_v50 }
 0x98f   :  { %v9443_v58 = vpop.eup %9442 }
 0x990   :  { %v3323_v29 = vmul.f32 %v9443_v58, %v10551_v59 }
 0x992   :  { %v3310_v55 = vpop.xlane.xlu1 %3309  ;;  %8994 = vmatprep.mubr.msk.f32.mxu0 %vm416_vm0, %v3323_v29 }
 0x993   :  { %8995 = vmatmul.mubr.msk.f32.vlgmr.msra.gmra.mxu0 %vm416_vm0, %v3324_v37  ;;  %9448 = vrcp.f32 %v3310_v55 }
 0x994   :  { %9005 = vmatpush3.xpose.msk.msra.mxu0 %vm416_vm0, %v3723_v50  ;;  %v3307_v35 = vpop.xlane.xlu0 %3306  ;;  %9008 = vmatprep.mubr.msk.f32.mxu0 %vm416_vm0, %v3717_v19 }
 0x995   :  { %9450 = vrcp.f32 %v3307_v35  ;;  %9006 = vmatprep.subr.msk.mxu0 %vm416_vm0, %v3721_v26 }
 0x996   :  { %v3808_v12 = vpop.permute.xlu1 %3807 }
 0x998   :  { %9007 = vmatpush3.xpose.msk.msra.mxu0 %vm416_vm0, %v3721_v26  ;;  %v9445_v25 = vpop.eup %9444  ;;  %v3899_v24 = vpop.permute.xlu0 %3898 }
 0x999   :  { %9018 = vmatprep.subr.msk.mxu0 %vm416_vm0, %v3905_v57  ;;  %v3322_v62 = vmul.f32 %v9445_v25, %v10556_v61 }
 0x99a   :  { %v9447_v52 = vpop.eup %9446 }
 0x99b   :  { %9009 = vmatmul.mubr.msk.f32.vlgmr.msra.gmra.mxu0 %vm416_vm0, %v3719_v31  ;;  %v3321_v11 = vmul.f32 %v9447_v52, %v10560_v54 }
 0x99c   :  { %9019 = vmatpush3.xpose.msk.msra.mxu0 %vm416_vm0, %v3905_v57  ;;  %9022 = vmatprep.mubr.msk.f32.mxu0 %vm416_vm0, %v3899_v24  ;;  %v3901_v54 = vpop.permute.xlu0 %3900 }
 0x99d   :  { %8987 = vmatprep.mubr.msk.f32.mxu1 %vm416_vm0, %v3321_v11  ;;  %9020 = vmatprep.subr.msk.mxu0 %vm416_vm0, %v3903_v3 }
 0x99e   :  { %8988 = vmatmul.mubr.msk.f32.vlgmr.msra.gmra.mxu1 %vm416_vm0, %v3322_v62 }
 0x99f   :  { %8998 = vmatpush3.msra.mxu1 %v10570_v38 }
 0x9a0   :  { %8999 = vmatprep.subr.mxu1 %v3589_v10  ;;  %9021 = vmatpush3.xpose.msk.msra.mxu0 %vm416_vm0, %v3903_v3  ;;  %v9449_v59 = vpop.eup %9448  ;;  %v3810_v38 = vpop.permute.xlu0 %3809 }
 0x9a1   :  { %9000 = vmatpush3.msra.mxu1 %v3589_v10  ;;  %v3326_v50 = vmul.f32 %v9449_v59, %v10564_v56  ;;  %v3996_v10 = vpop.permute.xlu1 %3995 }
 0x9a2   :  { %v9451_v6 = vpop.eup %9450  ;;  %9011 = vmatprep.subr.msk.mxu1 %vm416_vm0, %v10591_v8 }
 0x9a3   :  { %9023 = vmatmul.mubr.msk.f32.vlgmr.msra.gmra.mxu0 %vm416_vm0, %v3901_v54  ;;  %v3325_v61 = vmul.f32 %v9451_v6, %v10568_v21 }
 0x9a4   :  { %v3990_v56 = vpop.permute.xlu0 %3989 }
 0x9a5   :  { %9001 = vmatprep.mubr.msk.f32.mxu1 %vm416_vm0, %v3325_v61  ;;  %v3994_v21 = vpop.permute.xlu1 %3993 }
 0x9a6   :  { %9002 = vmatmul.mubr.msk.f32.vlgmr.msra.gmra.mxu1 %vm416_vm0, %v3326_v50 }
 0x9a7   :  { %9012 = vmatpush3.xpose.msk.msra.mxu1 %vm416_vm0, %v10591_v8  ;;  %9015 = vmatprep.mubr.msk.f32.mxu1 %vm416_vm0, %v3808_v12 }
 0x9a8   :  { %9013 = vmatprep.subr.msk.mxu1 %vm416_vm0, %v10593_v60 }
 0x9a9   :  { %v3992_v26 = vpop.permute.xlu1 %3991 }
 0x9ab   :  { %9014 = vmatpush3.xpose.msk.msra.mxu1 %vm416_vm0, %v10593_v60 }
 0x9ac   :  { %9025 = vmatprep.subr.msk.mxu1 %vm416_vm0, %v3996_v10 }
 0x9ae   :  { %9016 = vmatmul.mubr.msk.f32.vlgmr.msra.gmra.mxu1 %vm416_vm0, %v3810_v38 }
 0x9af   :  { %9026 = vmatpush3.xpose.msk.msra.mxu1 %vm416_vm0, %v3996_v10  ;;  %9029 = vmatprep.mubr.msk.f32.mxu1 %vm416_vm0, %v3990_v56 }
 0x9b0   :  { %9027 = vmatprep.subr.msk.mxu1 %vm416_vm0, %v3994_v21 }
 0x9b3   :  { %9028 = vmatpush3.xpose.msk.msra.mxu1 %vm416_vm0, %v3994_v21 }
 0x9b6   :  { %9030 = vmatmul.mubr.msk.f32.vlgmr.msra.gmra.mxu1 %vm416_vm0, %v3992_v26 }
 0xa49   :  { %v10640_v8 = vpop.f32.mrf.mxu0 }
 0xa4b   :  { %v10642_v19 = vpop.f32.mrf.mxu0 }
 0xa53   :  { %v10644_v31 = vpop.f32.mrf.mxu0 }
 0xa54   :  { %11777 = vst [vmem:[#allocation31_spill] sm:$0xff] %v10644_v31 }
 0xa55   :  { %v10646_v57 = vpop.f32.mrf.mxu0 }
 0xa56   :  { %11778 = vst [vmem:[#allocation32_spill] sm:$0xff] %v10646_v57 }
 0xa5b   :  { %v9010_v3 = vpop.f32.mrf.mxu0 }
 0xa5c   :  { %v4083_v60 = vsel %vm416_vm0, %v9010_v3, -inf }
 0xa5d   :  { %4084 = vmax.xlane.f32.xlu1 %v4083_v60  ;;  %v3798_v2 = vpop.f32.mrf.mxu0 }
 0xa5e   :  { %v4080_v0 = vsel %vm416_vm0, %v3798_v2, -inf  ;;  %v10650_v58 = vpop.f32.mrf.mxu1 }
 0xa5f   :  { %4081 = vmax.xlane.f32.xlu0 %v4080_v0  ;;  %11779 = vst [vmem:[#allocation33_spill] sm:$0xff] %v10650_v58 }
 0xa60   :  { %v10653_v35 = vpop.f32.mrf.mxu1 }
 0xa61   :  { %11780 = vst [vmem:[#allocation34_spill] sm:$0xff] %v10653_v35 }
 0xa63   :  { %v9024_v29 = vpop.f32.mrf.mxu0 }
 0xa64   :  { %v4095_v37 = vsel %vm416_vm0, %v9024_v29, -inf }
 0xa65   :  { %4096 = vmax.xlane.f32.xlu0 %v4095_v37  ;;  %v3980_v55 = vpop.f32.mrf.mxu0 }
 0xa66   :  { %v10655_v25 = vpop.f32.mrf.mxu1  ;;  %v4092_v52 = vsel %vm416_vm0, %v3980_v55, -inf }
 0xa67   :  { %11781 = vst [vmem:[#allocation35_spill] sm:$0xff] %v10655_v25 }
 0xa68   :  { %v10658_v24 = vpop.f32.mrf.mxu1 }
 0xa69   :  { %4093 = vmax.xlane.f32.xlu0 %v4092_v52  ;;  %11782 = vst [vmem:[#allocation36_spill] sm:$0xff] %v10658_v24 }
 0xa6e   :  { %v9017_v11 = vpop.f32.mrf.mxu1 }
 0xa6f   :  { %v4089_v62 = vsel %vm416_vm0, %v9017_v11, -inf }
 0xa70   :  { %4090 = vmax.xlane.f32.xlu1 %v4089_v62  ;;  %v3889_v59 = vpop.f32.mrf.mxu1 }
 0xa71   :  { %v4086_v6 = vsel %vm416_vm0, %v3889_v59, -inf }
 0xa72   :  { %4087 = vmax.xlane.f32.xlu0 %v4086_v6 }
 0xa76   :  { %v9031_v54 = vpop.f32.mrf.mxu1 }
 0xa77   :  { %v4101_v12 = vsel %vm416_vm0, %v9031_v54, -inf }
 0xa78   :  { %4102 = vmax.xlane.f32.xlu1 %v4101_v12  ;;  %v4071_v61 = vpop.f32.mrf.mxu1 }
 0xa79   :  { %v4098_v50 = vsel %vm416_vm0, %v4071_v61, -inf }
 0xa7a   :  { %4099 = vmax.xlane.f32.xlu0 %v4098_v50 }
 0xa89   :  { %4168 = vrot.lane.b32.xlu1 %v10006_v42, %s9786_s27 }
 0xa8d   :  { %4344 = vrot.lane.b32.xlu1 %v10014_v43, %s9786_s27 }
 0xa90   :  { %4170 = vrot.lane.b32.xlu0 %v9994_v36, %s9786_s27 }
 0xa91   :  { %4342 = vrot.lane.b32.xlu1 %v9976_v32, %s9786_s27 }
 0xa94   :  { %4257 = vrot.lane.b32.xlu0 %v10022_v44, %s9786_s27 }
 0xa95   :  { %4563 = vrot.lane.b32.xlu1 %v9922_v7, %s9787_s28 }
 0xa98   :  { %4255 = vrot.lane.b32.xlu0 %v10033_v46, %s9786_s27 }
 0xa99   :  { %4431 = vrot.lane.b32.xlu1 %v10039_v48, %s9786_s27 }
 0xa9c   :  { %4561 = vrot.lane.b32.xlu0 %v9920_v5, %s9787_s28 }
 0xa9d   :  { %4429 = vrot.lane.b32.xlu1 %v10125_v51, %s9786_s27 }
 0xaa0   :  { %4557 = vrot.lane.b32.xlu0 %v9912_v1, %s9787_s28 }
 0xaa1   :  { %4654 = vrot.lane.b32.xlu1 %v9936_v13, %s9787_s28 }
 0xaa4   :  { %4745 = vrot.lane.b32.xlu0 %v9968_v28, %s9787_s28 }
 0xaa5   :  { %4559 = vrot.lane.b32.xlu1 %v9939_v15, %s9787_s28 }
 0xaa8   :  { %4652 = vrot.lane.b32.xlu0 %v9951_v20, %s9787_s28 }
 0xaa9   :  { %4743 = vrot.lane.b32.xlu1 %v9978_v33, %s9787_s28 }
 0xae6   :  { %v4085_v38 = vpop.xlane.xlu1 %4084 }
 0xae7   :  { %v4105_v10 = vsub.f32 %v9010_v3, %v4085_v38 }
 0xae8   :  { %v4082_v56 = vpop.xlane.xlu0 %4081 }
 0xae9   :  { %v4114_v21 = vmul.f32 1.442695, %v4105_v10  ;;  %v4104_v26 = vsub.f32 %v3798_v2, %v4082_v56 }
 0xaeb   :  { %9452 = vpow2.f32 %v4114_v21  ;;  %v4112_v60 = vmul.f32 1.442695, %v4104_v26 }
 0xaed   :  { %9454 = vpow2.f32 %v4112_v60 }
 0xaee   :  { %v4097_v0 = vpop.xlane.xlu0 %4096 }
 0xaef   :  { %v4109_v37 = vsub.f32 %v9024_v29, %v4097_v0 }
 0xaf1   :  { %v4122_v52 = vmul.f32 1.442695, %v4109_v37 }
 0xaf2   :  { %v4094_v62 = vpop.xlane.xlu0 %4093 }
 0xaf3   :  { %9456 = vpow2.f32 %v4122_v52  ;;  %v4108_v6 = vsub.f32 %v3980_v55, %v4094_v62 }
 0xaf5   :  { %v4120_v12 = vmul.f32 1.442695, %v4108_v6 }
 0xaf7   :  { %9458 = vpow2.f32 %v4120_v12 }
 0xaf8   :  { %v10696_v50 = vpop.eup %9452 }
 0xaf9   :  { %v4091_v24 = vpop.xlane.xlu1 %4090  ;;  %v4131_v3 = vsel %vm416_vm0, %v10696_v50, 0.0 }
 0xafa   :  { %v10700_v38 = vpop.eup %9454  ;;  %v4107_v2 = vsub.f32 %v9017_v11, %v4091_v24  ;;  %4132 = vadd.xlane.f32.xlu1 %v4131_v3 }
 0xafb   :  { %v4088_v10 = vpop.xlane.xlu0 %4087  ;;  %v4128_v29 = vsel %vm416_vm0, %v10700_v38, 0.0 }
 0xafc   :  { %v4118_v56 = vmul.f32 1.442695, %v4107_v2  ;;  %v4106_v21 = vsub.f32 %v3889_v59, %v4088_v10  ;;  %4129 = vadd.xlane.f32.xlu0 %v4128_v29 }
 0xafe   :  { %9460 = vpow2.f32 %v4118_v56  ;;  %v4116_v55 = vmul.f32 1.442695, %v4106_v21 }
 0xb00   :  { %v10704_v26 = vpop.eup %9456  ;;  %9462 = vpow2.f32 %v4116_v55 }
 0xb01   :  { %v4103_v60 = vpop.xlane.xlu1 %4102  ;;  %v4143_v0 = vsel %vm416_vm0, %v10704_v26, 0.0 }
 0xb02   :  { %v4111_v37 = vsub.f32 %v9031_v54, %v4103_v60  ;;  %4144 = vadd.xlane.f32.xlu1 %v4143_v0 }
 0xb03   :  { %v4100_v24 = vpop.xlane.xlu0 %4099 }
 0xb04   :  { %v10708_v11 = vpop.eup %9458  ;;  %v4126_v52 = vmul.f32 1.442695, %v4111_v37  ;;  %v4110_v62 = vsub.f32 %v4071_v61, %v4100_v24 }
 0xb05   :  { %v4169_v6 = vpop.permute.xlu1 %4168  ;;  %v4140_v59 = vsel %vm416_vm0, %v10708_v11, 0.0 }
 0xb06   :  { %9464 = vpow2.f32 %v4126_v52  ;;  %v4124_v12 = vmul.f32 1.442695, %v4110_v62  ;;  %4141 = vadd.xlane.f32.xlu0 %v4140_v59 }
 0xb07   :  { %v4171_v3 = vpop.permute.xlu0 %4170 }
 0xb08   :  { %9466 = vpow2.f32 %v4124_v12  ;;  %9032 = vmatprep.subr.mxu0 %v4171_v3 }
 0xb09   :  { %v4345_v2 = vpop.permute.xlu1 %4344  ;;  %9033 = vmatpush3.msra.mxu0 %v4171_v3 }
 0xb0a   :  { %9034 = vmatprep.subr.mxu0 %v4169_v6 }
 0xb0b   :  { %v10712_v54 = vpop.eup %9460  ;;  %9035 = vmatpush3.msra.mxu0 %v4169_v6  ;;  %v4258_v10 = vpop.permute.xlu0 %4257 }
 0xb0c   :  { %9039 = vmatprep.subr.mxu1 %v4258_v10  ;;  %9046 = vmatprep.subr.mxu0 %v4345_v2  ;;  %v4137_v61 = vsel %vm416_vm0, %v10712_v54, 0.0 }
 0xb0d   :  { %v10716_v29 = vpop.eup %9462  ;;  %v4343_v56 = vpop.permute.xlu1 %4342  ;;  %4138 = vadd.xlane.f32.xlu1 %v4137_v61  ;;  %9040 = vmatpush3.msra.mxu1 %v4258_v10 }
 0xb0e   :  { %v4134_v21 = vsel %vm416_vm0, %v10716_v29, 0.0 }
 0xb0f   :  { %4135 = vadd.xlane.f32.xlu0 %v4134_v21  ;;  %v4256_v55 = vpop.permute.xlu0 %4255 }
 0xb10   :  { %9041 = vmatprep.subr.mxu1 %v4256_v55 }
 0xb11   :  { %v4564_v60 = vpop.permute.xlu1 %4563  ;;  %9042 = vmatpush3.msra.mxu1 %v4256_v55 }
 0xb13   :  { %v10720_v0 = vpop.eup %9464  ;;  %v4562_v59 = vpop.permute.xlu0 %4561 }
 0xb14   :  { %v4149_v37 = vsel %vm416_vm0, %v10720_v0, 0.0 }
 0xb15   :  { %v10724_v24 = vpop.eup %9466  ;;  %v10726_v52 = vpop.permute.xlu1 %4431  ;;  %4150 = vadd.xlane.f32.xlu1 %v4149_v37 }
 0xb16   :  { %9053 = vmatprep.subr.mxu1 %v10726_v52  ;;  %v4146_v62 = vsel %vm416_vm0, %v10724_v24, 0.0 }
 0xb17   :  { %4147 = vadd.xlane.f32.xlu0 %v4146_v62  ;;  %v4558_v3 = vpop.permute.xlu0 %4557 }
 0xb19   :  { %v4430_v6 = vpop.permute.xlu1 %4429 }
 0xb1b   :  { %v4746_v61 = vpop.permute.xlu0 %4745 }
 0xb1d   :  { %v10747_v12 = vpop.permute.xlu1 %4654 }
 0xb1f   :  { %v10749_v55 = vpop.permute.xlu0 %4652 }
 0xb21   :  { %v4560_v10 = vpop.permute.xlu1 %4559 }
 0xb25   :  { %v4744_v21 = vpop.permute.xlu1 %4743 }
 0xb26   :  { %4648 = vrot.lane.b32.xlu1 %v9942_v17, %s9787_s28 }
 0xb2a   :  { %4836 = vrot.lane.b32.xlu1 %v10003_v41, %s9787_s28 }
 0xb2d   :  { %4739 = vrot.lane.b32.xlu0 %v9945_v18, %s9787_s28 }
 0xb2e   :  { %4834 = vrot.lane.b32.xlu1 %v10001_v40, %s9787_s28 }
 0xb31   :  { %4741 = vrot.lane.b32.xlu0 %v9999_v39, %s9787_s28 }
 0xb32   :  { %4832 = vrot.lane.b32.xlu1 %v10027_v45, %s9787_s28 }
 0xb35   :  { %4650 = vrot.lane.b32.xlu0 %v9973_v30, %s9787_s28 }
 0xb39   :  { %4830 = vrot.lane.b32.xlu0 %v9981_v34, %s9787_s28 }
 0xb83   :  { %v4133_v37 = vpop.xlane.xlu1 %4132 }
 0xb84   :  { %9468 = vrcp.f32 %v4133_v37 }
 0xb85   :  { %v4130_v62 = vpop.xlane.xlu0 %4129 }
 0xb86   :  { %9470 = vrcp.f32 %v4130_v62 }
 0xb8b   :  { %v4145_v25 = vpop.xlane.xlu1 %4144 }
 0xb8c   :  { %9472 = vrcp.f32 %v4145_v25 }
 0xb8f   :  { %v4142_v57 = vpop.xlane.xlu0 %4141 }
 0xb90   :  { %9474 = vrcp.f32 %v4142_v57 }
 0xb91   :  { %v9469_v14 = vpop.eup %9468 }
 0xb92   :  { %v4161_v4 = vmul.f32 %v9469_v14, %v10696_v50 }
 0xb93   :  { %v9471_v31 = vpop.eup %9470 }
 0xb94   :  { %v4160_v53 = vmul.f32 %v9471_v31, %v10700_v38 }
 0xb96   :  { %v4139_v35 = vpop.xlane.xlu1 %4138  ;;  %9036 = vmatprep.mubr.msk.f32.mxu0 %vm416_vm0, %v4160_v53 }
 0xb97   :  { %9037 = vmatmul.mubr.msk.f32.vlgmr.msra.gmra.mxu0 %vm416_vm0, %v4161_v4  ;;  %9476 = vrcp.f32 %v4139_v35 }
 0xb98   :  { %9047 = vmatpush3.msra.mxu0 %v4345_v2  ;;  %v4136_v37 = vpop.xlane.xlu0 %4135 }
 0xb99   :  { %9478 = vrcp.f32 %v4136_v37  ;;  %9048 = vmatprep.subr.mxu0 %v4343_v56  ;;  %v9473_v57 = vpop.eup %9472 }
 0xb9a   :  { %9049 = vmatpush3.msra.mxu0 %v4343_v56  ;;  %v4165_v14 = vmul.f32 %v9473_v57, %v10704_v26 }
 0xb9b   :  { %9060 = vmatprep.subr.msk.mxu0 %vm416_vm0, %v4564_v60 }
 0xb9d   :  { %v9475_v25 = vpop.eup %9474 }
 0xb9e   :  { %v4151_v62 = vpop.xlane.xlu1 %4150  ;;  %v4164_v31 = vmul.f32 %v9475_v25, %v10708_v11 }
 0xb9f   :  { %9480 = vrcp.f32 %v4151_v62 }
 0xba0   :  { %v4148_v50 = vpop.xlane.xlu0 %4147  ;;  %9050 = vmatprep.mubr.msk.f32.mxu0 %vm416_vm0, %v4164_v31 }
 0xba1   :  { %9482 = vrcp.f32 %v4148_v50  ;;  %9051 = vmatmul.mubr.msk.f32.vlgmr.msra.gmra.mxu0 %vm416_vm0, %v4165_v14 }
 0xba2   :  { %9061 = vmatpush3.xpose.msk.msra.mxu0 %vm416_vm0, %v4564_v60  ;;  %9064 = vmatprep.mubr.msk.f32.mxu0 %vm416_vm0, %v4558_v3 }
 0xba3   :  { %9062 = vmatprep.subr.msk.mxu0 %vm416_vm0, %v4562_v59 }
 0xba4   :  { %v9477_v4 = vpop.eup %9476  ;;  %v4740_v38 = vpop.permute.xlu0 %4739 }
 0xba5   :  { %v4163_v26 = vmul.f32 %v9477_v4, %v10712_v54  ;;  %v4649_v54 = vpop.permute.xlu1 %4648 }
 0xba6   :  { %v9479_v53 = vpop.eup %9478  ;;  %9063 = vmatpush3.xpose.msk.msra.mxu0 %vm416_vm0, %v4562_v59 }
 0xba7   :  { %9074 = vmatprep.subr.msk.mxu0 %vm416_vm0, %v4746_v61  ;;  %v4162_v35 = vmul.f32 %v9479_v53, %v10716_v29 }
 0xba8   :  { %v4742_v29 = vpop.permute.xlu0 %4741 }
 0xba9   :  { %9043 = vmatprep.mubr.msk.f32.mxu1 %vm416_vm0, %v4162_v35  ;;  %9065 = vmatmul.mubr.msk.f32.vlgmr.msra.gmra.mxu0 %vm416_vm0, %v4560_v10 }
 0xbaa   :  { %9044 = vmatmul.mubr.msk.f32.vlgmr.msra.gmra.mxu1 %vm416_vm0, %v4163_v26  ;;  %9075 = vmatpush3.xpose.msk.msra.mxu0 %vm416_vm0, %v4746_v61 }
 0xbab   :  { %9054 = vmatpush3.msra.mxu1 %v10726_v52  ;;  %9078 = vmatprep.mubr.msk.f32.mxu0 %vm416_vm0, %v4740_v38 }
 0xbac   :  { %9055 = vmatprep.subr.mxu1 %v4430_v6  ;;  %9076 = vmatprep.subr.msk.mxu0 %vm416_vm0, %v4744_v21  ;;  %v9481_v11 = vpop.eup %9480  ;;  %v4651_v52 = vpop.permute.xlu0 %4650 }
 0xbad   :  { %9056 = vmatpush3.msra.mxu1 %v4430_v6  ;;  %v4167_v60 = vmul.f32 %v9481_v11, %v10720_v0  ;;  %v4837_v6 = vpop.permute.xlu1 %4836 }
 0xbae   :  { %v9483_v2 = vpop.eup %9482  ;;  %9067 = vmatprep.subr.msk.mxu1 %vm416_vm0, %v10747_v12  ;;  %9077 = vmatpush3.xpose.msk.msra.mxu0 %vm416_vm0, %v4744_v21 }
 0xbaf   :  { %v4166_v56 = vmul.f32 %v9483_v2, %v10724_v24 }
 0xbb0   :  { %v4831_v0 = vpop.permute.xlu0 %4830 }
 0xbb1   :  { %9057 = vmatprep.mubr.msk.f32.mxu1 %vm416_vm0, %v4166_v56  ;;  %9079 = vmatmul.mubr.msk.f32.vlgmr.msra.gmra.mxu0 %vm416_vm0, %v4742_v29  ;;  %v4835_v24 = vpop.permute.xlu1 %4834 }
 0xbb2   :  { %9058 = vmatmul.mubr.msk.f32.vlgmr.msra.gmra.mxu1 %vm416_vm0, %v4167_v60 }
 0xbb3   :  { %9068 = vmatpush3.xpose.msk.msra.mxu1 %vm416_vm0, %v10747_v12  ;;  %9071 = vmatprep.mubr.msk.f32.mxu1 %vm416_vm0, %v4649_v54 }
 0xbb4   :  { %9069 = vmatprep.subr.msk.mxu1 %vm416_vm0, %v10749_v55 }
 0xbb5   :  { %v4833_v59 = vpop.permute.xlu1 %4832 }
 0xbb7   :  { %9070 = vmatpush3.xpose.msk.msra.mxu1 %vm416_vm0, %v10749_v55 }
 0xbb8   :  { %9081 = vmatprep.subr.msk.mxu1 %vm416_vm0, %v4837_v6 }
 0xbba   :  { %9072 = vmatmul.mubr.msk.f32.vlgmr.msra.gmra.mxu1 %vm416_vm0, %v4651_v52 }
 0xbbb   :  { %9082 = vmatpush3.xpose.msk.msra.mxu1 %vm416_vm0, %v4837_v6  ;;  %9085 = vmatprep.mubr.msk.f32.mxu1 %vm416_vm0, %v4831_v0 }
 0xbbc   :  { %9083 = vmatprep.subr.msk.mxu1 %vm416_vm0, %v4835_v24 }
 0xbbf   :  { %9084 = vmatpush3.xpose.msk.msra.mxu1 %vm416_vm0, %v4835_v24 }
 0xbc2   :  { %9086 = vmatmul.mubr.msk.f32.vlgmr.msra.gmra.mxu1 %vm416_vm0, %v4833_v59 }
 0xc57   :  { %v10796_v12 = vpop.f32.mrf.mxu0 }
 0xc59   :  { %v10798_v3 = vpop.f32.mrf.mxu0 }
 0xc61   :  { %v10800_v10 = vpop.f32.mrf.mxu0 }
 0xc62   :  { %11783 = vst [vmem:[#allocation37_spill] sm:$0xff] %v10800_v10 }
 0xc63   :  { %v10802_v61 = vpop.f32.mrf.mxu0 }
 0xc64   :  { %11784 = vst [vmem:[#allocation38_spill] sm:$0xff] %v10802_v61 }
 0xc69   :  { %v9066_v21 = vpop.f32.mrf.mxu0 }
 0xc6a   :  { %v4924_v55 = vsel %vm416_vm0, %v9066_v21, -inf  ;;  %v10806_v25 = vpop.f32.mrf.mxu1 }
 0xc6b   :  { %4925 = vmax.xlane.f32.xlu1 %v4924_v55  ;;  %v4639_v37 = vpop.f32.mrf.mxu0  ;;  %11785 = vst [vmem:[#allocation39_spill] sm:$0xff] %v10806_v25 }
 0xc6c   :  { %v4921_v57 = vsel %vm416_vm0, %v4639_v37, -inf  ;;  %v10808_v31 = vpop.f32.mrf.mxu1 }
 0xc6d   :  { %4922 = vmax.xlane.f32.xlu0 %v4921_v57  ;;  %11786 = vst [vmem:[#allocation40_spill] sm:$0xff] %v10808_v31 }
 0xc71   :  { %v9080_v62 = vpop.f32.mrf.mxu0 }
 0xc72   :  { %v4936_v14 = vsel %vm416_vm0, %v9080_v62, -inf  ;;  %v10811_v4 = vpop.f32.mrf.mxu1 }
 0xc73   :  { %4937 = vmax.xlane.f32.xlu0 %v4936_v14  ;;  %v4821_v50 = vpop.f32.mrf.mxu0  ;;  %11787 = vst [vmem:[#allocation41_spill] sm:$0xff] %v10811_v4 }
 0xc74   :  { %v4933_v53 = vsel %vm416_vm0, %v4821_v50, -inf  ;;  %v10814_v35 = vpop.f32.mrf.mxu1 }
 0xc75   :  { %11788 = vst [vmem:[#allocation42_spill] sm:$0xff] %v10814_v35 }
 0xc77   :  { %4934 = vmax.xlane.f32.xlu0 %v4933_v53 }
 0xc7a   :  { %v9073_v38 = vpop.f32.mrf.mxu1 }
 0xc7b   :  { %v4930_v26 = vsel %vm416_vm0, %v9073_v38, -inf }
 0xc7c   :  { %4931 = vmax.xlane.f32.xlu1 %v4930_v26  ;;  %v4730_v11 = vpop.f32.mrf.mxu1 }
 0xc7d   :  { %v4927_v2 = vsel %vm416_vm0, %v4730_v11, -inf }
 0xc7e   :  { %4928 = vmax.xlane.f32.xlu0 %v4927_v2 }
 0xc82   :  { %v9087_v29 = vpop.f32.mrf.mxu1 }
 0xc83   :  { %v4942_v54 = vsel %vm416_vm0, %v9087_v29, -inf }
 0xc84   :  { %4943 = vmax.xlane.f32.xlu1 %v4942_v54  ;;  %v4912_v56 = vpop.f32.mrf.mxu1 }
 0xc85   :  { %v4939_v60 = vsel %vm416_vm0, %v4912_v56, -inf }
 0xc86   :  { %4940 = vmax.xlane.f32.xlu0 %v4939_v60 }
 0xc95   :  { %5009 = vrot.lane.b32.xlu1 %v10006_v42, %s9787_s28 }
 0xc99   :  { %5185 = vrot.lane.b32.xlu1 %v10014_v43, %s9787_s28 }
 0xc9c   :  { %5011 = vrot.lane.b32.xlu0 %v9994_v36, %s9787_s28 }
 0xc9d   :  { %5183 = vrot.lane.b32.xlu1 %v9976_v32, %s9787_s28 }
 0xca0   :  { %5098 = vrot.lane.b32.xlu0 %v10022_v44, %s9787_s28 }
 0xca1   :  { %5404 = vrot.lane.b32.xlu1 %v9922_v7, %s9780_s17 }
 0xca4   :  { %5096 = vrot.lane.b32.xlu0 %v10033_v46, %s9787_s28 }
 0xca5   :  { %5272 = vrot.lane.b32.xlu1 %v10039_v48, %s9787_s28 }
 0xca8   :  { %5402 = vrot.lane.b32.xlu0 %v9920_v5, %s9780_s17 }
 0xca9   :  { %5270 = vrot.lane.b32.xlu1 %v10125_v51, %s9787_s28 }
 0xcac   :  { %5398 = vrot.lane.b32.xlu0 %v9912_v1, %s9780_s17 }
 0xcad   :  { %5495 = vrot.lane.b32.xlu1 %v9936_v13, %s9780_s17 }
 0xcb0   :  { %5586 = vrot.lane.b32.xlu0 %v9968_v28, %s9780_s17 }
 0xcb1   :  { %5400 = vrot.lane.b32.xlu1 %v9939_v15, %s9780_s17 }
 0xcb4   :  { %5493 = vrot.lane.b32.xlu0 %v9951_v20, %s9780_s17 }
 0xcb5   :  { %5584 = vrot.lane.b32.xlu1 %v9978_v33, %s9780_s17 }
 0xcf4   :  { %v4926_v52 = vpop.xlane.xlu1 %4925 }
 0xcf5   :  { %v4946_v6 = vsub.f32 %v9066_v21, %v4926_v52 }
 0xcf6   :  { %v4923_v0 = vpop.xlane.xlu0 %4922 }
 0xcf7   :  { %v4955_v24 = vmul.f32 1.442695, %v4946_v6  ;;  %v4945_v59 = vsub.f32 %v4639_v37, %v4923_v0 }
 0xcf9   :  { %9484 = vpow2.f32 %v4955_v24  ;;  %v4953_v55 = vmul.f32 1.442695, %v4945_v59 }
 0xcfb   :  { %9486 = vpow2.f32 %v4953_v55 }
 0xcfc   :  { %v4938_v57 = vpop.xlane.xlu0 %4937 }
 0xcfd   :  { %v4950_v14 = vsub.f32 %v9080_v62, %v4938_v57 }
 0xcff   :  { %v4963_v53 = vmul.f32 1.442695, %v4950_v14 }
 0xd00   :  { %v4935_v26 = vpop.xlane.xlu0 %4934 }
 0xd01   :  { %9488 = vpow2.f32 %v4963_v53  ;;  %v4949_v2 = vsub.f32 %v4821_v50, %v4935_v26 }
 0xd03   :  { %v4961_v54 = vmul.f32 1.442695, %v4949_v2 }
 0xd05   :  { %9490 = vpow2.f32 %v4961_v54  ;;  %v4932_v60 = vpop.xlane.xlu1 %4931 }
 0xd06   :  { %v10852_v35 = vpop.eup %9484  ;;  %v4948_v4 = vsub.f32 %v9073_v38, %v4932_v60 }
 0xd07   :  { %v4929_v61 = vpop.xlane.xlu0 %4928  ;;  %v4972_v21 = vsel %vm416_vm0, %v10852_v35, 0.0 }
 0xd08   :  { %v10856_v37 = vpop.eup %9486  ;;  %v4959_v52 = vmul.f32 1.442695, %v4948_v4  ;;  %v4947_v6 = vsub.f32 %v4730_v11, %v4929_v61  ;;  %4973 = vadd.xlane.f32.xlu1 %v4972_v21 }
 0xd09   :  { %v4969_v62 = vsel %vm416_vm0, %v10856_v37, 0.0 }
 0xd0a   :  { %9492 = vpow2.f32 %v4959_v52  ;;  %v4957_v50 = vmul.f32 1.442695, %v4947_v6  ;;  %4970 = vadd.xlane.f32.xlu0 %v4969_v62 }
 0xd0c   :  { %9494 = vpow2.f32 %v4957_v50 }
 0xd0d   :  { %v4944_v0 = vpop.xlane.xlu1 %4943 }
 0xd0e   :  { %v10860_v24 = vpop.eup %9488  ;;  %v4952_v38 = vsub.f32 %v9087_v29, %v4944_v0 }
 0xd0f   :  { %v4941_v59 = vpop.xlane.xlu0 %4940  ;;  %v4984_v55 = vsel %vm416_vm0, %v10860_v24, 0.0 }
 0xd10   :  { %v4967_v57 = vmul.f32 1.442695, %v4952_v38  ;;  %v4951_v14 = vsub.f32 %v4912_v56, %v4941_v59  ;;  %4985 = vadd.xlane.f32.xlu1 %v4984_v55 }
 0xd11   :  { %v5010_v61 = vpop.permute.xlu1 %5009 }
 0xd12   :  { %v10864_v4 = vpop.eup %9490  ;;  %9496 = vpow2.f32 %v4967_v57  ;;  %v4965_v11 = vmul.f32 1.442695, %v4951_v14 }
 0xd13   :  { %v5012_v53 = vpop.permute.xlu0 %5011  ;;  %v4981_v26 = vsel %vm416_vm0, %v10864_v4, 0.0 }
 0xd14   :  { %9498 = vpow2.f32 %v4965_v11  ;;  %9088 = vmatprep.subr.mxu0 %v5012_v53  ;;  %4982 = vadd.xlane.f32.xlu0 %v4981_v26 }
 0xd15   :  { %v5186_v29 = vpop.permute.xlu1 %5185  ;;  %9089 = vmatpush3.msra.mxu0 %v5012_v53 }
 0xd16   :  { %9090 = vmatprep.subr.mxu0 %v5010_v61 }
 0xd17   :  { %v10868_v2 = vpop.eup %9492  ;;  %9091 = vmatpush3.msra.mxu0 %v5010_v61  ;;  %v5099_v56 = vpop.permute.xlu0 %5098 }
 0xd18   :  { %9095 = vmatprep.subr.mxu1 %v5099_v56  ;;  %9102 = vmatprep.subr.mxu0 %v5186_v29  ;;  %v4978_v54 = vsel %vm416_vm0, %v10868_v2, 0.0 }
 0xd19   :  { %v10872_v60 = vpop.eup %9494  ;;  %v5184_v21 = vpop.permute.xlu1 %5183  ;;  %4979 = vadd.xlane.f32.xlu1 %v4978_v54  ;;  %9096 = vmatpush3.msra.mxu1 %v5099_v56 }
 0xd1a   :  { %v4975_v52 = vsel %vm416_vm0, %v10872_v60, 0.0 }
 0xd1b   :  { %4976 = vadd.xlane.f32.xlu0 %v4975_v52  ;;  %v5097_v6 = vpop.permute.xlu0 %5096 }
 0xd1c   :  { %9097 = vmatprep.subr.mxu1 %v5097_v6 }
 0xd1d   :  { %v5405_v62 = vpop.permute.xlu1 %5404  ;;  %9098 = vmatpush3.msra.mxu1 %v5097_v6 }
 0xd1f   :  { %v10876_v50 = vpop.eup %9496  ;;  %v5403_v14 = vpop.permute.xlu0 %5402 }
 0xd20   :  { %v4990_v0 = vsel %vm416_vm0, %v10876_v50, 0.0 }
 0xd21   :  { %v10880_v38 = vpop.eup %9498  ;;  %v10882_v59 = vpop.permute.xlu1 %5272  ;;  %4991 = vadd.xlane.f32.xlu1 %v4990_v0 }
 0xd22   :  { %9109 = vmatprep.subr.mxu1 %v10882_v59  ;;  %v4987_v55 = vsel %vm416_vm0, %v10880_v38, 0.0 }
 0xd23   :  { %4988 = vadd.xlane.f32.xlu0 %v4987_v55  ;;  %v5399_v11 = vpop.permute.xlu0 %5398 }
 0xd25   :  { %v5271_v57 = vpop.permute.xlu1 %5270 }
 0xd27   :  { %v5587_v26 = vpop.permute.xlu0 %5586 }
 0xd29   :  { %v10903_v61 = vpop.permute.xlu1 %5495 }
 0xd2b   :  { %v10905_v54 = vpop.permute.xlu0 %5493 }
 0xd2d   :  { %v5401_v53 = vpop.permute.xlu1 %5400 }
 0xd31   :  { %v5585_v56 = vpop.permute.xlu1 %5584 }
 0xd32   :  { %5489 = vrot.lane.b32.xlu1 %v9942_v17, %s9780_s17 }
 0xd36   :  { %5677 = vrot.lane.b32.xlu1 %v10003_v41, %s9780_s17 }
 0xd39   :  { %5580 = vrot.lane.b32.xlu0 %v9945_v18, %s9780_s17 }
 0xd3a   :  { %5675 = vrot.lane.b32.xlu1 %v10001_v40, %s9780_s17 }
 0xd3d   :  { %5582 = vrot.lane.b32.xlu0 %v9999_v39, %s9780_s17 }
 0xd3e   :  { %5673 = vrot.lane.b32.xlu1 %v10027_v45, %s9780_s17 }
 0xd41   :  { %5491 = vrot.lane.b32.xlu0 %v9973_v30, %s9780_s17 }
 0xd45   :  { %5671 = vrot.lane.b32.xlu0 %v9981_v34, %s9780_s17 }
 0xd91   :  { %v4974_v52 = vpop.xlane.xlu1 %4973 }
 0xd92   :  { %9500 = vrcp.f32 %v4974_v52 }
 0xd93   :  { %v4971_v6 = vpop.xlane.xlu0 %4970 }
 0xd94   :  { %9502 = vrcp.f32 %v4971_v6 }
 0xd99   :  { %v4986_v0 = vpop.xlane.xlu1 %4985 }
 0xd9a   :  { %9504 = vrcp.f32 %v4986_v0 }
 0xd9d   :  { %v4983_v55 = vpop.xlane.xlu0 %4982 }
 0xd9e   :  { %9506 = vrcp.f32 %v4983_v55 }
 0xd9f   :  { %v9501_v10 = vpop.eup %9500 }
 0xda0   :  { %v5002_v49 = vmul.f32 %v9501_v10, %v10852_v35 }
 0xda1   :  { %v9503_v31 = vpop.eup %9502 }
 0xda2   :  { %v4980_v22 = vpop.xlane.xlu1 %4979  ;;  %v5001_v25 = vmul.f32 %v9503_v31, %v10856_v37 }
 0xda3   :  { %9508 = vrcp.f32 %v4980_v22 }
 0xda4   :  { %v4977_v58 = vpop.xlane.xlu0 %4976  ;;  %9092 = vmatprep.mubr.msk.f32.mxu0 %vm416_vm0, %v5001_v25 }
 0xda5   :  { %9510 = vrcp.f32 %v4977_v58  ;;  %9093 = vmatmul.mubr.msk.f32.vlgmr.msra.gmra.mxu0 %vm416_vm0, %v5002_v49 }
 0xda6   :  { %9103 = vmatpush3.msra.mxu0 %v5186_v29 }
 0xda7   :  { %9104 = vmatprep.subr.mxu0 %v5184_v21  ;;  %v9505_v52 = vpop.eup %9504 }
 0xda8   :  { %9105 = vmatpush3.msra.mxu0 %v5184_v21  ;;  %v5006_v22 = vmul.f32 %v9505_v52, %v10860_v24 }
 0xda9   :  { %9116 = vmatprep.subr.msk.mxu0 %vm416_vm0, %v5405_v62 }
 0xdaa   :  { %v4992_v6 = vpop.xlane.xlu1 %4991 }
 0xdab   :  { %v9507_v0 = vpop.eup %9506  ;;  %9512 = vrcp.f32 %v4992_v6 }
 0xdac   :  { %v4989_v55 = vpop.xlane.xlu0 %4988  ;;  %v5005_v31 = vmul.f32 %v9507_v0, %v10864_v4 }
 0xdad   :  { %9514 = vrcp.f32 %v4989_v55 }
 0xdae   :  { %9106 = vmatprep.mubr.msk.f32.mxu0 %vm416_vm0, %v5005_v31  ;;  %v5490_v29 = vpop.permute.xlu1 %5489 }
 0xdaf   :  { %9107 = vmatmul.mubr.msk.f32.vlgmr.msra.gmra.mxu0 %vm416_vm0, %v5006_v22 }
 0xdb0   :  { %9117 = vmatpush3.xpose.msk.msra.mxu0 %vm416_vm0, %v5405_v62  ;;  %9120 = vmatprep.mubr.msk.f32.mxu0 %vm416_vm0, %v5399_v11  ;;  %v9509_v49 = vpop.eup %9508  ;;  %v5581_v25 = vpop.permute.xlu0 %5580 }
 0xdb1   :  { %9118 = vmatprep.subr.msk.mxu0 %vm416_vm0, %v5403_v14  ;;  %v5004_v35 = vmul.f32 %v9509_v49, %v10868_v2 }
 0xdb2   :  { %v9511_v58 = vpop.eup %9510  ;;  %v5678_v62 = vpop.permute.xlu1 %5677 }
 0xdb3   :  { %v5003_v10 = vmul.f32 %v9511_v58, %v10872_v60 }
 0xdb4   :  { %9119 = vmatpush3.xpose.msk.msra.mxu0 %vm416_vm0, %v5403_v14  ;;  %v5583_v4 = vpop.permute.xlu0 %5582 }
 0xdb5   :  { %9099 = vmatprep.mubr.msk.f32.mxu1 %vm416_vm0, %v5003_v10  ;;  %9130 = vmatprep.subr.msk.mxu0 %vm416_vm0, %v5587_v26 }
 0xdb6   :  { %9100 = vmatmul.mubr.msk.f32.vlgmr.msra.gmra.mxu1 %vm416_vm0, %v5004_v35 }
 0xdb7   :  { %9110 = vmatpush3.msra.mxu1 %v10882_v59  ;;  %9121 = vmatmul.mubr.msk.f32.vlgmr.msra.gmra.mxu0 %vm416_vm0, %v5401_v53 }
 0xdb8   :  { %9111 = vmatprep.subr.mxu1 %v5271_v57  ;;  %9131 = vmatpush3.xpose.msk.msra.mxu0 %vm416_vm0, %v5587_v26  ;;  %v9513_v37 = vpop.eup %9512  ;;  %v5492_v21 = vpop.permute.xlu0 %5491 }
 0xdb9   :  { %9112 = vmatpush3.msra.mxu1 %v5271_v57  ;;  %9134 = vmatprep.mubr.msk.f32.mxu0 %vm416_vm0, %v5581_v25  ;;  %v5008_v60 = vmul.f32 %v9513_v37, %v10876_v50 }
 0xdba   :  { %v9515_v24 = vpop.eup %9514  ;;  %9123 = vmatprep.subr.msk.mxu1 %vm416_vm0, %v10903_v61  ;;  %9132 = vmatprep.subr.msk.mxu0 %vm416_vm0, %v5585_v56 }
 0xdbb   :  { %v5007_v2 = vmul.f32 %v9515_v24, %v10880_v38  ;;  %v5676_v38 = vpop.permute.xlu1 %5675 }
 0xdbc   :  { %9133 = vmatpush3.xpose.msk.msra.mxu0 %vm416_vm0, %v5585_v56  ;;  %v5672_v50 = vpop.permute.xlu0 %5671 }
 0xdbd   :  { %9113 = vmatprep.mubr.msk.f32.mxu1 %vm416_vm0, %v5007_v2 }
 0xdbe   :  { %9114 = vmatmul.mubr.msk.f32.vlgmr.msra.gmra.mxu1 %vm416_vm0, %v5008_v60 }
 0xdbf   :  { %9124 = vmatpush3.xpose.msk.msra.mxu1 %vm416_vm0, %v10903_v61  ;;  %9127 = vmatprep.mubr.msk.f32.mxu1 %vm416_vm0, %v5490_v29  ;;  %v5674_v59 = vpop.permute.xlu1 %5673 }
 0xdc0   :  { %9125 = vmatprep.subr.msk.mxu1 %vm416_vm0, %v10905_v54  ;;  %9135 = vmatmul.mubr.msk.f32.vlgmr.msra.gmra.mxu0 %vm416_vm0, %v5583_v4 }
 0xdc3   :  { %9126 = vmatpush3.xpose.msk.msra.mxu1 %vm416_vm0, %v10905_v54 }
 0xdc4   :  { %9137 = vmatprep.subr.msk.mxu1 %vm416_vm0, %v5678_v62 }
 0xdc6   :  { %9128 = vmatmul.mubr.msk.f32.vlgmr.msra.gmra.mxu1 %vm416_vm0, %v5492_v21 }
 0xdc7   :  { %9138 = vmatpush3.xpose.msk.msra.mxu1 %vm416_vm0, %v5678_v62  ;;  %9141 = vmatprep.mubr.msk.f32.mxu1 %vm416_vm0, %v5672_v50 }
 0xdc8   :  { %9139 = vmatprep.subr.msk.mxu1 %vm416_vm0, %v5676_v38 }
 0xdcb   :  { %9140 = vmatpush3.xpose.msk.msra.mxu1 %vm416_vm0, %v5676_v38 }
 0xdce   :  { %9142 = vmatmul.mubr.msk.f32.vlgmr.msra.gmra.mxu1 %vm416_vm0, %v5674_v59 }
 0xe65   :  { %v10952_v57 = vpop.f32.mrf.mxu0 }
 0xe67   :  { %v10954_v14 = vpop.f32.mrf.mxu0 }
 0xe6f   :  { %v10956_v61 = vpop.f32.mrf.mxu0 }
 0xe71   :  { %v10958_v11 = vpop.f32.mrf.mxu0 }
 0xe76   :  { %v10961_v54 = vpop.f32.mrf.mxu1 }
 0xe77   :  { %v9122_v53 = vpop.f32.mrf.mxu0 }
 0xe78   :  { %v5765_v26 = vsel %vm416_vm0, %v9122_v53, -inf  ;;  %v10964_v6 = vpop.f32.mrf.mxu1 }
 0xe79   :  { %5766 = vmax.xlane.f32.xlu1 %v5765_v26  ;;  %v5480_v56 = vpop.f32.mrf.mxu0 }
 0xe7a   :  { %v5762_v52 = vsel %vm416_vm0, %v5480_v56, -inf }
 0xe7b   :  { %5763 = vmax.xlane.f32.xlu0 %v5762_v52 }
 0xe7e   :  { %v10966_v0 = vpop.f32.mrf.mxu1 }
 0xe80   :  { %v9136_v55 = vpop.f32.mrf.mxu0  ;;  %v10969_v49 = vpop.f32.mrf.mxu1 }
 0xe81   :  { %v5777_v31 = vsel %vm416_vm0, %v9136_v55, -inf }
 0xe82   :  { %5778 = vmax.xlane.f32.xlu0 %v5777_v31  ;;  %v5662_v22 = vpop.f32.mrf.mxu0 }
 0xe83   :  { %v5774_v58 = vsel %vm416_vm0, %v5662_v22, -inf }
 0xe86   :  { %5775 = vmax.xlane.f32.xlu0 %v5774_v58  ;;  %v9129_v10 = vpop.f32.mrf.mxu1 }
 0xe87   :  { %v5771_v25 = vsel %vm416_vm0, %v9129_v10, -inf }
 0xe88   :  { %5772 = vmax.xlane.f32.xlu1 %v5771_v25  ;;  %v5571_v35 = vpop.f32.mrf.mxu1 }
 0xe89   :  { %v5768_v37 = vsel %vm416_vm0, %v5571_v35, -inf }
 0xe8a   :  { %5769 = vmax.xlane.f32.xlu0 %v5768_v37 }
 0xe8e   :  { %v9143_v24 = vpop.f32.mrf.mxu1 }
 0xe8f   :  { %v5783_v4 = vsel %vm416_vm0, %v9143_v24, -inf }
 0xe90   :  { %5784 = vmax.xlane.f32.xlu1 %v5783_v4  ;;  %v5753_v29 = vpop.f32.mrf.mxu1 }
 0xe91   :  { %v5780_v2 = vsel %vm416_vm0, %v5753_v29, -inf }
 0xe92   :  { %5781 = vmax.xlane.f32.xlu0 %v5780_v2 }
 0xea1   :  { %5850 = vrot.lane.b32.xlu1 %v10006_v42, %s9780_s17 }
 0xea5   :  { %6026 = vrot.lane.b32.xlu1 %v10014_v43, %s9780_s17 }
 0xea8   :  { %5852 = vrot.lane.b32.xlu0 %v9994_v36, %s9780_s17 }
 0xea9   :  { %6024 = vrot.lane.b32.xlu1 %v9976_v32, %s9780_s17 }
 0xeac   :  { %5939 = vrot.lane.b32.xlu0 %v10022_v44, %s9780_s17 }
 0xead   :  { %6245 = vrot.lane.b32.xlu1 %v9922_v7, %s9788_s4 }
 0xeb0   :  { %5937 = vrot.lane.b32.xlu0 %v10033_v46, %s9780_s17 }
 0xeb1   :  { %6113 = vrot.lane.b32.xlu1 %v10039_v48, %s9780_s17 }
 0xeb4   :  { %6243 = vrot.lane.b32.xlu0 %v9920_v5, %s9788_s4 }
 0xeb5   :  { %6111 = vrot.lane.b32.xlu1 %v10125_v51, %s9780_s17 }
 0xeb8   :  { %6239 = vrot.lane.b32.xlu0 %v9912_v1, %s9788_s4 }
 0xeb9   :  { %6241 = vrot.lane.b32.xlu1 %v9939_v15, %s9788_s4 }
 0xf02   :  { %v5767_v60 = vpop.xlane.xlu1 %5766 }
 0xf03   :  { %v5787_v7 = vsub.f32 %v9122_v53, %v5767_v60 }
 0xf04   :  { %v5764_v21 = vpop.xlane.xlu0 %5763 }
 0xf05   :  { %v5796_v62 = vmul.f32 1.442695, %v5787_v7  ;;  %v5786_v50 = vsub.f32 %v5480_v56, %v5764_v21 }
 0xf07   :  { %9516 = vpow2.f32 %v5796_v62  ;;  %v5794_v38 = vmul.f32 1.442695, %v5786_v50 }
 0xf09   :  { %9518 = vpow2.f32 %v5794_v38 }
 0xf0b   :  { %v5779_v59 = vpop.xlane.xlu0 %5778 }
 0xf0c   :  { %v5791_v26 = vsub.f32 %v9136_v55, %v5779_v59 }
 0xf0e   :  { %v5804_v5 = vmul.f32 1.442695, %v5791_v26 }
 0xf0f   :  { %v5776_v52 = vpop.xlane.xlu0 %5775 }
 0xf10   :  { %9520 = vpow2.f32 %v5804_v5  ;;  %v5790_v31 = vsub.f32 %v5662_v22, %v5776_v52 }
 0xf11   :  { %v5773_v58 = vpop.xlane.xlu1 %5772 }
 0xf12   :  { %v5802_v25 = vmul.f32 1.442695, %v5790_v31  ;;  %v5789_v1 = vsub.f32 %v9129_v10, %v5773_v58 }
 0xf13   :  { %v5770_v37 = vpop.xlane.xlu0 %5769 }
 0xf14   :  { %v11000_v4 = vpop.eup %9516  ;;  %9522 = vpow2.f32 %v5802_v25  ;;  %v5800_v15 = vmul.f32 1.442695, %v5789_v1  ;;  %v5788_v53 = vsub.f32 %v5571_v35, %v5770_v37 }
 0xf15   :  { %v5813_v56 = vsel %vm416_vm0, %v11000_v4, 0.0 }
 0xf16   :  { %v11004_v2 = vpop.eup %9518  ;;  %9524 = vpow2.f32 %v5800_v15  ;;  %v5798_v55 = vmul.f32 1.442695, %v5788_v53  ;;  %5814 = vadd.xlane.f32.xlu1 %v5813_v56 }
 0xf17   :  { %v5810_v22 = vsel %vm416_vm0, %v11004_v2, 0.0 }
 0xf18   :  { %9526 = vpow2.f32 %v5798_v55  ;;  %5811 = vadd.xlane.f32.xlu0 %v5810_v22 }
 0xf19   :  { %v5785_v10 = vpop.xlane.xlu1 %5784 }
 0xf1a   :  { %v5793_v60 = vsub.f32 %v9143_v24, %v5785_v10 }
 0xf1b   :  { %v5782_v7 = vpop.xlane.xlu0 %5781 }
 0xf1c   :  { %v5808_v21 = vmul.f32 1.442695, %v5793_v60  ;;  %v5792_v62 = vsub.f32 %v5753_v29, %v5782_v7 }
 0xf1d   :  { %v11008_v50 = vpop.eup %9520  ;;  %v5851_v35 = vpop.permute.xlu1 %5850 }
 0xf1e   :  { %9528 = vpow2.f32 %v5808_v21  ;;  %v5806_v38 = vmul.f32 1.442695, %v5792_v62  ;;  %v5825_v59 = vsel %vm416_vm0, %v11008_v50, 0.0 }
 0xf1f   :  { %5826 = vadd.xlane.f32.xlu1 %v5825_v59  ;;  %v5853_v26 = vpop.permute.xlu0 %5852 }
 0xf20   :  { %9530 = vpow2.f32 %v5806_v38  ;;  %9144 = vmatprep.subr.mxu0 %v5853_v26 }
 0xf21   :  { %v11012_v5 = vpop.eup %9522  ;;  %v11014_v52 = vpop.permute.xlu1 %6026  ;;  %9145 = vmatpush3.msra.mxu0 %v5853_v26 }
 0xf22   :  { %9146 = vmatprep.subr.mxu0 %v5851_v35  ;;  %v5822_v24 = vsel %vm416_vm0, %v11012_v5, 0.0 }
 0xf23   :  { %v11018_v29 = vpop.eup %9524  ;;  %5823 = vadd.xlane.f32.xlu0 %v5822_v24  ;;  %9147 = vmatpush3.msra.mxu0 %v5851_v35  ;;  %v5940_v31 = vpop.permute.xlu0 %5939 }
 0xf24   :  { %9151 = vmatprep.subr.mxu1 %v5940_v31  ;;  %9158 = vmatprep.subr.mxu0 %v11014_v52  ;;  %v5819_v58 = vsel %vm416_vm0, %v11018_v29, 0.0 }
 0xf25   :  { %v11023_v25 = vpop.eup %9526  ;;  %v6025_v1 = vpop.permute.xlu1 %6024  ;;  %5820 = vadd.xlane.f32.xlu1 %v5819_v58  ;;  %9152 = vmatpush3.msra.mxu1 %v5940_v31 }
 0xf26   :  { %v5816_v37 = vsel %vm416_vm0, %v11023_v25, 0.0 }
 0xf27   :  { %5817 = vadd.xlane.f32.xlu0 %v5816_v37  ;;  %v5938_v15 = vpop.permute.xlu0 %5937 }
 0xf28   :  { %9153 = vmatprep.subr.mxu1 %v5938_v15 }
 0xf29   :  { %v6246_v53 = vpop.permute.xlu1 %6245  ;;  %9154 = vmatpush3.msra.mxu1 %v5938_v15 }
 0xf2b   :  { %v11027_v56 = vpop.eup %9528 }
 0xf2c   :  { %v5831_v55 = vsel %vm416_vm0, %v11027_v56, 0.0 }
 0xf2d   :  { %v11031_v22 = vpop.eup %9530  ;;  %v11033_v10 = vpop.permute.xlu1 %6113  ;;  %5832 = vadd.xlane.f32.xlu1 %v5831_v55 }
 0xf2e   :  { %9165 = vmatprep.subr.mxu1 %v11033_v10  ;;  %v5828_v60 = vsel %vm416_vm0, %v11031_v22, 0.0 }
 0xf2f   :  { %5829 = vadd.xlane.f32.xlu0 %v5828_v60 }
 0xf3e   :  { %6334 = vrot.lane.b32.xlu1 %v9951_v20, %s9788_s4 }
 0xf42   :  { %6332 = vrot.lane.b32.xlu1 %v9973_v30, %s9788_s4 }
 0xf45   :  { %6336 = vrot.lane.b32.xlu0 %v9936_v13, %s9788_s4  ;;  %v6112_v13 = vpop.permute.xlu1 %6111 }
 0xf46   :  { %6425 = vrot.lane.b32.xlu1 %v9978_v33, %s9788_s4 }
 0xf49   :  { %6330 = vrot.lane.b32.xlu0 %v9942_v17, %s9788_s4  ;;  %v6244_v17 = vpop.permute.xlu0 %6243  ;;  %v6242_v20 = vpop.permute.xlu1 %6241 }
 0xf4a   :  { %6423 = vrot.lane.b32.xlu1 %v9999_v39, %s9788_s4 }
 0xf4d   :  { %6427 = vrot.lane.b32.xlu0 %v9968_v28, %s9788_s4  ;;  %v6240_v30 = vpop.permute.xlu0 %6239 }
 0xf4e   :  { %6516 = vrot.lane.b32.xlu1 %v10001_v40, %s9788_s4 }
 0xf51   :  { %6421 = vrot.lane.b32.xlu0 %v9945_v18, %s9788_s4 }
 0xf52   :  { %6514 = vrot.lane.b32.xlu1 %v10027_v45, %s9788_s4 }
 0xf55   :  { %6518 = vrot.lane.b32.xlu0 %v10003_v41, %s9788_s4 }
 0xf59   :  { %6512 = vrot.lane.b32.xlu0 %v9981_v34, %s9788_s4 }
 0xf9f   :  { %v5815_v28 = vpop.xlane.xlu1 %5814 }
 0xfa0   :  { %9532 = vrcp.f32 %v5815_v28 }
 0xfa1   :  { %v5812_v33 = vpop.xlane.xlu0 %5811 }
 0xfa2   :  { %9534 = vrcp.f32 %v5812_v33 }
 0xfa8   :  { %v5827_v39 = vpop.xlane.xlu1 %5826 }
 0xfa9   :  { %9536 = vrcp.f32 %v5827_v39 }
 0xfac   :  { %v5824_v18 = vpop.xlane.xlu0 %5823 }
 0xfad   :  { %9538 = vrcp.f32 %v5824_v18  ;;  %v9533_v40 = vpop.eup %9532 }
 0xfae   :  { %v5821_v45 = vpop.xlane.xlu1 %5820  ;;  %v5843_v34 = vmul.f32 %v9533_v40, %v11000_v4 }
 0xfaf   :  { %v9535_v7 = vpop.eup %9534  ;;  %9540 = vrcp.f32 %v5821_v45 }
 0xfb0   :  { %v5818_v41 = vpop.xlane.xlu0 %5817  ;;  %v5842_v21 = vmul.f32 %v9535_v7, %v11004_v2 }
 0xfb1   :  { %9542 = vrcp.f32 %v5818_v41 }
 0xfb2   :  { %9148 = vmatprep.mubr.msk.f32.mxu0 %vm416_vm0, %v5842_v21 }
 0xfb3   :  { %9149 = vmatmul.mubr.msk.f32.vlgmr.msra.gmra.mxu0 %vm416_vm0, %v5843_v34 }
 0xfb4   :  { %9159 = vmatpush3.msra.mxu0 %v11014_v52 }
 0xfb5   :  { %9160 = vmatprep.subr.mxu0 %v6025_v1 }
 0xfb6   :  { %v5833_v62 = vpop.xlane.xlu1 %5832  ;;  %9161 = vmatpush3.msra.mxu0 %v6025_v1  ;;  %v9537_v38 = vpop.eup %9536 }
 0xfb7   :  { %9172 = vmatprep.subr.msk.mxu0 %vm416_vm0, %v6246_v53  ;;  %9544 = vrcp.f32 %v5833_v62  ;;  %v5847_v24 = vmul.f32 %v9537_v38, %v11008_v50 }
 0xfb8   :  { %v5830_v35 = vpop.xlane.xlu0 %5829 }
 0xfb9   :  { %9546 = vrcp.f32 %v5830_v35 }
 0xfba   :  { %v9539_v59 = vpop.eup %9538  ;;  %v6335_v2 = vpop.permute.xlu1 %6334 }
 0xfbb   :  { %v5846_v26 = vmul.f32 %v9539_v59, %v11012_v5 }
 0xfbc   :  { %v6337_v4 = vpop.permute.xlu0 %6336  ;;  %v9541_v31 = vpop.eup %9540 }
 0xfbd   :  { %9162 = vmatprep.mubr.msk.f32.mxu0 %vm416_vm0, %v5846_v26  ;;  %v5845_v5 = vmul.f32 %v9541_v31, %v11018_v29 }
 0xfbe   :  { %v9543_v52 = vpop.eup %9542  ;;  %9163 = vmatmul.mubr.msk.f32.vlgmr.msra.gmra.mxu0 %vm416_vm0, %v5847_v24  ;;  %v6333_v37 = vpop.permute.xlu1 %6332 }
 0xfbf   :  { %9173 = vmatpush3.xpose.msk.msra.mxu0 %vm416_vm0, %v6246_v53  ;;  %9176 = vmatprep.mubr.msk.f32.mxu0 %vm416_vm0, %v6240_v30  ;;  %v5844_v58 = vmul.f32 %v9543_v52, %v11023_v25 }
 0xfc0   :  { %9174 = vmatprep.subr.msk.mxu0 %vm416_vm0, %v6244_v17  ;;  %v6331_v1 = vpop.permute.xlu0 %6330 }
 0xfc1   :  { %9155 = vmatprep.mubr.msk.f32.mxu1 %vm416_vm0, %v5844_v58 }
 0xfc2   :  { %9156 = vmatmul.mubr.msk.f32.vlgmr.msra.gmra.mxu1 %vm416_vm0, %v5845_v5  ;;  %v6426_v29 = vpop.permute.xlu1 %6425 }
 0xfc3   :  { %9166 = vmatpush3.msra.mxu1 %v11033_v10  ;;  %9175 = vmatpush3.xpose.msk.msra.mxu0 %vm416_vm0, %v6244_v17 }
 0xfc4   :  { %9167 = vmatprep.subr.mxu1 %v6112_v13  ;;  %v6428_v50 = vpop.permute.xlu0 %6427  ;;  %v9545_v15 = vpop.eup %9544 }
 0xfc5   :  { %9168 = vmatpush3.msra.mxu1 %v6112_v13  ;;  %9186 = vmatprep.subr.msk.mxu0 %vm416_vm0, %v6428_v50  ;;  %v5849_v10 = vmul.f32 %v9545_v15, %v11027_v56 }
 0xfc6   :  { %v9547_v25 = vpop.eup %9546  ;;  %9177 = vmatmul.mubr.msk.f32.vlgmr.msra.gmra.mxu0 %vm416_vm0, %v6242_v20  ;;  %9179 = vmatprep.subr.msk.mxu1 %vm416_vm0, %v6337_v4  ;;  %v6424_v60 = vpop.permute.xlu1 %6423 }
 0xfc7   :  { %9187 = vmatpush3.xpose.msk.msra.mxu0 %vm416_vm0, %v6428_v50  ;;  %v5848_v53 = vmul.f32 %v9547_v25, %v11031_v22 }
 0xfc8   :  { %9188 = vmatprep.subr.msk.mxu0 %vm416_vm0, %v6426_v29  ;;  %v6422_v55 = vpop.permute.xlu0 %6421 }
 0xfc9   :  { %9169 = vmatprep.mubr.msk.f32.mxu1 %vm416_vm0, %v5848_v53  ;;  %9190 = vmatprep.mubr.msk.f32.mxu0 %vm416_vm0, %v6422_v55 }
 0xfca   :  { %9170 = vmatmul.mubr.msk.f32.vlgmr.msra.gmra.mxu1 %vm416_vm0, %v5849_v10  ;;  %v6517_v13 = vpop.permute.xlu1 %6516 }
 0xfcb   :  { %9180 = vmatpush3.xpose.msk.msra.mxu1 %vm416_vm0, %v6337_v4  ;;  %9189 = vmatpush3.xpose.msk.msra.mxu0 %vm416_vm0, %v6426_v29 }
 0xfcc   :  { %9181 = vmatprep.subr.msk.mxu1 %vm416_vm0, %v6335_v2  ;;  %9183 = vmatprep.mubr.msk.f32.mxu1 %vm416_vm0, %v6331_v1  ;;  %v6519_v22 = vpop.permute.xlu0 %6518 }
 0xfce   :  { %9191 = vmatmul.mubr.msk.f32.vlgmr.msra.gmra.mxu0 %vm416_vm0, %v6424_v60  ;;  %v6515_v17 = vpop.permute.xlu1 %6514 }
 0xfcf   :  { %9182 = vmatpush3.xpose.msk.msra.mxu1 %vm416_vm0, %v6335_v2 }
 0xfd0   :  { %9193 = vmatprep.subr.msk.mxu1 %vm416_vm0, %v6519_v22  ;;  %v6513_v56 = vpop.permute.xlu0 %6512 }
 0xfd2   :  { %9184 = vmatmul.mubr.msk.f32.vlgmr.msra.gmra.mxu1 %vm416_vm0, %v6333_v37 }
 0xfd3   :  { %9194 = vmatpush3.xpose.msk.msra.mxu1 %vm416_vm0, %v6519_v22  ;;  %9197 = vmatprep.mubr.msk.f32.mxu1 %vm416_vm0, %v6513_v56 }
 0xfd4   :  { %9195 = vmatprep.subr.msk.mxu1 %vm416_vm0, %v6517_v13 }
 0xfd7   :  { %9196 = vmatpush3.xpose.msk.msra.mxu1 %vm416_vm0, %v6517_v13 }
 0xfda   :  { %9198 = vmatmul.mubr.msk.f32.vlgmr.msra.gmra.mxu1 %vm416_vm0, %v6515_v17 }
0x1073   :  { %v11104_v20 = vpop.f32.mrf.mxu0 }
0x1075   :  { %v11106_v30 = vpop.f32.mrf.mxu0 }
0x107e   :  { %v11108_v28 = vpop.f32.mrf.mxu0 }
0x1080   :  { %v11110_v33 = vpop.f32.mrf.mxu0 }
0x1082   :  { %v11112_v39 = vpop.f32.mrf.mxu1 }
0x1084   :  { %v11116_v41 = vpop.f32.mrf.mxu1 }
0x1086   :  { %v9178_v18 = vpop.f32.mrf.mxu0 }
0x1087   :  { %v6606_v40 = vsel %vm416_vm0, %v9178_v18, -inf }
0x1088   :  { %6607 = vmax.xlane.f32.xlu1 %v6606_v40  ;;  %v6321_v45 = vpop.f32.mrf.mxu0 }
0x1089   :  { %v6603_v7 = vsel %vm416_vm0, %v6321_v45, -inf }
0x108a   :  { %6604 = vmax.xlane.f32.xlu0 %v6603_v7  ;;  %v11118_v21 = vpop.f32.mrf.mxu1 }
0x108c   :  { %v11121_v35 = vpop.f32.mrf.mxu1 }
0x108e   :  { %v9192_v34 = vpop.f32.mrf.mxu0 }
0x108f   :  { %v6618_v62 = vsel %vm416_vm0, %v9192_v34, -inf }
0x1090   :  { %6619 = vmax.xlane.f32.xlu1 %v6618_v62  ;;  %v11125_v4 = vpop.f32.mrf.mxu0 }
0x1091   :  { %v6615_v31 = vsel %vm416_vm0, %v11125_v4, -inf }
0x1092   :  { %v9185_v38 = vpop.f32.mrf.mxu1 }
0x1093   :  { %v6612_v59 = vsel %vm416_vm0, %v9185_v38, -inf }
0x1094   :  { %6613 = vmax.xlane.f32.xlu0 %v6612_v59  ;;  %v6412_v2 = vpop.f32.mrf.mxu1 }
0x1095   :  { %v6609_v26 = vsel %vm416_vm0, %v6412_v2, -inf }
0x1098   :  { %6610 = vmax.xlane.f32.xlu0 %v6609_v26 }
0x109a   :  { %v11127_v24 = vpop.f32.mrf.mxu1 }
0x109b   :  { %v6624_v52 = vsel %vm416_vm0, %v11127_v24, -inf }
0x109c   :  { %6616 = vmax.xlane.f32.xlu0 %v6615_v31  ;;  %6625 = vmax.xlane.f32.xlu1 %v6624_v52  ;;  %v11133_v58 = vpop.f32.mrf.mxu1 }
0x109d   :  { %v6621_v1 = vsel %vm416_vm0, %v11133_v58, -inf }
0x10a0   :  { %6622 = vmax.xlane.f32.xlu0 %v6621_v1 }
0x10ad   :  { %6691 = vrot.lane.b32.xlu1 %v10006_v42, %s9788_s4 }
0x10b1   :  { %6780 = vrot.lane.b32.xlu1 %v10022_v44, %s9788_s4 }
0x10b5   :  { %6778 = vrot.lane.b32.xlu1 %v10033_v46, %s9788_s4 }
0x10b6   :  { %6693 = vrot.lane.b32.xlu0 %v9994_v36, %s9788_s4 }
0x1111   :  { %v6608_v5 = vpop.xlane.xlu1 %6607 }
0x1112   :  { %v6628_v37 = vsub.f32 %v9178_v18, %v6608_v5 }
0x1113   :  { %v6605_v50 = vpop.xlane.xlu0 %6604 }
0x1114   :  { %v6637_v15 = vmul.f32 1.442695, %v6628_v37  ;;  %v6627_v25 = vsub.f32 %v6321_v45, %v6605_v50 }
0x1116   :  { %9548 = vpow2.f32 %v6637_v15  ;;  %v6635_v29 = vmul.f32 1.442695, %v6627_v25 }
0x1118   :  { %9550 = vpow2.f32 %v6635_v29 }
0x1119   :  { %v6620_v53 = vpop.xlane.xlu1 %6619 }
0x111a   :  { %v6632_v55 = vsub.f32 %v9192_v34, %v6620_v53 }
0x111c   :  { %v6645_v22 = vmul.f32 1.442695, %v6632_v55 }
0x111d   :  { %v6614_v42 = vpop.xlane.xlu0 %6613 }
0x111e   :  { %v6630_v10 = vsub.f32 %v9185_v38, %v6614_v42 }
0x1120   :  { %v6641_v44 = vmul.f32 1.442695, %v6630_v10 }
0x1121   :  { %v6611_v60 = vpop.xlane.xlu0 %6610 }
0x1122   :  { %9552 = vpow2.f32 %v6641_v44  ;;  %v6629_v46 = vsub.f32 %v6412_v2, %v6611_v60  ;;  %v11803_v60 = vld [vmem:[#allocation24_spill] sm:$0xff] }
0x1123   :  { %v11145_v56 = vpop.eup %9548  ;;  %9554 = vpow2.f32 %v6645_v22 }
0x1124   :  { %v6639_v36 = vmul.f32 1.442695, %v6629_v46  ;;  %v6654_v13 = vsel %vm416_vm0, %v11145_v56, 0.0  ;;  %v11804_v46 = vld [vmem:[#allocation29_spill] sm:$0xff] }
0x1125   :  { %v11149_v17 = vpop.eup %9550  ;;  %6655 = vadd.xlane.f32.xlu1 %v6654_v13  ;;  %v6626_v18 = vpop.xlane.xlu1 %6625  ;;  %v11805_v13 = vld [vmem:[#allocation35_spill] sm:$0xff] }
0x1126   :  { %v6617_v40 = vpop.xlane.xlu0 %6616  ;;  %9556 = vpow2.f32 %v6639_v36  ;;  %v6651_v45 = vsel %vm416_vm0, %v11149_v17, 0.0  ;;  %v6634_v37 = vsub.f32 %v11127_v24, %v6626_v18  ;;  %v11806_v18 = vld [vmem:[#allocation25_spill] sm:$0xff] }
0x1127   :  { %6652 = vadd.xlane.f32.xlu0 %v6651_v45  ;;  %v6631_v50 = vsub.f32 %v11125_v4, %v6617_v40 }
0x1128   :  { %v6649_v15 = vmul.f32 1.442695, %v6634_v37 }
0x1129   :  { %v6692_v7 = vpop.permute.xlu1 %6691  ;;  %v6643_v25 = vmul.f32 1.442695, %v6631_v50 }
0x112a   :  { %v6623_v34 = vpop.xlane.xlu0 %6622  ;;  %9558 = vpow2.f32 %v6649_v15 }
0x112b   :  { %v6633_v29 = vsub.f32 %v11133_v58, %v6623_v34  ;;  %9560 = vpow2.f32 %v6643_v25  ;;  %v11801_v58 = vld [vmem:[#allocation32_spill] sm:$0xff] }
0x112d   :  { %v6781_v62 = vpop.permute.xlu1 %6780  ;;  %v6647_v53 = vmul.f32 1.442695, %v6633_v29 }
0x112e   :  { %v6694_v38 = vpop.permute.xlu0 %6693  ;;  %9207 = vmatprep.subr.mxu1 %v6781_v62 }
0x112f   :  { %9200 = vmatprep.subr.mxu0 %v6694_v38  ;;  %v11153_v59 = vpop.eup %9552  ;;  %9208 = vmatpush3.msra.mxu1 %v6781_v62  ;;  %9562 = vpow2.f32 %v6647_v53 }
0x1130   :  { %9201 = vmatpush3.msra.mxu0 %v6694_v38  ;;  %v6660_v2 = vsel %vm416_vm0, %v11153_v59, 0.0  ;;  %v11157_v26 = vpop.eup %9554 }
0x1131   :  { %9202 = vmatprep.subr.mxu0 %v6692_v7  ;;  %v6779_v31 = vpop.permute.xlu1 %6778  ;;  %6661 = vadd.xlane.f32.xlu1 %v6660_v2  ;;  %v6666_v1 = vsel %vm416_vm0, %v11157_v26, 0.0 }
0x1132   :  { %9203 = vmatpush3.msra.mxu0 %v6692_v7  ;;  %9209 = vmatprep.subr.mxu1 %v6779_v31 }
0x1133   :  { %v11159_v52 = vpop.eup %9556  ;;  %9210 = vmatpush3.msra.mxu1 %v6779_v31 }
0x1134   :  { %v6657_v5 = vsel %vm416_vm0, %v11159_v52, 0.0 }
0x1135   :  { %6667 = vadd.xlane.f32.xlu1 %v6666_v1  ;;  %6658 = vadd.xlane.f32.xlu0 %v6657_v5 }
0x1137   :  { %v11172_v55 = vpop.eup %9558 }
0x1138   :  { %v11174_v42 = vpop.eup %9560 }
0x113c   :  { %v11180_v24 = vpop.eup %9562 }
0x113d   :  { %v6669_v4 = vsel %vm416_vm0, %v11180_v24, 0.0 }
0x1146   :  { %6865 = vrot.lane.b32.xlu1 %v9976_v32, %s9788_s4  ;;  %v6672_v32 = vsel %vm416_vm0, %v11172_v55, 0.0 }
0x114b   :  { %6867 = vrot.lane.b32.xlu0 %v10014_v43, %s9788_s4  ;;  %v6663_v43 = vsel %vm416_vm0, %v11174_v42, 0.0 }
0x116a   :  { %6673 = vadd.xlane.f32.xlu1 %v6672_v32  ;;  %6664 = vadd.xlane.f32.xlu0 %v6663_v43 }
0x116e   :  { %6670 = vadd.xlane.f32.xlu0 %v6669_v4 }
0x117b   :  { %6952 = vrot.lane.b32.xlu1 %v10125_v51, %s9788_s4  ;;  %v11790_v51 = vld [vmem:[#allocation23_spill] sm:$0xff] }
0x117f   :  { %2003 = vrot.lane.b32.xlu1 %v10320_v63, %s9788_s4  ;;  %v11791_v63 = vld [vmem:[#allocation39_spill] sm:$0xff] }
0x1183   :  { %2844 = vrot.lane.b32.xlu1 %v10480_v47, %s9780_s17  ;;  %v11794_v47 = vld [vmem:[#allocation40_spill] sm:$0xff] }
0x1184   :  { %6954 = vrot.lane.b32.xlu0 %v10039_v48, %s9788_s4  ;;  %v11789_v48 = vld [vmem:[#allocation33_spill] sm:$0xff] }
0x1187   :  { %3685 = vrot.lane.b32.xlu1 %v10640_v8, %s9787_s28 }
0x1188   :  { %2001 = vrot.lane.b32.xlu0 %v10322_v16, %s9788_s4  ;;  %v11792_v16 = vld [vmem:[#allocation28_spill] sm:$0xff] }
0x118b   :  { %4526 = vrot.lane.b32.xlu1 %v10796_v12, %s9786_s27  ;;  %v11797_v12 = vld [vmem:[#allocation31_spill] sm:$0xff] }
0x118c   :  { %2842 = vrot.lane.b32.xlu0 %v10482_v9, %s9780_s17 }
0x118f   :  { %5367 = vrot.lane.b32.xlu1 %v10952_v57, %s9785_s26 }
0x1190   :  { %3683 = vrot.lane.b32.xlu0 %v10642_v19, %s9787_s28  ;;  %v11796_v19 = vld [vmem:[#allocation26_spill] sm:$0xff] }
0x1193   :  { %6208 = vrot.lane.b32.xlu1 %v11104_v20, %s9784_s2 }
0x1194   :  { %4524 = vrot.lane.b32.xlu0 %v10798_v3, %s9786_s27  ;;  %v11798_v3 = vld [vmem:[#allocation22_spill] sm:$0xff] }
0x1197   :  { %2007 = vrot.lane.b32.xlu1 %v10331_v23, %s9788_s4  ;;  %v11793_v23 = vld [vmem:[#allocation34_spill] sm:$0xff] }
0x1198   :  { %5365 = vrot.lane.b32.xlu0 %v10954_v14, %s9785_s26  ;;  %v11799_v14 = vld [vmem:[#allocation37_spill] sm:$0xff] }
0x119b   :  { %2848 = vrot.lane.b32.xlu1 %v10490_v27, %s9780_s17  ;;  %v11795_v27 = vld [vmem:[#allocation21_spill] sm:$0xff] }
0x119c   :  { %6206 = vrot.lane.b32.xlu0 %v11106_v30, %s9784_s2 }
0x119f   :  { %3689 = vrot.lane.b32.xlu1 %v11789_v48, %s9787_s28 }
0x11a0   :  { %2005 = vrot.lane.b32.xlu0 %v11790_v51, %s9788_s4 }
0x11a3   :  { %4530 = vrot.lane.b32.xlu1 %v11791_v63, %s9786_s27 }
0x11a4   :  { %2846 = vrot.lane.b32.xlu0 %v11792_v16, %s9780_s17 }
0x11a7   :  { %5371 = vrot.lane.b32.xlu1 %v10961_v54, %s9785_s26  ;;  %v11800_v54 = vld [vmem:[#allocation27_spill] sm:$0xff] }
0x11a8   :  { %3687 = vrot.lane.b32.xlu0 %v11793_v23, %s9787_s28 }
0x11ab   :  { %6212 = vrot.lane.b32.xlu1 %v11112_v39, %s9784_s2 }
0x11ac   :  { %4528 = vrot.lane.b32.xlu0 %v11794_v47, %s9786_s27 }
0x11ae   :  { %v6656_v9 = vpop.xlane.xlu1 %6655 }
0x11af   :  { %2011 = vrot.lane.b32.xlu1 %v11795_v27, %s9788_s4  ;;  %9564 = vrcp.f32 %v6656_v9 }
0x11b0   :  { %5369 = vrot.lane.b32.xlu0 %v10964_v6, %s9785_s26  ;;  %v6653_v8 = vpop.xlane.xlu0 %6652 }
0x11b1   :  { %9566 = vrcp.f32 %v6653_v8 }
0x11b3   :  { %2852 = vrot.lane.b32.xlu1 %v11796_v19, %s9780_s17 }
0x11b4   :  { %6210 = vrot.lane.b32.xlu0 %v11116_v41, %s9784_s2 }
0x11b7   :  { %3693 = vrot.lane.b32.xlu1 %v11797_v12, %s9787_s28 }
0x11b8   :  { %2009 = vrot.lane.b32.xlu0 %v11798_v3, %s9788_s4 }
0x11ba   :  { %v6662_v57 = vpop.xlane.xlu1 %6661 }
0x11bb   :  { %4534 = vrot.lane.b32.xlu1 %v11799_v14, %s9786_s27  ;;  %9568 = vrcp.f32 %v6662_v57 }
0x11bc   :  { %2850 = vrot.lane.b32.xlu0 %v11800_v54, %s9780_s17  ;;  %v9565_v6 = vpop.eup %9564 }
0x11bd   :  { %v6684_v10 = vmul.f32 %v9565_v6, %v11145_v56 }
0x11be   :  { %v9567_v20 = vpop.eup %9566  ;;  %v6668_v30 = vpop.xlane.xlu1 %6667 }
0x11bf   :  { %v6659_v39 = vpop.xlane.xlu0 %6658  ;;  %5375 = vrot.lane.b32.xlu1 %v10956_v61, %s9785_s26  ;;  %v6683_v41 = vmul.f32 %v9567_v20, %v11149_v17  ;;  %v11802_v61 = vld [vmem:[#allocation38_spill] sm:$0xff] }
0x11c0   :  { %9570 = vrcp.f32 %v6659_v39  ;;  %3691 = vrot.lane.b32.xlu0 %v11801_v58, %s9787_s28 }
0x11c1   :  { %9204 = vmatprep.mubr.msk.f32.mxu0 %vm416_vm0, %v6683_v41  ;;  %9572 = vrcp.f32 %v6668_v30 }
0x11c2   :  { %9205 = vmatmul.mubr.msk.f32.vlgmr.msra.gmra.mxu0 %vm416_vm0, %v6684_v10  ;;  %v6866_v44 = vpop.permute.xlu1 %6865 }
0x11c3   :  { %v6868_v22 = vpop.permute.xlu0 %6867  ;;  %6216 = vrot.lane.b32.xlu1 %v11108_v28, %s9784_s2 }
0x11c4   :  { %9214 = vmatprep.subr.mxu0 %v6868_v22  ;;  %4532 = vrot.lane.b32.xlu0 %v11802_v61, %s9786_s27 }
0x11c5   :  { %9215 = vmatpush3.msra.mxu0 %v6868_v22 }
0x11c6   :  { %9216 = vmatprep.subr.mxu0 %v6866_v44 }
0x11c7   :  { %9217 = vmatpush3.msra.mxu0 %v6866_v44  ;;  %2015 = vrot.lane.b32.xlu1 %v11803_v60, %s9788_s4 }
0x11c8   :  { %5373 = vrot.lane.b32.xlu0 %v10958_v11, %s9785_s26  ;;  %v9569_v56 = vpop.eup %9568  ;;  %v11807_v11 = vld [vmem:[#allocation30_spill] sm:$0xff] }
0x11c9   :  { %v6686_v17 = vmul.f32 %v9569_v56, %v11153_v59 }
0x11cb   :  { %2856 = vrot.lane.b32.xlu1 %v11804_v46, %s9780_s17 }
0x11cc   :  { %6214 = vrot.lane.b32.xlu0 %v11110_v33, %s9784_s2  ;;  %v11808_v33 = vld [vmem:[#allocation36_spill] sm:$0xff] }
0x11cd   :  { %v9571_v28 = vpop.eup %9570 }
0x11ce   :  { %v6685_v36 = vmul.f32 %v9571_v28, %v11159_v52  ;;  %v9573_v31 = vpop.eup %9572 }
0x11cf   :  { %3697 = vrot.lane.b32.xlu1 %v11805_v13, %s9787_s28  ;;  %v6688_v15 = vmul.f32 %v9573_v31, %v11157_v26  ;;  %v11809_v26 = vmov 0.0   ;;  %v7091_v31 = vld [vmem:[#allocation8 + $0x18] sm:$0xff] }
0x11d0   :  { %9211 = vmatprep.mubr.msk.f32.mxu1 %vm416_vm0, %v6685_v36  ;;  %2013 = vrot.lane.b32.xlu0 %v11806_v18, %s9788_s4  ;;  %v7102_v18 = vld [vmem:[#allocation8 + $0x70] sm:$0xff] }
0x11d1   :  { %9212 = vmatmul.mubr.msk.f32.vlgmr.msra.gmra.mxu1 %vm416_vm0, %v6686_v17  ;;  %v7103_v17 = vld [vmem:[#allocation8 + $0x78] sm:$0xff] }
0x11d2   :  { %9228 = vmatprep.subr.mxu0 %v7103_v17 }
0x11d4   :  { %2854 = vrot.lane.b32.xlu0 %v11807_v11, %s9780_s17  ;;  %v7101_v11 = vld [vmem:[#allocation8 + $0x68] sm:$0xff] }
0x11d8   :  { %3695 = vrot.lane.b32.xlu0 %v11808_v33, %s9787_s28  ;;  %v7100_v33 = vld [vmem:[#allocation8 + $0x60] sm:$0xff] }
0x11f3   :  { %v6674_v40 = vpop.xlane.xlu1 %6673  ;;  %v6665_v45 = vpop.xlane.xlu0 %6664 }
0x11f4   :  { %9574 = vrcp.f32 %v6665_v45  ;;  %v7098_v45 = vld [vmem:[#allocation8 + $0x50] sm:$0xff] }
0x11f5   :  { %9576 = vrcp.f32 %v6674_v40  ;;  %v7099_v40 = vld [vmem:[#allocation8 + $0x58] sm:$0xff] }
0x11f7   :  { %v6953_v7 = vpop.permute.xlu1 %6952  ;;  %v6671_v34 = vpop.xlane.xlu0 %6670 }
0x11f8   :  { %9578 = vrcp.f32 %v6671_v34  ;;  %v7096_v34 = vld [vmem:[#allocation8 + $0x40] sm:$0xff] }
0x11fb   :  { %v2004_v62 = vpop.permute.xlu1 %2003  ;;  %v6955_v38 = vpop.permute.xlu0 %6954 }
0x11fc   :  { %2027 = vst.msk [vmem:[#allocation2 + $0x8] sm:$0xff] %vm2025_vm1, %v2004_v62  ;;  %9221 = vmatprep.subr.mxu1 %v6955_v38  ;;  %v7095_v62 = vld [vmem:[#allocation8 + $0x38] sm:$0xff] }
0x11fd   :  { %9222 = vmatpush3.msra.mxu1 %v6955_v38  ;;  %v7094_v38 = vld [vmem:[#allocation8 + $0x30] sm:$0xff] }
0x11fe   :  { %9223 = vmatprep.subr.mxu1 %v6953_v7 }
0x11ff   :  { %v2845_v59 = vpop.permute.xlu1 %2844  ;;  %9224 = vmatpush3.msra.mxu1 %v6953_v7  ;;  %v2002_v2 = vpop.permute.xlu0 %2001  ;;  %v7097_v7 = vld [vmem:[#allocation8 + $0x48] sm:$0xff] }
0x1200   :  { %2868 = vst.msk [vmem:[#allocation2 + $0x8] sm:$0xff] %vm2866_vm2, %v2845_v59  ;;  %v7093_v59 = vld [vmem:[#allocation8 + $0x28] sm:$0xff] }
0x1201   :  { %2026 = vst.msk [vmem:[#allocation2] sm:$0xff] %vm2025_vm1, %v2002_v2  ;;  %v9575_v52 = vpop.eup %9574  ;;  %v7092_v2 = vld [vmem:[#allocation8 + $0x20] sm:$0xff] }
0x1202   :  { %v6687_v37 = vmul.f32 %v9575_v52, %v11174_v42  ;;  %v9577_v50 = vpop.eup %9576  ;;  %v7090_v52 = vld [vmem:[#allocation8 + $0x10] sm:$0xff] }
0x1203   :  { %v3686_v1 = vpop.permute.xlu1 %3685  ;;  %v2843_v5 = vpop.permute.xlu0 %2842  ;;  %v6690_v43 = vmul.f32 %v9577_v50, %v11172_v55 }
0x1204   :  { %3709 = vst.msk [vmem:[#allocation2 + $0x8] sm:$0xff] %vm3707_vm3, %v3686_v1  ;;  %9218 = vmatprep.mubr.msk.f32.mxu0 %vm416_vm0, %v6687_v37  ;;  %v7089_v1 = vld [vmem:[#allocation8 + $0x8] sm:$0xff] }
0x1205   :  { %2867 = vst.msk [vmem:[#allocation2] sm:$0xff] %vm2866_vm2, %v2843_v5  ;;  %v9579_v25 = vpop.eup %9578  ;;  %9219 = vmatmul.mubr.msk.f32.vlgmr.msra.gmra.mxu0 %vm416_vm0, %v6688_v15  ;;  %v7088_v5 = vld [vmem:[#allocation8] sm:$0xff]  ;;  %v11810_v15 = vld [vmem:[#allocation41_spill] sm:$0xff] }
0x1206   :  { %v6689_v29 = vmul.f32 %v9579_v25, %v11180_v24  ;;  %9229 = vmatpush3.msra.mxu0 %v7103_v17  ;;  %v11811_v25 = vld [vmem:[#allocation42_spill] sm:$0xff] }
0x1207   :  { %v4527_v53 = vpop.permute.xlu1 %4526  ;;  %v3684_v32 = vpop.permute.xlu0 %3683  ;;  %9230 = vmatprep.subr.mxu0 %v7102_v18  ;;  %v9615_v17 = vld [vmem:[#allocation3 + $0x18] sm:$0xff] }
0x1208   :  { %4550 = vst.msk [vmem:[#allocation2 + $0x8] sm:$0xff] %vm4548_vm4, %v4527_v53  ;;  %9225 = vmatprep.mubr.msk.f32.mxu1 %vm416_vm0, %v6689_v29  ;;  %9231 = vmatpush3.msra.mxu0 %v7102_v18 }
0x1209   :  { %3708 = vst.msk [vmem:[#allocation2] sm:$0xff] %vm3707_vm3, %v3684_v32  ;;  %9226 = vmatmul.mubr.msk.f32.vlgmr.msra.gmra.mxu1 %vm416_vm0, %v6690_v43  ;;  %9232 = vmatprep.subr.mxu0 %v7101_v11 }
0x120a   :  { %7493 = vmatprep.mubr.f32.mxu1 %v11809_v26  ;;  %9233 = vmatpush3.msra.mxu0 %v7101_v11 }
0x120b   :  { %v5368_v42 = vpop.permute.xlu1 %5367  ;;  %v4525_v4 = vpop.permute.xlu0 %4524  ;;  %9234 = vmatprep.subr.mxu0 %v7100_v33 }
0x120c   :  { %5391 = vst.msk [vmem:[#allocation2 + $0x8] sm:$0xff] %vm5389_vm5, %v5368_v42  ;;  %9235 = vmatpush3.msra.mxu0 %v7100_v33 }
0x120d   :  { %4549 = vst.msk [vmem:[#allocation2] sm:$0xff] %vm4548_vm4, %v4525_v4  ;;  %9236 = vmatprep.subr.mxu0 %v7099_v40 }
0x120e   :  { %9237 = vmatpush3.msra.mxu0 %v7099_v40 }
0x120f   :  { %v6209_v24 = vpop.permute.xlu1 %6208  ;;  %v5366_v55 = vpop.permute.xlu0 %5365  ;;  %9238 = vmatprep.subr.mxu0 %v7098_v45 }
0x1210   :  { %6232 = vst.msk [vmem:[#allocation2 + $0x8] sm:$0xff] %vm6230_vm6, %v6209_v24  ;;  %9239 = vmatpush3.msra.mxu0 %v7098_v45  ;;  %v9616_v45 = vld [vmem:[#allocation3 + $0x28] sm:$0xff] }
0x1211   :  { %5390 = vst.msk [vmem:[#allocation2] sm:$0xff] %vm5389_vm5, %v5366_v55  ;;  %9240 = vmatprep.subr.mxu0 %v7097_v7 }
0x1212   :  { %9241 = vmatpush3.msra.mxu0 %v7097_v7 }
0x1213   :  { %v2008_v48 = vpop.permute.xlu1 %2007  ;;  %v6207_v51 = vpop.permute.xlu0 %6206  ;;  %9242 = vmatprep.subr.mxu0 %v7096_v34 }
0x1214   :  { %2029 = vst.msk [vmem:[#allocation2 + $0x18] sm:$0xff] %vm2025_vm1, %v2008_v48  ;;  %9243 = vmatpush3.msra.mxu0 %v7096_v34 }
0x1215   :  { %6231 = vst.msk [vmem:[#allocation2] sm:$0xff] %vm6230_vm6, %v6207_v51  ;;  %9244 = vmatprep.subr.mxu0 %v7095_v62 }
0x1216   :  { %9245 = vmatpush3.msra.mxu0 %v7095_v62  ;;  %v9617_v62 = vld [vmem:[#allocation3 + $0x20] sm:$0xff] }
0x1217   :  { %v2849_v63 = vpop.permute.xlu1 %2848  ;;  %v2006_v16 = vpop.permute.xlu0 %2005  ;;  %9246 = vmatprep.subr.mxu0 %v7094_v38 }
0x1218   :  { %2870 = vst.msk [vmem:[#allocation2 + $0x18] sm:$0xff] %vm2866_vm2, %v2849_v63  ;;  %9247 = vmatpush3.msra.mxu0 %v7094_v38 }
0x1219   :  { %2028 = vst.msk [vmem:[#allocation2 + $0x10] sm:$0xff] %vm2025_vm1, %v2006_v16  ;;  %9248 = vmatprep.subr.mxu0 %v7093_v59 }
0x121a   :  { %9249 = vmatpush3.msra.mxu0 %v7093_v59 }
0x121b   :  { %v3690_v23 = vpop.permute.xlu1 %3689  ;;  %v2847_v47 = vpop.permute.xlu0 %2846  ;;  %9250 = vmatprep.subr.mxu0 %v7092_v2 }
0x121c   :  { %3711 = vst.msk [vmem:[#allocation2 + $0x18] sm:$0xff] %vm3707_vm3, %v3690_v23  ;;  %9251 = vmatpush3.msra.mxu0 %v7092_v2 }
0x121d   :  { %2869 = vst.msk [vmem:[#allocation2 + $0x10] sm:$0xff] %vm2866_vm2, %v2847_v47  ;;  %9252 = vmatprep.subr.mxu0 %v7091_v31 }
0x121e   :  { %9253 = vmatpush3.msra.mxu0 %v7091_v31 }
0x121f   :  { %v4531_v9 = vpop.permute.xlu1 %4530  ;;  %v3688_v27 = vpop.permute.xlu0 %3687  ;;  %9254 = vmatprep.subr.mxu0 %v7090_v52 }
0x1220   :  { %4552 = vst.msk [vmem:[#allocation2 + $0x18] sm:$0xff] %vm4548_vm4, %v4531_v9  ;;  %9255 = vmatpush3.msra.mxu0 %v7090_v52  ;;  %v9618_v52 = vld [vmem:[#allocation3 + $0x38] sm:$0xff] }
0x1221   :  { %3710 = vst.msk [vmem:[#allocation2 + $0x10] sm:$0xff] %vm3707_vm3, %v3688_v27  ;;  %9256 = vmatprep.subr.mxu0 %v7089_v1 }
0x1222   :  { %9257 = vmatpush3.msra.mxu0 %v7089_v1 }
0x1223   :  { %v5372_v8 = vpop.permute.xlu1 %5371  ;;  %v4529_v19 = vpop.permute.xlu0 %4528  ;;  %9258 = vmatprep.subr.mxu0 %v7088_v5 }
0x1224   :  { %5393 = vst.msk [vmem:[#allocation2 + $0x18] sm:$0xff] %vm5389_vm5, %v5372_v8  ;;  %9259 = vmatpush3.msra.mxu0 %v7088_v5 }
0x1225   :  { %4551 = vst.msk [vmem:[#allocation2 + $0x10] sm:$0xff] %vm4548_vm4, %v4529_v19 }
0x1227   :  { %v6213_v12 = vpop.permute.xlu1 %6212  ;;  %v5370_v3 = vpop.permute.xlu0 %5369 }
0x1228   :  { %6234 = vst.msk [vmem:[#allocation2 + $0x18] sm:$0xff] %vm6230_vm6, %v6213_v12 }
0x1229   :  { %5392 = vst.msk [vmem:[#allocation2 + $0x10] sm:$0xff] %vm5389_vm5, %v5370_v3 }
0x122b   :  { %v2012_v57 = vpop.permute.xlu1 %2011  ;;  %v6211_v14 = vpop.permute.xlu0 %6210 }
0x122c   :  { %2031 = vst.msk [vmem:[#allocation2 + $0x28] sm:$0xff] %vm2025_vm1, %v2012_v57 }
0x122d   :  { %6233 = vst.msk [vmem:[#allocation2 + $0x10] sm:$0xff] %vm6230_vm6, %v6211_v14 }
0x122f   :  { %v2853_v54 = vpop.permute.xlu1 %2852  ;;  %v2010_v6 = vpop.permute.xlu0 %2009 }
0x1230   :  { %2872 = vst.msk [vmem:[#allocation2 + $0x28] sm:$0xff] %vm2866_vm2, %v2853_v54 }
0x1231   :  { %2030 = vst.msk [vmem:[#allocation2 + $0x20] sm:$0xff] %vm2025_vm1, %v2010_v6 }
0x1233   :  { %v3694_v20 = vpop.permute.xlu1 %3693  ;;  %v2851_v30 = vpop.permute.xlu0 %2850 }
0x1234   :  { %3713 = vst.msk [vmem:[#allocation2 + $0x28] sm:$0xff] %vm3707_vm3, %v3694_v20  ;;  %v8314_v20 = vld [vmem:[#allocation9] ss:$0 sm:$0xff] }
0x1235   :  { %2871 = vst.msk [vmem:[#allocation2 + $0x20] sm:$0xff] %vm2866_vm2, %v2851_v30 }
0x1237   :  { %v4535_v39 = vpop.permute.xlu1 %4534  ;;  %v3692_v41 = vpop.permute.xlu0 %3691 }
0x1238   :  { %4554 = vst.msk [vmem:[#allocation2 + $0x28] sm:$0xff] %vm4548_vm4, %v4535_v39 }
0x1239   :  { %3712 = vst.msk [vmem:[#allocation2 + $0x20] sm:$0xff] %vm3707_vm3, %v3692_v41 }
0x123b   :  { %v5376_v58 = vpop.permute.xlu1 %5375  ;;  %v4533_v10 = vpop.permute.xlu0 %4532 }
0x123c   :  { %5395 = vst.msk [vmem:[#allocation2 + $0x28] sm:$0xff] %vm5389_vm5, %v5376_v58  ;;  %v9612_v58 = vld [vmem:[#allocation3 + $0x8] sm:$0xff] }
0x123d   :  { %4553 = vst.msk [vmem:[#allocation2 + $0x20] sm:$0xff] %vm4548_vm4, %v4533_v10 }
0x123f   :  { %v6217_v22 = vpop.permute.xlu1 %6216  ;;  %v5374_v44 = vpop.permute.xlu0 %5373 }
0x1240   :  { %6236 = vst.msk [vmem:[#allocation2 + $0x28] sm:$0xff] %vm6230_vm6, %v6217_v22 }
0x1241   :  { %5394 = vst.msk [vmem:[#allocation2 + $0x20] sm:$0xff] %vm5389_vm5, %v5374_v44  ;;  %v9613_v44 = vld [vmem:[#allocation3] sm:$0xff] }
0x1243   :  { %v2016_v61 = vpop.permute.xlu1 %2015  ;;  %v6215_v60 = vpop.permute.xlu0 %6214 }
0x1244   :  { %2033 = vst.msk [vmem:[#allocation2 + $0x38] sm:$0xff] %vm2025_vm1, %v2016_v61 }
0x1245   :  { %6235 = vst.msk [vmem:[#allocation2 + $0x20] sm:$0xff] %vm6230_vm6, %v6215_v60 }
0x1247   :  { %v2857_v46 = vpop.permute.xlu1 %2856  ;;  %v2014_v56 = vpop.permute.xlu0 %2013 }
0x1248   :  { %2874 = vst.msk [vmem:[#allocation2 + $0x38] sm:$0xff] %vm2866_vm2, %v2857_v46 }
0x1249   :  { %2032 = vst.msk [vmem:[#allocation2 + $0x30] sm:$0xff] %vm2025_vm1, %v2014_v56 }
0x124b   :  { %v3698_v28 = vpop.permute.xlu1 %3697  ;;  %v2855_v36 = vpop.permute.xlu0 %2854 }
0x124c   :  { %3715 = vst.msk [vmem:[#allocation2 + $0x38] sm:$0xff] %vm3707_vm3, %v3698_v28 }
0x124d   :  { %2873 = vst.msk [vmem:[#allocation2 + $0x30] sm:$0xff] %vm2866_vm2, %v2855_v36  ;;  %v9614_v36 = vld [vmem:[#allocation3 + $0x10] sm:$0xff] }
0x124f   :  { %v3696_v13 = vpop.permute.xlu0 %3695 }
0x1250   :  { %3714 = vst.msk [vmem:[#allocation2 + $0x30] sm:$0xff] %vm3707_vm3, %v3696_v13 }
0x1282   :  { %v9206_v37 = vpop.f32.mrf.mxu0 }
0x1283   :  { %7049 = vrot.lane.b32.xlu1 %v9206_v37, %s9783_s25  ;;  %v9619_v37 = vld [vmem:[#allocation3 + $0x30] sm:$0xff] }
0x1284   :  { %v6769_v50 = vpop.f32.mrf.mxu0 }
0x1285   :  { %7047 = vrot.lane.b32.xlu0 %v6769_v50, %s9783_s25 }
0x1287   :  { %4538 = vrot.lane.b32.xlu1 %v11810_v15, %s9786_s27  ;;  %v7404_v15 = vld [vmem:[#allocation11 + $0x1e8] sm:$0xff] }
0x1288   :  { %7429 = vmatprep.subr.mxu1 %v7404_v15  ;;  %v7365_v15 = vld [vmem:[#allocation11 + $0xb0] sm:$0xff] }
0x1289   :  { %4536 = vrot.lane.b32.xlu0 %v11811_v25, %s9786_s27  ;;  %v7406_v25 = vld [vmem:[#allocation11 + $0x1f8] sm:$0xff] }
0x128a   :  { %7542 = vmatprep.subr.mxu0 %v7406_v25  ;;  %v7360_v25 = vld [vmem:[#allocation11 + $0x88] sm:$0xff] }
0x1291   :  { %v9213_v29 = vpop.f32.mrf.mxu1 }
0x1292   :  { %7053 = vrot.lane.b32.xlu1 %v9213_v29, %s9783_s25  ;;  %v7403_v29 = vld [vmem:[#allocation11 + $0x1e0] sm:$0xff] }
0x1293   :  { %v6856_v53 = vpop.f32.mrf.mxu1  ;;  %7430 = vmatpush1.msra.mxu1 %v7403_v29  ;;  %v7362_v29 = vld [vmem:[#allocation11 + $0x98] sm:$0xff] }
0x1294   :  { %7051 = vrot.lane.b32.xlu0 %v6856_v53, %s9783_s25  ;;  %v7405_v53 = vld [vmem:[#allocation11 + $0x1f0] sm:$0xff] }
0x1298   :  { %5377 = vrot.lane.b32.xlu0 %v10969_v49, %s9785_s26 }
0x12c5   :  { %v9220_v32 = vpop.f32.mrf.mxu0 }
0x12c6   :  { %7057 = vrot.lane.b32.xlu1 %v9220_v32, %s9783_s25  ;;  %v7400_v32 = vld [vmem:[#allocation11 + $0x1c8] sm:$0xff] }
0x12c7   :  { %v6943_v43 = vpop.f32.mrf.mxu0  ;;  %7431 = vmatprep.subr.mxu1 %v7400_v32  ;;  %v7361_v32 = vld [vmem:[#allocation11 + $0x90] sm:$0xff] }
0x12c8   :  { %7055 = vrot.lane.b32.xlu0 %v6943_v43, %s9783_s25  ;;  %v7402_v43 = vld [vmem:[#allocation11 + $0x1d8] sm:$0xff] }
0x12c9   :  { %v9227_v42 = vpop.f32.mrf.mxu1 }
0x12ca   :  { %5379 = vrot.lane.b32.xlu1 %v10966_v0, %s9785_s26 }
0x12cb   :  { %v7030_v4 = vpop.f32.mrf.mxu1 }
0x12cc   :  { %6218 = vrot.lane.b32.xlu0 %v11121_v35, %s9784_s2 }
0x12ce   :  { %6220 = vrot.lane.b32.xlu1 %v11118_v21, %s9784_s2 }
0x12d0   :  { %7059 = vrot.lane.b32.xlu0 %v7030_v4, %s9783_s25  ;;  %v7401_v4 = vld [vmem:[#allocation11 + $0x1d0] sm:$0xff] }
0x12d2   :  { %7061 = vrot.lane.b32.xlu1 %v9227_v42, %s9783_s25  ;;  %v7399_v42 = vld [vmem:[#allocation11 + $0x1c0] sm:$0xff] }
0x12d3   :  { %7432 = vmatpush1.msra.mxu1 %v7399_v42  ;;  %v7358_v42 = vld [vmem:[#allocation11 + $0x78] sm:$0xff] }
0x12f5   :  { %v7050_v49 = vpop.permute.xlu1 %7049 }
0x12f6   :  { %7073 = vst.msk [vmem:[#allocation2 + $0x8] sm:$0xff] %vm7071_vm7, %v7050_v49  ;;  %v7396_v49 = vld [vmem:[#allocation11 + $0x1a8] sm:$0xff] }
0x12f7   :  { %v7048_v24 = vpop.permute.xlu0 %7047  ;;  %7433 = vmatprep.subr.mxu1 %v7396_v49  ;;  %v7357_v49 = vld [vmem:[#allocation11 + $0x70] sm:$0xff] }
0x12f8   :  { %7072 = vst.msk [vmem:[#allocation2] sm:$0xff] %vm7071_vm7, %v7048_v24  ;;  %v7398_v24 = vld [vmem:[#allocation11 + $0x1b8] sm:$0xff] }
0x12f9   :  { %v4539_v0 = vpop.permute.xlu1 %4538 }
0x12fa   :  { %4556 = vst.msk [vmem:[#allocation2 + $0x38] sm:$0xff] %vm4548_vm4, %v4539_v0  ;;  %v7395_v0 = vld [vmem:[#allocation11 + $0x1a0] sm:$0xff] }
0x12fb   :  { %v4537_v55 = vpop.permute.xlu0 %4536  ;;  %7434 = vmatpush1.msra.mxu1 %v7395_v0  ;;  %v7354_v0 = vld [vmem:[#allocation11 + $0x58] sm:$0xff] }
0x12fc   :  { %4555 = vst.msk [vmem:[#allocation2 + $0x30] sm:$0xff] %vm4548_vm4, %v4537_v55  ;;  %v7397_v55 = vld [vmem:[#allocation11 + $0x1b0] sm:$0xff] }
0x12fd   :  { %v7081_v21 = vld [vmem:[#allocation2 + $0x8] sm:$0xff] }
0x12ff   :  { %v7080_v35 = vld [vmem:[#allocation2] sm:$0xff] }
0x1300   :  { %9260 = vmatprep.mubr.f32.mxu0 %v7080_v35 }
0x1301   :  { %9261 = vmatmul.mubr.f32.vlgmr.msra.gmra.mxu0 %v7081_v21 }
0x1302   :  { %7543 = vmatpush1.msra.mxu0 %v7405_v53  ;;  %v7359_v53 = vld [vmem:[#allocation11 + $0x80] sm:$0xff] }
0x1303   :  { %7544 = vmatprep.subr.mxu0 %v7402_v43  ;;  %v7356_v43 = vld [vmem:[#allocation11 + $0x68] sm:$0xff] }
0x1304   :  { %v7054_v48 = vpop.permute.xlu1 %7053  ;;  %7545 = vmatpush1.msra.mxu0 %v7401_v4  ;;  %v7355_v4 = vld [vmem:[#allocation11 + $0x60] sm:$0xff] }
0x1305   :  { %7075 = vst.msk [vmem:[#allocation2 + $0x18] sm:$0xff] %vm7071_vm7, %v7054_v48  ;;  %7546 = vmatprep.subr.mxu0 %v7398_v24  ;;  %v7352_v24 = vld [vmem:[#allocation11 + $0x48] sm:$0xff] }
0x1306   :  { %v7052_v51 = vpop.permute.xlu0 %7051  ;;  %7547 = vmatpush1.msra.mxu0 %v7397_v55  ;;  %v7351_v55 = vld [vmem:[#allocation11 + $0x40] sm:$0xff] }
0x1307   :  { %7074 = vst.msk [vmem:[#allocation2 + $0x10] sm:$0xff] %vm7071_vm7, %v7052_v51 }
0x130a   :  { %v5378_v63 = vpop.permute.xlu0 %5377 }
0x130b   :  { %5396 = vst.msk [vmem:[#allocation2 + $0x30] sm:$0xff] %vm5389_vm5, %v5378_v63 }
0x130c   :  { %v7083_v23 = vld [vmem:[#allocation2 + $0x18] sm:$0xff] }
0x130e   :  { %v7082_v16 = vld [vmem:[#allocation2 + $0x10] sm:$0xff] }
0x130f   :  { %9263 = vmatprep.mubr.f32.mxu0 %v7082_v16 }
0x1310   :  { %9264 = vmatmul.mubr.f32.gmra.mxu0 %v7083_v23 }
0x1338   :  { %v7058_v47 = vpop.permute.xlu1 %7057 }
0x1339   :  { %7077 = vst.msk [vmem:[#allocation2 + $0x28] sm:$0xff] %vm7071_vm7, %v7058_v47 }
0x133a   :  { %v7056_v9 = vpop.permute.xlu0 %7055 }
0x133b   :  { %7076 = vst.msk [vmem:[#allocation2 + $0x20] sm:$0xff] %vm7071_vm7, %v7056_v9 }
0x133c   :  { %v5380_v27 = vpop.permute.xlu1 %5379 }
0x133d   :  { %5397 = vst.msk [vmem:[#allocation2 + $0x38] sm:$0xff] %vm5389_vm5, %v5380_v27  ;;  %v7392_v27 = vld [vmem:[#allocation11 + $0x188] sm:$0xff] }
0x133e   :  { %v6219_v8 = vpop.permute.xlu0 %6218  ;;  %7435 = vmatprep.subr.mxu1 %v7392_v27  ;;  %v7343_v27 = vld [vmem:[#allocation11] sm:$0xff] }
0x133f   :  { %6237 = vst.msk [vmem:[#allocation2 + $0x30] sm:$0xff] %vm6230_vm6, %v6219_v8  ;;  %v7394_v8 = vld [vmem:[#allocation11 + $0x198] sm:$0xff] }
0x1340   :  { %v6221_v19 = vpop.permute.xlu1 %6220  ;;  %v7085_v57 = vld [vmem:[#allocation2 + $0x28] sm:$0xff]  ;;  %7548 = vmatprep.subr.mxu0 %v7394_v8  ;;  %v7345_v8 = vld [vmem:[#allocation11 + $0x10] sm:$0xff] }
0x1341   :  { %6238 = vst.msk [vmem:[#allocation2 + $0x38] sm:$0xff] %vm6230_vm6, %v6221_v19 }
0x1342   :  { %v7060_v12 = vpop.permute.xlu0 %7059  ;;  %v7084_v3 = vld [vmem:[#allocation2 + $0x20] sm:$0xff] }
0x1343   :  { %7078 = vst.msk [vmem:[#allocation2 + $0x30] sm:$0xff] %vm7071_vm7, %v7060_v12  ;;  %9266 = vmatprep.mubr.f32.mxu0 %v7084_v3  ;;  %v7391_v12 = vld [vmem:[#allocation11 + $0x180] sm:$0xff]  ;;  %v7393_v3 = vld [vmem:[#allocation11 + $0x190] sm:$0xff] }
0x1344   :  { %v7062_v14 = vpop.permute.xlu1 %7061  ;;  %9267 = vmatmul.mubr.f32.gmra.mxu0 %v7085_v57  ;;  %7436 = vmatpush1.msra.mxu1 %v7391_v12  ;;  %v7388_v57 = vld [vmem:[#allocation11 + $0x168] sm:$0xff] }
0x1345   :  { %7079 = vst.msk [vmem:[#allocation2 + $0x38] sm:$0xff] %vm7071_vm7, %v7062_v14  ;;  %7549 = vmatpush1.msra.mxu0 %v7393_v3  ;;  %v7390_v14 = vld [vmem:[#allocation11 + $0x178] sm:$0xff]  ;;  %7437 = vmatprep.subr.mxu1 %v7388_v57 }
0x1346   :  { %7550 = vmatprep.subr.mxu0 %v7390_v14 }
0x134a   :  { %v7086_v54 = vld [vmem:[#allocation2 + $0x30] sm:$0xff] }
0x134b   :  { %9269 = vmatprep.mubr.f32.mxu0 %v7086_v54 }
0x134c   :  { %v7087_v6 = vld [vmem:[#allocation2 + $0x38] sm:$0xff] }
0x134d   :  { %9270 = vmatmul.mubr.f32.gmra.mxu0 %v7087_v6  ;;  %v7387_v6 = vld [vmem:[#allocation11 + $0x160] sm:$0xff] }
0x134e   :  { %7606 = vmatprep.mubr.f32.mxu0 %v11809_v26  ;;  %7438 = vmatpush1.msra.mxu1 %v7387_v6 }
0x13c1   :  { %v9262_v30 = vpop.f32.mrf.mxu0 }
0x13c2   :  { %v7183_v39 = vadd.f32 %v9262_v30, %v8314_v20 }
0x13c3   :  { %v7177_v41 = vpop.f32.mrf.mxu0 }
0x13c4   :  { %v11366_v10 = vadd.f32 %v9612_v58, %v7183_v39  ;;  %v7178_v22 = vadd.f32 %v8314_v20, %v7177_v41  ;;  %v7384_v39 = vld [vmem:[#allocation11 + $0x148] sm:$0xff]  ;;  %v7386_v41 = vld [vmem:[#allocation11 + $0x158] sm:$0xff] }
0x13c5   :  { %7439 = vmatprep.subr.mxu1 %v7384_v39 }
0x13c6   :  { %v7216_v61 = vadd.f32 %v9613_v44, %v7178_v22  ;;  %7228 = vadd.xlane.f32.xlu1 %v11366_v10  ;;  %v7383_v22 = vld [vmem:[#allocation11 + $0x140] sm:$0xff]  ;;  %v7385_v44 = vld [vmem:[#allocation11 + $0x150] sm:$0xff] }
0x13c7   :  { %7440 = vmatpush1.msra.mxu1 %v7383_v22 }
0x13c8   :  { %7226 = vadd.xlane.f32.xlu0 %v7216_v61 }
0x13d0   :  { %v9265_v60 = vpop.f32.mrf.mxu0 }
0x13d1   :  { %v7193_v28 = vadd.f32 %v9265_v60, %v8314_v20  ;;  %v7382_v60 = vld [vmem:[#allocation11 + $0x138] sm:$0xff] }
0x13d2   :  { %v7187_v46 = vpop.f32.mrf.mxu0 }
0x13d3   :  { %v7188_v56 = vadd.f32 %v8314_v20, %v7187_v46  ;;  %v11372_v18 = vadd.f32 %v9615_v17, %v7193_v28  ;;  %v7379_v46 = vld [vmem:[#allocation11 + $0x120] sm:$0xff]  ;;  %v7381_v28 = vld [vmem:[#allocation11 + $0x130] sm:$0xff] }
0x13d4   :  { %v7375_v17 = vld [vmem:[#allocation11 + $0x100] sm:$0xff] }
0x13d5   :  { %v11369_v13 = vadd.f32 %v9614_v36, %v7188_v56  ;;  %v7376_v36 = vld [vmem:[#allocation11 + $0x108] sm:$0xff] }
0x13d7   :  { %7230 = vadd.xlane.f32.xlu0 %v11369_v13 }
0x13db   :  { %7232 = vadd.xlane.f32.xlu0 %v11372_v18 }
0x1404   :  { %v9268_v11 = vpop.f32.mrf.mxu0 }
0x1405   :  { %v7203_v33 = vadd.f32 %v9268_v11, %v8314_v20  ;;  %v7377_v11 = vld [vmem:[#allocation11 + $0x110] sm:$0xff] }
0x1406   :  { %v7197_v40 = vpop.f32.mrf.mxu0 }
0x1407   :  { %v11375_v7 = vadd.f32 %v9616_v45, %v7203_v33  ;;  %v7198_v34 = vadd.f32 %v8314_v20, %v7197_v40  ;;  %v7372_v40 = vld [vmem:[#allocation11 + $0xe8] sm:$0xff]  ;;  %v7374_v45 = vld [vmem:[#allocation11 + $0xf8] sm:$0xff] }
0x1409   :  { %v11377_v38 = vadd.f32 %v9617_v62, %v7198_v34  ;;  %7236 = vadd.xlane.f32.xlu1 %v11375_v7  ;;  %v7373_v34 = vld [vmem:[#allocation11 + $0xf0] sm:$0xff]  ;;  %v7368_v62 = vld [vmem:[#allocation11 + $0xc8] sm:$0xff] }
0x140b   :  { %7234 = vadd.xlane.f32.xlu0 %v11377_v38 }
0x140d   :  { %v9271_v59 = vpop.f32.mrf.mxu0 }
0x140e   :  { %v7213_v2 = vadd.f32 %v9271_v59, %v8314_v20  ;;  %v7370_v59 = vld [vmem:[#allocation11 + $0xd8] sm:$0xff] }
0x140f   :  { %v7207_v31 = vpop.f32.mrf.mxu0 }
0x1410   :  { %v11381_v1 = vadd.f32 %v9618_v52, %v7213_v2  ;;  %v7208_v5 = vadd.f32 %v8314_v20, %v7207_v31  ;;  %v7389_v20 = vld [vmem:[#allocation11 + $0x170] sm:$0xff]  ;;  %v7367_v2 = vld [vmem:[#allocation11 + $0xc0] sm:$0xff]  ;;  %v7364_v52 = vld [vmem:[#allocation11 + $0xa8] sm:$0xff] }
0x1411   :  { %7551 = vmatpush1.msra.mxu0 %v7389_v20  ;;  %v7369_v31 = vld [vmem:[#allocation11 + $0xd0] sm:$0xff] }
0x1412   :  { %v11383_v50 = vadd.f32 %v9619_v37, %v7208_v5  ;;  %7240 = vadd.xlane.f32.xlu1 %v11381_v1  ;;  %7552 = vmatprep.subr.mxu0 %v7386_v41  ;;  %v7366_v5 = vld [vmem:[#allocation11 + $0xb8] sm:$0xff]  ;;  %v7363_v37 = vld [vmem:[#allocation11 + $0xa0] sm:$0xff] }
0x1413   :  { %7553 = vmatpush1.msra.mxu0 %v7385_v44 }
0x1414   :  { %7238 = vadd.xlane.f32.xlu0 %v11383_v50  ;;  %7554 = vmatprep.subr.mxu0 %v7382_v60  ;;  %v11426_v60 = vld [vmem:[#allocation12 + $0x1f8] sm:$0xff] }
0x1415   :  { %7555 = vmatpush1.msra.mxu0 %v7381_v28 }
0x144f   :  { %v7229_v35 = vpop.xlane.xlu1 %7228 }
0x1450   :  { %v7244_v21 = vmul.f32 0.0078125, %v7229_v35  ;;  %v7353_v35 = vld [vmem:[#allocation11 + $0x50] sm:$0xff] }
0x1451   :  { %v7227_v48 = vpop.xlane.xlu0 %7226 }
0x1452   :  { %v11388_v51 = vsub.f32 %v11366_v10, %v7244_v21  ;;  %v7243_v63 = vmul.f32 0.0078125, %v7227_v48  ;;  %v7348_v21 = vld [vmem:[#allocation11 + $0x28] sm:$0xff]  ;;  %v7350_v48 = vld [vmem:[#allocation11 + $0x38] sm:$0xff] }
0x1454   :  { %v11390_v16 = vsub.f32 %v7216_v61, %v7243_v63  ;;  %v7260_v23 = vmul.f32 %v11388_v51, %v11388_v51  ;;  %v7380_v61 = vld [vmem:[#allocation11 + $0x128] sm:$0xff]  ;;  %v7347_v63 = vld [vmem:[#allocation11 + $0x20] sm:$0xff] }
0x1455   :  { %7441 = vmatprep.subr.mxu1 %v7380_v61  ;;  %v7718_v61 = vld [vmem:[#allocation12 + $0xf8] sm:$0xff] }
0x1456   :  { %7269 = vadd.xlane.f32.xlu1 %v7260_v23  ;;  %v7259_v47 = vmul.f32 %v11390_v16, %v11390_v16  ;;  %7442 = vmatpush1.msra.mxu1 %v7379_v46  ;;  %v7349_v23 = vld [vmem:[#allocation11 + $0x30] sm:$0xff] }
0x1457   :  { %7443 = vmatprep.subr.mxu1 %v7376_v36 }
0x1458   :  { %7267 = vadd.xlane.f32.xlu0 %v7259_v47  ;;  %7444 = vmatpush1.msra.mxu1 %v7375_v17  ;;  %v7344_v47 = vld [vmem:[#allocation11 + $0x8] sm:$0xff] }
0x1459   :  { %7445 = vmatprep.subr.mxu1 %v7372_v40 }
0x1460   :  { %v7231_v9 = vpop.xlane.xlu0 %7230 }
0x1461   :  { %v7245_v19 = vmul.f32 0.0078125, %v7231_v9  ;;  %v7346_v9 = vld [vmem:[#allocation11 + $0x18] sm:$0xff] }
0x1463   :  { %v11397_v54 = vsub.f32 %v11369_v13, %v7245_v19  ;;  %v7378_v13 = vld [vmem:[#allocation11 + $0x118] sm:$0xff] }
0x1464   :  { %v7233_v30 = vpop.xlane.xlu0 %7232  ;;  %7556 = vmatprep.subr.mxu0 %v7378_v13 }
0x1465   :  { %v7246_v58 = vmul.f32 0.0078125, %v7233_v30  ;;  %v7261_v10 = vmul.f32 %v11397_v54, %v11397_v54  ;;  %7557 = vmatpush1.msra.mxu0 %v7377_v11 }
0x1466   :  { %7558 = vmatprep.subr.mxu0 %v7374_v45 }
0x1467   :  { %v11402_v56 = vsub.f32 %v11372_v18, %v7246_v58  ;;  %7271 = vadd.xlane.f32.xlu0 %v7261_v10  ;;  %v7371_v18 = vld [vmem:[#allocation11 + $0xe0] sm:$0xff]  ;;  %7559 = vmatpush1.msra.mxu0 %v7373_v34 }
0x1468   :  { %7446 = vmatpush1.msra.mxu1 %v7371_v18  ;;  %7560 = vmatprep.subr.mxu0 %v7370_v59 }
0x1469   :  { %v7262_v33 = vmul.f32 %v11402_v56, %v11402_v56  ;;  %7447 = vmatprep.subr.mxu1 %v7368_v62  ;;  %7561 = vmatpush1.msra.mxu0 %v7369_v31 }
0x146a   :  { %7448 = vmatpush1.msra.mxu1 %v7367_v2  ;;  %7562 = vmatprep.subr.mxu0 %v7366_v5  ;;  %v11434_v2 = vld [vmem:[%s11750_s5] ss:$0 sm:$0xff] }
0x146b   :  { %7273 = vadd.xlane.f32.xlu1 %v7262_v33  ;;  %7449 = vmatprep.subr.mxu1 %v7364_v52  ;;  %v11440_v5 = vld [vmem:[%s11751_s6] ss:$0 sm:$0xff] }
0x146c   :  { %7450 = vmatpush1.msra.mxu1 %v7363_v37  ;;  %7563 = vmatpush1.msra.mxu0 %v7365_v15  ;;  %v11446_v15 = vld [vmem:[#allocation12 + $0x178] sm:$0xff] }
0x146d   :  { %7451 = vmatprep.subr.mxu1 %v7360_v25  ;;  %7564 = vmatprep.subr.mxu0 %v7362_v29  ;;  %v7717_v25 = vld [vmem:[#allocation12 + $0xf0] sm:$0xff] }
0x146e   :  { %7452 = vmatpush1.msra.mxu1 %v7359_v53  ;;  %7565 = vmatpush1.msra.mxu0 %v7361_v32  ;;  %v11450_v29 = vld [vmem:[#allocation12 + $0x1f0] sm:$0xff] }
0x146f   :  { %7453 = vmatprep.subr.mxu1 %v7356_v43  ;;  %7566 = vmatprep.subr.mxu0 %v7358_v42  ;;  %v7701_v32 = vld [vmem:[#allocation12 + $0x70] sm:$0xff]  ;;  %v7716_v42 = vld [vmem:[#allocation12 + $0xe8] sm:$0xff] }
0x1470   :  { %7454 = vmatpush1.msra.mxu1 %v7355_v4  ;;  %7567 = vmatpush1.msra.mxu0 %v7357_v49  ;;  %v11459_v43 = vld [vmem:[#allocation12 + $0x170] sm:$0xff]  ;;  %v11463_v4 = vld [vmem:[#allocation12 + $0x1e8] sm:$0xff] }
0x1471   :  { %7455 = vmatprep.subr.mxu1 %v7352_v24  ;;  %7568 = vmatprep.subr.mxu0 %v7354_v0  ;;  %v7700_v49 = vld [vmem:[#allocation12 + $0x68] sm:$0xff]  ;;  %v7715_v0 = vld [vmem:[#allocation12 + $0xe0] sm:$0xff] }
0x1472   :  { %7456 = vmatpush1.msra.mxu1 %v7351_v55  ;;  %7569 = vmatpush1.msra.mxu0 %v7353_v35  ;;  %v11467_v24 = vld [vmem:[#allocation12 + $0x168] sm:$0xff]  ;;  %v11470_v55 = vld [vmem:[#allocation12 + $0x1e0] sm:$0xff] }
0x1473   :  { %7457 = vmatprep.subr.mxu1 %v7348_v21  ;;  %7570 = vmatprep.subr.mxu0 %v7350_v48  ;;  %v7699_v35 = vld [vmem:[#allocation12 + $0x60] sm:$0xff] }
0x1474   :  { %7458 = vmatpush1.msra.mxu1 %v7347_v63  ;;  %7571 = vmatpush1.msra.mxu0 %v7349_v23  ;;  %v11473_v21 = vld [vmem:[#allocation12 + $0x160] sm:$0xff]  ;;  %v7714_v63 = vld [vmem:[#allocation12 + $0xd8] sm:$0xff] }
0x1475   :  { %7459 = vmatprep.subr.mxu1 %v7344_v47  ;;  %7572 = vmatprep.subr.mxu0 %v7346_v9  ;;  %v11476_v23 = vld [vmem:[#allocation12 + $0x1d8] sm:$0xff] }
0x1476   :  { %7460 = vmatpush1.msra.mxu1 %v7343_v27  ;;  %7573 = vmatpush1.msra.mxu0 %v7345_v8  ;;  %v7698_v9 = vld [vmem:[#allocation12 + $0x58] sm:$0xff]  ;;  %v7713_v8 = vld [vmem:[#allocation12 + $0xd0] sm:$0xff] }
0x1477   :  { %8624 = vmatprep.subr.mxu1 %v7718_v61  ;;  %8680 = vmatprep.subr.mxu0 %v11426_v60  ;;  %v11480_v27 = vld [vmem:[#allocation12 + $0x158] sm:$0xff]  ;;  %v11510_v61 = vld [vmem:[#allocation12 + $0x1c0] sm:$0xff] }
0x1492   :  { %v7237_v19 = vpop.xlane.xlu1 %7236 }
0x1493   :  { %v7248_v12 = vmul.f32 0.0078125, %v7237_v19  ;;  %v11483_v19 = vld [vmem:[#allocation12 + $0x1d0] sm:$0xff] }
0x1494   :  { %v7235_v3 = vpop.xlane.xlu0 %7234 }
0x1495   :  { %v11407_v57 = vsub.f32 %v11375_v7, %v7248_v12  ;;  %v7247_v14 = vmul.f32 0.0078125, %v7235_v3  ;;  %v7697_v3 = vld [vmem:[#allocation12 + $0x50] sm:$0xff] }
0x1497   :  { %v11410_v6 = vsub.f32 %v11377_v38, %v7247_v14  ;;  %v7264_v20 = vmul.f32 %v11407_v57, %v11407_v57  ;;  %v11487_v14 = vld [vmem:[#allocation12 + $0x150] sm:$0xff] }
0x1499   :  { %7277 = vadd.xlane.f32.xlu1 %v7264_v20  ;;  %v7263_v30 = vmul.f32 %v11410_v6, %v11410_v6 }
0x149b   :  { %v7241_v39 = vpop.xlane.xlu1 %7240  ;;  %7275 = vadd.xlane.f32.xlu0 %v7263_v30 }
0x149c   :  { %v7250_v41 = vmul.f32 0.0078125, %v7241_v39  ;;  %v7712_v39 = vld [vmem:[#allocation12 + $0xc8] sm:$0xff] }
0x149d   :  { %v7239_v58 = vpop.xlane.xlu0 %7238 }
0x149e   :  { %v11417_v10 = vsub.f32 %v11381_v1, %v7250_v41  ;;  %v7249_v7 = vmul.f32 0.0078125, %v7239_v58  ;;  %v11496_v41 = vld [vmem:[#allocation12 + $0x1c8] sm:$0xff] }
0x14a0   :  { %v11420_v22 = vsub.f32 %v11383_v50, %v7249_v7  ;;  %v7266_v38 = vmul.f32 %v11417_v10, %v11417_v10  ;;  %v7696_v7 = vld [vmem:[#allocation12 + $0x48] sm:$0xff] }
0x14a2   :  { %7281 = vadd.xlane.f32.xlu1 %v7266_v38  ;;  %v7265_v44 = vmul.f32 %v11420_v22, %v11420_v22  ;;  %v11501_v38 = vld [vmem:[#allocation12 + $0x148] sm:$0xff] }
0x14a4   :  { %7279 = vadd.xlane.f32.xlu0 %v7265_v44  ;;  %v7711_v44 = vld [vmem:[#allocation12 + $0xc0] sm:$0xff] }
0x14df   :  { %v7270_v1 = vpop.xlane.xlu1 %7269 }
0x14e0   :  { %v7284_v46 = vmul.f32 0.0078125, %v7270_v1  ;;  %v7695_v1 = vld [vmem:[#allocation12 + $0x40] sm:$0xff] }
0x14e1   :  { %v7268_v28 = vpop.xlane.xlu0 %7267 }
0x14e2   :  { %v7292_v36 = vadd.f32 1e-05, %v7284_v46  ;;  %v7283_v50 = vmul.f32 0.0078125, %v7268_v28  ;;  %v11514_v46 = vld [vmem:[#allocation12 + $0x140] sm:$0xff]  ;;  %v7710_v28 = vld [vmem:[#allocation12 + $0xb8] sm:$0xff] }
0x14e4   :  { %9580 = vrsqrt.f32 %v7292_v36  ;;  %v7291_v13 = vadd.f32 1e-05, %v7283_v50  ;;  %v11518_v36 = vld [vmem:[#allocation12 + $0x1b8] sm:$0xff] }
0x14e5   :  { %v7694_v50 = vld [vmem:[#allocation12 + $0x38] sm:$0xff] }
0x14e6   :  { %9582 = vrsqrt.f32 %v7291_v13  ;;  %v11521_v13 = vld [vmem:[#allocation12 + $0x138] sm:$0xff] }
0x14f0   :  { %v7272_v17 = vpop.xlane.xlu0 %7271 }
0x14f1   :  { %v9581_v11 = vpop.eup %9580  ;;  %v7285_v33 = vmul.f32 0.0078125, %v7272_v17  ;;  %v7709_v17 = vld [vmem:[#allocation12 + $0xb0] sm:$0xff] }
0x14f2   :  { %v7308_v62 = vmul.f32 %v9581_v11, %v11388_v51  ;;  %v11524_v11 = vld [vmem:[#allocation12 + $0x1b0] sm:$0xff] }
0x14f3   :  { %v9583_v40 = vpop.eup %9582  ;;  %v7293_v45 = vadd.f32 1e-05, %v7285_v33  ;;  %v7693_v33 = vld [vmem:[#allocation12 + $0x30] sm:$0xff] }
0x14f4   :  { %v7274_v18 = vpop.xlane.xlu1 %7273  ;;  %v7307_v34 = vmul.f32 %v9583_v40, %v11390_v16  ;;  %v7322_v51 = vmul.f32 %v11434_v2, %v7308_v62  ;;  %v7702_v16 = vld [vmem:[#allocation12 + $0x78] sm:$0xff]  ;;  %v11527_v40 = vld [vmem:[#allocation12 + $0x130] sm:$0xff]  ;;  %v11533_v62 = vld [vmem:[#allocation12 + $0x128] sm:$0xff] }
0x14f5   :  { %9584 = vrsqrt.f32 %v7293_v45  ;;  %v7286_v59 = vmul.f32 0.0078125, %v7274_v18  ;;  %v7708_v45 = vld [vmem:[#allocation12 + $0xa8] sm:$0xff] }
0x14f6   :  { %v7321_v31 = vmul.f32 %v11434_v2, %v7307_v34  ;;  %v11455_v53 = vadd.f32 %v11440_v5, %v7322_v51  ;;  %v11530_v18 = vld [vmem:[#allocation12 + $0x1a8] sm:$0xff]  ;;  %v11539_v51 = vld [vmem:[#allocation12 + $0x120] sm:$0xff] }
0x14f7   :  { %v7294_v52 = vadd.f32 1e-05, %v7286_v59  ;;  %v7692_v34 = vld [vmem:[#allocation12 + $0x28] sm:$0xff]  ;;  %v7707_v59 = vld [vmem:[#allocation12 + $0xa0] sm:$0xff] }
0x14f8   :  { %v11443_v37 = vadd.f32 %v11440_v5, %v7321_v31  ;;  %v11536_v31 = vld [vmem:[#allocation12 + $0x1a0] sm:$0xff] }
0x14f9   :  { %9586 = vrsqrt.f32 %v7294_v52  ;;  %v7691_v52 = vld [vmem:[#allocation12 + $0x20] sm:$0xff] }
0x14fa   :  { %7494 = vmatmul.mubr.f32.vlgmr.msra.gmra.mxu1 %v11443_v37  ;;  %7607 = vmatmul.mubr.f32.vlgmr.msra.gmra.mxu0 %v11443_v37 }
0x14fb   :  { %7499 = vmatprep.mubr.f32.mxu1 %v11809_v26  ;;  %7612 = vmatprep.mubr.f32.mxu0 %v11809_v26 }
0x14fc   :  { %8625 = vmatpush3.msra.mxu1 %v7702_v16  ;;  %8681 = vmatpush3.msra.mxu0 %v11446_v15 }
0x14fd   :  { %8626 = vmatprep.subr.mxu1 %v7717_v25  ;;  %8682 = vmatprep.subr.mxu0 %v11450_v29 }
0x14fe   :  { %7500 = vmatmul.mubr.f32.gmra.mxu1 %v11455_v53  ;;  %7613 = vmatmul.mubr.f32.gmra.mxu0 %v11455_v53 }
0x14ff   :  { %7505 = vmatprep.mubr.f32.mxu1 %v11809_v26  ;;  %7618 = vmatprep.mubr.f32.mxu0 %v11809_v26 }
0x1500   :  { %8627 = vmatpush3.msra.mxu1 %v7701_v32  ;;  %8683 = vmatpush3.msra.mxu0 %v11459_v43 }
0x1501   :  { %8628 = vmatprep.subr.mxu1 %v7716_v42  ;;  %8684 = vmatprep.subr.mxu0 %v11463_v4 }
0x1502   :  { %v9585_v48 = vpop.eup %9584  ;;  %8629 = vmatpush3.msra.mxu1 %v7700_v49  ;;  %8685 = vmatpush3.msra.mxu0 %v11467_v24 }
0x1503   :  { %v7309_v47 = vmul.f32 %v9585_v48, %v11397_v54  ;;  %8630 = vmatprep.subr.mxu1 %v7715_v0  ;;  %8686 = vmatprep.subr.mxu0 %v11470_v55 }
0x1504   :  { %8631 = vmatpush3.msra.mxu1 %v7699_v35  ;;  %8687 = vmatpush3.msra.mxu0 %v11473_v21 }
0x1505   :  { %v7323_v12 = vmul.f32 %v11434_v2, %v7309_v47  ;;  %8632 = vmatprep.subr.mxu1 %v7714_v63  ;;  %8688 = vmatprep.subr.mxu0 %v11476_v23 }
0x1506   :  { %v9587_v54 = vpop.eup %9586  ;;  %8633 = vmatpush3.msra.mxu1 %v7698_v9  ;;  %8689 = vmatpush3.msra.mxu0 %v11480_v27 }
0x1507   :  { %v11491_v20 = vadd.f32 %v11440_v5, %v7323_v12  ;;  %v7310_v30 = vmul.f32 %v9587_v54, %v11402_v56  ;;  %8634 = vmatprep.subr.mxu1 %v7713_v8  ;;  %8690 = vmatprep.subr.mxu0 %v11483_v19 }
0x1508   :  { %8635 = vmatpush3.msra.mxu1 %v7697_v3  ;;  %8691 = vmatpush3.msra.mxu0 %v11487_v14 }
0x1509   :  { %7506 = vmatmul.mubr.f32.gmra.mxu1 %v11491_v20  ;;  %7619 = vmatmul.mubr.f32.gmra.mxu0 %v11491_v20  ;;  %v7324_v58 = vmul.f32 %v11434_v2, %v7310_v30 }
0x150a   :  { %7511 = vmatprep.mubr.f32.mxu1 %v11809_v26  ;;  %7624 = vmatprep.mubr.f32.mxu0 %v11809_v26 }
0x150b   :  { %v11506_v56 = vadd.f32 %v11440_v5, %v7324_v58  ;;  %8636 = vmatprep.subr.mxu1 %v7712_v39  ;;  %8692 = vmatprep.subr.mxu0 %v11496_v41  ;;  %v7706_v58 = vld [vmem:[#allocation12 + $0x98] sm:$0xff] }
0x150c   :  { %8637 = vmatpush3.msra.mxu1 %v7696_v7  ;;  %8693 = vmatpush3.msra.mxu0 %v11501_v38  ;;  %v11547_v7 = vld [vmem:[#allocation12 + $0x198] sm:$0xff] }
0x150d   :  { %7512 = vmatmul.mubr.f32.gmra.mxu1 %v11506_v56  ;;  %7625 = vmatmul.mubr.f32.gmra.mxu0 %v11506_v56 }
0x150e   :  { %7517 = vmatprep.mubr.f32.mxu1 %v11809_v26  ;;  %7630 = vmatprep.mubr.f32.mxu0 %v11809_v26 }
0x150f   :  { %8638 = vmatprep.subr.mxu1 %v7711_v44  ;;  %8694 = vmatprep.subr.mxu0 %v11510_v61  ;;  %v7690_v44 = vld [vmem:[#allocation12 + $0x18] sm:$0xff] }
0x1510   :  { %8639 = vmatpush3.msra.mxu1 %v7695_v1  ;;  %8695 = vmatpush3.msra.mxu0 %v11514_v46  ;;  %v11550_v1 = vld [vmem:[#allocation12 + $0x118] sm:$0xff] }
0x1511   :  { %8640 = vmatprep.subr.mxu1 %v7710_v28  ;;  %8696 = vmatprep.subr.mxu0 %v11518_v36 }
0x1512   :  { %8641 = vmatpush3.msra.mxu1 %v7694_v50  ;;  %8697 = vmatpush3.msra.mxu0 %v11521_v13 }
0x1513   :  { %8642 = vmatprep.subr.mxu1 %v7709_v17  ;;  %8698 = vmatprep.subr.mxu0 %v11524_v11  ;;  %v7689_v17 = vld [vmem:[#allocation12 + $0x10] sm:$0xff] }
0x1514   :  { %8643 = vmatpush3.msra.mxu1 %v7693_v33  ;;  %8699 = vmatpush3.msra.mxu0 %v11527_v40  ;;  %v11560_v33 = vld [vmem:[#allocation12 + $0x110] sm:$0xff] }
0x1515   :  { %8644 = vmatprep.subr.mxu1 %v7708_v45  ;;  %8700 = vmatprep.subr.mxu0 %v11530_v18 }
0x1516   :  { %8645 = vmatpush3.msra.mxu1 %v7692_v34  ;;  %8701 = vmatpush3.msra.mxu0 %v11533_v62  ;;  %v7704_v34 = vld [vmem:[#allocation12 + $0x88] sm:$0xff] }
0x1517   :  { %8646 = vmatprep.subr.mxu1 %v7707_v59  ;;  %8702 = vmatprep.subr.mxu0 %v11536_v31  ;;  %v11564_v59 = vld [vmem:[#allocation12 + $0x188] sm:$0xff] }
0x1518   :  { %8647 = vmatpush3.msra.mxu1 %v7691_v52  ;;  %8703 = vmatpush3.msra.mxu0 %v11539_v51 }
0x1519   :  { %8648 = vmatprep.subr.mxu1 %v7706_v58  ;;  %8704 = vmatprep.subr.mxu0 %v11547_v7 }
0x151a   :  { %8649 = vmatpush3.msra.mxu1 %v7690_v44  ;;  %8705 = vmatpush3.msra.mxu0 %v11550_v1 }
0x1522   :  { %v7278_v16 = vpop.xlane.xlu1 %7277 }
0x1523   :  { %v7288_v25 = vmul.f32 0.0078125, %v7278_v16 }
0x1524   :  { %v7276_v32 = vpop.xlane.xlu0 %7275 }
0x1525   :  { %v7296_v42 = vadd.f32 1e-05, %v7288_v25  ;;  %v7287_v49 = vmul.f32 0.0078125, %v7276_v32 }
0x1527   :  { %9588 = vrsqrt.f32 %v7296_v42  ;;  %v7295_v0 = vadd.f32 1e-05, %v7287_v49  ;;  %v7688_v42 = vld [vmem:[#allocation12 + $0x8] sm:$0xff] }
0x1528   :  { %v11575_v49 = vld [vmem:[#allocation12 + $0x108] sm:$0xff] }
0x1529   :  { %9590 = vrsqrt.f32 %v7295_v0  ;;  %v7703_v0 = vld [vmem:[#allocation12 + $0x80] sm:$0xff] }
0x152b   :  { %v7282_v35 = vpop.xlane.xlu1 %7281 }
0x152c   :  { %v7290_v48 = vmul.f32 0.0078125, %v7282_v35  ;;  %v11579_v35 = vld [vmem:[#allocation12 + $0x180] sm:$0xff] }
0x152d   :  { %v7280_v63 = vpop.xlane.xlu0 %7279 }
0x152e   :  { %v7298_v47 = vadd.f32 1e-05, %v7290_v48  ;;  %v7289_v9 = vmul.f32 0.0078125, %v7280_v63  ;;  %v11584_v48 = vld [vmem:[#allocation12 + $0x100] sm:$0xff] }
0x1530   :  { %9592 = vrsqrt.f32 %v7298_v47  ;;  %v7297_v8 = vadd.f32 1e-05, %v7289_v9 }
0x1532   :  { %9594 = vrsqrt.f32 %v7297_v8  ;;  %v11812_v8 = vld [vmem:[#allocation20_spill] sm:$0xff] }
0x1534   :  { %v9589_v12 = vpop.eup %9588 }
0x1535   :  { %v7312_v30 = vmul.f32 %v9589_v12, %v11407_v57  ;;  %v7705_v57 = vld [vmem:[#allocation12 + $0x90] sm:$0xff]  ;;  %v7423_v12 = vsub.s32 3, %v11812_v8 }
0x1536   :  { %v9591_v3 = vpop.eup %9590  ;;  %8650 = vmatprep.subr.mxu1 %v7705_v57 }
0x1537   :  { %v7311_v54 = vmul.f32 %v9591_v3, %v11410_v6  ;;  %v7326_v50 = vmul.f32 %v11434_v2, %v7312_v30  ;;  %v11557_v6 = vld [vmem:[#allocation12 + $0x190] sm:$0xff]  ;;  %8651 = vmatpush3.msra.mxu1 %v7689_v17  ;;  %v11813_v3 = vsub.s32 0, %v11812_v8 }
0x1538   :  { %8706 = vmatprep.subr.mxu0 %v11557_v6  ;;  %8652 = vmatprep.subr.mxu1 %v7704_v34 }
0x1539   :  { %v7325_v39 = vmul.f32 %v11434_v2, %v7311_v54  ;;  %v11569_v16 = vadd.f32 %v11440_v5, %v7326_v50  ;;  %8707 = vmatpush3.msra.mxu0 %v11560_v33  ;;  %8653 = vmatpush3.msra.mxu1 %v7688_v42 }
0x153a   :  { %8708 = vmatprep.subr.mxu0 %v11564_v59  ;;  %8654 = vmatprep.subr.mxu1 %v7703_v0 }
0x153b   :  { %v11553_v28 = vadd.f32 %v11440_v5, %v7325_v39  ;;  %8709 = vmatpush3.msra.mxu0 %v11575_v49 }
0x153c   :  { %8710 = vmatprep.subr.mxu0 %v11579_v35 }
0x153d   :  { %v9593_v45 = vpop.eup %9592  ;;  %7518 = vmatmul.mubr.f32.gmra.mxu1 %v11553_v28  ;;  %7631 = vmatmul.mubr.f32.gmra.mxu0 %v11553_v28 }
0x153e   :  { %7523 = vmatprep.mubr.f32.mxu1 %v11809_v26  ;;  %7636 = vmatprep.mubr.f32.mxu0 %v11809_v26  ;;  %v7314_v32 = vmul.f32 %v9593_v45, %v11417_v10  ;;  %v7687_v10 = vld [vmem:[#allocation12] sm:$0xff] }
0x153f   :  { %v9595_v52 = vpop.eup %9594  ;;  %8655 = vmatpush3.msra.mxu1 %v7687_v10  ;;  %8711 = vmatpush3.msra.mxu0 %v11584_v48 }
0x1540   :  { %v7313_v25 = vmul.f32 %v9595_v52, %v11420_v22  ;;  %v7328_v47 = vmul.f32 %v11434_v2, %v7314_v32  ;;  %9272 = vmatprep.subr.mxu1 %v11426_v60  ;;  %v11815_v60 = vsub.s32 1, %v11812_v8 }
0x1541   :  { %7524 = vmatmul.mubr.f32.gmra.mxu1 %v11569_v16  ;;  %7637 = vmatmul.mubr.f32.gmra.mxu0 %v11569_v16 }
0x1542   :  { %7529 = vmatprep.mubr.f32.mxu1 %v11809_v26  ;;  %7642 = vmatprep.mubr.f32.mxu0 %v11809_v26  ;;  %v7327_v22 = vmul.f32 %v11434_v2, %v7313_v25  ;;  %v11598_v9 = vadd.f32 %v11440_v5, %v7328_v47  ;;  %v7407_v2 = vld [vmem:[%s11753_s8] sm:$0xf] }
0x1543   :  { %v11609_v54 = vrot.slane %v7407_v2, %v11813_v3  ;;  %v11617_v30 = vrot.slane %v7407_v2, %v11815_v60  ;;  %v11619_v39 = vrot.slane %v7407_v2, %v7423_v12 }
0x1544   :  { %v11588_v63 = vadd.f32 %v11440_v5, %v7327_v22 }
0x1546   :  { %7530 = vmatmul.mubr.f32.gmra.mxu1 %v11588_v63  ;;  %7643 = vmatmul.mubr.f32.gmra.mxu0 %v11588_v63 }
0x1547   :  { %7535 = vmatprep.mubr.f32.mxu1 %v11809_v26  ;;  %7648 = vmatprep.mubr.f32.mxu0 %v11809_v26  ;;  %v11814_v26 = vsub.s32 2, %v11812_v8 }
0x1549   :  { %v11613_v5 = vrot.slane %v7407_v2, %v11814_v26 }
0x154a   :  { %7536 = vmatmul.mubr.f32.gmra.mxu1 %v11598_v9  ;;  %7649 = vmatmul.mubr.f32.gmra.mxu0 %v11598_v9 }
0x15ba   :  { %v7495_v58 = vpop.f32.mrf.mxu1  ;;  %v7608_v44 = vpop.f32.mrf.mxu0 }
0x15bb   :  { %v7496_v50 = vadd.f32 %v7495_v58, %v11609_v54  ;;  %v7609_v57 = vadd.f32 %v7608_v44, %v11613_v5 }
0x15bc   :  { %v7497_v17 = vpop.f32.mrf.mxu1  ;;  %v7610_v45 = vpop.f32.mrf.mxu0 }
0x15bd   :  { %v7498_v34 = vadd.f32 %v7497_v17, %v11617_v30  ;;  %v7611_v52 = vadd.f32 %v7610_v45, %v11619_v39  ;;  %v7655_v22 = vmax.f32 %v7496_v50, 0.0  ;;  %v7657_v10 = vmax.f32 %v7609_v57, 0.0 }
0x15be   :  { %v7501_v25 = vpop.f32.mrf.mxu1  ;;  %v7614_v32 = vpop.f32.mrf.mxu0 }
0x15bf   :  { %v7656_v42 = vmax.f32 %v7498_v34, 0.0  ;;  %v7658_v0 = vmax.f32 %v7611_v52, 0.0  ;;  %v7502_v47 = vadd.f32 %v7501_v25, %v11609_v54  ;;  %v7615_v2 = vadd.f32 %v7614_v32, %v11613_v5 }
0x15c0   :  { %v7503_v8 = vpop.f32.mrf.mxu1  ;;  %v7616_v12 = vpop.f32.mrf.mxu0 }
0x15c1   :  { %v7504_v3 = vadd.f32 %v7503_v8, %v11617_v30  ;;  %v7617_v26 = vadd.f32 %v7616_v12, %v11619_v39  ;;  %7822 = vmatprep.mubr.f32.mxu1 %v7656_v42  ;;  %7927 = vmatprep.mubr.f32.mxu0 %v7658_v0  ;;  %v7659_v44 = vmax.f32 %v7502_v47, 0.0  ;;  %v7661_v50 = vmax.f32 %v7615_v2, 0.0 }
0x15c2   :  { %7823 = vmatmul.mubr.f32.vlgmr.msra.gmra.mxu1 %v7655_v22  ;;  %7928 = vmatmul.mubr.f32.vlgmr.msra.gmra.mxu0 %v7657_v10 }
0x15c3   :  { %v7660_v60 = vmax.f32 %v7504_v3, 0.0  ;;  %v7662_v58 = vmax.f32 %v7617_v26, 0.0  ;;  %9288 = vmatpush3.msra.mxu1 %v11446_v15 }
0x15c4   :  { %9273 = vmatprep.subr.mxu1 %v11450_v29 }
0x15c5   :  { %7827 = vmatprep.mubr.f32.mxu1 %v7660_v60  ;;  %7932 = vmatprep.mubr.f32.mxu0 %v7662_v58 }
0x15c6   :  { %7828 = vmatmul.mubr.f32.gmra.mxu1 %v7659_v44  ;;  %7933 = vmatmul.mubr.f32.gmra.mxu0 %v7661_v50 }
0x15c7   :  { %9289 = vmatpush3.msra.mxu1 %v11459_v43 }
0x15c8   :  { %9274 = vmatprep.subr.mxu1 %v11463_v4 }
0x15c9   :  { %v7507_v57 = vpop.f32.mrf.mxu1  ;;  %v7620_v17 = vpop.f32.mrf.mxu0  ;;  %9290 = vmatpush3.msra.mxu1 %v11467_v24 }
0x15ca   :  { %9275 = vmatprep.subr.mxu1 %v11470_v55  ;;  %v7508_v15 = vadd.f32 %v7507_v57, %v11609_v54  ;;  %v7621_v45 = vadd.f32 %v7620_v17, %v11613_v5 }
0x15cb   :  { %v7509_v34 = vpop.f32.mrf.mxu1  ;;  %v7622_v29 = vpop.f32.mrf.mxu0  ;;  %9291 = vmatpush3.msra.mxu1 %v11473_v21 }
0x15cc   :  { %v7510_v52 = vadd.f32 %v7509_v34, %v11617_v30  ;;  %v7623_v43 = vadd.f32 %v7622_v29, %v11619_v39  ;;  %9276 = vmatprep.subr.mxu1 %v11476_v23  ;;  %v7663_v32 = vmax.f32 %v7508_v15, 0.0  ;;  %v7665_v42 = vmax.f32 %v7621_v45, 0.0 }
0x15cd   :  { %v7513_v4 = vpop.f32.mrf.mxu1  ;;  %v7626_v25 = vpop.f32.mrf.mxu0  ;;  %9292 = vmatpush3.msra.mxu1 %v11480_v27 }
0x15ce   :  { %v7664_v24 = vmax.f32 %v7510_v52, 0.0  ;;  %v7666_v55 = vmax.f32 %v7623_v43, 0.0  ;;  %9277 = vmatprep.subr.mxu1 %v11483_v19  ;;  %v7514_v0 = vadd.f32 %v7513_v4, %v11609_v54  ;;  %v7627_v21 = vadd.f32 %v7626_v25, %v11613_v5 }
0x15cf   :  { %v7515_v22 = vpop.f32.mrf.mxu1  ;;  %v7628_v10 = vpop.f32.mrf.mxu0  ;;  %9293 = vmatpush3.msra.mxu1 %v11487_v14 }
0x15d0   :  { %v7516_v23 = vadd.f32 %v7515_v22, %v11617_v30  ;;  %v7629_v47 = vadd.f32 %v7628_v10, %v11619_v39  ;;  %7832 = vmatprep.mubr.f32.mxu1 %v7664_v24  ;;  %7937 = vmatprep.mubr.f32.mxu0 %v7666_v55  ;;  %v7667_v2 = vmax.f32 %v7514_v0, 0.0  ;;  %v7669_v8 = vmax.f32 %v7627_v21, 0.0 }
0x15d1   :  { %7833 = vmatmul.mubr.f32.gmra.mxu1 %v7663_v32  ;;  %7938 = vmatmul.mubr.f32.gmra.mxu0 %v7665_v42 }
0x15d2   :  { %v7668_v27 = vmax.f32 %v7516_v23, 0.0  ;;  %v7670_v19 = vmax.f32 %v7629_v47, 0.0  ;;  %9278 = vmatprep.subr.mxu1 %v11496_v41 }
0x15d3   :  { %9294 = vmatpush3.msra.mxu1 %v11501_v38 }
0x15d4   :  { %7837 = vmatprep.mubr.f32.mxu1 %v7668_v27  ;;  %7942 = vmatprep.mubr.f32.mxu0 %v7670_v19  ;;  %v11687_v27 = vld [vmem:[%s11755_s10] ss:$0 sm:$0xff] }
0x15d5   :  { %7838 = vmatmul.mubr.f32.gmra.mxu1 %v7667_v2  ;;  %7943 = vmatmul.mubr.f32.gmra.mxu0 %v7669_v8 }
0x15d6   :  { %9279 = vmatprep.subr.mxu1 %v11510_v61 }
0x15d7   :  { %9295 = vmatpush3.msra.mxu1 %v11514_v46 }
0x15d8   :  { %9280 = vmatprep.subr.mxu1 %v11518_v36 }
0x15d9   :  { %9296 = vmatpush3.msra.mxu1 %v11521_v13 }
0x15da   :  { %9281 = vmatprep.subr.mxu1 %v11524_v11 }
0x15db   :  { %9297 = vmatpush3.msra.mxu1 %v11527_v40 }
0x15dc   :  { %9282 = vmatprep.subr.mxu1 %v11530_v18 }
0x15dd   :  { %9298 = vmatpush3.msra.mxu1 %v11533_v62 }
0x15de   :  { %9283 = vmatprep.subr.mxu1 %v11536_v31 }
0x15df   :  { %9299 = vmatpush3.msra.mxu1 %v11539_v51 }
0x15e0   :  { %9284 = vmatprep.subr.mxu1 %v11547_v7 }
0x15e1   :  { %9300 = vmatpush3.msra.mxu1 %v11550_v1 }
0x15e2   :  { %9285 = vmatprep.subr.mxu1 %v11557_v6 }
0x15e3   :  { %9301 = vmatpush3.msra.mxu1 %v11560_v33 }
0x15e4   :  { %9286 = vmatprep.subr.mxu1 %v11564_v59 }
0x15e5   :  { %9302 = vmatpush3.msra.mxu1 %v11575_v49 }
0x15e6   :  { %9287 = vmatprep.subr.mxu1 %v11579_v35 }
0x15e7   :  { %9303 = vmatpush3.msra.mxu1 %v11584_v48 }
0x15fd   :  { %v7519_v14 = vpop.f32.mrf.mxu1  ;;  %v7632_v41 = vpop.f32.mrf.mxu0 }
0x15fe   :  { %v7520_v38 = vadd.f32 %v7519_v14, %v11609_v54  ;;  %v7633_v15 = vadd.f32 %v7632_v41, %v11613_v5 }
0x15ff   :  { %v7521_v61 = vpop.f32.mrf.mxu1  ;;  %v7634_v46 = vpop.f32.mrf.mxu0 }
0x1600   :  { %v7522_v36 = vadd.f32 %v7521_v61, %v11617_v30  ;;  %v7671_v18 = vmax.f32 %v7520_v38, 0.0  ;;  %v7635_v44 = vadd.f32 %v7634_v46, %v11619_v39 }
0x1601   :  { %v7525_v13 = vpop.f32.mrf.mxu1  ;;  %v7638_v40 = vpop.f32.mrf.mxu0 }
0x1602   :  { %v7672_v11 = vmax.f32 %v7522_v36, 0.0  ;;  %v7526_v62 = vadd.f32 %v7525_v13, %v11609_v54  ;;  %v7674_v34 = vmax.f32 %v7635_v44, 0.0  ;;  %v7639_v43 = vadd.f32 %v7638_v40, %v11613_v5 }
0x1603   :  { %v7527_v31 = vpop.f32.mrf.mxu1  ;;  %v7640_v1 = vpop.f32.mrf.mxu0 }
0x1604   :  { %v7528_v51 = vadd.f32 %v7527_v31, %v11617_v30  ;;  %7842 = vmatprep.mubr.f32.mxu1 %v7672_v11  ;;  %v7675_v33 = vmax.f32 %v7526_v62, 0.0  ;;  %v7641_v29 = vadd.f32 %v7640_v1, %v11619_v39  ;;  %v7677_v24 = vmax.f32 %v7639_v43, 0.0 }
0x1605   :  { %7843 = vmatmul.mubr.f32.gmra.mxu1 %v7671_v18 }
0x1606   :  { %v7676_v7 = vmax.f32 %v7528_v51, 0.0  ;;  %v7531_v6 = vpop.f32.mrf.mxu1  ;;  %v7644_v48 = vpop.f32.mrf.mxu0  ;;  %v7678_v4 = vmax.f32 %v7641_v29, 0.0 }
0x1607   :  { %v7532_v59 = vadd.f32 %v7531_v6, %v11609_v54  ;;  %v7645_v55 = vadd.f32 %v7644_v48, %v11613_v5 }
0x1608   :  { %v7533_v49 = vpop.f32.mrf.mxu1  ;;  %7847 = vmatprep.mubr.f32.mxu1 %v7676_v7  ;;  %v7646_v57 = vpop.f32.mrf.mxu0 }
0x1609   :  { %v7534_v35 = vadd.f32 %v7533_v49, %v11617_v30  ;;  %7848 = vmatmul.mubr.f32.gmra.mxu1 %v7675_v33  ;;  %v7679_v26 = vmax.f32 %v7532_v59, 0.0  ;;  %v7681_v0 = vmax.f32 %v7645_v55, 0.0 }
0x160a   :  { %v7537_v12 = vpop.f32.mrf.mxu1  ;;  %v7650_v52 = vpop.f32.mrf.mxu0 }
0x160b   :  { %v7680_v3 = vmax.f32 %v7534_v35, 0.0  ;;  %v7538_v60 = vadd.f32 %v7537_v12, %v11609_v54  ;;  %v7673_v54 = vmax.f32 %v7633_v15, 0.0  ;;  %v7651_v21 = vadd.f32 %v7650_v52, %v11613_v5 }
0x160c   :  { %v7539_v58 = vpop.f32.mrf.mxu1  ;;  %v7652_v25 = vpop.f32.mrf.mxu0 }
0x160d   :  { %v7540_v50 = vadd.f32 %v7539_v58, %v11617_v30  ;;  %7852 = vmatprep.mubr.f32.mxu1 %v7680_v3  ;;  %v7683_v45 = vmax.f32 %v7538_v60, 0.0  ;;  %v7647_v30 = vadd.f32 %v7646_v57, %v11619_v39  ;;  %v7653_v42 = vadd.f32 %v7652_v25, %v11619_v39 }
0x160e   :  { %7853 = vmatmul.mubr.f32.gmra.mxu1 %v7679_v26  ;;  %v7685_v10 = vmax.f32 %v7651_v21, 0.0 }
0x160f   :  { %v7684_v17 = vmax.f32 %v7540_v50, 0.0  ;;  %v7682_v32 = vmax.f32 %v7647_v30, 0.0  ;;  %v7686_v22 = vmax.f32 %v7653_v42, 0.0 }
0x1611   :  { %7857 = vmatprep.mubr.f32.mxu1 %v7684_v17 }
0x1612   :  { %7858 = vmatmul.mubr.f32.gmra.mxu1 %v7683_v45 }
0x1613   :  { %7947 = vmatprep.mubr.f32.mxu1 %v7674_v34 }
0x1616   :  { %7948 = vmatmul.mubr.f32.vlgmr.msra.gmra.mxu1 %v7673_v54 }
0x1617   :  { %7952 = vmatprep.mubr.f32.mxu1 %v7678_v4 }
0x161a   :  { %7953 = vmatmul.mubr.f32.gmra.mxu1 %v7677_v24 }
0x161b   :  { %7957 = vmatprep.mubr.f32.mxu1 %v7682_v32 }
0x161e   :  { %7958 = vmatmul.mubr.f32.gmra.mxu1 %v7681_v0 }
0x161f   :  { %7962 = vmatprep.mubr.f32.mxu1 %v7686_v22 }
0x1622   :  { %7963 = vmatmul.mubr.f32.gmra.mxu1 %v7685_v10 }
0x1682   :  { %v8656_v23 = vpop.f32.mrf.mxu1  ;;  %v8712_v47 = vpop.f32.mrf.mxu0 }
0x1684   :  { %v8657_v19 = vpop.f32.mrf.mxu1  ;;  %v8713_v2 = vpop.f32.mrf.mxu0 }
0x1685   :  { %v8658_v39 = vadd.f32 %v8657_v19, %v8656_v23  ;;  %v8714_v5 = vadd.f32 %v8713_v2, %v8712_v47 }
0x1686   :  { %v8659_v8 = vpop.f32.mrf.mxu1  ;;  %v8715_v14 = vpop.f32.mrf.mxu0 }
0x1687   :  { %v7825_v41 = vadd.f32 %v8658_v39, %v11687_v27 }
0x1688   :  { %v8660_v38 = vpop.f32.mrf.mxu1  ;;  %v8716_v61 = vpop.f32.mrf.mxu0 }
0x1689   :  { %v7930_v46 = vadd.f32 %v8714_v5, %v7825_v41  ;;  %v8661_v36 = vadd.f32 %v8660_v38, %v8659_v8  ;;  %v8717_v11 = vadd.f32 %v8716_v61, %v8715_v14 }
0x168b   :  { %v7830_v13 = vadd.f32 %v8661_v36, %v11687_v27  ;;  %v11692_v40 = vadd.f32 %v7930_v46, %v11443_v37 }
0x168d   :  { %v7935_v18 = vadd.f32 %v8717_v11, %v7830_v13  ;;  %7978 = vadd.xlane.f32.xlu0 %v11692_v40 }
0x168f   :  { %v11696_v62 = vadd.f32 %v7935_v18, %v11455_v53 }
0x1691   :  { %v8662_v31 = vpop.f32.mrf.mxu1  ;;  %v8718_v51 = vpop.f32.mrf.mxu0  ;;  %7980 = vadd.xlane.f32.xlu1 %v11696_v62 }
0x1693   :  { %v8663_v7 = vpop.f32.mrf.mxu1  ;;  %v8719_v1 = vpop.f32.mrf.mxu0 }
0x1694   :  { %v8664_v6 = vadd.f32 %v8663_v7, %v8662_v31  ;;  %v8720_v35 = vadd.f32 %v8719_v1, %v8718_v51 }
0x1695   :  { %v8665_v33 = vpop.f32.mrf.mxu1  ;;  %v8721_v59 = vpop.f32.mrf.mxu0 }
0x1696   :  { %v7835_v49 = vadd.f32 %v8664_v6, %v11687_v27 }
0x1697   :  { %v8666_v37 = vpop.f32.mrf.mxu1  ;;  %v8722_v48 = vpop.f32.mrf.mxu0 }
0x1698   :  { %v7940_v12 = vadd.f32 %v8720_v35, %v7835_v49  ;;  %v8667_v3 = vadd.f32 %v8666_v37, %v8665_v33  ;;  %v8723_v53 = vadd.f32 %v8722_v48, %v8721_v59 }
0x169a   :  { %v7840_v26 = vadd.f32 %v8667_v3, %v11687_v27  ;;  %v7970_v60 = vadd.f32 %v7940_v12, %v11491_v20 }
0x169c   :  { %v7945_v58 = vadd.f32 %v8723_v53, %v7840_v26  ;;  %7982 = vadd.xlane.f32.xlu0 %v7970_v60 }
0x169e   :  { %v7971_v44 = vadd.f32 %v7945_v58, %v11506_v56 }
0x16a0   :  { %7984 = vadd.xlane.f32.xlu1 %v7971_v44 }
0x16c5   :  { %v8668_v50 = vpop.f32.mrf.mxu1 }
0x16c7   :  { %v8669_v57 = vpop.f32.mrf.mxu1 }
0x16c8   :  { %v8670_v54 = vadd.f32 %v8669_v57, %v8668_v50 }
0x16c9   :  { %v8671_v17 = vpop.f32.mrf.mxu1 }
0x16ca   :  { %v7845_v30 = vadd.f32 %v8670_v54, %v11687_v27 }
0x16cb   :  { %v8672_v15 = vpop.f32.mrf.mxu1 }
0x16cc   :  { %v8673_v25 = vadd.f32 %v8672_v15, %v8671_v17 }
0x16ce   :  { %v8674_v45 = vpop.f32.mrf.mxu1  ;;  %v7850_v56 = vadd.f32 %v8673_v25, %v11687_v27 }
0x16d0   :  { %v8675_v34 = vpop.f32.mrf.mxu1 }
0x16d1   :  { %v8676_v42 = vadd.f32 %v8675_v34, %v8674_v45 }
0x16d2   :  { %v8677_v29 = vpop.f32.mrf.mxu1 }
0x16d3   :  { %v7855_v47 = vadd.f32 %v8676_v42, %v11687_v27 }
0x16d4   :  { %v8678_v52 = vpop.f32.mrf.mxu1 }
0x16d5   :  { %v8679_v19 = vadd.f32 %v8678_v52, %v8677_v29 }
0x16d6   :  { %v8724_v43 = vpop.f32.mrf.mxu1 }
0x16d7   :  { %v7860_v5 = vadd.f32 %v8679_v19, %v11687_v27 }
0x16d8   :  { %v8725_v4 = vpop.f32.mrf.mxu1 }
0x16d9   :  { %v8726_v20 = vadd.f32 %v8725_v4, %v8724_v43 }
0x16da   :  { %v8727_v24 = vpop.f32.mrf.mxu1 }
0x16db   :  { %v7950_v55 = vadd.f32 %v8726_v20, %v7845_v30  ;;  %v8318_v20 = vld [vmem:[%s11756_s11] ss:$0 sm:$0xff]  ;;  %s9789_s11 = smov [#allocation14]  }
0x16dc   :  { %v8728_v32 = vpop.f32.mrf.mxu1 }
0x16dd   :  { %v8729_v0 = vadd.f32 %v8728_v32, %v8727_v24  ;;  %v7972_v21 = vadd.f32 %v7950_v55, %v11553_v28 }
0x16de   :  { %v8730_v22 = vpop.f32.mrf.mxu1 }
0x16df   :  { %v7955_v10 = vadd.f32 %v8729_v0, %v7850_v56  ;;  %7986 = vadd.xlane.f32.xlu0 %v7972_v21  ;;  %v8319_v56 = vld [vmem:[%s11757_s12] ss:$0 sm:$0xff]  ;;  %s8107_s12 = sshll.u32 %s9789_s11, 4  ;;  %s8108_s12 = int_to_ptr.vmem [resolvable:$true] %s8107_s12 }
0x16e0   :  { %v8731_v23 = vpop.f32.mrf.mxu1  ;;  %s9740_s19 = scalar_lea.vmem %s8108_s12, 1024  ;;  %p9745_p3 = scmp.lt.s32.totalorder %s8108_s12, %s8108_s12 }
0x16e1   :  { %v8732_v2 = vadd.f32 %v8731_v23, %v8730_v22  ;;  %v7973_v39 = vadd.f32 %v7955_v10, %v11569_v16  ;;  %p9741_p2 = scmp.ne.s32.totalorder %s8108_s12, %s9740_s19  ;;  %p9746_p4 = scmp.lt.s32.totalorder %s9740_s19, %s9740_s19 }
0x16e2   :  { %v8733_v8 = vpop.f32.mrf.mxu1 }
0x16e3   :  { %v7960_v14 = vadd.f32 %v8732_v2, %v7855_v47  ;;  %7988 = vadd.xlane.f32.xlu1 %v7973_v39  ;;  %p9747_p5 = por %p9746_p4, %p9745_p3 }
0x16e4   :  { %v8734_v41 = vpop.f32.mrf.mxu1 }
0x16e5   :  { %v8735_v38 = vadd.f32 %v8734_v41, %v8733_v8  ;;  %v7974_v61 = vadd.f32 %v7960_v14, %v11588_v63  ;;  %p9748_p6 = pnand %p9747_p5, %p9741_p2 }
0x16e7   :  { %v7965_v28 = vadd.f32 %v8735_v38, %v7860_v5  ;;  %7990 = vadd.xlane.f32.xlu0 %v7974_v61 }
0x16e9   :  { %v7975_v46 = vadd.f32 %v7965_v28, %v11598_v9 }
0x16eb   :  { %7992 = vadd.xlane.f32.xlu1 %v7975_v46 }
0x1716   :  { %v7979_v36 = vpop.xlane.xlu0 %7978 }
0x1717   :  { %v7994_v13 = vmul.f32 0.0078125, %v7979_v36 }
0x1719   :  { %v8002_v11 = vsub.f32 %v11692_v40, %v7994_v13 }
0x171a   :  { %v7981_v18 = vpop.xlane.xlu1 %7980 }
0x171b   :  { %v7995_v16 = vmul.f32 0.0078125, %v7981_v18  ;;  %v8010_v31 = vmul.f32 %v8002_v11, %v8002_v11 }
0x171d   :  { %v8003_v51 = vsub.f32 %v11696_v62, %v7995_v16  ;;  %8018 = vadd.xlane.f32.xlu0 %v8010_v31 }
0x171f   :  { %v8011_v7 = vmul.f32 %v8003_v51, %v8003_v51 }
0x1721   :  { %8020 = vadd.xlane.f32.xlu1 %v8011_v7 }
0x1725   :  { %v7983_v27 = vpop.xlane.xlu0 %7982 }
0x1726   :  { %v7996_v1 = vmul.f32 0.0078125, %v7983_v27 }
0x1728   :  { %v8004_v63 = vsub.f32 %v7970_v60, %v7996_v1 }
0x1729   :  { %v7985_v6 = vpop.xlane.xlu1 %7984 }
0x172a   :  { %v7997_v33 = vmul.f32 0.0078125, %v7985_v6  ;;  %v8012_v59 = vmul.f32 %v8004_v63, %v8004_v63 }
0x172c   :  { %v8005_v9 = vsub.f32 %v7971_v44, %v7997_v33  ;;  %8022 = vadd.xlane.f32.xlu0 %v8012_v59 }
0x172e   :  { %v8013_v49 = vmul.f32 %v8005_v9, %v8005_v9 }
0x1730   :  { %8024 = vadd.xlane.f32.xlu1 %v8013_v49 }
0x1768   :  { %v7987_v35 = vpop.xlane.xlu0 %7986 }
0x1769   :  { %v7998_v40 = vmul.f32 0.0078125, %v7987_v35 }
0x176b   :  { %v11713_v37 = vsub.f32 %v7972_v21, %v7998_v40 }
0x176c   :  { %v7989_v48 = vpop.xlane.xlu1 %7988 }
0x176d   :  { %v7999_v12 = vmul.f32 0.0078125, %v7989_v48  ;;  %v8014_v62 = vmul.f32 %v11713_v37, %v11713_v37 }
0x176f   :  { %v11717_v3 = vsub.f32 %v7973_v39, %v7999_v12  ;;  %8026 = vadd.xlane.f32.xlu0 %v8014_v62 }
0x1770   :  { %v7991_v26 = vpop.xlane.xlu0 %7990 }
0x1771   :  { %v8000_v53 = vmul.f32 0.0078125, %v7991_v26  ;;  %v8015_v60 = vmul.f32 %v11717_v3, %v11717_v3 }
0x1773   :  { %v11721_v58 = vsub.f32 %v7974_v61, %v8000_v53  ;;  %8028 = vadd.xlane.f32.xlu1 %v8015_v60 }
0x1774   :  { %v7993_v44 = vpop.xlane.xlu1 %7992 }
0x1775   :  { %v8001_v50 = vmul.f32 0.0078125, %v7993_v44  ;;  %v8016_v57 = vmul.f32 %v11721_v58, %v11721_v58 }
0x1777   :  { %v11725_v17 = vsub.f32 %v7975_v46, %v8001_v50  ;;  %8030 = vadd.xlane.f32.xlu0 %v8016_v57 }
0x1779   :  { %v8017_v15 = vmul.f32 %v11725_v17, %v11725_v17 }
0x177b   :  { %8032 = vadd.xlane.f32.xlu1 %v8017_v15 }
0x17a6   :  { %v8019_v45 = vpop.xlane.xlu0 %8018 }
0x17a7   :  { %v8034_v34 = vmul.f32 0.0078125, %v8019_v45 }
0x17a9   :  { %v8042_v29 = vadd.f32 1e-05, %v8034_v34 }
0x17aa   :  { %v8021_v52 = vpop.xlane.xlu1 %8020 }
0x17ab   :  { %9596 = vrsqrt.f32 %v8042_v29  ;;  %v8035_v54 = vmul.f32 0.0078125, %v8021_v52 }
0x17ad   :  { %v8043_v43 = vadd.f32 1e-05, %v8035_v54 }
0x17af   :  { %9598 = vrsqrt.f32 %v8043_v43 }
0x17b5   :  { %v8023_v4 = vpop.xlane.xlu0 %8022 }
0x17b6   :  { %v8036_v30 = vmul.f32 0.0078125, %v8023_v4 }
0x17b8   :  { %v9597_v25 = vpop.eup %9596  ;;  %v8044_v24 = vadd.f32 1e-05, %v8036_v30 }
0x17b9   :  { %v8058_v55 = vmul.f32 %v9597_v25, %v8002_v11  ;;  %v8025_v32 = vpop.xlane.xlu1 %8024 }
0x17ba   :  { %9600 = vrsqrt.f32 %v8044_v24  ;;  %v8037_v42 = vmul.f32 0.0078125, %v8025_v32 }
0x17bb   :  { %v8072_v0 = vmul.f32 %v8318_v20, %v8058_v55 }
0x17bc   :  { %v9599_v21 = vpop.eup %9598  ;;  %v8045_v22 = vadd.f32 1e-05, %v8037_v42 }
0x17bd   :  { %v8086_v10 = vadd.f32 %v8319_v56, %v8072_v0  ;;  %v8059_v23 = vmul.f32 %v9599_v21, %v8003_v51 }
0x17be   :  { %9602 = vrsqrt.f32 %v8045_v22 }
0x17bf   :  { %8094 = vst [vmem:[#allocation14] sm:$0xff] %v8086_v10  ;;  %v8073_v47 = vmul.f32 %v8318_v20, %v8059_v23 }
0x17c1   :  { %v8087_v19 = vadd.f32 %v8319_v56, %v8073_v47 }
0x17c3   :  { %8095 = vst [vmem:[#allocation14 + $0x8] sm:$0xff] %v8087_v19 }
0x17c7   :  { %v9601_v2 = vpop.eup %9600 }
0x17c8   :  { %v8060_v39 = vmul.f32 %v9601_v2, %v8004_v63 }
0x17ca   :  { %v8074_v8 = vmul.f32 %v8318_v20, %v8060_v39 }
0x17cb   :  { %v9603_v14 = vpop.eup %9602 }
0x17cc   :  { %v8088_v41 = vadd.f32 %v8319_v56, %v8074_v8  ;;  %v8061_v5 = vmul.f32 %v9603_v14, %v8005_v9 }
0x17ce   :  { %8096 = vst [vmem:[#allocation14 + $0x10] sm:$0xff] %v8088_v41  ;;  %v8075_v38 = vmul.f32 %v8318_v20, %v8061_v5 }
0x17d0   :  { %v8089_v61 = vadd.f32 %v8319_v56, %v8075_v38 }
0x17d2   :  { %8097 = vst [vmem:[#allocation14 + $0x18] sm:$0xff] %v8089_v61 }
0x17f8   :  { %v8027_v28 = vpop.xlane.xlu0 %8026 }
0x17f9   :  { %v8038_v46 = vmul.f32 0.0078125, %v8027_v28 }
0x17fb   :  { %v8046_v36 = vadd.f32 1e-05, %v8038_v46 }
0x17fc   :  { %v8029_v13 = vpop.xlane.xlu1 %8028 }
0x17fd   :  { %9604 = vrsqrt.f32 %v8046_v36  ;;  %v8039_v11 = vmul.f32 0.0078125, %v8029_v13 }
0x17ff   :  { %v8047_v18 = vadd.f32 1e-05, %v8039_v11 }
0x1800   :  { %v8031_v16 = vpop.xlane.xlu0 %8030 }
0x1801   :  { %9606 = vrsqrt.f32 %v8047_v18  ;;  %v8040_v31 = vmul.f32 0.0078125, %v8031_v16 }
0x1803   :  { %v8048_v51 = vadd.f32 1e-05, %v8040_v31 }
0x1804   :  { %v8033_v7 = vpop.xlane.xlu1 %8032 }
0x1805   :  { %9608 = vrsqrt.f32 %v8048_v51  ;;  %v8041_v27 = vmul.f32 0.0078125, %v8033_v7 }
0x1807   :  { %v8049_v1 = vadd.f32 1e-05, %v8041_v27 }
0x1809   :  { %9610 = vrsqrt.f32 %v8049_v1 }
0x180a   :  { %v9605_v63 = vpop.eup %9604 }
0x180b   :  { %v8062_v6 = vmul.f32 %v9605_v63, %v11713_v37 }
0x180d   :  { %v8076_v33 = vmul.f32 %v8318_v20, %v8062_v6 }
0x180e   :  { %v9607_v59 = vpop.eup %9606 }
0x180f   :  { %v8090_v9 = vadd.f32 %v8319_v56, %v8076_v33  ;;  %v8063_v49 = vmul.f32 %v9607_v59, %v11717_v3 }
0x1811   :  { %8098 = vst [vmem:[#allocation14 + $0x20] sm:$0xff] %v8090_v9  ;;  %v8077_v35 = vmul.f32 %v8318_v20, %v8063_v49 }
0x1812   :  { %v9609_v40 = vpop.eup %9608 }
0x1813   :  { %v8091_v48 = vadd.f32 %v8319_v56, %v8077_v35  ;;  %v8064_v12 = vmul.f32 %v9609_v40, %v11721_v58 }
0x1815   :  { %8099 = vst [vmem:[#allocation14 + $0x28] sm:$0xff] %v8091_v48  ;;  %v8078_v62 = vmul.f32 %v8318_v20, %v8064_v12 }
0x1816   :  { %v9611_v26 = vpop.eup %9610 }
0x1817   :  { %v8092_v53 = vadd.f32 %v8319_v56, %v8078_v62  ;;  %v8065_v60 = vmul.f32 %v9611_v26, %v11725_v17 }
0x1819   :  { %8100 = vst [vmem:[#allocation14 + $0x30] sm:$0xff] %v8092_v53  ;;  %v8079_v37 = vmul.f32 %v8318_v20, %v8065_v60 }
0x181b   :  { %v8093_v44 = vadd.f32 %v8319_v56, %v8079_v37 }
0x181d   :  { %8101 = vst [vmem:[#allocation14 + $0x38] sm:$0xff] %v8093_v44 }
0x181e   :  { %9751 = shalt.err (!%p9748_p6)
}
0x181f   :  { %8113 = dma.vmem_to_hbm [thread:$0]  %s8108_s12, 1024, %s11758_s13, [#allocation5], %s9775_s1, %s9775_s1, %s9776_s24  }
0x1820   :  { %9768 = dma.done.wait [#allocation5], 1024  }
0x1821   :  { %9769 = vsyncadd [#allocation5], 4294966272 }
0x1822   :  { %8117 = vsyncpa [#allocation4], 1 }
0x1823   :  { %8118 = vsyncpa [#allocation7], 1 }
0x1824   :  { %8119 = vsyncpa [#allocation10], 1 }
0x1825   :  { %8120 = vsyncpa [#allocation13], 1 }
0x1826   :  { %8121 = vsyncpa [#allocation5], 1 }

</bundles_post_ra>
